<compile_context>
chip_gen: v5e
topology: v5e:2x2
jax: 0.10.0
libtpu: 0.0.40
codegen_flags: <defaults>
</compile_context>

<pallas_src>
from functools import partial

import jax
import jax.numpy as jnp
from jax.experimental import pallas as pl
from jax.experimental.pallas import tpu as pltpu


VMEM_LIMIT = 32 * 1024 * 1024
LANE = 128


# ----------------------------------------------------------------------------
# helpers (mirrors torch _make_divisible)
# ----------------------------------------------------------------------------
def _make_divisible(ch, divisor=8, min_ch=None):
    if min_ch is None:
        min_ch = divisor
    new_ch = max(min_ch, int(ch + divisor / 2) // divisor * divisor)
    if new_ch < 0.9 * ch:
        new_ch += divisor
    return new_ch


def _round_up(v, m):
    return ((v + m - 1) // m) * m


def _cpad(c):
    return _round_up(c, LANE)


def _act(y, act):
    if act == "relu":
        return jnp.maximum(y, 0.0)
    if act == "hardswish":
        return y * (jnp.clip(y + 3.0, 0.0, 6.0) * (1.0 / 6.0))
    if act == "hardsigmoid":
        return jnp.clip(y + 3.0, 0.0, 6.0) * (1.0 / 6.0)
    return y  # identity


def _row_tiling(M):
    """Pick a row tile (multiple of 8) and the padded row count."""
    if M < 128:
        tm = _round_up(M, 8)
        return tm, tm
    for tm in (512, 256, 128):
        if M >= 2 * tm:
            return tm, _round_up(M, tm)
    return 128, _round_up(M, 128)


# ----------------------------------------------------------------------------
# Pallas kernels
# ----------------------------------------------------------------------------
def _mm_kernel(x_ref, w_ref, s_ref, b_ref, *rest, act, has_res):
    """Fused matmul + folded-BN affine + activation (+ optional residual)."""
    if has_res:
        r_ref, o_ref = rest
    else:
        (o_ref,) = rest
        r_ref = None
    y = jnp.dot(x_ref[...], w_ref[...], preferred_element_type=jnp.float32)
    y = y * s_ref[...] + b_ref[...]
    y = _act(y, act)
    if r_ref is not None:
        y = y + r_ref[...].astype(jnp.float32)
    o_ref[...] = y.astype(o_ref.dtype)


def matmul_bn_act(x, w, scale, bias, act, residual=None, out_dtype=jnp.bfloat16):
    """(M,K)@(K,N) * scale + bias, activation, optional fused residual add."""
    M, K = x.shape
    N = w.shape[1]
    tm, Mp = _row_tiling(M)
    if Mp != M:
        x = jnp.pad(x, ((0, Mp - M), (0, 0)))
        if residual is not None:
            residual = jnp.pad(residual, ((0, Mp - M), (0, 0)))
    grid = (Mp // tm,)

    in_specs = [
        pl.BlockSpec((tm, K), lambda i: (i, 0)),
        pl.BlockSpec((K, N), lambda i: (0, 0)),
        pl.BlockSpec((1, N), lambda i: (0, 0)),
        pl.BlockSpec((1, N), lambda i: (0, 0)),
    ]
    args = [x, w, scale, bias]
    if residual is not None:
        in_specs.append(pl.BlockSpec((tm, N), lambda i: (i, 0)))
        args.append(residual)

    out_itemsize = jnp.dtype(out_dtype).itemsize
    bytes_accessed = (Mp * K * x.dtype.itemsize + K * N * w.dtype.itemsize
                      + 2 * N * 4 + Mp * N * out_itemsize)
    if residual is not None:
        bytes_accessed += Mp * N * residual.dtype.itemsize
    cost = pl.CostEstimate(flops=2 * Mp * K * N, transcendentals=0,
                           bytes_accessed=int(bytes_accessed))

    out = pl.pallas_call(
        partial(_mm_kernel, act=act, has_res=residual is not None),
        out_shape=jax.ShapeDtypeStruct((Mp, N), out_dtype),
        grid=grid,
        in_specs=in_specs,
        out_specs=pl.BlockSpec((tm, N), lambda i: (i, 0)),
        compiler_params=pltpu.CompilerParams(
            dimension_semantics=("parallel",), vmem_limit_bytes=VMEM_LIMIT),
        cost_estimate=cost,
    )(*args)
    return out[:M] if Mp != M else out


def _dw_kernel(x_ref, w_ref, s_ref, b_ref, o_ref, *, act, k, stride, Ho, Wo):
    """Depthwise kxk conv + BN + act; one batch element per grid step.

    x_ref: (stride^2, 1, Hq, Wq, C) stride-phase decomposition of the padded
    activation. Each tap reads a static contiguous window of one phase.
    """
    C = o_ref.shape[-1]
    acc = jnp.zeros((Ho, Wo, C), jnp.float32)
    for ki in range(k):
        for kj in range(k):
            p = (ki % stride) * stride + (kj % stride)
            oi = ki // stride
            oj = kj // stride
            tap = x_ref[p, 0, oi:oi + Ho, oj:oj + Wo, :].astype(jnp.float32)
            acc = acc + tap * w_ref[ki * k + kj].astype(jnp.float32)
    y = acc * s_ref[...] + b_ref[...]
    o_ref[0] = _act(y, act).astype(o_ref.dtype)


def depthwise_bn_act(x, w_k2c, scale, bias, act, stride, k):
    """Depthwise kxk conv (groups=C) + BN + activation.

    Avoids the k^2 im2col HBM amplification: the padded activation is
    decomposed into stride^2 phases (total size == padded input) and the
    k^2 taps are static window slices inside the kernel.
    # TODO(synk): tile the spatial dims for very large resolutions (here the
    # whole per-batch image comfortably fits in VMEM).
    """
    pad = (k - 1) // 2
    N, H, W, C = x.shape
    Ho = (H + 2 * pad - k) // stride + 1
    Wo = (W + 2 * pad - k) // stride + 1
    Hp, Wp = H + 2 * pad, W + 2 * pad
    Hp2, Wp2 = _round_up(Hp, stride), _round_up(Wp, stride)
    xp = jnp.pad(x, ((0, 0), (pad, pad + Hp2 - Hp), (pad, pad + Wp2 - Wp), (0, 0)))
    s2 = stride * stride
    phases = jnp.stack(
        [xp[:, p::stride, q::stride, :] for p in range(stride) for q in range(stride)],
        axis=0)                                            # (s2, N, Hq, Wq, C)
    Hq, Wq = Hp2 // stride, Wp2 // stride

    out = pl.pallas_call(
        partial(_dw_kernel, act=act, k=k, stride=stride, Ho=Ho, Wo=Wo),
        out_shape=jax.ShapeDtypeStruct((N, Ho, Wo, C), x.dtype),
        grid=(N,),
        in_specs=[
            pl.BlockSpec((s2, 1, Hq, Wq, C), lambda n: (0, n, 0, 0, 0)),
            pl.BlockSpec((k * k, 1, C), lambda n: (0, 0, 0)),
            pl.BlockSpec((1, C), lambda n: (0, 0)),
            pl.BlockSpec((1, C), lambda n: (0, 0)),
        ],
        out_specs=pl.BlockSpec((1, Ho, Wo, C), lambda n: (n, 0, 0, 0)),
        compiler_params=pltpu.CompilerParams(
            dimension_semantics=("parallel",), vmem_limit_bytes=VMEM_LIMIT),
    )(phases, w_k2c, scale, bias)
    return out


def _se_kernel(x_ref, w1_ref, b1_ref, w2_ref, b2_ref, o_ref):
    """Fused SE block: pool + FC1/relu + FC2/hardsigmoid + scale apply."""
    x = x_ref[0].astype(jnp.float32)                       # (HW, C)
    pooled = jnp.mean(x, axis=0, keepdims=True)            # (1, C)
    h = jnp.dot(pooled.astype(jnp.bfloat16), w1_ref[...],
                preferred_element_type=jnp.float32) + b1_ref[...]
    h = _act(h, "relu")
    s = jnp.dot(h.astype(jnp.bfloat16), w2_ref[...],
                preferred_element_type=jnp.float32) + b2_ref[...]
    s = _act(s, "hardsigmoid")                             # (1, C)
    o_ref[0] = (x * s).astype(o_ref.dtype)


def squeeze_excitation(x, se):
    N, H, W, C = x.shape
    x3 = x.reshape(N, H * W, C)
    S = se["w1"].shape[1]
    out = pl.pallas_call(
        _se_kernel,
        out_shape=jax.ShapeDtypeStruct((N, H * W, C), x.dtype),
        grid=(N,),
        in_specs=[
            pl.BlockSpec((1, H * W, C), lambda n: (n, 0, 0)),
            pl.BlockSpec((C, S), lambda n: (0, 0)),
            pl.BlockSpec((1, S), lambda n: (0, 0)),
            pl.BlockSpec((S, C), lambda n: (0, 0)),
            pl.BlockSpec((1, C), lambda n: (0, 0)),
        ],
        out_specs=pl.BlockSpec((1, H * W, C), lambda n: (n, 0, 0)),
        compiler_params=pltpu.CompilerParams(
            dimension_semantics=("parallel",), vmem_limit_bytes=VMEM_LIMIT),
    )(x3, se["w1"], se["b1"], se["w2"], se["b2"])
    return out.reshape(N, H, W, C)


def _head_kernel(x_ref, w1_ref, b1_ref, w2_ref, b2_ref, o_ref):
    """Fused classifier head: global avg pool + Linear+hardswish + Linear."""
    x = x_ref[0].astype(jnp.float32)                       # (HW, C)
    pooled = jnp.mean(x, axis=0, keepdims=True)            # (1, C)
    h = jnp.dot(pooled.astype(jnp.bfloat16), w1_ref[...],
                preferred_element_type=jnp.float32) + b1_ref[...]
    h = _act(h, "hardswish")
    # Dropout(p=0.2): identity in eval mode.
    logits = jnp.dot(h.astype(jnp.bfloat16), w2_ref[...],
                     preferred_element_type=jnp.float32) + b2_ref[...]
    o_ref[0] = logits.astype(o_ref.dtype)


def classifier_head(x3, head):
    N, HW, C = x3.shape
    LC = head["w1"].shape[1]
    NC = head["w2"].shape[1]
    out = pl.pallas_call(
        _head_kernel,
        out_shape=jax.ShapeDtypeStruct((N, 1, NC), jnp.float32),
        grid=(N,),
        in_specs=[
            pl.BlockSpec((1, HW, C), lambda n: (n, 0, 0)),
            pl.BlockSpec((C, LC), lambda n: (0, 0)),
            pl.BlockSpec((1, LC), lambda n: (0, 0)),
            pl.BlockSpec((LC, NC), lambda n: (0, 0)),
            pl.BlockSpec((1, NC), lambda n: (0, 0)),
        ],
        out_specs=pl.BlockSpec((1, 1, NC), lambda n: (n, 0, 0)),
        compiler_params=pltpu.CompilerParams(
            dimension_semantics=("parallel",), vmem_limit_bytes=VMEM_LIMIT),
    )(x3, head["w1"], head["b1"], head["w2"], head["b2"])
    return out.reshape(N, NC)


# ----------------------------------------------------------------------------
# glue: im2col (plain JAX) + the Pallas matmul
# ----------------------------------------------------------------------------
def conv_bn_act_dense(x, w_flat, scale, bias, act, stride, k):
    """Dense kxk conv (groups=1) via im2col + fused Pallas matmul (stem only)."""
    pad = (k - 1) // 2
    N, H, W, Cin = x.shape
    Ho = (H + 2 * pad - k) // stride + 1
    Wo = (W + 2 * pad - k) // stride + 1
    xp = jnp.pad(x, ((0, 0), (pad, pad), (pad, pad), (0, 0)))
    cols = []
    for ki in range(k):
        for kj in range(k):
            cols.append(xp[:, ki:ki + Ho * stride:stride,
                           kj:kj + Wo * stride:stride, :])
    patches = jnp.concatenate(cols, axis=-1).reshape(N * Ho * Wo, k * k * Cin)
    y = matmul_bn_act(patches, w_flat, scale, bias, act)
    return y.reshape(N, Ho, Wo, -1)


def pointwise_bn_act(x, w, scale, bias, act, residual=None):
    """1x1 conv + BN + activation (+ fused residual)."""
    N, H, W, Cin = x.shape
    res = residual.reshape(N * H * W, -1) if residual is not None else None
    y = matmul_bn_act(x.reshape(N * H * W, Cin), w, scale, bias, act, residual=res)
    return y.reshape(N, H, W, -1)


def inverted_residual(x, blk):
    inp = x
    if "expand" in blk:
        e = blk["expand"]
        x = pointwise_bn_act(x, e["w"], e["scale"], e["bias"], blk["act"])
    d = blk["dw"]
    x = depthwise_bn_act(x, d["w"], d["scale"], d["bias"], blk["act"],
                         blk["stride"], blk["k"])
    if "se" in blk:
        x = squeeze_excitation(x, blk["se"])
    p = blk["project"]
    x = pointwise_bn_act(x, p["w"], p["scale"], p["bias"], "identity",
                         residual=inp if blk["use_res"] else None)
    return x


def mobilenet_v3_forward(params, x_nchw):
    x = jnp.transpose(x_nchw, (0, 2, 3, 1)).astype(jnp.bfloat16)  # NCHW -> NHWC
    # stem: 3x3 conv stride 2 + BN + hardswish
    x = conv_bn_act_dense(x, params["stem_w"], params["stem_scale"],
                          params["stem_bias"], "hardswish", stride=2, k=3)
    for blk in params["blocks"]:
        x = inverted_residual(x, blk)
    # last conv: 1x1 + BN + hardswish
    x = pointwise_bn_act(x, params["last_w"], params["last_scale"],
                         params["last_bias"], "hardswish")
    N, H, W, C = x.shape
    logits = classifier_head(x.reshape(N, H * W, C), params["head"])
    return logits[:, :params["num_classes"]]


# ----------------------------------------------------------------------------
# deterministic parameter construction (channel-padded, bf16 weights)
# ----------------------------------------------------------------------------
# (input_c, kernel, expanded_c, out_c, use_se, activation, stride), width_multi=1.0
CONFIGS = [
    (16, 3, 16, 16, True,  "relu",      2),
    (16, 3, 72, 24, False, "relu",      2),
    (24, 5, 96, 24, True,  "hardswish", 1),
]


def init_model(key, num_classes=16, last_channel=128):
    keys = iter(jax.random.split(key, 64))

    def nk():
        return next(keys)

    def conv_w(shape, fan_in):
        return jax.random.normal(nk(), shape, jnp.float32) * (2.0 / fan_in) ** 0.5

    def pad2(a, rows, cols):
        return jnp.pad(a, ((0, rows - a.shape[0]), (0, cols - a.shape[1])))

    def bn(c, cpad):
        gamma = jax.random.normal(nk(), (c,), jnp.float32) * 0.01
        # fold eval-mode BN: running_mean=0, running_var=1, eps=1e-3
        scale = gamma / jnp.sqrt(1.0 + 1e-3)
        scale = jnp.pad(scale, (0, cpad - c)).reshape(1, cpad)   # pad channels -> 0
        bias = jnp.zeros((1, cpad), jnp.float32)
        return scale, bias

    params = {"num_classes": num_classes}

    first_c = _make_divisible(CONFIGS[0][0] * 1.0)
    cp0 = _cpad(first_c)
    params["stem_w"] = pad2(conv_w((3 * 3 * 3, first_c), fan_in=3 * 3 * 3),
                            3 * 3 * 3, cp0).astype(jnp.bfloat16)
    params["stem_scale"], params["stem_bias"] = bn(first_c, cp0)

    blocks = []
    oc = first_c
    for (ic_raw, k, ec_raw, oc_raw, use_se, act, stride) in CONFIGS:
        ic = _make_divisible(ic_raw * 1.0)
        ec = _make_divisible(ec_raw * 1.0)
        oc = _make_divisible(oc_raw * 1.0)
        icp, ecp, ocp = _cpad(ic), _cpad(ec), _cpad(oc)
        blk = {"act": act, "k": k, "stride": stride,
               "use_res": stride == 1 and ic == oc}
        if ec != ic:
            s, b = bn(ec, ecp)
            blk["expand"] = {"w": pad2(conv_w((ic, ec), fan_in=ic), icp, ecp
                                       ).astype(jnp.bfloat16),
                             "scale": s, "bias": b}
        dw_w = pad2(conv_w((k * k, ec), fan_in=k * k), k * k, ecp)
        s, b = bn(ec, ecp)
        blk["dw"] = {"w": dw_w.reshape(k * k, 1, ecp).astype(jnp.bfloat16),
                     "scale": s, "bias": b}
        if use_se:
            sq = _make_divisible(ec // 4)
            sqp = _cpad(sq)
            blk["se"] = {"w1": pad2(conv_w((ec, sq), fan_in=ec), ecp, sqp
                                    ).astype(jnp.bfloat16),
                         "b1": jnp.zeros((1, sqp), jnp.float32),
                         "w2": pad2(conv_w((sq, ec), fan_in=sq), sqp, ecp
                                    ).astype(jnp.bfloat16),
                         "b2": jnp.zeros((1, ecp), jnp.float32)}
        s, b = bn(oc, ocp)
        blk["project"] = {"w": pad2(conv_w((ec, oc), fan_in=ec), ecp, ocp
                                    ).astype(jnp.bfloat16),
                          "scale": s, "bias": b}
        blocks.append(blk)
    params["blocks"] = blocks

    last_in = oc
    last_out = last_in * 6
    lip, lop = _cpad(last_in), _cpad(last_out)
    params["last_w"] = pad2(conv_w((last_in, last_out), fan_in=last_in),
                            lip, lop).astype(jnp.bfloat16)
    params["last_scale"], params["last_bias"] = bn(last_out, lop)

    lcp, ncp = _cpad(last_channel), _cpad(num_classes)
    w1 = jax.random.normal(nk(), (last_out, last_channel), jnp.float32) \
        * (1.0 / last_out) ** 0.5
    b1 = jax.random.normal(nk(), (last_channel,), jnp.float32) * 0.01
    w2 = jax.random.normal(nk(), (last_channel, num_classes), jnp.float32) \
        * (1.0 / last_channel) ** 0.5
    b2 = jax.random.normal(nk(), (num_classes,), jnp.float32) * 0.01
    params["head"] = {
        "w1": pad2(w1, lop, lcp).astype(jnp.bfloat16),
        "b1": jnp.pad(b1, (0, lcp - last_channel)).reshape(1, lcp),
        "w2": pad2(w2, lcp, ncp).astype(jnp.bfloat16),
        "b2": jnp.pad(b2, (0, ncp - num_classes)).reshape(1, ncp),
    }
    return params


if __name__ == "__main__":
    key = jax.random.PRNGKey(0)
    pkey, xkey = jax.random.split(key)
    params = init_model(pkey, num_classes=16, last_channel=128)
    x = jax.random.normal(xkey, (2, 3, 32, 32), jnp.float32)   # NCHW like PyTorch
    fwd = jax.jit(lambda inp: mobilenet_v3_forward(params, inp))
    out = jax.block_until_ready(fwd(x))
    assert out.shape == (2, 16), out.shape
    assert bool(jnp.all(jnp.isfinite(out)))
    print("KERNEL_OK")
</pallas_src>

<mosaic_0001>
module attributes {stable_mosaic.version = 11 : i64} {
  func.func @_mm_kernel(%arg0: i32, %arg1: memref<256x27xbf16, #tpu.memory_space<vmem>>, %arg2: memref<27x128xbf16, #tpu.memory_space<vmem>>, %arg3: memref<1x128xf32, #tpu.memory_space<vmem>>, %arg4: memref<1x128xf32, #tpu.memory_space<vmem>>, %arg5: memref<256x128xbf16, #tpu.memory_space<vmem>>) attributes {dimension_semantics = [#tpu.dimension_semantics<parallel>], iteration_bounds = array<i64: 2>, scalar_prefetch = 0 : i64, scratch_operands = 0 : i64, tpu.core_type = #tpu.core_type<tc>, window_params = [{transform_indices = @transform_0, window_bounds = array<i64: 256, 27>}, {pipeline_mode = #tpu.pipeline_mode<synchronous>, transform_indices = @transform_1, window_bounds = array<i64: 27, 128>}, {pipeline_mode = #tpu.pipeline_mode<synchronous>, transform_indices = @transform_2, window_bounds = array<i64: 1, 128>}, {pipeline_mode = #tpu.pipeline_mode<synchronous>, transform_indices = @transform_3, window_bounds = array<i64: 1, 128>}, {transform_indices = @transform_4, window_bounds = array<i64: 256, 128>}]} {
    %c0 = arith.constant 0 : index
    %c0_0 = arith.constant 0 : index
    %0 = vector.load %arg1[%c0, %c0_0] : memref<256x27xbf16, #tpu.memory_space<vmem>>, vector<256x27xbf16>
    %c0_1 = arith.constant 0 : index
    %c0_2 = arith.constant 0 : index
    %1 = vector.load %arg2[%c0_1, %c0_2] : memref<27x128xbf16, #tpu.memory_space<vmem>>, vector<27x128xbf16>
    %cst = arith.constant dense<0.000000e+00> : vector<256x128xf32>
    %2 = tpu.matmul %0, %1, %cst {dimension_numbers = #tpu.dot_dimension_numbers<[1], [0], [0], [1], [0, 0, 1, 1], [], []>} : vector<256x27xbf16>, vector<27x128xbf16>, vector<256x128xf32> -> vector<256x128xf32>
    %c0_3 = arith.constant 0 : index
    %c0_4 = arith.constant 0 : index
    %3 = vector.load %arg3[%c0_3, %c0_4] : memref<1x128xf32, #tpu.memory_space<vmem>>, vector<1x128xf32>
    %4 = vector.broadcast %3 : vector<1x128xf32> to vector<256x128xf32>
    %5 = arith.mulf %2, %4 : vector<256x128xf32>
    %c0_5 = arith.constant 0 : index
    %c0_6 = arith.constant 0 : index
    %6 = vector.load %arg4[%c0_5, %c0_6] : memref<1x128xf32, #tpu.memory_space<vmem>>, vector<1x128xf32>
    %7 = vector.broadcast %6 : vector<1x128xf32> to vector<256x128xf32>
    %8 = arith.addf %5, %7 : vector<256x128xf32>
    %cst_7 = arith.constant 3.000000e+00 : f32
    %9 = vector.broadcast %cst_7 : f32 to vector<256x128xf32>
    %10 = arith.addf %8, %9 : vector<256x128xf32>
    %cst_8 = arith.constant 0.000000e+00 : f32
    %cst_9 = arith.constant 6.000000e+00 : f32
    %11 = vector.broadcast %cst_8 : f32 to vector<256x128xf32>
    %12 = arith.maximumf %11, %10 : vector<256x128xf32>
    %13 = vector.broadcast %cst_9 : f32 to vector<256x128xf32>
    %14 = arith.minimumf %13, %12 : vector<256x128xf32>
    %cst_10 = arith.constant 0.166666672 : f32
    %15 = vector.broadcast %cst_10 : f32 to vector<256x128xf32>
    %16 = arith.mulf %14, %15 : vector<256x128xf32>
    %17 = arith.mulf %8, %16 : vector<256x128xf32>
    %18 = arith.truncf %17 : vector<256x128xf32> to vector<256x128xbf16>
    %c0_11 = arith.constant 0 : index
    %c0_12 = arith.constant 0 : index
    %19 = vector.load %arg5[%c0_11, %c0_12] : memref<256x128xbf16, #tpu.memory_space<vmem>>, vector<256x128xbf16>
    tpu.vector_store %arg5[%c0_11, %c0_12], %18 {strides = array<i32>} : memref<256x128xbf16, #tpu.memory_space<vmem>>, vector<256x128xbf16>,
    return
  }
  func.func @transform_0(%arg0: i32) -> (i32, i32) {
    %c0_i32 = arith.constant 0 : i32
    %c0_i32_0 = arith.constant 0 : i32
    return %arg0, %c0_i32 : i32, i32
  }
  func.func @transform_1(%arg0: i32) -> (i32, i32) {
    %c0_i32 = arith.constant 0 : i32
    %c0_i32_0 = arith.constant 0 : i32
    %c0_i32_1 = arith.constant 0 : i32
    return %c0_i32, %c0_i32_0 : i32, i32
  }
  func.func @transform_2(%arg0: i32) -> (i32, i32) {
    %c0_i32 = arith.constant 0 : i32
    %c0_i32_0 = arith.constant 0 : i32
    %c0_i32_1 = arith.constant 0 : i32
    return %c0_i32, %c0_i32_0 : i32, i32
  }
  func.func @transform_3(%arg0: i32) -> (i32, i32) {
    %c0_i32 = arith.constant 0 : i32
    %c0_i32_0 = arith.constant 0 : i32
    %c0_i32_1 = arith.constant 0 : i32
    return %c0_i32, %c0_i32_0 : i32, i32
  }
  func.func @transform_4(%arg0: i32) -> (i32, i32) {
    %c0_i32 = arith.constant 0 : i32
    %c0_i32_0 = arith.constant 0 : i32
    return %arg0, %c0_i32 : i32, i32
  }
}

module attributes {stable_mosaic.version = 11 : i64} {
  func.func @_dw_kernel(%arg0: i32, %arg1: memref<4x1x9x9x128xbf16, #tpu.memory_space<vmem>>, %arg2: memref<9x1x128xbf16, #tpu.memory_space<vmem>>, %arg3: memref<1x128xf32, #tpu.memory_space<vmem>>, %arg4: memref<1x128xf32, #tpu.memory_space<vmem>>, %arg5: memref<1x8x8x128xbf16, #tpu.memory_space<vmem>>) attributes {dimension_semantics = [#tpu.dimension_semantics<parallel>], iteration_bounds = array<i64: 2>, scalar_prefetch = 0 : i64, scratch_operands = 0 : i64, tpu.core_type = #tpu.core_type<tc>, window_params = [{transform_indices = @transform_0, window_bounds = array<i64: 4, 1, 9, 9, 128>}, {pipeline_mode = #tpu.pipeline_mode<synchronous>, transform_indices = @transform_1, window_bounds = array<i64: 9, 1, 128>}, {pipeline_mode = #tpu.pipeline_mode<synchronous>, transform_indices = @transform_2, window_bounds = array<i64: 1, 128>}, {pipeline_mode = #tpu.pipeline_mode<synchronous>, transform_indices = @transform_3, window_bounds = array<i64: 1, 128>}, {transform_indices = @transform_4, window_bounds = array<i64: 1, 8, 8, 128>}]} {
    %cst = arith.constant 0.000000e+00 : f32
    %0 = vector.broadcast %cst : f32 to vector<8x8x128xf32>
    %c0 = arith.constant 0 : index
    %c0_0 = arith.constant 0 : index
    %c0_1 = arith.constant 0 : index
    %c0_2 = arith.constant 0 : index
    %c0_3 = arith.constant 0 : index
    %1 = vector.load %arg1[%c0, %c0_0, %c0_1, %c0_2, %c0_3] : memref<4x1x9x9x128xbf16, #tpu.memory_space<vmem>>, vector<1x1x8x8x128xbf16>
    %2 = vector.shape_cast %1 : vector<1x1x8x8x128xbf16> to vector<8x8x128xbf16>
    %3 = arith.extf %2 : vector<8x8x128xbf16> to vector<8x8x128xf32>
    %c0_4 = arith.constant 0 : index
    %c0_5 = arith.constant 0 : index
    %c0_6 = arith.constant 0 : index
    %4 = vector.load %arg2[%c0_4, %c0_5, %c0_6] : memref<9x1x128xbf16, #tpu.memory_space<vmem>>, vector<1x1x128xbf16>
    %5 = vector.shape_cast %4 : vector<1x1x128xbf16> to vector<1x128xbf16>
    %6 = arith.extf %5 : vector<1x128xbf16> to vector<1x128xf32>
    %7 = vector.shape_cast %6 : vector<1x128xf32> to vector<1x1x128xf32>
    %8 = vector.broadcast %7 : vector<1x1x128xf32> to vector<8x8x128xf32>
    %9 = arith.mulf %3, %8 : vector<8x8x128xf32>
    %10 = arith.addf %0, %9 : vector<8x8x128xf32>
    %c1 = arith.constant 1 : index
    %c0_7 = arith.constant 0 : index
    %c0_8 = arith.constant 0 : index
    %c0_9 = arith.constant 0 : index
    %c0_10 = arith.constant 0 : index
    %11 = vector.load %arg1[%c1, %c0_7, %c0_8, %c0_9, %c0_10] : memref<4x1x9x9x128xbf16, #tpu.memory_space<vmem>>, vector<1x1x8x8x128xbf16>
    %12 = vector.shape_cast %11 : vector<1x1x8x8x128xbf16> to vector<8x8x128xbf16>
    %13 = arith.extf %12 : vector<8x8x128xbf16> to vector<8x8x128xf32>
    %c1_11 = arith.constant 1 : index
    %c0_12 = arith.constant 0 : index
    %c0_13 = arith.constant 0 : index
    %14 = vector.load %arg2[%c1_11, %c0_12, %c0_13] : memref<9x1x128xbf16, #tpu.memory_space<vmem>>, vector<1x1x128xbf16>
    %15 = vector.shape_cast %14 : vector<1x1x128xbf16> to vector<1x128xbf16>
    %16 = arith.extf %15 : vector<1x128xbf16> to vector<1x128xf32>
    %17 = vector.shape_cast %16 : vector<1x128xf32> to vector<1x1x128xf32>
    %18 = vector.broadcast %17 : vector<1x1x128xf32> to vector<8x8x128xf32>
    %19 = arith.mulf %13, %18 : vector<8x8x128xf32>
    %20 = arith.addf %10, %19 : vector<8x8x128xf32>
    %c0_14 = arith.constant 0 : index
    %c0_15 = arith.constant 0 : index
    %c0_16 = arith.constant 0 : index
    %c1_17 = arith.constant 1 : index
    %c0_18 = arith.constant 0 : index
    %21 = vector.load %arg1[%c0_14, %c0_15, %c0_16, %c1_17, %c0_18] : memref<4x1x9x9x128xbf16, #tpu.memory_space<vmem>>, vector<1x1x8x8x128xbf16>
    %22 = vector.shape_cast %21 : vector<1x1x8x8x128xbf16> to vector<8x8x128xbf16>
    %23 = arith.extf %22 : vector<8x8x128xbf16> to vector<8x8x128xf32>
    %c2 = arith.constant 2 : index
    %c0_19 = arith.constant 0 : index
    %c0_20 = arith.constant 0 : index
    %24 = vector.load %arg2[%c2, %c0_19, %c0_20] : memref<9x1x128xbf16, #tpu.memory_space<vmem>>, vector<1x1x128xbf16>
    %25 = vector.shape_cast %24 : vector<1x1x128xbf16> to vector<1x128xbf16>
    %26 = arith.extf %25 : vector<1x128xbf16> to vector<1x128xf32>
    %27 = vector.shape_cast %26 : vector<1x128xf32> to vector<1x1x128xf32>
    %28 = vector.broadcast %27 : vector<1x1x128xf32> to vector<8x8x128xf32>
    %29 = arith.mulf %23, %28 : vector<8x8x128xf32>
    %30 = arith.addf %20, %29 : vector<8x8x128xf32>
    %c2_21 = arith.constant 2 : index
    %c0_22 = arith.constant 0 : index
    %c0_23 = arith.constant 0 : index
    %c0_24 = arith.constant 0 : index
    %c0_25 = arith.constant 0 : index
    %31 = vector.load %arg1[%c2_21, %c0_22, %c0_23, %c0_24, %c0_25] : memref<4x1x9x9x128xbf16, #tpu.memory_space<vmem>>, vector<1x1x8x8x128xbf16>
    %32 = vector.shape_cast %31 : vector<1x1x8x8x128xbf16> to vector<8x8x128xbf16>
    %33 = arith.extf %32 : vector<8x8x128xbf16> to vector<8x8x128xf32>
    %c3 = arith.constant 3 : index
    %c0_26 = arith.constant 0 : index
    %c0_27 = arith.constant 0 : index
    %34 = vector.load %arg2[%c3, %c0_26, %c0_27] : memref<9x1x128xbf16, #tpu.memory_space<vmem>>, vector<1x1x128xbf16>
    %35 = vector.shape_cast %34 : vector<1x1x128xbf16> to vector<1x128xbf16>
    %36 = arith.extf %35 : vector<1x128xbf16> to vector<1x128xf32>
    %37 = vector.shape_cast %36 : vector<1x128xf32> to vector<1x1x128xf32>
    %38 = vector.broadcast %37 : vector<1x1x128xf32> to vector<8x8x128xf32>
    %39 = arith.mulf %33, %38 : vector<8x8x128xf32>
    %40 = arith.addf %30, %39 : vector<8x8x128xf32>
    %c3_28 = arith.constant 3 : index
    %c0_29 = arith.constant 0 : index
    %c0_30 = arith.constant 0 : index
    %c0_31 = arith.constant 0 : index
    %c0_32 = arith.constant 0 : index
    %41 = vector.load %arg1[%c3_28, %c0_29, %c0_30, %c0_31, %c0_32] : memref<4x1x9x9x128xbf16, #tpu.memory_space<vmem>>, vector<1x1x8x8x128xbf16>
    %42 = vector.shape_cast %41 : vector<1x1x8x8x128xbf16> to vector<8x8x128xbf16>
    %43 = arith.extf %42 : vector<8x8x128xbf16> to vector<8x8x128xf32>
    %c4 = arith.constant 4 : index
    %c0_33 = arith.constant 0 : index
    %c0_34 = arith.constant 0 : index
    %44 = vector.load %arg2[%c4, %c0_33, %c0_34] : memref<9x1x128xbf16, #tpu.memory_space<vmem>>, vector<1x1x128xbf16>
    %45 = vector.shape_cast %44 : vector<1x1x128xbf16> to vector<1x128xbf16>
    %46 = arith.extf %45 : vector<1x128xbf16> to vector<1x128xf32>
    %47 = vector.shape_cast %46 : vector<1x128xf32> to vector<1x1x128xf32>
    %48 = vector.broadcast %47 : vector<1x1x128xf32> to vector<8x8x128xf32>
    %49 = arith.mulf %43, %48 : vector<8x8x128xf32>
    %50 = arith.addf %40, %49 : vector<8x8x128xf32>
    %c2_35 = arith.constant 2 : index
    %c0_36 = arith.constant 0 : index
    %c0_37 = arith.constant 0 : index
    %c1_38 = arith.constant 1 : index
    %c0_39 = arith.constant 0 : index
    %51 = vector.load %arg1[%c2_35, %c0_36, %c0_37, %c1_38, %c0_39] : memref<4x1x9x9x128xbf16, #tpu.memory_space<vmem>>, vector<1x1x8x8x128xbf16>
    %52 = vector.shape_cast %51 : vector<1x1x8x8x128xbf16> to vector<8x8x128xbf16>
    %53 = arith.extf %52 : vector<8x8x128xbf16> to vector<8x8x128xf32>
    %c5 = arith.constant 5 : index
    %c0_40 = arith.constant 0 : index
    %c0_41 = arith.constant 0 : index
    %54 = vector.load %arg2[%c5, %c0_40, %c0_41] : memref<9x1x128xbf16, #tpu.memory_space<vmem>>, vector<1x1x128xbf16>
    %55 = vector.shape_cast %54 : vector<1x1x128xbf16> to vector<1x128xbf16>
    %56 = arith.extf %55 : vector<1x128xbf16> to vector<1x128xf32>
    %57 = vector.shape_cast %56 : vector<1x128xf32> to vector<1x1x128xf32>
    %58 = vector.broadcast %57 : vector<1x1x128xf32> to vector<8x8x128xf32>
    %59 = arith.mulf %53, %58 : vector<8x8x128xf32>
    %60 = arith.addf %50, %59 : vector<8x8x128xf32>
    %c0_42 = arith.constant 0 : index
    %c0_43 = arith.constant 0 : index
    %c1_44 = arith.constant 1 : index
    %c0_45 = arith.constant 0 : index
    %c0_46 = arith.constant 0 : index
    %61 = vector.load %arg1[%c0_42, %c0_43, %c1_44, %c0_45, %c0_46] : memref<4x1x9x9x128xbf16, #tpu.memory_space<vmem>>, vector<1x1x8x8x128xbf16>
    %62 = vector.shape_cast %61 : vector<1x1x8x8x128xbf16> to vector<8x8x128xbf16>
    %63 = arith.extf %62 : vector<8x8x128xbf16> to vector<8x8x128xf32>
    %c6 = arith.constant 6 : index
    %c0_47 = arith.constant 0 : index
    %c0_48 = arith.constant 0 : index
    %64 = vector.load %arg2[%c6, %c0_47, %c0_48] : memref<9x1x128xbf16, #tpu.memory_space<vmem>>, vector<1x1x128xbf16>
    %65 = vector.shape_cast %64 : vector<1x1x128xbf16> to vector<1x128xbf16>
    %66 = arith.extf %65 : vector<1x128xbf16> to vector<1x128xf32>
    %67 = vector.shape_cast %66 : vector<1x128xf32> to vector<1x1x128xf32>
    %68 = vector.broadcast %67 : vector<1x1x128xf32> to vector<8x8x128xf32>
    %69 = arith.mulf %63, %68 : vector<8x8x128xf32>
    %70 = arith.addf %60, %69 : vector<8x8x128xf32>
    %c1_49 = arith.constant 1 : index
    %c0_50 = arith.constant 0 : index
    %c1_51 = arith.constant 1 : index
    %c0_52 = arith.constant 0 : index
    %c0_53 = arith.constant 0 : index
    %71 = vector.load %arg1[%c1_49, %c0_50, %c1_51, %c0_52, %c0_53] : memref<4x1x9x9x128xbf16, #tpu.memory_space<vmem>>, vector<1x1x8x8x128xbf16>
    %72 = vector.shape_cast %71 : vector<1x1x8x8x128xbf16> to vector<8x8x128xbf16>
    %73 = arith.extf %72 : vector<8x8x128xbf16> to vector<8x8x128xf32>
    %c7 = arith.constant 7 : index
    %c0_54 = arith.constant 0 : index
    %c0_55 = arith.constant 0 : index
    %74 = vector.load %arg2[%c7, %c0_54, %c0_55] : memref<9x1x128xbf16, #tpu.memory_space<vmem>>, vector<1x1x128xbf16>
    %75 = vector.shape_cast %74 : vector<1x1x128xbf16> to vector<1x128xbf16>
    %76 = arith.extf %75 : vector<1x128xbf16> to vector<1x128xf32>
    %77 = vector.shape_cast %76 : vector<1x128xf32> to vector<1x1x128xf32>
    %78 = vector.broadcast %77 : vector<1x1x128xf32> to vector<8x8x128xf32>
    %79 = arith.mulf %73, %78 : vector<8x8x128xf32>
    %80 = arith.addf %70, %79 : vector<8x8x128xf32>
    %c0_56 = arith.constant 0 : index
    %c0_57 = arith.constant 0 : index
    %c1_58 = arith.constant 1 : index
    %c1_59 = arith.constant 1 : index
    %c0_60 = arith.constant 0 : index
    %81 = vector.load %arg1[%c0_56, %c0_57, %c1_58, %c1_59, %c0_60] : memref<4x1x9x9x128xbf16, #tpu.memory_space<vmem>>, vector<1x1x8x8x128xbf16>
    %82 = vector.shape_cast %81 : vector<1x1x8x8x128xbf16> to vector<8x8x128xbf16>
    %83 = arith.extf %82 : vector<8x8x128xbf16> to vector<8x8x128xf32>
    %c8 = arith.constant 8 : index
    %c0_61 = arith.constant 0 : index
    %c0_62 = arith.constant 0 : index
    %84 = vector.load %arg2[%c8, %c0_61, %c0_62] : memref<9x1x128xbf16, #tpu.memory_space<vmem>>, vector<1x1x128xbf16>
    %85 = vector.shape_cast %84 : vector<1x1x128xbf16> to vector<1x128xbf16>
    %86 = arith.extf %85 : vector<1x128xbf16> to vector<1x128xf32>
    %87 = vector.shape_cast %86 : vector<1x128xf32> to vector<1x1x128xf32>
    %88 = vector.broadcast %87 : vector<1x1x128xf32> to vector<8x8x128xf32>
    %89 = arith.mulf %83, %88 : vector<8x8x128xf32>
    %90 = arith.addf %80, %89 : vector<8x8x128xf32>
    %c0_63 = arith.constant 0 : index
    %c0_64 = arith.constant 0 : index
    %91 = vector.load %arg3[%c0_63, %c0_64] : memref<1x128xf32, #tpu.memory_space<vmem>>, vector<1x128xf32>
    %92 = vector.shape_cast %91 : vector<1x128xf32> to vector<1x1x128xf32>
    %93 = vector.broadcast %92 : vector<1x1x128xf32> to vector<8x8x128xf32>
    %94 = arith.mulf %90, %93 : vector<8x8x128xf32>
    %c0_65 = arith.constant 0 : index
    %c0_66 = arith.constant 0 : index
    %95 = vector.load %arg4[%c0_65, %c0_66] : memref<1x128xf32, #tpu.memory_space<vmem>>, vector<1x128xf32>
    %96 = vector.shape_cast %95 : vector<1x128xf32> to vector<1x1x128xf32>
    %97 = vector.broadcast %96 : vector<1x1x128xf32> to vector<8x8x128xf32>
    %98 = arith.addf %94, %97 : vector<8x8x128xf32>
    %cst_67 = arith.constant 0.000000e+00 : f32
    %99 = vector.broadcast %cst_67 : f32 to vector<8x8x128xf32>
    %100 = arith.maximumf %98, %99 : vector<8x8x128xf32>
    %101 = arith.truncf %100 : vector<8x8x128xf32> to vector<8x8x128xbf16>
    %c0_68 = arith.constant 0 : index
    %c0_69 = arith.constant 0 : index
    %c0_70 = arith.constant 0 : index
    %c0_71 = arith.constant 0 : index
    %102 = vector.load %arg5[%c0_68, %c0_69, %c0_70, %c0_71] : memref<1x8x8x128xbf16, #tpu.memory_space<vmem>>, vector<1x8x8x128xbf16>
    %103 = vector.shape_cast %102 : vector<1x8x8x128xbf16> to vector<8x8x128xbf16>
    %104 = vector.shape_cast %101 : vector<8x8x128xbf16> to vector<1x8x8x128xbf16>
    tpu.vector_store %arg5[%c0_68, %c0_69, %c0_70, %c0_71], %104 {strides = array<i32>} : memref<1x8x8x128xbf16, #tpu.memory_space<vmem>>, vector<1x8x8x128xbf16>,
    return
  }
  func.func @transform_0(%arg0: i32) -> (i32, i32, i32, i32, i32) {
    %c0_i32 = arith.constant 0 : i32
    %c0_i32_0 = arith.constant 0 : i32
    %c0_i32_1 = arith.constant 0 : i32
    %c0_i32_2 = arith.constant 0 : i32
    %c0_i32_3 = arith.constant 0 : i32
    return %c0_i32, %arg0, %c0_i32_0, %c0_i32_1, %c0_i32_2 : i32, i32, i32, i32, i32
  }
  func.func @transform_1(%arg0: i32) -> (i32, i32, i32) {
    %c0_i32 = arith.constant 0 : i32
    %c0_i32_0 = arith.constant 0 : i32
    %c0_i32_1 = arith.constant 0 : i32
    %c0_i32_2 = arith.constant 0 : i32
    return %c0_i32, %c0_i32_0, %c0_i32_1 : i32, i32, i32
  }
  func.func @transform_2(%arg0: i32) -> (i32, i32) {
    %c0_i32 = arith.constant 0 : i32
    %c0_i32_0 = arith.constant 0 : i32
    %c0_i32_1 = arith.constant 0 : i32
    return %c0_i32, %c0_i32_0 : i32, i32
  }
  func.func @transform_3(%arg0: i32) -> (i32, i32) {
    %c0_i32 = arith.constant 0 : i32
    %c0_i32_0 = arith.constant 0 : i32
    %c0_i32_1 = arith.constant 0 : i32
    return %c0_i32, %c0_i32_0 : i32, i32
  }
  func.func @transform_4(%arg0: i32) -> (i32, i32, i32, i32) {
    %c0_i32 = arith.constant 0 : i32
    %c0_i32_0 = arith.constant 0 : i32
    %c0_i32_1 = arith.constant 0 : i32
    %c0_i32_2 = arith.constant 0 : i32
    return %arg0, %c0_i32, %c0_i32_0, %c0_i32_1 : i32, i32, i32, i32
  }
}

module attributes {stable_mosaic.version = 11 : i64} {
  func.func @_se_kernel(%arg0: i32, %arg1: memref<1x64x128xbf16, #tpu.memory_space<vmem>>, %arg2: memref<128x128xbf16, #tpu.memory_space<vmem>>, %arg3: memref<1x128xf32, #tpu.memory_space<vmem>>, %arg4: memref<128x128xbf16, #tpu.memory_space<vmem>>, %arg5: memref<1x128xf32, #tpu.memory_space<vmem>>, %arg6: memref<1x64x128xbf16, #tpu.memory_space<vmem>>) attributes {dimension_semantics = [#tpu.dimension_semantics<parallel>], iteration_bounds = array<i64: 2>, scalar_prefetch = 0 : i64, scratch_operands = 0 : i64, tpu.core_type = #tpu.core_type<tc>, window_params = [{transform_indices = @transform_0, window_bounds = array<i64: 1, 64, 128>}, {pipeline_mode = #tpu.pipeline_mode<synchronous>, transform_indices = @transform_1, window_bounds = array<i64: 128, 128>}, {pipeline_mode = #tpu.pipeline_mode<synchronous>, transform_indices = @transform_2, window_bounds = array<i64: 1, 128>}, {pipeline_mode = #tpu.pipeline_mode<synchronous>, transform_indices = @transform_3, window_bounds = array<i64: 128, 128>}, {pipeline_mode = #tpu.pipeline_mode<synchronous>, transform_indices = @transform_4, window_bounds = array<i64: 1, 128>}, {transform_indices = @transform_5, window_bounds = array<i64: 1, 64, 128>}]} {
    %c0 = arith.constant 0 : index
    %c0_0 = arith.constant 0 : index
    %c0_1 = arith.constant 0 : index
    %0 = vector.load %arg1[%c0, %c0_0, %c0_1] : memref<1x64x128xbf16, #tpu.memory_space<vmem>>, vector<1x64x128xbf16>
    %1 = vector.shape_cast %0 : vector<1x64x128xbf16> to vector<64x128xbf16>
    %2 = arith.extf %1 : vector<64x128xbf16> to vector<64x128xf32>
    %cst = arith.constant dense<0.000000e+00> : vector<128xf32>
    %3 = vector.multi_reduction <add>, %2, %cst [0] : vector<64x128xf32> to vector<128xf32>
    %4 = vector.shape_cast %3 : vector<128xf32> to vector<1x128xf32>
    %cst_2 = arith.constant 6.400000e+01 : f32
    %5 = vector.broadcast %cst_2 : f32 to vector<1x128xf32>
    %6 = arith.divf %4, %5 : vector<1x128xf32>
    %7 = arith.truncf %6 : vector<1x128xf32> to vector<1x128xbf16>
    %c0_3 = arith.constant 0 : index
    %c0_4 = arith.constant 0 : index
    %8 = vector.load %arg2[%c0_3, %c0_4] : memref<128x128xbf16, #tpu.memory_space<vmem>>, vector<128x128xbf16>
    %cst_5 = arith.constant dense<0.000000e+00> : vector<1x128xf32>
    %9 = tpu.matmul %7, %8, %cst_5 {dimension_numbers = #tpu.dot_dimension_numbers<[1], [0], [0], [1], [0, 0, 1, 1], [], []>} : vector<1x128xbf16>, vector<128x128xbf16>, vector<1x128xf32> -> vector<1x128xf32>
    %c0_6 = arith.constant 0 : index
    %c0_7 = arith.constant 0 : index
    %10 = vector.load %arg3[%c0_6, %c0_7] : memref<1x128xf32, #tpu.memory_space<vmem>>, vector<1x128xf32>
    %11 = arith.addf %9, %10 : vector<1x128xf32>
    %cst_8 = arith.constant 0.000000e+00 : f32
    %12 = vector.broadcast %cst_8 : f32 to vector<1x128xf32>
    %13 = arith.maximumf %11, %12 : vector<1x128xf32>
    %14 = arith.truncf %13 : vector<1x128xf32> to vector<1x128xbf16>
    %c0_9 = arith.constant 0 : index
    %c0_10 = arith.constant 0 : index
    %15 = vector.load %arg4[%c0_9, %c0_10] : memref<128x128xbf16, #tpu.memory_space<vmem>>, vector<128x128xbf16>
    %cst_11 = arith.constant dense<0.000000e+00> : vector<1x128xf32>
    %16 = tpu.matmul %14, %15, %cst_11 {dimension_numbers = #tpu.dot_dimension_numbers<[1], [0], [0], [1], [0, 0, 1, 1], [], []>} : vector<1x128xbf16>, vector<128x128xbf16>, vector<1x128xf32> -> vector<1x128xf32>
    %c0_12 = arith.constant 0 : index
    %c0_13 = arith.constant 0 : index
    %17 = vector.load %arg5[%c0_12, %c0_13] : memref<1x128xf32, #tpu.memory_space<vmem>>, vector<1x128xf32>
    %18 = arith.addf %16, %17 : vector<1x128xf32>
    %cst_14 = arith.constant 3.000000e+00 : f32
    %19 = vector.broadcast %cst_14 : f32 to vector<1x128xf32>
    %20 = arith.addf %18, %19 : vector<1x128xf32>
    %cst_15 = arith.constant 0.000000e+00 : f32
    %cst_16 = arith.constant 6.000000e+00 : f32
    %21 = vector.broadcast %cst_15 : f32 to vector<1x128xf32>
    %22 = arith.maximumf %21, %20 : vector<1x128xf32>
    %23 = vector.broadcast %cst_16 : f32 to vector<1x128xf32>
    %24 = arith.minimumf %23, %22 : vector<1x128xf32>
    %cst_17 = arith.constant 0.166666672 : f32
    %25 = vector.broadcast %cst_17 : f32 to vector<1x128xf32>
    %26 = arith.mulf %24, %25 : vector<1x128xf32>
    %27 = vector.broadcast %26 : vector<1x128xf32> to vector<64x128xf32>
    %28 = arith.mulf %2, %27 : vector<64x128xf32>
    %29 = arith.truncf %28 : vector<64x128xf32> to vector<64x128xbf16>
    %c0_18 = arith.constant 0 : index
    %c0_19 = arith.constant 0 : index
    %c0_20 = arith.constant 0 : index
    %30 = vector.load %arg6[%c0_18, %c0_19, %c0_20] : memref<1x64x128xbf16, #tpu.memory_space<vmem>>, vector<1x64x128xbf16>
    %31 = vector.shape_cast %30 : vector<1x64x128xbf16> to vector<64x128xbf16>
    %32 = vector.shape_cast %29 : vector<64x128xbf16> to vector<1x64x128xbf16>
    tpu.vector_store %arg6[%c0_18, %c0_19, %c0_20], %32 {strides = array<i32>} : memref<1x64x128xbf16, #tpu.memory_space<vmem>>, vector<1x64x128xbf16>,
    return
  }
  func.func @transform_0(%arg0: i32) -> (i32, i32, i32) {
    %c0_i32 = arith.constant 0 : i32
    %c0_i32_0 = arith.constant 0 : i32
    %c0_i32_1 = arith.constant 0 : i32
    return %arg0, %c0_i32, %c0_i32_0 : i32, i32, i32
  }
  func.func @transform_1(%arg0: i32) -> (i32, i32) {
    %c0_i32 = arith.constant 0 : i32
    %c0_i32_0 = arith.constant 0 : i32
    %c0_i32_1 = arith.constant 0 : i32
    return %c0_i32, %c0_i32_0 : i32, i32
  }
  func.func @transform_2(%arg0: i32) -> (i32, i32) {
    %c0_i32 = arith.constant 0 : i32
    %c0_i32_0 = arith.constant 0 : i32
    %c0_i32_1 = arith.constant 0 : i32
    return %c0_i32, %c0_i32_0 : i32, i32
  }
  func.func @transform_3(%arg0: i32) -> (i32, i32) {
    %c0_i32 = arith.constant 0 : i32
    %c0_i32_0 = arith.constant 0 : i32
    %c0_i32_1 = arith.constant 0 : i32
    return %c0_i32, %c0_i32_0 : i32, i32
  }
  func.func @transform_4(%arg0: i32) -> (i32, i32) {
    %c0_i32 = arith.constant 0 : i32
    %c0_i32_0 = arith.constant 0 : i32
    %c0_i32_1 = arith.constant 0 : i32
    return %c0_i32, %c0_i32_0 : i32, i32
  }
  func.func @transform_5(%arg0: i32) -> (i32, i32, i32) {
    %c0_i32 = arith.constant 0 : i32
    %c0_i32_0 = arith.constant 0 : i32
    %c0_i32_1 = arith.constant 0 : i32
    return %arg0, %c0_i32, %c0_i32_0 : i32, i32, i32
  }
}

module attributes {stable_mosaic.version = 11 : i64} {
  func.func @_mm_kernel(%arg0: i32, %arg1: memref<128x128xbf16, #tpu.memory_space<vmem>>, %arg2: memref<128x128xbf16, #tpu.memory_space<vmem>>, %arg3: memref<1x128xf32, #tpu.memory_space<vmem>>, %arg4: memref<1x128xf32, #tpu.memory_space<vmem>>, %arg5: memref<128x128xbf16, #tpu.memory_space<vmem>>) attributes {dimension_semantics = [#tpu.dimension_semantics<parallel>], iteration_bounds = array<i64: 1>, scalar_prefetch = 0 : i64, scratch_operands = 0 : i64, tpu.core_type = #tpu.core_type<tc>, window_params = [{transform_indices = @transform_0, window_bounds = array<i64: 128, 128>}, {pipeline_mode = #tpu.pipeline_mode<synchronous>, transform_indices = @transform_1, window_bounds = array<i64: 128, 128>}, {pipeline_mode = #tpu.pipeline_mode<synchronous>, transform_indices = @transform_2, window_bounds = array<i64: 1, 128>}, {pipeline_mode = #tpu.pipeline_mode<synchronous>, transform_indices = @transform_3, window_bounds = array<i64: 1, 128>}, {transform_indices = @transform_4, window_bounds = array<i64: 128, 128>}]} {
    %c0 = arith.constant 0 : index
    %c0_0 = arith.constant 0 : index
    %0 = vector.load %arg1[%c0, %c0_0] : memref<128x128xbf16, #tpu.memory_space<vmem>>, vector<128x128xbf16>
    %c0_1 = arith.constant 0 : index
    %c0_2 = arith.constant 0 : index
    %1 = vector.load %arg2[%c0_1, %c0_2] : memref<128x128xbf16, #tpu.memory_space<vmem>>, vector<128x128xbf16>
    %cst = arith.constant dense<0.000000e+00> : vector<128x128xf32>
    %2 = tpu.matmul %0, %1, %cst {dimension_numbers = #tpu.dot_dimension_numbers<[1], [0], [0], [1], [0, 0, 1, 1], [], []>} : vector<128x128xbf16>, vector<128x128xbf16>, vector<128x128xf32> -> vector<128x128xf32>
    %c0_3 = arith.constant 0 : index
    %c0_4 = arith.constant 0 : index
    %3 = vector.load %arg3[%c0_3, %c0_4] : memref<1x128xf32, #tpu.memory_space<vmem>>, vector<1x128xf32>
    %4 = vector.broadcast %3 : vector<1x128xf32> to vector<128x128xf32>
    %5 = arith.mulf %2, %4 : vector<128x128xf32>
    %c0_5 = arith.constant 0 : index
    %c0_6 = arith.constant 0 : index
    %6 = vector.load %arg4[%c0_5, %c0_6] : memref<1x128xf32, #tpu.memory_space<vmem>>, vector<1x128xf32>
    %7 = vector.broadcast %6 : vector<1x128xf32> to vector<128x128xf32>
    %8 = arith.addf %5, %7 : vector<128x128xf32>
    %9 = arith.truncf %8 : vector<128x128xf32> to vector<128x128xbf16>
    %c0_7 = arith.constant 0 : index
    %c0_8 = arith.constant 0 : index
    %10 = vector.load %arg5[%c0_7, %c0_8] : memref<128x128xbf16, #tpu.memory_space<vmem>>, vector<128x128xbf16>
    tpu.vector_store %arg5[%c0_7, %c0_8], %9 {strides = array<i32>} : memref<128x128xbf16, #tpu.memory_space<vmem>>, vector<128x128xbf16>,
    return
  }
  func.func @transform_0(%arg0: i32) -> (i32, i32) {
    %c0_i32 = arith.constant 0 : i32
    %c0_i32_0 = arith.constant 0 : i32
    return %arg0, %c0_i32 : i32, i32
  }
  func.func @transform_1(%arg0: i32) -> (i32, i32) {
    %c0_i32 = arith.constant 0 : i32
    %c0_i32_0 = arith.constant 0 : i32
    %c0_i32_1 = arith.constant 0 : i32
    return %c0_i32, %c0_i32_0 : i32, i32
  }
  func.func @transform_2(%arg0: i32) -> (i32, i32) {
    %c0_i32 = arith.constant 0 : i32
    %c0_i32_0 = arith.constant 0 : i32
    %c0_i32_1 = arith.constant 0 : i32
    return %c0_i32, %c0_i32_0 : i32, i32
  }
  func.func @transform_3(%arg0: i32) -> (i32, i32) {
    %c0_i32 = arith.constant 0 : i32
    %c0_i32_0 = arith.constant 0 : i32
    %c0_i32_1 = arith.constant 0 : i32
    return %c0_i32, %c0_i32_0 : i32, i32
  }
  func.func @transform_4(%arg0: i32) -> (i32, i32) {
    %c0_i32 = arith.constant 0 : i32
    %c0_i32_0 = arith.constant 0 : i32
    return %arg0, %c0_i32 : i32, i32
  }
}

module attributes {stable_mosaic.version = 11 : i64} {
  func.func @_mm_kernel(%arg0: i32, %arg1: memref<128x128xbf16, #tpu.memory_space<vmem>>, %arg2: memref<128x128xbf16, #tpu.memory_space<vmem>>, %arg3: memref<1x128xf32, #tpu.memory_space<vmem>>, %arg4: memref<1x128xf32, #tpu.memory_space<vmem>>, %arg5: memref<128x128xbf16, #tpu.memory_space<vmem>>) attributes {dimension_semantics = [#tpu.dimension_semantics<parallel>], iteration_bounds = array<i64: 1>, scalar_prefetch = 0 : i64, scratch_operands = 0 : i64, tpu.core_type = #tpu.core_type<tc>, window_params = [{transform_indices = @transform_0, window_bounds = array<i64: 128, 128>}, {pipeline_mode = #tpu.pipeline_mode<synchronous>, transform_indices = @transform_1, window_bounds = array<i64: 128, 128>}, {pipeline_mode = #tpu.pipeline_mode<synchronous>, transform_indices = @transform_2, window_bounds = array<i64: 1, 128>}, {pipeline_mode = #tpu.pipeline_mode<synchronous>, transform_indices = @transform_3, window_bounds = array<i64: 1, 128>}, {transform_indices = @transform_4, window_bounds = array<i64: 128, 128>}]} {
    %c0 = arith.constant 0 : index
    %c0_0 = arith.constant 0 : index
    %0 = vector.load %arg1[%c0, %c0_0] : memref<128x128xbf16, #tpu.memory_space<vmem>>, vector<128x128xbf16>
    %c0_1 = arith.constant 0 : index
    %c0_2 = arith.constant 0 : index
    %1 = vector.load %arg2[%c0_1, %c0_2] : memref<128x128xbf16, #tpu.memory_space<vmem>>, vector<128x128xbf16>
    %cst = arith.constant dense<0.000000e+00> : vector<128x128xf32>
    %2 = tpu.matmul %0, %1, %cst {dimension_numbers = #tpu.dot_dimension_numbers<[1], [0], [0], [1], [0, 0, 1, 1], [], []>} : vector<128x128xbf16>, vector<128x128xbf16>, vector<128x128xf32> -> vector<128x128xf32>
    %c0_3 = arith.constant 0 : index
    %c0_4 = arith.constant 0 : index
    %3 = vector.load %arg3[%c0_3, %c0_4] : memref<1x128xf32, #tpu.memory_space<vmem>>, vector<1x128xf32>
    %4 = vector.broadcast %3 : vector<1x128xf32> to vector<128x128xf32>
    %5 = arith.mulf %2, %4 : vector<128x128xf32>
    %c0_5 = arith.constant 0 : index
    %c0_6 = arith.constant 0 : index
    %6 = vector.load %arg4[%c0_5, %c0_6] : memref<1x128xf32, #tpu.memory_space<vmem>>, vector<1x128xf32>
    %7 = vector.broadcast %6 : vector<1x128xf32> to vector<128x128xf32>
    %8 = arith.addf %5, %7 : vector<128x128xf32>
    %cst_7 = arith.constant 0.000000e+00 : f32
    %9 = vector.broadcast %cst_7 : f32 to vector<128x128xf32>
    %10 = arith.maximumf %8, %9 : vector<128x128xf32>
    %11 = arith.truncf %10 : vector<128x128xf32> to vector<128x128xbf16>
    %c0_8 = arith.constant 0 : index
    %c0_9 = arith.constant 0 : index
    %12 = vector.load %arg5[%c0_8, %c0_9] : memref<128x128xbf16, #tpu.memory_space<vmem>>, vector<128x128xbf16>
    tpu.vector_store %arg5[%c0_8, %c0_9], %11 {strides = array<i32>} : memref<128x128xbf16, #tpu.memory_space<vmem>>, vector<128x128xbf16>,
    return
  }
  func.func @transform_0(%arg0: i32) -> (i32, i32) {
    %c0_i32 = arith.constant 0 : i32
    %c0_i32_0 = arith.constant 0 : i32
    return %arg0, %c0_i32 : i32, i32
  }
  func.func @transform_1(%arg0: i32) -> (i32, i32) {
    %c0_i32 = arith.constant 0 : i32
    %c0_i32_0 = arith.constant 0 : i32
    %c0_i32_1 = arith.constant 0 : i32
    return %c0_i32, %c0_i32_0 : i32, i32
  }
  func.func @transform_2(%arg0: i32) -> (i32, i32) {
    %c0_i32 = arith.constant 0 : i32
    %c0_i32_0 = arith.constant 0 : i32
    %c0_i32_1 = arith.constant 0 : i32
    return %c0_i32, %c0_i32_0 : i32, i32
  }
  func.func @transform_3(%arg0: i32) -> (i32, i32) {
    %c0_i32 = arith.constant 0 : i32
    %c0_i32_0 = arith.constant 0 : i32
    %c0_i32_1 = arith.constant 0 : i32
    return %c0_i32, %c0_i32_0 : i32, i32
  }
  func.func @transform_4(%arg0: i32) -> (i32, i32) {
    %c0_i32 = arith.constant 0 : i32
    %c0_i32_0 = arith.constant 0 : i32
    return %arg0, %c0_i32 : i32, i32
  }
}

module attributes {stable_mosaic.version = 11 : i64} {
  func.func @_dw_kernel(%arg0: i32, %arg1: memref<4x1x5x5x128xbf16, #tpu.memory_space<vmem>>, %arg2: memref<9x1x128xbf16, #tpu.memory_space<vmem>>, %arg3: memref<1x128xf32, #tpu.memory_space<vmem>>, %arg4: memref<1x128xf32, #tpu.memory_space<vmem>>, %arg5: memref<1x4x4x128xbf16, #tpu.memory_space<vmem>>) attributes {dimension_semantics = [#tpu.dimension_semantics<parallel>], iteration_bounds = array<i64: 2>, scalar_prefetch = 0 : i64, scratch_operands = 0 : i64, tpu.core_type = #tpu.core_type<tc>, window_params = [{transform_indices = @transform_0, window_bounds = array<i64: 4, 1, 5, 5, 128>}, {pipeline_mode = #tpu.pipeline_mode<synchronous>, transform_indices = @transform_1, window_bounds = array<i64: 9, 1, 128>}, {pipeline_mode = #tpu.pipeline_mode<synchronous>, transform_indices = @transform_2, window_bounds = array<i64: 1, 128>}, {pipeline_mode = #tpu.pipeline_mode<synchronous>, transform_indices = @transform_3, window_bounds = array<i64: 1, 128>}, {transform_indices = @transform_4, window_bounds = array<i64: 1, 4, 4, 128>}]} {
    %cst = arith.constant 0.000000e+00 : f32
    %0 = vector.broadcast %cst : f32 to vector<4x4x128xf32>
    %c0 = arith.constant 0 : index
    %c0_0 = arith.constant 0 : index
    %c0_1 = arith.constant 0 : index
    %c0_2 = arith.constant 0 : index
    %c0_3 = arith.constant 0 : index
    %1 = vector.load %arg1[%c0, %c0_0, %c0_1, %c0_2, %c0_3] : memref<4x1x5x5x128xbf16, #tpu.memory_space<vmem>>, vector<1x1x4x4x128xbf16>
    %2 = vector.shape_cast %1 : vector<1x1x4x4x128xbf16> to vector<4x4x128xbf16>
    %3 = arith.extf %2 : vector<4x4x128xbf16> to vector<4x4x128xf32>
    %c0_4 = arith.constant 0 : index
    %c0_5 = arith.constant 0 : index
    %c0_6 = arith.constant 0 : index
    %4 = vector.load %arg2[%c0_4, %c0_5, %c0_6] : memref<9x1x128xbf16, #tpu.memory_space<vmem>>, vector<1x1x128xbf16>
    %5 = vector.shape_cast %4 : vector<1x1x128xbf16> to vector<1x128xbf16>
    %6 = arith.extf %5 : vector<1x128xbf16> to vector<1x128xf32>
    %7 = vector.shape_cast %6 : vector<1x128xf32> to vector<1x1x128xf32>
    %8 = vector.broadcast %7 : vector<1x1x128xf32> to vector<4x4x128xf32>
    %9 = arith.mulf %3, %8 : vector<4x4x128xf32>
    %10 = arith.addf %0, %9 : vector<4x4x128xf32>
    %c1 = arith.constant 1 : index
    %c0_7 = arith.constant 0 : index
    %c0_8 = arith.constant 0 : index
    %c0_9 = arith.constant 0 : index
    %c0_10 = arith.constant 0 : index
    %11 = vector.load %arg1[%c1, %c0_7, %c0_8, %c0_9, %c0_10] : memref<4x1x5x5x128xbf16, #tpu.memory_space<vmem>>, vector<1x1x4x4x128xbf16>
    %12 = vector.shape_cast %11 : vector<1x1x4x4x128xbf16> to vector<4x4x128xbf16>
    %13 = arith.extf %12 : vector<4x4x128xbf16> to vector<4x4x128xf32>
    %c1_11 = arith.constant 1 : index
    %c0_12 = arith.constant 0 : index
    %c0_13 = arith.constant 0 : index
    %14 = vector.load %arg2[%c1_11, %c0_12, %c0_13] : memref<9x1x128xbf16, #tpu.memory_space<vmem>>, vector<1x1x128xbf16>
    %15 = vector.shape_cast %14 : vector<1x1x128xbf16> to vector<1x128xbf16>
    %16 = arith.extf %15 : vector<1x128xbf16> to vector<1x128xf32>
    %17 = vector.shape_cast %16 : vector<1x128xf32> to vector<1x1x128xf32>
    %18 = vector.broadcast %17 : vector<1x1x128xf32> to vector<4x4x128xf32>
    %19 = arith.mulf %13, %18 : vector<4x4x128xf32>
    %20 = arith.addf %10, %19 : vector<4x4x128xf32>
    %c0_14 = arith.constant 0 : index
    %c0_15 = arith.constant 0 : index
    %c0_16 = arith.constant 0 : index
    %c1_17 = arith.constant 1 : index
    %c0_18 = arith.constant 0 : index
    %21 = vector.load %arg1[%c0_14, %c0_15, %c0_16, %c1_17, %c0_18] : memref<4x1x5x5x128xbf16, #tpu.memory_space<vmem>>, vector<1x1x4x4x128xbf16>
    %22 = vector.shape_cast %21 : vector<1x1x4x4x128xbf16> to vector<4x4x128xbf16>
    %23 = arith.extf %22 : vector<4x4x128xbf16> to vector<4x4x128xf32>
    %c2 = arith.constant 2 : index
    %c0_19 = arith.constant 0 : index
    %c0_20 = arith.constant 0 : index
    %24 = vector.load %arg2[%c2, %c0_19, %c0_20] : memref<9x1x128xbf16, #tpu.memory_space<vmem>>, vector<1x1x128xbf16>
    %25 = vector.shape_cast %24 : vector<1x1x128xbf16> to vector<1x128xbf16>
    %26 = arith.extf %25 : vector<1x128xbf16> to vector<1x128xf32>
    %27 = vector.shape_cast %26 : vector<1x128xf32> to vector<1x1x128xf32>
    %28 = vector.broadcast %27 : vector<1x1x128xf32> to vector<4x4x128xf32>
    %29 = arith.mulf %23, %28 : vector<4x4x128xf32>
    %30 = arith.addf %20, %29 : vector<4x4x128xf32>
    %c2_21 = arith.constant 2 : index
    %c0_22 = arith.constant 0 : index
    %c0_23 = arith.constant 0 : index
    %c0_24 = arith.constant 0 : index
    %c0_25 = arith.constant 0 : index
    %31 = vector.load %arg1[%c2_21, %c0_22, %c0_23, %c0_24, %c0_25] : memref<4x1x5x5x128xbf16, #tpu.memory_space<vmem>>, vector<1x1x4x4x128xbf16>
    %32 = vector.shape_cast %31 : vector<1x1x4x4x128xbf16> to vector<4x4x128xbf16>
    %33 = arith.extf %32 : vector<4x4x128xbf16> to vector<4x4x128xf32>
    %c3 = arith.constant 3 : index
    %c0_26 = arith.constant 0 : index
    %c0_27 = arith.constant 0 : index
    %34 = vector.load %arg2[%c3, %c0_26, %c0_27] : memref<9x1x128xbf16, #tpu.memory_space<vmem>>, vector<1x1x128xbf16>
    %35 = vector.shape_cast %34 : vector<1x1x128xbf16> to vector<1x128xbf16>
    %36 = arith.extf %35 : vector<1x128xbf16> to vector<1x128xf32>
    %37 = vector.shape_cast %36 : vector<1x128xf32> to vector<1x1x128xf32>
    %38 = vector.broadcast %37 : vector<1x1x128xf32> to vector<4x4x128xf32>
    %39 = arith.mulf %33, %38 : vector<4x4x128xf32>
    %40 = arith.addf %30, %39 : vector<4x4x128xf32>
    %c3_28 = arith.constant 3 : index
    %c0_29 = arith.constant 0 : index
    %c0_30 = arith.constant 0 : index
    %c0_31 = arith.constant 0 : index
    %c0_32 = arith.constant 0 : index
    %41 = vector.load %arg1[%c3_28, %c0_29, %c0_30, %c0_31, %c0_32] : memref<4x1x5x5x128xbf16, #tpu.memory_space<vmem>>, vector<1x1x4x4x128xbf16>
    %42 = vector.shape_cast %41 : vector<1x1x4x4x128xbf16> to vector<4x4x128xbf16>
    %43 = arith.extf %42 : vector<4x4x128xbf16> to vector<4x4x128xf32>
    %c4 = arith.constant 4 : index
    %c0_33 = arith.constant 0 : index
    %c0_34 = arith.constant 0 : index
    %44 = vector.load %arg2[%c4, %c0_33, %c0_34] : memref<9x1x128xbf16, #tpu.memory_space<vmem>>, vector<1x1x128xbf16>
    %45 = vector.shape_cast %44 : vector<1x1x128xbf16> to vector<1x128xbf16>
    %46 = arith.extf %45 : vector<1x128xbf16> to vector<1x128xf32>
    %47 = vector.shape_cast %46 : vector<1x128xf32> to vector<1x1x128xf32>
    %48 = vector.broadcast %47 : vector<1x1x128xf32> to vector<4x4x128xf32>
    %49 = arith.mulf %43, %48 : vector<4x4x128xf32>
    %50 = arith.addf %40, %49 : vector<4x4x128xf32>
    %c2_35 = arith.constant 2 : index
    %c0_36 = arith.constant 0 : index
    %c0_37 = arith.constant 0 : index
    %c1_38 = arith.constant 1 : index
    %c0_39 = arith.constant 0 : index
    %51 = vector.load %arg1[%c2_35, %c0_36, %c0_37, %c1_38, %c0_39] : memref<4x1x5x5x128xbf16, #tpu.memory_space<vmem>>, vector<1x1x4x4x128xbf16>
    %52 = vector.shape_cast %51 : vector<1x1x4x4x128xbf16> to vector<4x4x128xbf16>
    %53 = arith.extf %52 : vector<4x4x128xbf16> to vector<4x4x128xf32>
    %c5 = arith.constant 5 : index
    %c0_40 = arith.constant 0 : index
    %c0_41 = arith.constant 0 : index
    %54 = vector.load %arg2[%c5, %c0_40, %c0_41] : memref<9x1x128xbf16, #tpu.memory_space<vmem>>, vector<1x1x128xbf16>
    %55 = vector.shape_cast %54 : vector<1x1x128xbf16> to vector<1x128xbf16>
    %56 = arith.extf %55 : vector<1x128xbf16> to vector<1x128xf32>
    %57 = vector.shape_cast %56 : vector<1x128xf32> to vector<1x1x128xf32>
    %58 = vector.broadcast %57 : vector<1x1x128xf32> to vector<4x4x128xf32>
    %59 = arith.mulf %53, %58 : vector<4x4x128xf32>
    %60 = arith.addf %50, %59 : vector<4x4x128xf32>
    %c0_42 = arith.constant 0 : index
    %c0_43 = arith.constant 0 : index
    %c1_44 = arith.constant 1 : index
    %c0_45 = arith.constant 0 : index
    %c0_46 = arith.constant 0 : index
    %61 = vector.load %arg1[%c0_42, %c0_43, %c1_44, %c0_45, %c0_46] : memref<4x1x5x5x128xbf16, #tpu.memory_space<vmem>>, vector<1x1x4x4x128xbf16>
    %62 = vector.shape_cast %61 : vector<1x1x4x4x128xbf16> to vector<4x4x128xbf16>
    %63 = arith.extf %62 : vector<4x4x128xbf16> to vector<4x4x128xf32>
    %c6 = arith.constant 6 : index
    %c0_47 = arith.constant 0 : index
    %c0_48 = arith.constant 0 : index
    %64 = vector.load %arg2[%c6, %c0_47, %c0_48] : memref<9x1x128xbf16, #tpu.memory_space<vmem>>, vector<1x1x128xbf16>
    %65 = vector.shape_cast %64 : vector<1x1x128xbf16> to vector<1x128xbf16>
    %66 = arith.extf %65 : vector<1x128xbf16> to vector<1x128xf32>
    %67 = vector.shape_cast %66 : vector<1x128xf32> to vector<1x1x128xf32>
    %68 = vector.broadcast %67 : vector<1x1x128xf32> to vector<4x4x128xf32>
    %69 = arith.mulf %63, %68 : vector<4x4x128xf32>
    %70 = arith.addf %60, %69 : vector<4x4x128xf32>
    %c1_49 = arith.constant 1 : index
    %c0_50 = arith.constant 0 : index
    %c1_51 = arith.constant 1 : index
    %c0_52 = arith.constant 0 : index
    %c0_53 = arith.constant 0 : index
    %71 = vector.load %arg1[%c1_49, %c0_50, %c1_51, %c0_52, %c0_53] : memref<4x1x5x5x128xbf16, #tpu.memory_space<vmem>>, vector<1x1x4x4x128xbf16>
    %72 = vector.shape_cast %71 : vector<1x1x4x4x128xbf16> to vector<4x4x128xbf16>
    %73 = arith.extf %72 : vector<4x4x128xbf16> to vector<4x4x128xf32>
    %c7 = arith.constant 7 : index
    %c0_54 = arith.constant 0 : index
    %c0_55 = arith.constant 0 : index
    %74 = vector.load %arg2[%c7, %c0_54, %c0_55] : memref<9x1x128xbf16, #tpu.memory_space<vmem>>, vector<1x1x128xbf16>
    %75 = vector.shape_cast %74 : vector<1x1x128xbf16> to vector<1x128xbf16>
    %76 = arith.extf %75 : vector<1x128xbf16> to vector<1x128xf32>
    %77 = vector.shape_cast %76 : vector<1x128xf32> to vector<1x1x128xf32>
    %78 = vector.broadcast %77 : vector<1x1x128xf32> to vector<4x4x128xf32>
    %79 = arith.mulf %73, %78 : vector<4x4x128xf32>
    %80 = arith.addf %70, %79 : vector<4x4x128xf32>
    %c0_56 = arith.constant 0 : index
    %c0_57 = arith.constant 0 : index
    %c1_58 = arith.constant 1 : index
    %c1_59 = arith.constant 1 : index
    %c0_60 = arith.constant 0 : index
    %81 = vector.load %arg1[%c0_56, %c0_57, %c1_58, %c1_59, %c0_60] : memref<4x1x5x5x128xbf16, #tpu.memory_space<vmem>>, vector<1x1x4x4x128xbf16>
    %82 = vector.shape_cast %81 : vector<1x1x4x4x128xbf16> to vector<4x4x128xbf16>
    %83 = arith.extf %82 : vector<4x4x128xbf16> to vector<4x4x128xf32>
    %c8 = arith.constant 8 : index
    %c0_61 = arith.constant 0 : index
    %c0_62 = arith.constant 0 : index
    %84 = vector.load %arg2[%c8, %c0_61, %c0_62] : memref<9x1x128xbf16, #tpu.memory_space<vmem>>, vector<1x1x128xbf16>
    %85 = vector.shape_cast %84 : vector<1x1x128xbf16> to vector<1x128xbf16>
    %86 = arith.extf %85 : vector<1x128xbf16> to vector<1x128xf32>
    %87 = vector.shape_cast %86 : vector<1x128xf32> to vector<1x1x128xf32>
    %88 = vector.broadcast %87 : vector<1x1x128xf32> to vector<4x4x128xf32>
    %89 = arith.mulf %83, %88 : vector<4x4x128xf32>
    %90 = arith.addf %80, %89 : vector<4x4x128xf32>
    %c0_63 = arith.constant 0 : index
    %c0_64 = arith.constant 0 : index
    %91 = vector.load %arg3[%c0_63, %c0_64] : memref<1x128xf32, #tpu.memory_space<vmem>>, vector<1x128xf32>
    %92 = vector.shape_cast %91 : vector<1x128xf32> to vector<1x1x128xf32>
    %93 = vector.broadcast %92 : vector<1x1x128xf32> to vector<4x4x128xf32>
    %94 = arith.mulf %90, %93 : vector<4x4x128xf32>
    %c0_65 = arith.constant 0 : index
    %c0_66 = arith.constant 0 : index
    %95 = vector.load %arg4[%c0_65, %c0_66] : memref<1x128xf32, #tpu.memory_space<vmem>>, vector<1x128xf32>
    %96 = vector.shape_cast %95 : vector<1x128xf32> to vector<1x1x128xf32>
    %97 = vector.broadcast %96 : vector<1x1x128xf32> to vector<4x4x128xf32>
    %98 = arith.addf %94, %97 : vector<4x4x128xf32>
    %cst_67 = arith.constant 0.000000e+00 : f32
    %99 = vector.broadcast %cst_67 : f32 to vector<4x4x128xf32>
    %100 = arith.maximumf %98, %99 : vector<4x4x128xf32>
    %101 = arith.truncf %100 : vector<4x4x128xf32> to vector<4x4x128xbf16>
    %c0_68 = arith.constant 0 : index
    %c0_69 = arith.constant 0 : index
    %c0_70 = arith.constant 0 : index
    %c0_71 = arith.constant 0 : index
    %102 = vector.load %arg5[%c0_68, %c0_69, %c0_70, %c0_71] : memref<1x4x4x128xbf16, #tpu.memory_space<vmem>>, vector<1x4x4x128xbf16>
    %103 = vector.shape_cast %102 : vector<1x4x4x128xbf16> to vector<4x4x128xbf16>
    %104 = vector.shape_cast %101 : vector<4x4x128xbf16> to vector<1x4x4x128xbf16>
    tpu.vector_store %arg5[%c0_68, %c0_69, %c0_70, %c0_71], %104 {strides = array<i32>} : memref<1x4x4x128xbf16, #tpu.memory_space<vmem>>, vector<1x4x4x128xbf16>,
    return
  }
  func.func @transform_0(%arg0: i32) -> (i32, i32, i32, i32, i32) {
    %c0_i32 = arith.constant 0 : i32
    %c0_i32_0 = arith.constant 0 : i32
    %c0_i32_1 = arith.constant 0 : i32
    %c0_i32_2 = arith.constant 0 : i32
    %c0_i32_3 = arith.constant 0 : i32
    return %c0_i32, %arg0, %c0_i32_0, %c0_i32_1, %c0_i32_2 : i32, i32, i32, i32, i32
  }
  func.func @transform_1(%arg0: i32) -> (i32, i32, i32) {
    %c0_i32 = arith.constant 0 : i32
    %c0_i32_0 = arith.constant 0 : i32
    %c0_i32_1 = arith.constant 0 : i32
    %c0_i32_2 = arith.constant 0 : i32
    return %c0_i32, %c0_i32_0, %c0_i32_1 : i32, i32, i32
  }
  func.func @transform_2(%arg0: i32) -> (i32, i32) {
    %c0_i32 = arith.constant 0 : i32
    %c0_i32_0 = arith.constant 0 : i32
    %c0_i32_1 = arith.constant 0 : i32
    return %c0_i32, %c0_i32_0 : i32, i32
  }
  func.func @transform_3(%arg0: i32) -> (i32, i32) {
    %c0_i32 = arith.constant 0 : i32
    %c0_i32_0 = arith.constant 0 : i32
    %c0_i32_1 = arith.constant 0 : i32
    return %c0_i32, %c0_i32_0 : i32, i32
  }
  func.func @transform_4(%arg0: i32) -> (i32, i32, i32, i32) {
    %c0_i32 = arith.constant 0 : i32
    %c0_i32_0 = arith.constant 0 : i32
    %c0_i32_1 = arith.constant 0 : i32
    %c0_i32_2 = arith.constant 0 : i32
    return %arg0, %c0_i32, %c0_i32_0, %c0_i32_1 : i32, i32, i32, i32
  }
}

module attributes {stable_mosaic.version = 11 : i64} {
  func.func @_mm_kernel(%arg0: i32, %arg1: memref<32x128xbf16, #tpu.memory_space<vmem>>, %arg2: memref<128x128xbf16, #tpu.memory_space<vmem>>, %arg3: memref<1x128xf32, #tpu.memory_space<vmem>>, %arg4: memref<1x128xf32, #tpu.memory_space<vmem>>, %arg5: memref<32x128xbf16, #tpu.memory_space<vmem>>) attributes {dimension_semantics = [#tpu.dimension_semantics<parallel>], iteration_bounds = array<i64: 1>, scalar_prefetch = 0 : i64, scratch_operands = 0 : i64, tpu.core_type = #tpu.core_type<tc>, window_params = [{transform_indices = @transform_0, window_bounds = array<i64: 32, 128>}, {pipeline_mode = #tpu.pipeline_mode<synchronous>, transform_indices = @transform_1, window_bounds = array<i64: 128, 128>}, {pipeline_mode = #tpu.pipeline_mode<synchronous>, transform_indices = @transform_2, window_bounds = array<i64: 1, 128>}, {pipeline_mode = #tpu.pipeline_mode<synchronous>, transform_indices = @transform_3, window_bounds = array<i64: 1, 128>}, {transform_indices = @transform_4, window_bounds = array<i64: 32, 128>}]} {
    %c0 = arith.constant 0 : index
    %c0_0 = arith.constant 0 : index
    %0 = vector.load %arg1[%c0, %c0_0] : memref<32x128xbf16, #tpu.memory_space<vmem>>, vector<32x128xbf16>
    %c0_1 = arith.constant 0 : index
    %c0_2 = arith.constant 0 : index
    %1 = vector.load %arg2[%c0_1, %c0_2] : memref<128x128xbf16, #tpu.memory_space<vmem>>, vector<128x128xbf16>
    %cst = arith.constant dense<0.000000e+00> : vector<32x128xf32>
    %2 = tpu.matmul %0, %1, %cst {dimension_numbers = #tpu.dot_dimension_numbers<[1], [0], [0], [1], [0, 0, 1, 1], [], []>} : vector<32x128xbf16>, vector<128x128xbf16>, vector<32x128xf32> -> vector<32x128xf32>
    %c0_3 = arith.constant 0 : index
    %c0_4 = arith.constant 0 : index
    %3 = vector.load %arg3[%c0_3, %c0_4] : memref<1x128xf32, #tpu.memory_space<vmem>>, vector<1x128xf32>
    %4 = vector.broadcast %3 : vector<1x128xf32> to vector<32x128xf32>
    %5 = arith.mulf %2, %4 : vector<32x128xf32>
    %c0_5 = arith.constant 0 : index
    %c0_6 = arith.constant 0 : index
    %6 = vector.load %arg4[%c0_5, %c0_6] : memref<1x128xf32, #tpu.memory_space<vmem>>, vector<1x128xf32>
    %7 = vector.broadcast %6 : vector<1x128xf32> to vector<32x128xf32>
    %8 = arith.addf %5, %7 : vector<32x128xf32>
    %9 = arith.truncf %8 : vector<32x128xf32> to vector<32x128xbf16>
    %c0_7 = arith.constant 0 : index
    %c0_8 = arith.constant 0 : index
    %10 = vector.load %arg5[%c0_7, %c0_8] : memref<32x128xbf16, #tpu.memory_space<vmem>>, vector<32x128xbf16>
    tpu.vector_store %arg5[%c0_7, %c0_8], %9 {strides = array<i32>} : memref<32x128xbf16, #tpu.memory_space<vmem>>, vector<32x128xbf16>,
    return
  }
  func.func @transform_0(%arg0: i32) -> (i32, i32) {
    %c0_i32 = arith.constant 0 : i32
    %c0_i32_0 = arith.constant 0 : i32
    return %arg0, %c0_i32 : i32, i32
  }
  func.func @transform_1(%arg0: i32) -> (i32, i32) {
    %c0_i32 = arith.constant 0 : i32
    %c0_i32_0 = arith.constant 0 : i32
    %c0_i32_1 = arith.constant 0 : i32
    return %c0_i32, %c0_i32_0 : i32, i32
  }
  func.func @transform_2(%arg0: i32) -> (i32, i32) {
    %c0_i32 = arith.constant 0 : i32
    %c0_i32_0 = arith.constant 0 : i32
    %c0_i32_1 = arith.constant 0 : i32
    return %c0_i32, %c0_i32_0 : i32, i32
  }
  func.func @transform_3(%arg0: i32) -> (i32, i32) {
    %c0_i32 = arith.constant 0 : i32
    %c0_i32_0 = arith.constant 0 : i32
    %c0_i32_1 = arith.constant 0 : i32
    return %c0_i32, %c0_i32_0 : i32, i32
  }
  func.func @transform_4(%arg0: i32) -> (i32, i32) {
    %c0_i32 = arith.constant 0 : i32
    %c0_i32_0 = arith.constant 0 : i32
    return %arg0, %c0_i32 : i32, i32
  }
}

module attributes {stable_mosaic.version = 11 : i64} {
  func.func @_mm_kernel(%arg0: i32, %arg1: memref<32x128xbf16, #tpu.memory_space<vmem>>, %arg2: memref<128x128xbf16, #tpu.memory_space<vmem>>, %arg3: memref<1x128xf32, #tpu.memory_space<vmem>>, %arg4: memref<1x128xf32, #tpu.memory_space<vmem>>, %arg5: memref<32x128xbf16, #tpu.memory_space<vmem>>) attributes {dimension_semantics = [#tpu.dimension_semantics<parallel>], iteration_bounds = array<i64: 1>, scalar_prefetch = 0 : i64, scratch_operands = 0 : i64, tpu.core_type = #tpu.core_type<tc>, window_params = [{transform_indices = @transform_0, window_bounds = array<i64: 32, 128>}, {pipeline_mode = #tpu.pipeline_mode<synchronous>, transform_indices = @transform_1, window_bounds = array<i64: 128, 128>}, {pipeline_mode = #tpu.pipeline_mode<synchronous>, transform_indices = @transform_2, window_bounds = array<i64: 1, 128>}, {pipeline_mode = #tpu.pipeline_mode<synchronous>, transform_indices = @transform_3, window_bounds = array<i64: 1, 128>}, {transform_indices = @transform_4, window_bounds = array<i64: 32, 128>}]} {
    %c0 = arith.constant 0 : index
    %c0_0 = arith.constant 0 : index
    %0 = vector.load %arg1[%c0, %c0_0] : memref<32x128xbf16, #tpu.memory_space<vmem>>, vector<32x128xbf16>
    %c0_1 = arith.constant 0 : index
    %c0_2 = arith.constant 0 : index
    %1 = vector.load %arg2[%c0_1, %c0_2] : memref<128x128xbf16, #tpu.memory_space<vmem>>, vector<128x128xbf16>
    %cst = arith.constant dense<0.000000e+00> : vector<32x128xf32>
    %2 = tpu.matmul %0, %1, %cst {dimension_numbers = #tpu.dot_dimension_numbers<[1], [0], [0], [1], [0, 0, 1, 1], [], []>} : vector<32x128xbf16>, vector<128x128xbf16>, vector<32x128xf32> -> vector<32x128xf32>
    %c0_3 = arith.constant 0 : index
    %c0_4 = arith.constant 0 : index
    %3 = vector.load %arg3[%c0_3, %c0_4] : memref<1x128xf32, #tpu.memory_space<vmem>>, vector<1x128xf32>
    %4 = vector.broadcast %3 : vector<1x128xf32> to vector<32x128xf32>
    %5 = arith.mulf %2, %4 : vector<32x128xf32>
    %c0_5 = arith.constant 0 : index
    %c0_6 = arith.constant 0 : index
    %6 = vector.load %arg4[%c0_5, %c0_6] : memref<1x128xf32, #tpu.memory_space<vmem>>, vector<1x128xf32>
    %7 = vector.broadcast %6 : vector<1x128xf32> to vector<32x128xf32>
    %8 = arith.addf %5, %7 : vector<32x128xf32>
    %cst_7 = arith.constant 3.000000e+00 : f32
    %9 = vector.broadcast %cst_7 : f32 to vector<32x128xf32>
    %10 = arith.addf %8, %9 : vector<32x128xf32>
    %cst_8 = arith.constant 0.000000e+00 : f32
    %cst_9 = arith.constant 6.000000e+00 : f32
    %11 = vector.broadcast %cst_8 : f32 to vector<32x128xf32>
    %12 = arith.maximumf %11, %10 : vector<32x128xf32>
    %13 = vector.broadcast %cst_9 : f32 to vector<32x128xf32>
    %14 = arith.minimumf %13, %12 : vector<32x128xf32>
    %cst_10 = arith.constant 0.166666672 : f32
    %15 = vector.broadcast %cst_10 : f32 to vector<32x128xf32>
    %16 = arith.mulf %14, %15 : vector<32x128xf32>
    %17 = arith.mulf %8, %16 : vector<32x128xf32>
    %18 = arith.truncf %17 : vector<32x128xf32> to vector<32x128xbf16>
    %c0_11 = arith.constant 0 : index
    %c0_12 = arith.constant 0 : index
    %19 = vector.load %arg5[%c0_11, %c0_12] : memref<32x128xbf16, #tpu.memory_space<vmem>>, vector<32x128xbf16>
    tpu.vector_store %arg5[%c0_11, %c0_12], %18 {strides = array<i32>} : memref<32x128xbf16, #tpu.memory_space<vmem>>, vector<32x128xbf16>,
    return
  }
  func.func @transform_0(%arg0: i32) -> (i32, i32) {
    %c0_i32 = arith.constant 0 : i32
    %c0_i32_0 = arith.constant 0 : i32
    return %arg0, %c0_i32 : i32, i32
  }
  func.func @transform_1(%arg0: i32) -> (i32, i32) {
    %c0_i32 = arith.constant 0 : i32
    %c0_i32_0 = arith.constant 0 : i32
    %c0_i32_1 = arith.constant 0 : i32
    return %c0_i32, %c0_i32_0 : i32, i32
  }
  func.func @transform_2(%arg0: i32) -> (i32, i32) {
    %c0_i32 = arith.constant 0 : i32
    %c0_i32_0 = arith.constant 0 : i32
    %c0_i32_1 = arith.constant 0 : i32
    return %c0_i32, %c0_i32_0 : i32, i32
  }
  func.func @transform_3(%arg0: i32) -> (i32, i32) {
    %c0_i32 = arith.constant 0 : i32
    %c0_i32_0 = arith.constant 0 : i32
    %c0_i32_1 = arith.constant 0 : i32
    return %c0_i32, %c0_i32_0 : i32, i32
  }
  func.func @transform_4(%arg0: i32) -> (i32, i32) {
    %c0_i32 = arith.constant 0 : i32
    %c0_i32_0 = arith.constant 0 : i32
    return %arg0, %c0_i32 : i32, i32
  }
}

module attributes {stable_mosaic.version = 11 : i64} {
  func.func @_dw_kernel(%arg0: i32, %arg1: memref<1x1x8x8x128xbf16, #tpu.memory_space<vmem>>, %arg2: memref<25x1x128xbf16, #tpu.memory_space<vmem>>, %arg3: memref<1x128xf32, #tpu.memory_space<vmem>>, %arg4: memref<1x128xf32, #tpu.memory_space<vmem>>, %arg5: memref<1x4x4x128xbf16, #tpu.memory_space<vmem>>) attributes {dimension_semantics = [#tpu.dimension_semantics<parallel>], iteration_bounds = array<i64: 2>, scalar_prefetch = 0 : i64, scratch_operands = 0 : i64, tpu.core_type = #tpu.core_type<tc>, window_params = [{transform_indices = @transform_0, window_bounds = array<i64: 1, 1, 8, 8, 128>}, {pipeline_mode = #tpu.pipeline_mode<synchronous>, transform_indices = @transform_1, window_bounds = array<i64: 25, 1, 128>}, {pipeline_mode = #tpu.pipeline_mode<synchronous>, transform_indices = @transform_2, window_bounds = array<i64: 1, 128>}, {pipeline_mode = #tpu.pipeline_mode<synchronous>, transform_indices = @transform_3, window_bounds = array<i64: 1, 128>}, {transform_indices = @transform_4, window_bounds = array<i64: 1, 4, 4, 128>}]} {
    %cst = arith.constant 0.000000e+00 : f32
    %0 = vector.broadcast %cst : f32 to vector<4x4x128xf32>
    %c0 = arith.constant 0 : index
    %c0_0 = arith.constant 0 : index
    %c0_1 = arith.constant 0 : index
    %c0_2 = arith.constant 0 : index
    %c0_3 = arith.constant 0 : index
    %1 = vector.load %arg1[%c0, %c0_0, %c0_1, %c0_2, %c0_3] : memref<1x1x8x8x128xbf16, #tpu.memory_space<vmem>>, vector<1x1x4x4x128xbf16>
    %2 = vector.shape_cast %1 : vector<1x1x4x4x128xbf16> to vector<4x4x128xbf16>
    %3 = arith.extf %2 : vector<4x4x128xbf16> to vector<4x4x128xf32>
    %c0_4 = arith.constant 0 : index
    %c0_5 = arith.constant 0 : index
    %c0_6 = arith.constant 0 : index
    %4 = vector.load %arg2[%c0_4, %c0_5, %c0_6] : memref<25x1x128xbf16, #tpu.memory_space<vmem>>, vector<1x1x128xbf16>
    %5 = vector.shape_cast %4 : vector<1x1x128xbf16> to vector<1x128xbf16>
    %6 = arith.extf %5 : vector<1x128xbf16> to vector<1x128xf32>
    %7 = vector.shape_cast %6 : vector<1x128xf32> to vector<1x1x128xf32>
    %8 = vector.broadcast %7 : vector<1x1x128xf32> to vector<4x4x128xf32>
    %9 = arith.mulf %3, %8 : vector<4x4x128xf32>
    %10 = arith.addf %0, %9 : vector<4x4x128xf32>
    %c0_7 = arith.constant 0 : index
    %c0_8 = arith.constant 0 : index
    %c0_9 = arith.constant 0 : index
    %c1 = arith.constant 1 : index
    %c0_10 = arith.constant 0 : index
    %11 = vector.load %arg1[%c0_7, %c0_8, %c0_9, %c1, %c0_10] : memref<1x1x8x8x128xbf16, #tpu.memory_space<vmem>>, vector<1x1x4x4x128xbf16>
    %12 = vector.shape_cast %11 : vector<1x1x4x4x128xbf16> to vector<4x4x128xbf16>
    %13 = arith.extf %12 : vector<4x4x128xbf16> to vector<4x4x128xf32>
    %c1_11 = arith.constant 1 : index
    %c0_12 = arith.constant 0 : index
    %c0_13 = arith.constant 0 : index
    %14 = vector.load %arg2[%c1_11, %c0_12, %c0_13] : memref<25x1x128xbf16, #tpu.memory_space<vmem>>, vector<1x1x128xbf16>
    %15 = vector.shape_cast %14 : vector<1x1x128xbf16> to vector<1x128xbf16>
    %16 = arith.extf %15 : vector<1x128xbf16> to vector<1x128xf32>
    %17 = vector.shape_cast %16 : vector<1x128xf32> to vector<1x1x128xf32>
    %18 = vector.broadcast %17 : vector<1x1x128xf32> to vector<4x4x128xf32>
    %19 = arith.mulf %13, %18 : vector<4x4x128xf32>
    %20 = arith.addf %10, %19 : vector<4x4x128xf32>
    %c0_14 = arith.constant 0 : index
    %c0_15 = arith.constant 0 : index
    %c0_16 = arith.constant 0 : index
    %c2 = arith.constant 2 : index
    %c0_17 = arith.constant 0 : index
    %21 = vector.load %arg1[%c0_14, %c0_15, %c0_16, %c2, %c0_17] : memref<1x1x8x8x128xbf16, #tpu.memory_space<vmem>>, vector<1x1x4x4x128xbf16>
    %22 = vector.shape_cast %21 : vector<1x1x4x4x128xbf16> to vector<4x4x128xbf16>
    %23 = arith.extf %22 : vector<4x4x128xbf16> to vector<4x4x128xf32>
    %c2_18 = arith.constant 2 : index
    %c0_19 = arith.constant 0 : index
    %c0_20 = arith.constant 0 : index
    %24 = vector.load %arg2[%c2_18, %c0_19, %c0_20] : memref<25x1x128xbf16, #tpu.memory_space<vmem>>, vector<1x1x128xbf16>
    %25 = vector.shape_cast %24 : vector<1x1x128xbf16> to vector<1x128xbf16>
    %26 = arith.extf %25 : vector<1x128xbf16> to vector<1x128xf32>
    %27 = vector.shape_cast %26 : vector<1x128xf32> to vector<1x1x128xf32>
    %28 = vector.broadcast %27 : vector<1x1x128xf32> to vector<4x4x128xf32>
    %29 = arith.mulf %23, %28 : vector<4x4x128xf32>
    %30 = arith.addf %20, %29 : vector<4x4x128xf32>
    %c0_21 = arith.constant 0 : index
    %c0_22 = arith.constant 0 : index
    %c0_23 = arith.constant 0 : index
    %c3 = arith.constant 3 : index
    %c0_24 = arith.constant 0 : index
    %31 = vector.load %arg1[%c0_21, %c0_22, %c0_23, %c3, %c0_24] : memref<1x1x8x8x128xbf16, #tpu.memory_space<vmem>>, vector<1x1x4x4x128xbf16>
    %32 = vector.shape_cast %31 : vector<1x1x4x4x128xbf16> to vector<4x4x128xbf16>
    %33 = arith.extf %32 : vector<4x4x128xbf16> to vector<4x4x128xf32>
    %c3_25 = arith.constant 3 : index
    %c0_26 = arith.constant 0 : index
    %c0_27 = arith.constant 0 : index
    %34 = vector.load %arg2[%c3_25, %c0_26, %c0_27] : memref<25x1x128xbf16, #tpu.memory_space<vmem>>, vector<1x1x128xbf16>
    %35 = vector.shape_cast %34 : vector<1x1x128xbf16> to vector<1x128xbf16>
    %36 = arith.extf %35 : vector<1x128xbf16> to vector<1x128xf32>
    %37 = vector.shape_cast %36 : vector<1x128xf32> to vector<1x1x128xf32>
    %38 = vector.broadcast %37 : vector<1x1x128xf32> to vector<4x4x128xf32>
    %39 = arith.mulf %33, %38 : vector<4x4x128xf32>
    %40 = arith.addf %30, %39 : vector<4x4x128xf32>
    %c0_28 = arith.constant 0 : index
    %c0_29 = arith.constant 0 : index
    %c0_30 = arith.constant 0 : index
    %c4 = arith.constant 4 : index
    %c0_31 = arith.constant 0 : index
    %41 = vector.load %arg1[%c0_28, %c0_29, %c0_30, %c4, %c0_31] : memref<1x1x8x8x128xbf16, #tpu.memory_space<vmem>>, vector<1x1x4x4x128xbf16>
    %42 = vector.shape_cast %41 : vector<1x1x4x4x128xbf16> to vector<4x4x128xbf16>
    %43 = arith.extf %42 : vector<4x4x128xbf16> to vector<4x4x128xf32>
    %c4_32 = arith.constant 4 : index
    %c0_33 = arith.constant 0 : index
    %c0_34 = arith.constant 0 : index
    %44 = vector.load %arg2[%c4_32, %c0_33, %c0_34] : memref<25x1x128xbf16, #tpu.memory_space<vmem>>, vector<1x1x128xbf16>
    %45 = vector.shape_cast %44 : vector<1x1x128xbf16> to vector<1x128xbf16>
    %46 = arith.extf %45 : vector<1x128xbf16> to vector<1x128xf32>
    %47 = vector.shape_cast %46 : vector<1x128xf32> to vector<1x1x128xf32>
    %48 = vector.broadcast %47 : vector<1x1x128xf32> to vector<4x4x128xf32>
    %49 = arith.mulf %43, %48 : vector<4x4x128xf32>
    %50 = arith.addf %40, %49 : vector<4x4x128xf32>
    %c0_35 = arith.constant 0 : index
    %c0_36 = arith.constant 0 : index
    %c1_37 = arith.constant 1 : index
    %c0_38 = arith.constant 0 : index
    %c0_39 = arith.constant 0 : index
    %51 = vector.load %arg1[%c0_35, %c0_36, %c1_37, %c0_38, %c0_39] : memref<1x1x8x8x128xbf16, #tpu.memory_space<vmem>>, vector<1x1x4x4x128xbf16>
    %52 = vector.shape_cast %51 : vector<1x1x4x4x128xbf16> to vector<4x4x128xbf16>
    %53 = arith.extf %52 : vector<4x4x128xbf16> to vector<4x4x128xf32>
    %c5 = arith.constant 5 : index
    %c0_40 = arith.constant 0 : index
    %c0_41 = arith.constant 0 : index
    %54 = vector.load %arg2[%c5, %c0_40, %c0_41] : memref<25x1x128xbf16, #tpu.memory_space<vmem>>, vector<1x1x128xbf16>
    %55 = vector.shape_cast %54 : vector<1x1x128xbf16> to vector<1x128xbf16>
    %56 = arith.extf %55 : vector<1x128xbf16> to vector<1x128xf32>
    %57 = vector.shape_cast %56 : vector<1x128xf32> to vector<1x1x128xf32>
    %58 = vector.broadcast %57 : vector<1x1x128xf32> to vector<4x4x128xf32>
    %59 = arith.mulf %53, %58 : vector<4x4x128xf32>
    %60 = arith.addf %50, %59 : vector<4x4x128xf32>
    %c0_42 = arith.constant 0 : index
    %c0_43 = arith.constant 0 : index
    %c1_44 = arith.constant 1 : index
    %c1_45 = arith.constant 1 : index
    %c0_46 = arith.constant 0 : index
    %61 = vector.load %arg1[%c0_42, %c0_43, %c1_44, %c1_45, %c0_46] : memref<1x1x8x8x128xbf16, #tpu.memory_space<vmem>>, vector<1x1x4x4x128xbf16>
    %62 = vector.shape_cast %61 : vector<1x1x4x4x128xbf16> to vector<4x4x128xbf16>
    %63 = arith.extf %62 : vector<4x4x128xbf16> to vector<4x4x128xf32>
    %c6 = arith.constant 6 : index
    %c0_47 = arith.constant 0 : index
    %c0_48 = arith.constant 0 : index
    %64 = vector.load %arg2[%c6, %c0_47, %c0_48] : memref<25x1x128xbf16, #tpu.memory_space<vmem>>, vector<1x1x128xbf16>
    %65 = vector.shape_cast %64 : vector<1x1x128xbf16> to vector<1x128xbf16>
    %66 = arith.extf %65 : vector<1x128xbf16> to vector<1x128xf32>
    %67 = vector.shape_cast %66 : vector<1x128xf32> to vector<1x1x128xf32>
    %68 = vector.broadcast %67 : vector<1x1x128xf32> to vector<4x4x128xf32>
    %69 = arith.mulf %63, %68 : vector<4x4x128xf32>
    %70 = arith.addf %60, %69 : vector<4x4x128xf32>
    %c0_49 = arith.constant 0 : index
    %c0_50 = arith.constant 0 : index
    %c1_51 = arith.constant 1 : index
    %c2_52 = arith.constant 2 : index
    %c0_53 = arith.constant 0 : index
    %71 = vector.load %arg1[%c0_49, %c0_50, %c1_51, %c2_52, %c0_53] : memref<1x1x8x8x128xbf16, #tpu.memory_space<vmem>>, vector<1x1x4x4x128xbf16>
    %72 = vector.shape_cast %71 : vector<1x1x4x4x128xbf16> to vector<4x4x128xbf16>
    %73 = arith.extf %72 : vector<4x4x128xbf16> to vector<4x4x128xf32>
    %c7 = arith.constant 7 : index
    %c0_54 = arith.constant 0 : index
    %c0_55 = arith.constant 0 : index
    %74 = vector.load %arg2[%c7, %c0_54, %c0_55] : memref<25x1x128xbf16, #tpu.memory_space<vmem>>, vector<1x1x128xbf16>
    %75 = vector.shape_cast %74 : vector<1x1x128xbf16> to vector<1x128xbf16>
    %76 = arith.extf %75 : vector<1x128xbf16> to vector<1x128xf32>
    %77 = vector.shape_cast %76 : vector<1x128xf32> to vector<1x1x128xf32>
    %78 = vector.broadcast %77 : vector<1x1x128xf32> to vector<4x4x128xf32>
    %79 = arith.mulf %73, %78 : vector<4x4x128xf32>
    %80 = arith.addf %70, %79 : vector<4x4x128xf32>
    %c0_56 = arith.constant 0 : index
    %c0_57 = arith.constant 0 : index
    %c1_58 = arith.constant 1 : index
    %c3_59 = arith.constant 3 : index
    %c0_60 = arith.constant 0 : index
    %81 = vector.load %arg1[%c0_56, %c0_57, %c1_58, %c3_59, %c0_60] : memref<1x1x8x8x128xbf16, #tpu.memory_space<vmem>>, vector<1x1x4x4x128xbf16>
    %82 = vector.shape_cast %81 : vector<1x1x4x4x128xbf16> to vector<4x4x128xbf16>
    %83 = arith.extf %82 : vector<4x4x128xbf16> to vector<4x4x128xf32>
    %c8 = arith.constant 8 : index
    %c0_61 = arith.constant 0 : index
    %c0_62 = arith.constant 0 : index
    %84 = vector.load %arg2[%c8, %c0_61, %c0_62] : memref<25x1x128xbf16, #tpu.memory_space<vmem>>, vector<1x1x128xbf16>
    %85 = vector.shape_cast %84 : vector<1x1x128xbf16> to vector<1x128xbf16>
    %86 = arith.extf %85 : vector<1x128xbf16> to vector<1x128xf32>
    %87 = vector.shape_cast %86 : vector<1x128xf32> to vector<1x1x128xf32>
    %88 = vector.broadcast %87 : vector<1x1x128xf32> to vector<4x4x128xf32>
    %89 = arith.mulf %83, %88 : vector<4x4x128xf32>
    %90 = arith.addf %80, %89 : vector<4x4x128xf32>
    %c0_63 = arith.constant 0 : index
    %c0_64 = arith.constant 0 : index
    %c1_65 = arith.constant 1 : index
    %c4_66 = arith.constant 4 : index
    %c0_67 = arith.constant 0 : index
    %91 = vector.load %arg1[%c0_63, %c0_64, %c1_65, %c4_66, %c0_67] : memref<1x1x8x8x128xbf16, #tpu.memory_space<vmem>>, vector<1x1x4x4x128xbf16>
    %92 = vector.shape_cast %91 : vector<1x1x4x4x128xbf16> to vector<4x4x128xbf16>
    %93 = arith.extf %92 : vector<4x4x128xbf16> to vector<4x4x128xf32>
    %c9 = arith.constant 9 : index
    %c0_68 = arith.constant 0 : index
    %c0_69 = arith.constant 0 : index
    %94 = vector.load %arg2[%c9, %c0_68, %c0_69] : memref<25x1x128xbf16, #tpu.memory_space<vmem>>, vector<1x1x128xbf16>
    %95 = vector.shape_cast %94 : vector<1x1x128xbf16> to vector<1x128xbf16>
    %96 = arith.extf %95 : vector<1x128xbf16> to vector<1x128xf32>
    %97 = vector.shape_cast %96 : vector<1x128xf32> to vector<1x1x128xf32>
    %98 = vector.broadcast %97 : vector<1x1x128xf32> to vector<4x4x128xf32>
    %99 = arith.mulf %93, %98 : vector<4x4x128xf32>
    %100 = arith.addf %90, %99 : vector<4x4x128xf32>
    %c0_70 = arith.constant 0 : index
    %c0_71 = arith.constant 0 : index
    %c2_72 = arith.constant 2 : index
    %c0_73 = arith.constant 0 : index
    %c0_74 = arith.constant 0 : index
    %101 = vector.load %arg1[%c0_70, %c0_71, %c2_72, %c0_73, %c0_74] : memref<1x1x8x8x128xbf16, #tpu.memory_space<vmem>>, vector<1x1x4x4x128xbf16>
    %102 = vector.shape_cast %101 : vector<1x1x4x4x128xbf16> to vector<4x4x128xbf16>
    %103 = arith.extf %102 : vector<4x4x128xbf16> to vector<4x4x128xf32>
    %c10 = arith.constant 10 : index
    %c0_75 = arith.constant 0 : index
    %c0_76 = arith.constant 0 : index
    %104 = vector.load %arg2[%c10, %c0_75, %c0_76] : memref<25x1x128xbf16, #tpu.memory_space<vmem>>, vector<1x1x128xbf16>
    %105 = vector.shape_cast %104 : vector<1x1x128xbf16> to vector<1x128xbf16>
    %106 = arith.extf %105 : vector<1x128xbf16> to vector<1x128xf32>
    %107 = vector.shape_cast %106 : vector<1x128xf32> to vector<1x1x128xf32>
    %108 = vector.broadcast %107 : vector<1x1x128xf32> to vector<4x4x128xf32>
    %109 = arith.mulf %103, %108 : vector<4x4x128xf32>
    %110 = arith.addf %100, %109 : vector<4x4x128xf32>
    %c0_77 = arith.constant 0 : index
    %c0_78 = arith.constant 0 : index
    %c2_79 = arith.constant 2 : index
    %c1_80 = arith.constant 1 : index
    %c0_81 = arith.constant 0 : index
    %111 = vector.load %arg1[%c0_77, %c0_78, %c2_79, %c1_80, %c0_81] : memref<1x1x8x8x128xbf16, #tpu.memory_space<vmem>>, vector<1x1x4x4x128xbf16>
    %112 = vector.shape_cast %111 : vector<1x1x4x4x128xbf16> to vector<4x4x128xbf16>
    %113 = arith.extf %112 : vector<4x4x128xbf16> to vector<4x4x128xf32>
    %c11 = arith.constant 11 : index
    %c0_82 = arith.constant 0 : index
    %c0_83 = arith.constant 0 : index
    %114 = vector.load %arg2[%c11, %c0_82, %c0_83] : memref<25x1x128xbf16, #tpu.memory_space<vmem>>, vector<1x1x128xbf16>
    %115 = vector.shape_cast %114 : vector<1x1x128xbf16> to vector<1x128xbf16>
    %116 = arith.extf %115 : vector<1x128xbf16> to vector<1x128xf32>
    %117 = vector.shape_cast %116 : vector<1x128xf32> to vector<1x1x128xf32>
    %118 = vector.broadcast %117 : vector<1x1x128xf32> to vector<4x4x128xf32>
    %119 = arith.mulf %113, %118 : vector<4x4x128xf32>
    %120 = arith.addf %110, %119 : vector<4x4x128xf32>
    %c0_84 = arith.constant 0 : index
    %c0_85 = arith.constant 0 : index
    %c2_86 = arith.constant 2 : index
    %c2_87 = arith.constant 2 : index
    %c0_88 = arith.constant 0 : index
    %121 = vector.load %arg1[%c0_84, %c0_85, %c2_86, %c2_87, %c0_88] : memref<1x1x8x8x128xbf16, #tpu.memory_space<vmem>>, vector<1x1x4x4x128xbf16>
    %122 = vector.shape_cast %121 : vector<1x1x4x4x128xbf16> to vector<4x4x128xbf16>
    %123 = arith.extf %122 : vector<4x4x128xbf16> to vector<4x4x128xf32>
    %c12 = arith.constant 12 : index
    %c0_89 = arith.constant 0 : index
    %c0_90 = arith.constant 0 : index
    %124 = vector.load %arg2[%c12, %c0_89, %c0_90] : memref<25x1x128xbf16, #tpu.memory_space<vmem>>, vector<1x1x128xbf16>
    %125 = vector.shape_cast %124 : vector<1x1x128xbf16> to vector<1x128xbf16>
    %126 = arith.extf %125 : vector<1x128xbf16> to vector<1x128xf32>
    %127 = vector.shape_cast %126 : vector<1x128xf32> to vector<1x1x128xf32>
    %128 = vector.broadcast %127 : vector<1x1x128xf32> to vector<4x4x128xf32>
    %129 = arith.mulf %123, %128 : vector<4x4x128xf32>
    %130 = arith.addf %120, %129 : vector<4x4x128xf32>
    %c0_91 = arith.constant 0 : index
    %c0_92 = arith.constant 0 : index
    %c2_93 = arith.constant 2 : index
    %c3_94 = arith.constant 3 : index
    %c0_95 = arith.constant 0 : index
    %131 = vector.load %arg1[%c0_91, %c0_92, %c2_93, %c3_94, %c0_95] : memref<1x1x8x8x128xbf16, #tpu.memory_space<vmem>>, vector<1x1x4x4x128xbf16>
    %132 = vector.shape_cast %131 : vector<1x1x4x4x128xbf16> to vector<4x4x128xbf16>
    %133 = arith.extf %132 : vector<4x4x128xbf16> to vector<4x4x128xf32>
    %c13 = arith.constant 13 : index
    %c0_96 = arith.constant 0 : index
    %c0_97 = arith.constant 0 : index
    %134 = vector.load %arg2[%c13, %c0_96, %c0_97] : memref<25x1x128xbf16, #tpu.memory_space<vmem>>, vector<1x1x128xbf16>
    %135 = vector.shape_cast %134 : vector<1x1x128xbf16> to vector<1x128xbf16>
    %136 = arith.extf %135 : vector<1x128xbf16> to vector<1x128xf32>
    %137 = vector.shape_cast %136 : vector<1x128xf32> to vector<1x1x128xf32>
    %138 = vector.broadcast %137 : vector<1x1x128xf32> to vector<4x4x128xf32>
    %139 = arith.mulf %133, %138 : vector<4x4x128xf32>
    %140 = arith.addf %130, %139 : vector<4x4x128xf32>
    %c0_98 = arith.constant 0 : index
    %c0_99 = arith.constant 0 : index
    %c2_100 = arith.constant 2 : index
    %c4_101 = arith.constant 4 : index
    %c0_102 = arith.constant 0 : index
    %141 = vector.load %arg1[%c0_98, %c0_99, %c2_100, %c4_101, %c0_102] : memref<1x1x8x8x128xbf16, #tpu.memory_space<vmem>>, vector<1x1x4x4x128xbf16>
    %142 = vector.shape_cast %141 : vector<1x1x4x4x128xbf16> to vector<4x4x128xbf16>
    %143 = arith.extf %142 : vector<4x4x128xbf16> to vector<4x4x128xf32>
    %c14 = arith.constant 14 : index
    %c0_103 = arith.constant 0 : index
    %c0_104 = arith.constant 0 : index
    %144 = vector.load %arg2[%c14, %c0_103, %c0_104] : memref<25x1x128xbf16, #tpu.memory_space<vmem>>, vector<1x1x128xbf16>
    %145 = vector.shape_cast %144 : vector<1x1x128xbf16> to vector<1x128xbf16>
    %146 = arith.extf %145 : vector<1x128xbf16> to vector<1x128xf32>
    %147 = vector.shape_cast %146 : vector<1x128xf32> to vector<1x1x128xf32>
    %148 = vector.broadcast %147 : vector<1x1x128xf32> to vector<4x4x128xf32>
    %149 = arith.mulf %143, %148 : vector<4x4x128xf32>
    %150 = arith.addf %140, %149 : vector<4x4x128xf32>
    %c0_105 = arith.constant 0 : index
    %c0_106 = arith.constant 0 : index
    %c3_107 = arith.constant 3 : index
    %c0_108 = arith.constant 0 : index
    %c0_109 = arith.constant 0 : index
    %151 = vector.load %arg1[%c0_105, %c0_106, %c3_107, %c0_108, %c0_109] : memref<1x1x8x8x128xbf16, #tpu.memory_space<vmem>>, vector<1x1x4x4x128xbf16>
    %152 = vector.shape_cast %151 : vector<1x1x4x4x128xbf16> to vector<4x4x128xbf16>
    %153 = arith.extf %152 : vector<4x4x128xbf16> to vector<4x4x128xf32>
    %c15 = arith.constant 15 : index
    %c0_110 = arith.constant 0 : index
    %c0_111 = arith.constant 0 : index
    %154 = vector.load %arg2[%c15, %c0_110, %c0_111] : memref<25x1x128xbf16, #tpu.memory_space<vmem>>, vector<1x1x128xbf16>
    %155 = vector.shape_cast %154 : vector<1x1x128xbf16> to vector<1x128xbf16>
    %156 = arith.extf %155 : vector<1x128xbf16> to vector<1x128xf32>
    %157 = vector.shape_cast %156 : vector<1x128xf32> to vector<1x1x128xf32>
    %158 = vector.broadcast %157 : vector<1x1x128xf32> to vector<4x4x128xf32>
    %159 = arith.mulf %153, %158 : vector<4x4x128xf32>
    %160 = arith.addf %150, %159 : vector<4x4x128xf32>
    %c0_112 = arith.constant 0 : index
    %c0_113 = arith.constant 0 : index
    %c3_114 = arith.constant 3 : index
    %c1_115 = arith.constant 1 : index
    %c0_116 = arith.constant 0 : index
    %161 = vector.load %arg1[%c0_112, %c0_113, %c3_114, %c1_115, %c0_116] : memref<1x1x8x8x128xbf16, #tpu.memory_space<vmem>>, vector<1x1x4x4x128xbf16>
    %162 = vector.shape_cast %161 : vector<1x1x4x4x128xbf16> to vector<4x4x128xbf16>
    %163 = arith.extf %162 : vector<4x4x128xbf16> to vector<4x4x128xf32>
    %c16 = arith.constant 16 : index
    %c0_117 = arith.constant 0 : index
    %c0_118 = arith.constant 0 : index
    %164 = vector.load %arg2[%c16, %c0_117, %c0_118] : memref<25x1x128xbf16, #tpu.memory_space<vmem>>, vector<1x1x128xbf16>
    %165 = vector.shape_cast %164 : vector<1x1x128xbf16> to vector<1x128xbf16>
    %166 = arith.extf %165 : vector<1x128xbf16> to vector<1x128xf32>
    %167 = vector.shape_cast %166 : vector<1x128xf32> to vector<1x1x128xf32>
    %168 = vector.broadcast %167 : vector<1x1x128xf32> to vector<4x4x128xf32>
    %169 = arith.mulf %163, %168 : vector<4x4x128xf32>
    %170 = arith.addf %160, %169 : vector<4x4x128xf32>
    %c0_119 = arith.constant 0 : index
    %c0_120 = arith.constant 0 : index
    %c3_121 = arith.constant 3 : index
    %c2_122 = arith.constant 2 : index
    %c0_123 = arith.constant 0 : index
    %171 = vector.load %arg1[%c0_119, %c0_120, %c3_121, %c2_122, %c0_123] : memref<1x1x8x8x128xbf16, #tpu.memory_space<vmem>>, vector<1x1x4x4x128xbf16>
    %172 = vector.shape_cast %171 : vector<1x1x4x4x128xbf16> to vector<4x4x128xbf16>
    %173 = arith.extf %172 : vector<4x4x128xbf16> to vector<4x4x128xf32>
    %c17 = arith.constant 17 : index
    %c0_124 = arith.constant 0 : index
    %c0_125 = arith.constant 0 : index
    %174 = vector.load %arg2[%c17, %c0_124, %c0_125] : memref<25x1x128xbf16, #tpu.memory_space<vmem>>, vector<1x1x128xbf16>
    %175 = vector.shape_cast %174 : vector<1x1x128xbf16> to vector<1x128xbf16>
    %176 = arith.extf %175 : vector<1x128xbf16> to vector<1x128xf32>
    %177 = vector.shape_cast %176 : vector<1x128xf32> to vector<1x1x128xf32>
    %178 = vector.broadcast %177 : vector<1x1x128xf32> to vector<4x4x128xf32>
    %179 = arith.mulf %173, %178 : vector<4x4x128xf32>
    %180 = arith.addf %170, %179 : vector<4x4x128xf32>
    %c0_126 = arith.constant 0 : index
    %c0_127 = arith.constant 0 : index
    %c3_128 = arith.constant 3 : index
    %c3_129 = arith.constant 3 : index
    %c0_130 = arith.constant 0 : index
    %181 = vector.load %arg1[%c0_126, %c0_127, %c3_128, %c3_129, %c0_130] : memref<1x1x8x8x128xbf16, #tpu.memory_space<vmem>>, vector<1x1x4x4x128xbf16>
    %182 = vector.shape_cast %181 : vector<1x1x4x4x128xbf16> to vector<4x4x128xbf16>
    %183 = arith.extf %182 : vector<4x4x128xbf16> to vector<4x4x128xf32>
    %c18 = arith.constant 18 : index
    %c0_131 = arith.constant 0 : index
    %c0_132 = arith.constant 0 : index
    %184 = vector.load %arg2[%c18, %c0_131, %c0_132] : memref<25x1x128xbf16, #tpu.memory_space<vmem>>, vector<1x1x128xbf16>
    %185 = vector.shape_cast %184 : vector<1x1x128xbf16> to vector<1x128xbf16>
    %186 = arith.extf %185 : vector<1x128xbf16> to vector<1x128xf32>
    %187 = vector.shape_cast %186 : vector<1x128xf32> to vector<1x1x128xf32>
    %188 = vector.broadcast %187 : vector<1x1x128xf32> to vector<4x4x128xf32>
    %189 = arith.mulf %183, %188 : vector<4x4x128xf32>
    %190 = arith.addf %180, %189 : vector<4x4x128xf32>
    %c0_133 = arith.constant 0 : index
    %c0_134 = arith.constant 0 : index
    %c3_135 = arith.constant 3 : index
    %c4_136 = arith.constant 4 : index
    %c0_137 = arith.constant 0 : index
    %191 = vector.load %arg1[%c0_133, %c0_134, %c3_135, %c4_136, %c0_137] : memref<1x1x8x8x128xbf16, #tpu.memory_space<vmem>>, vector<1x1x4x4x128xbf16>
    %192 = vector.shape_cast %191 : vector<1x1x4x4x128xbf16> to vector<4x4x128xbf16>
    %193 = arith.extf %192 : vector<4x4x128xbf16> to vector<4x4x128xf32>
    %c19 = arith.constant 19 : index
    %c0_138 = arith.constant 0 : index
    %c0_139 = arith.constant 0 : index
    %194 = vector.load %arg2[%c19, %c0_138, %c0_139] : memref<25x1x128xbf16, #tpu.memory_space<vmem>>, vector<1x1x128xbf16>
    %195 = vector.shape_cast %194 : vector<1x1x128xbf16> to vector<1x128xbf16>
    %196 = arith.extf %195 : vector<1x128xbf16> to vector<1x128xf32>
    %197 = vector.shape_cast %196 : vector<1x128xf32> to vector<1x1x128xf32>
    %198 = vector.broadcast %197 : vector<1x1x128xf32> to vector<4x4x128xf32>
    %199 = arith.mulf %193, %198 : vector<4x4x128xf32>
    %200 = arith.addf %190, %199 : vector<4x4x128xf32>
    %c0_140 = arith.constant 0 : index
    %c0_141 = arith.constant 0 : index
    %c4_142 = arith.constant 4 : index
    %c0_143 = arith.constant 0 : index
    %c0_144 = arith.constant 0 : index
    %201 = vector.load %arg1[%c0_140, %c0_141, %c4_142, %c0_143, %c0_144] : memref<1x1x8x8x128xbf16, #tpu.memory_space<vmem>>, vector<1x1x4x4x128xbf16>
    %202 = vector.shape_cast %201 : vector<1x1x4x4x128xbf16> to vector<4x4x128xbf16>
    %203 = arith.extf %202 : vector<4x4x128xbf16> to vector<4x4x128xf32>
    %c20 = arith.constant 20 : index
    %c0_145 = arith.constant 0 : index
    %c0_146 = arith.constant 0 : index
    %204 = vector.load %arg2[%c20, %c0_145, %c0_146] : memref<25x1x128xbf16, #tpu.memory_space<vmem>>, vector<1x1x128xbf16>
    %205 = vector.shape_cast %204 : vector<1x1x128xbf16> to vector<1x128xbf16>
    %206 = arith.extf %205 : vector<1x128xbf16> to vector<1x128xf32>
    %207 = vector.shape_cast %206 : vector<1x128xf32> to vector<1x1x128xf32>
    %208 = vector.broadcast %207 : vector<1x1x128xf32> to vector<4x4x128xf32>
    %209 = arith.mulf %203, %208 : vector<4x4x128xf32>
    %210 = arith.addf %200, %209 : vector<4x4x128xf32>
    %c0_147 = arith.constant 0 : index
    %c0_148 = arith.constant 0 : index
    %c4_149 = arith.constant 4 : index
    %c1_150 = arith.constant 1 : index
    %c0_151 = arith.constant 0 : index
    %211 = vector.load %arg1[%c0_147, %c0_148, %c4_149, %c1_150, %c0_151] : memref<1x1x8x8x128xbf16, #tpu.memory_space<vmem>>, vector<1x1x4x4x128xbf16>
    %212 = vector.shape_cast %211 : vector<1x1x4x4x128xbf16> to vector<4x4x128xbf16>
    %213 = arith.extf %212 : vector<4x4x128xbf16> to vector<4x4x128xf32>
    %c21 = arith.constant 21 : index
    %c0_152 = arith.constant 0 : index
    %c0_153 = arith.constant 0 : index
    %214 = vector.load %arg2[%c21, %c0_152, %c0_153] : memref<25x1x128xbf16, #tpu.memory_space<vmem>>, vector<1x1x128xbf16>
    %215 = vector.shape_cast %214 : vector<1x1x128xbf16> to vector<1x128xbf16>
    %216 = arith.extf %215 : vector<1x128xbf16> to vector<1x128xf32>
    %217 = vector.shape_cast %216 : vector<1x128xf32> to vector<1x1x128xf32>
    %218 = vector.broadcast %217 : vector<1x1x128xf32> to vector<4x4x128xf32>
    %219 = arith.mulf %213, %218 : vector<4x4x128xf32>
    %220 = arith.addf %210, %219 : vector<4x4x128xf32>
    %c0_154 = arith.constant 0 : index
    %c0_155 = arith.constant 0 : index
    %c4_156 = arith.constant 4 : index
    %c2_157 = arith.constant 2 : index
    %c0_158 = arith.constant 0 : index
    %221 = vector.load %arg1[%c0_154, %c0_155, %c4_156, %c2_157, %c0_158] : memref<1x1x8x8x128xbf16, #tpu.memory_space<vmem>>, vector<1x1x4x4x128xbf16>
    %222 = vector.shape_cast %221 : vector<1x1x4x4x128xbf16> to vector<4x4x128xbf16>
    %223 = arith.extf %222 : vector<4x4x128xbf16> to vector<4x4x128xf32>
    %c22 = arith.constant 22 : index
    %c0_159 = arith.constant 0 : index
    %c0_160 = arith.constant 0 : index
    %224 = vector.load %arg2[%c22, %c0_159, %c0_160] : memref<25x1x128xbf16, #tpu.memory_space<vmem>>, vector<1x1x128xbf16>
    %225 = vector.shape_cast %224 : vector<1x1x128xbf16> to vector<1x128xbf16>
    %226 = arith.extf %225 : vector<1x128xbf16> to vector<1x128xf32>
    %227 = vector.shape_cast %226 : vector<1x128xf32> to vector<1x1x128xf32>
    %228 = vector.broadcast %227 : vector<1x1x128xf32> to vector<4x4x128xf32>
    %229 = arith.mulf %223, %228 : vector<4x4x128xf32>
    %230 = arith.addf %220, %229 : vector<4x4x128xf32>
    %c0_161 = arith.constant 0 : index
    %c0_162 = arith.constant 0 : index
    %c4_163 = arith.constant 4 : index
    %c3_164 = arith.constant 3 : index
    %c0_165 = arith.constant 0 : index
    %231 = vector.load %arg1[%c0_161, %c0_162, %c4_163, %c3_164, %c0_165] : memref<1x1x8x8x128xbf16, #tpu.memory_space<vmem>>, vector<1x1x4x4x128xbf16>
    %232 = vector.shape_cast %231 : vector<1x1x4x4x128xbf16> to vector<4x4x128xbf16>
    %233 = arith.extf %232 : vector<4x4x128xbf16> to vector<4x4x128xf32>
    %c23 = arith.constant 23 : index
    %c0_166 = arith.constant 0 : index
    %c0_167 = arith.constant 0 : index
    %234 = vector.load %arg2[%c23, %c0_166, %c0_167] : memref<25x1x128xbf16, #tpu.memory_space<vmem>>, vector<1x1x128xbf16>
    %235 = vector.shape_cast %234 : vector<1x1x128xbf16> to vector<1x128xbf16>
    %236 = arith.extf %235 : vector<1x128xbf16> to vector<1x128xf32>
    %237 = vector.shape_cast %236 : vector<1x128xf32> to vector<1x1x128xf32>
    %238 = vector.broadcast %237 : vector<1x1x128xf32> to vector<4x4x128xf32>
    %239 = arith.mulf %233, %238 : vector<4x4x128xf32>
    %240 = arith.addf %230, %239 : vector<4x4x128xf32>
    %c0_168 = arith.constant 0 : index
    %c0_169 = arith.constant 0 : index
    %c4_170 = arith.constant 4 : index
    %c4_171 = arith.constant 4 : index
    %c0_172 = arith.constant 0 : index
    %241 = vector.load %arg1[%c0_168, %c0_169, %c4_170, %c4_171, %c0_172] : memref<1x1x8x8x128xbf16, #tpu.memory_space<vmem>>, vector<1x1x4x4x128xbf16>
    %242 = vector.shape_cast %241 : vector<1x1x4x4x128xbf16> to vector<4x4x128xbf16>
    %243 = arith.extf %242 : vector<4x4x128xbf16> to vector<4x4x128xf32>
    %c24 = arith.constant 24 : index
    %c0_173 = arith.constant 0 : index
    %c0_174 = arith.constant 0 : index
    %244 = vector.load %arg2[%c24, %c0_173, %c0_174] : memref<25x1x128xbf16, #tpu.memory_space<vmem>>, vector<1x1x128xbf16>
    %245 = vector.shape_cast %244 : vector<1x1x128xbf16> to vector<1x128xbf16>
    %246 = arith.extf %245 : vector<1x128xbf16> to vector<1x128xf32>
    %247 = vector.shape_cast %246 : vector<1x128xf32> to vector<1x1x128xf32>
    %248 = vector.broadcast %247 : vector<1x1x128xf32> to vector<4x4x128xf32>
    %249 = arith.mulf %243, %248 : vector<4x4x128xf32>
    %250 = arith.addf %240, %249 : vector<4x4x128xf32>
    %c0_175 = arith.constant 0 : index
    %c0_176 = arith.constant 0 : index
    %251 = vector.load %arg3[%c0_175, %c0_176] : memref<1x128xf32, #tpu.memory_space<vmem>>, vector<1x128xf32>
    %252 = vector.shape_cast %251 : vector<1x128xf32> to vector<1x1x128xf32>
    %253 = vector.broadcast %252 : vector<1x1x128xf32> to vector<4x4x128xf32>
    %254 = arith.mulf %250, %253 : vector<4x4x128xf32>
    %c0_177 = arith.constant 0 : index
    %c0_178 = arith.constant 0 : index
    %255 = vector.load %arg4[%c0_177, %c0_178] : memref<1x128xf32, #tpu.memory_space<vmem>>, vector<1x128xf32>
    %256 = vector.shape_cast %255 : vector<1x128xf32> to vector<1x1x128xf32>
    %257 = vector.broadcast %256 : vector<1x1x128xf32> to vector<4x4x128xf32>
    %258 = arith.addf %254, %257 : vector<4x4x128xf32>
    %cst_179 = arith.constant 3.000000e+00 : f32
    %259 = vector.broadcast %cst_179 : f32 to vector<4x4x128xf32>
    %260 = arith.addf %258, %259 : vector<4x4x128xf32>
    %cst_180 = arith.constant 0.000000e+00 : f32
    %cst_181 = arith.constant 6.000000e+00 : f32
    %261 = vector.broadcast %cst_180 : f32 to vector<4x4x128xf32>
    %262 = arith.maximumf %261, %260 : vector<4x4x128xf32>
    %263 = vector.broadcast %cst_181 : f32 to vector<4x4x128xf32>
    %264 = arith.minimumf %263, %262 : vector<4x4x128xf32>
    %cst_182 = arith.constant 0.166666672 : f32
    %265 = vector.broadcast %cst_182 : f32 to vector<4x4x128xf32>
    %266 = arith.mulf %264, %265 : vector<4x4x128xf32>
    %267 = arith.mulf %258, %266 : vector<4x4x128xf32>
    %268 = arith.truncf %267 : vector<4x4x128xf32> to vector<4x4x128xbf16>
    %c0_183 = arith.constant 0 : index
    %c0_184 = arith.constant 0 : index
    %c0_185 = arith.constant 0 : index
    %c0_186 = arith.constant 0 : index
    %269 = vector.load %arg5[%c0_183, %c0_184, %c0_185, %c0_186] : memref<1x4x4x128xbf16, #tpu.memory_space<vmem>>, vector<1x4x4x128xbf16>
    %270 = vector.shape_cast %269 : vector<1x4x4x128xbf16> to vector<4x4x128xbf16>
    %271 = vector.shape_cast %268 : vector<4x4x128xbf16> to vector<1x4x4x128xbf16>
    tpu.vector_store %arg5[%c0_183, %c0_184, %c0_185, %c0_186], %271 {strides = array<i32>} : memref<1x4x4x128xbf16, #tpu.memory_space<vmem>>, vector<1x4x4x128xbf16>,
    return
  }
  func.func @transform_0(%arg0: i32) -> (i32, i32, i32, i32, i32) {
    %c0_i32 = arith.constant 0 : i32
    %c0_i32_0 = arith.constant 0 : i32
    %c0_i32_1 = arith.constant 0 : i32
    %c0_i32_2 = arith.constant 0 : i32
    %c0_i32_3 = arith.constant 0 : i32
    return %c0_i32, %arg0, %c0_i32_0, %c0_i32_1, %c0_i32_2 : i32, i32, i32, i32, i32
  }
  func.func @transform_1(%arg0: i32) -> (i32, i32, i32) {
    %c0_i32 = arith.constant 0 : i32
    %c0_i32_0 = arith.constant 0 : i32
    %c0_i32_1 = arith.constant 0 : i32
    %c0_i32_2 = arith.constant 0 : i32
    return %c0_i32, %c0_i32_0, %c0_i32_1 : i32, i32, i32
  }
  func.func @transform_2(%arg0: i32) -> (i32, i32) {
    %c0_i32 = arith.constant 0 : i32
    %c0_i32_0 = arith.constant 0 : i32
    %c0_i32_1 = arith.constant 0 : i32
    return %c0_i32, %c0_i32_0 : i32, i32
  }
  func.func @transform_3(%arg0: i32) -> (i32, i32) {
    %c0_i32 = arith.constant 0 : i32
    %c0_i32_0 = arith.constant 0 : i32
    %c0_i32_1 = arith.constant 0 : i32
    return %c0_i32, %c0_i32_0 : i32, i32
  }
  func.func @transform_4(%arg0: i32) -> (i32, i32, i32, i32) {
    %c0_i32 = arith.constant 0 : i32
    %c0_i32_0 = arith.constant 0 : i32
    %c0_i32_1 = arith.constant 0 : i32
    %c0_i32_2 = arith.constant 0 : i32
    return %arg0, %c0_i32, %c0_i32_0, %c0_i32_1 : i32, i32, i32, i32
  }
}

module attributes {stable_mosaic.version = 11 : i64} {
  func.func @_se_kernel(%arg0: i32, %arg1: memref<1x16x128xbf16, #tpu.memory_space<vmem>>, %arg2: memref<128x128xbf16, #tpu.memory_space<vmem>>, %arg3: memref<1x128xf32, #tpu.memory_space<vmem>>, %arg4: memref<128x128xbf16, #tpu.memory_space<vmem>>, %arg5: memref<1x128xf32, #tpu.memory_space<vmem>>, %arg6: memref<1x16x128xbf16, #tpu.memory_space<vmem>>) attributes {dimension_semantics = [#tpu.dimension_semantics<parallel>], iteration_bounds = array<i64: 2>, scalar_prefetch = 0 : i64, scratch_operands = 0 : i64, tpu.core_type = #tpu.core_type<tc>, window_params = [{transform_indices = @transform_0, window_bounds = array<i64: 1, 16, 128>}, {pipeline_mode = #tpu.pipeline_mode<synchronous>, transform_indices = @transform_1, window_bounds = array<i64: 128, 128>}, {pipeline_mode = #tpu.pipeline_mode<synchronous>, transform_indices = @transform_2, window_bounds = array<i64: 1, 128>}, {pipeline_mode = #tpu.pipeline_mode<synchronous>, transform_indices = @transform_3, window_bounds = array<i64: 128, 128>}, {pipeline_mode = #tpu.pipeline_mode<synchronous>, transform_indices = @transform_4, window_bounds = array<i64: 1, 128>}, {transform_indices = @transform_5, window_bounds = array<i64: 1, 16, 128>}]} {
    %c0 = arith.constant 0 : index
    %c0_0 = arith.constant 0 : index
    %c0_1 = arith.constant 0 : index
    %0 = vector.load %arg1[%c0, %c0_0, %c0_1] : memref<1x16x128xbf16, #tpu.memory_space<vmem>>, vector<1x16x128xbf16>
    %1 = vector.shape_cast %0 : vector<1x16x128xbf16> to vector<16x128xbf16>
    %2 = arith.extf %1 : vector<16x128xbf16> to vector<16x128xf32>
    %cst = arith.constant dense<0.000000e+00> : vector<128xf32>
    %3 = vector.multi_reduction <add>, %2, %cst [0] : vector<16x128xf32> to vector<128xf32>
    %4 = vector.shape_cast %3 : vector<128xf32> to vector<1x128xf32>
    %cst_2 = arith.constant 1.600000e+01 : f32
    %5 = vector.broadcast %cst_2 : f32 to vector<1x128xf32>
    %6 = arith.divf %4, %5 : vector<1x128xf32>
    %7 = arith.truncf %6 : vector<1x128xf32> to vector<1x128xbf16>
    %c0_3 = arith.constant 0 : index
    %c0_4 = arith.constant 0 : index
    %8 = vector.load %arg2[%c0_3, %c0_4] : memref<128x128xbf16, #tpu.memory_space<vmem>>, vector<128x128xbf16>
    %cst_5 = arith.constant dense<0.000000e+00> : vector<1x128xf32>
    %9 = tpu.matmul %7, %8, %cst_5 {dimension_numbers = #tpu.dot_dimension_numbers<[1], [0], [0], [1], [0, 0, 1, 1], [], []>} : vector<1x128xbf16>, vector<128x128xbf16>, vector<1x128xf32> -> vector<1x128xf32>
    %c0_6 = arith.constant 0 : index
    %c0_7 = arith.constant 0 : index
    %10 = vector.load %arg3[%c0_6, %c0_7] : memref<1x128xf32, #tpu.memory_space<vmem>>, vector<1x128xf32>
    %11 = arith.addf %9, %10 : vector<1x128xf32>
    %cst_8 = arith.constant 0.000000e+00 : f32
    %12 = vector.broadcast %cst_8 : f32 to vector<1x128xf32>
    %13 = arith.maximumf %11, %12 : vector<1x128xf32>
    %14 = arith.truncf %13 : vector<1x128xf32> to vector<1x128xbf16>
    %c0_9 = arith.constant 0 : index
    %c0_10 = arith.constant 0 : index
    %15 = vector.load %arg4[%c0_9, %c0_10] : memref<128x128xbf16, #tpu.memory_space<vmem>>, vector<128x128xbf16>
    %cst_11 = arith.constant dense<0.000000e+00> : vector<1x128xf32>
    %16 = tpu.matmul %14, %15, %cst_11 {dimension_numbers = #tpu.dot_dimension_numbers<[1], [0], [0], [1], [0, 0, 1, 1], [], []>} : vector<1x128xbf16>, vector<128x128xbf16>, vector<1x128xf32> -> vector<1x128xf32>
    %c0_12 = arith.constant 0 : index
    %c0_13 = arith.constant 0 : index
    %17 = vector.load %arg5[%c0_12, %c0_13] : memref<1x128xf32, #tpu.memory_space<vmem>>, vector<1x128xf32>
    %18 = arith.addf %16, %17 : vector<1x128xf32>
    %cst_14 = arith.constant 3.000000e+00 : f32
    %19 = vector.broadcast %cst_14 : f32 to vector<1x128xf32>
    %20 = arith.addf %18, %19 : vector<1x128xf32>
    %cst_15 = arith.constant 0.000000e+00 : f32
    %cst_16 = arith.constant 6.000000e+00 : f32
    %21 = vector.broadcast %cst_15 : f32 to vector<1x128xf32>
    %22 = arith.maximumf %21, %20 : vector<1x128xf32>
    %23 = vector.broadcast %cst_16 : f32 to vector<1x128xf32>
    %24 = arith.minimumf %23, %22 : vector<1x128xf32>
    %cst_17 = arith.constant 0.166666672 : f32
    %25 = vector.broadcast %cst_17 : f32 to vector<1x128xf32>
    %26 = arith.mulf %24, %25 : vector<1x128xf32>
    %27 = vector.broadcast %26 : vector<1x128xf32> to vector<16x128xf32>
    %28 = arith.mulf %2, %27 : vector<16x128xf32>
    %29 = arith.truncf %28 : vector<16x128xf32> to vector<16x128xbf16>
    %c0_18 = arith.constant 0 : index
    %c0_19 = arith.constant 0 : index
    %c0_20 = arith.constant 0 : index
    %30 = vector.load %arg6[%c0_18, %c0_19, %c0_20] : memref<1x16x128xbf16, #tpu.memory_space<vmem>>, vector<1x16x128xbf16>
    %31 = vector.shape_cast %30 : vector<1x16x128xbf16> to vector<16x128xbf16>
    %32 = vector.shape_cast %29 : vector<16x128xbf16> to vector<1x16x128xbf16>
    tpu.vector_store %arg6[%c0_18, %c0_19, %c0_20], %32 {strides = array<i32>} : memref<1x16x128xbf16, #tpu.memory_space<vmem>>, vector<1x16x128xbf16>,
    return
  }
  func.func @transform_0(%arg0: i32) -> (i32, i32, i32) {
    %c0_i32 = arith.constant 0 : i32
    %c0_i32_0 = arith.constant 0 : i32
    %c0_i32_1 = arith.constant 0 : i32
    return %arg0, %c0_i32, %c0_i32_0 : i32, i32, i32
  }
  func.func @transform_1(%arg0: i32) -> (i32, i32) {
    %c0_i32 = arith.constant 0 : i32
    %c0_i32_0 = arith.constant 0 : i32
    %c0_i32_1 = arith.constant 0 : i32
    return %c0_i32, %c0_i32_0 : i32, i32
  }
  func.func @transform_2(%arg0: i32) -> (i32, i32) {
    %c0_i32 = arith.constant 0 : i32
    %c0_i32_0 = arith.constant 0 : i32
    %c0_i32_1 = arith.constant 0 : i32
    return %c0_i32, %c0_i32_0 : i32, i32
  }
  func.func @transform_3(%arg0: i32) -> (i32, i32) {
    %c0_i32 = arith.constant 0 : i32
    %c0_i32_0 = arith.constant 0 : i32
    %c0_i32_1 = arith.constant 0 : i32
    return %c0_i32, %c0_i32_0 : i32, i32
  }
  func.func @transform_4(%arg0: i32) -> (i32, i32) {
    %c0_i32 = arith.constant 0 : i32
    %c0_i32_0 = arith.constant 0 : i32
    %c0_i32_1 = arith.constant 0 : i32
    return %c0_i32, %c0_i32_0 : i32, i32
  }
  func.func @transform_5(%arg0: i32) -> (i32, i32, i32) {
    %c0_i32 = arith.constant 0 : i32
    %c0_i32_0 = arith.constant 0 : i32
    %c0_i32_1 = arith.constant 0 : i32
    return %arg0, %c0_i32, %c0_i32_0 : i32, i32, i32
  }
}

module attributes {stable_mosaic.version = 11 : i64} {
  func.func @_mm_kernel(%arg0: i32, %arg1: memref<32x128xbf16, #tpu.memory_space<vmem>>, %arg2: memref<128x128xbf16, #tpu.memory_space<vmem>>, %arg3: memref<1x128xf32, #tpu.memory_space<vmem>>, %arg4: memref<1x128xf32, #tpu.memory_space<vmem>>, %arg5: memref<32x128xbf16, #tpu.memory_space<vmem>>, %arg6: memref<32x128xbf16, #tpu.memory_space<vmem>>) attributes {dimension_semantics = [#tpu.dimension_semantics<parallel>], iteration_bounds = array<i64: 1>, scalar_prefetch = 0 : i64, scratch_operands = 0 : i64, tpu.core_type = #tpu.core_type<tc>, window_params = [{transform_indices = @transform_0, window_bounds = array<i64: 32, 128>}, {pipeline_mode = #tpu.pipeline_mode<synchronous>, transform_indices = @transform_1, window_bounds = array<i64: 128, 128>}, {pipeline_mode = #tpu.pipeline_mode<synchronous>, transform_indices = @transform_2, window_bounds = array<i64: 1, 128>}, {pipeline_mode = #tpu.pipeline_mode<synchronous>, transform_indices = @transform_3, window_bounds = array<i64: 1, 128>}, {transform_indices = @transform_4, window_bounds = array<i64: 32, 128>}, {transform_indices = @transform_5, window_bounds = array<i64: 32, 128>}]} {
    %c0 = arith.constant 0 : index
    %c0_0 = arith.constant 0 : index
    %0 = vector.load %arg1[%c0, %c0_0] : memref<32x128xbf16, #tpu.memory_space<vmem>>, vector<32x128xbf16>
    %c0_1 = arith.constant 0 : index
    %c0_2 = arith.constant 0 : index
    %1 = vector.load %arg2[%c0_1, %c0_2] : memref<128x128xbf16, #tpu.memory_space<vmem>>, vector<128x128xbf16>
    %cst = arith.constant dense<0.000000e+00> : vector<32x128xf32>
    %2 = tpu.matmul %0, %1, %cst {dimension_numbers = #tpu.dot_dimension_numbers<[1], [0], [0], [1], [0, 0, 1, 1], [], []>} : vector<32x128xbf16>, vector<128x128xbf16>, vector<32x128xf32> -> vector<32x128xf32>
    %c0_3 = arith.constant 0 : index
    %c0_4 = arith.constant 0 : index
    %3 = vector.load %arg3[%c0_3, %c0_4] : memref<1x128xf32, #tpu.memory_space<vmem>>, vector<1x128xf32>
    %4 = vector.broadcast %3 : vector<1x128xf32> to vector<32x128xf32>
    %5 = arith.mulf %2, %4 : vector<32x128xf32>
    %c0_5 = arith.constant 0 : index
    %c0_6 = arith.constant 0 : index
    %6 = vector.load %arg4[%c0_5, %c0_6] : memref<1x128xf32, #tpu.memory_space<vmem>>, vector<1x128xf32>
    %7 = vector.broadcast %6 : vector<1x128xf32> to vector<32x128xf32>
    %8 = arith.addf %5, %7 : vector<32x128xf32>
    %c0_7 = arith.constant 0 : index
    %c0_8 = arith.constant 0 : index
    %9 = vector.load %arg5[%c0_7, %c0_8] : memref<32x128xbf16, #tpu.memory_space<vmem>>, vector<32x128xbf16>
    %10 = arith.extf %9 : vector<32x128xbf16> to vector<32x128xf32>
    %11 = arith.addf %8, %10 : vector<32x128xf32>
    %12 = arith.truncf %11 : vector<32x128xf32> to vector<32x128xbf16>
    %c0_9 = arith.constant 0 : index
    %c0_10 = arith.constant 0 : index
    %13 = vector.load %arg6[%c0_9, %c0_10] : memref<32x128xbf16, #tpu.memory_space<vmem>>, vector<32x128xbf16>
    tpu.vector_store %arg6[%c0_9, %c0_10], %12 {strides = array<i32>} : memref<32x128xbf16, #tpu.memory_space<vmem>>, vector<32x128xbf16>,
    return
  }
  func.func @transform_0(%arg0: i32) -> (i32, i32) {
    %c0_i32 = arith.constant 0 : i32
    %c0_i32_0 = arith.constant 0 : i32
    return %arg0, %c0_i32 : i32, i32
  }
  func.func @transform_1(%arg0: i32) -> (i32, i32) {
    %c0_i32 = arith.constant 0 : i32
    %c0_i32_0 = arith.constant 0 : i32
    %c0_i32_1 = arith.constant 0 : i32
    return %c0_i32, %c0_i32_0 : i32, i32
  }
  func.func @transform_2(%arg0: i32) -> (i32, i32) {
    %c0_i32 = arith.constant 0 : i32
    %c0_i32_0 = arith.constant 0 : i32
    %c0_i32_1 = arith.constant 0 : i32
    return %c0_i32, %c0_i32_0 : i32, i32
  }
  func.func @transform_3(%arg0: i32) -> (i32, i32) {
    %c0_i32 = arith.constant 0 : i32
    %c0_i32_0 = arith.constant 0 : i32
    %c0_i32_1 = arith.constant 0 : i32
    return %c0_i32, %c0_i32_0 : i32, i32
  }
  func.func @transform_4(%arg0: i32) -> (i32, i32) {
    %c0_i32 = arith.constant 0 : i32
    %c0_i32_0 = arith.constant 0 : i32
    return %arg0, %c0_i32 : i32, i32
  }
  func.func @transform_5(%arg0: i32) -> (i32, i32) {
    %c0_i32 = arith.constant 0 : i32
    %c0_i32_0 = arith.constant 0 : i32
    return %arg0, %c0_i32 : i32, i32
  }
}

module attributes {stable_mosaic.version = 11 : i64} {
  func.func @_mm_kernel(%arg0: i32, %arg1: memref<32x128xbf16, #tpu.memory_space<vmem>>, %arg2: memref<128x256xbf16, #tpu.memory_space<vmem>>, %arg3: memref<1x256xf32, #tpu.memory_space<vmem>>, %arg4: memref<1x256xf32, #tpu.memory_space<vmem>>, %arg5: memref<32x256xbf16, #tpu.memory_space<vmem>>) attributes {dimension_semantics = [#tpu.dimension_semantics<parallel>], iteration_bounds = array<i64: 1>, scalar_prefetch = 0 : i64, scratch_operands = 0 : i64, tpu.core_type = #tpu.core_type<tc>, window_params = [{transform_indices = @transform_0, window_bounds = array<i64: 32, 128>}, {pipeline_mode = #tpu.pipeline_mode<synchronous>, transform_indices = @transform_1, window_bounds = array<i64: 128, 256>}, {pipeline_mode = #tpu.pipeline_mode<synchronous>, transform_indices = @transform_2, window_bounds = array<i64: 1, 256>}, {pipeline_mode = #tpu.pipeline_mode<synchronous>, transform_indices = @transform_3, window_bounds = array<i64: 1, 256>}, {transform_indices = @transform_4, window_bounds = array<i64: 32, 256>}]} {
    %c0 = arith.constant 0 : index
    %c0_0 = arith.constant 0 : index
    %0 = vector.load %arg1[%c0, %c0_0] : memref<32x128xbf16, #tpu.memory_space<vmem>>, vector<32x128xbf16>
    %c0_1 = arith.constant 0 : index
    %c0_2 = arith.constant 0 : index
    %1 = vector.load %arg2[%c0_1, %c0_2] : memref<128x256xbf16, #tpu.memory_space<vmem>>, vector<128x256xbf16>
    %cst = arith.constant dense<0.000000e+00> : vector<32x256xf32>
    %2 = tpu.matmul %0, %1, %cst {dimension_numbers = #tpu.dot_dimension_numbers<[1], [0], [0], [1], [0, 0, 1, 1], [], []>} : vector<32x128xbf16>, vector<128x256xbf16>, vector<32x256xf32> -> vector<32x256xf32>
    %c0_3 = arith.constant 0 : index
    %c0_4 = arith.constant 0 : index
    %3 = vector.load %arg3[%c0_3, %c0_4] : memref<1x256xf32, #tpu.memory_space<vmem>>, vector<1x256xf32>
    %4 = vector.broadcast %3 : vector<1x256xf32> to vector<32x256xf32>
    %5 = arith.mulf %2, %4 : vector<32x256xf32>
    %c0_5 = arith.constant 0 : index
    %c0_6 = arith.constant 0 : index
    %6 = vector.load %arg4[%c0_5, %c0_6] : memref<1x256xf32, #tpu.memory_space<vmem>>, vector<1x256xf32>
    %7 = vector.broadcast %6 : vector<1x256xf32> to vector<32x256xf32>
    %8 = arith.addf %5, %7 : vector<32x256xf32>
    %cst_7 = arith.constant 3.000000e+00 : f32
    %9 = vector.broadcast %cst_7 : f32 to vector<32x256xf32>
    %10 = arith.addf %8, %9 : vector<32x256xf32>
    %cst_8 = arith.constant 0.000000e+00 : f32
    %cst_9 = arith.constant 6.000000e+00 : f32
    %11 = vector.broadcast %cst_8 : f32 to vector<32x256xf32>
    %12 = arith.maximumf %11, %10 : vector<32x256xf32>
    %13 = vector.broadcast %cst_9 : f32 to vector<32x256xf32>
    %14 = arith.minimumf %13, %12 : vector<32x256xf32>
    %cst_10 = arith.constant 0.166666672 : f32
    %15 = vector.broadcast %cst_10 : f32 to vector<32x256xf32>
    %16 = arith.mulf %14, %15 : vector<32x256xf32>
    %17 = arith.mulf %8, %16 : vector<32x256xf32>
    %18 = arith.truncf %17 : vector<32x256xf32> to vector<32x256xbf16>
    %c0_11 = arith.constant 0 : index
    %c0_12 = arith.constant 0 : index
    %19 = vector.load %arg5[%c0_11, %c0_12] : memref<32x256xbf16, #tpu.memory_space<vmem>>, vector<32x256xbf16>
    tpu.vector_store %arg5[%c0_11, %c0_12], %18 {strides = array<i32>} : memref<32x256xbf16, #tpu.memory_space<vmem>>, vector<32x256xbf16>,
    return
  }
  func.func @transform_0(%arg0: i32) -> (i32, i32) {
    %c0_i32 = arith.constant 0 : i32
    %c0_i32_0 = arith.constant 0 : i32
    return %arg0, %c0_i32 : i32, i32
  }
  func.func @transform_1(%arg0: i32) -> (i32, i32) {
    %c0_i32 = arith.constant 0 : i32
    %c0_i32_0 = arith.constant 0 : i32
    %c0_i32_1 = arith.constant 0 : i32
    return %c0_i32, %c0_i32_0 : i32, i32
  }
  func.func @transform_2(%arg0: i32) -> (i32, i32) {
    %c0_i32 = arith.constant 0 : i32
    %c0_i32_0 = arith.constant 0 : i32
    %c0_i32_1 = arith.constant 0 : i32
    return %c0_i32, %c0_i32_0 : i32, i32
  }
  func.func @transform_3(%arg0: i32) -> (i32, i32) {
    %c0_i32 = arith.constant 0 : i32
    %c0_i32_0 = arith.constant 0 : i32
    %c0_i32_1 = arith.constant 0 : i32
    return %c0_i32, %c0_i32_0 : i32, i32
  }
  func.func @transform_4(%arg0: i32) -> (i32, i32) {
    %c0_i32 = arith.constant 0 : i32
    %c0_i32_0 = arith.constant 0 : i32
    return %arg0, %c0_i32 : i32, i32
  }
}

module attributes {stable_mosaic.version = 11 : i64} {
  func.func @_head_kernel(%arg0: i32, %arg1: memref<1x16x256xbf16, #tpu.memory_space<vmem>>, %arg2: memref<256x128xbf16, #tpu.memory_space<vmem>>, %arg3: memref<1x128xf32, #tpu.memory_space<vmem>>, %arg4: memref<128x128xbf16, #tpu.memory_space<vmem>>, %arg5: memref<1x128xf32, #tpu.memory_space<vmem>>, %arg6: memref<1x1x128xf32, #tpu.memory_space<vmem>>) attributes {dimension_semantics = [#tpu.dimension_semantics<parallel>], iteration_bounds = array<i64: 2>, scalar_prefetch = 0 : i64, scratch_operands = 0 : i64, tpu.core_type = #tpu.core_type<tc>, window_params = [{transform_indices = @transform_0, window_bounds = array<i64: 1, 16, 256>}, {pipeline_mode = #tpu.pipeline_mode<synchronous>, transform_indices = @transform_1, window_bounds = array<i64: 256, 128>}, {pipeline_mode = #tpu.pipeline_mode<synchronous>, transform_indices = @transform_2, window_bounds = array<i64: 1, 128>}, {pipeline_mode = #tpu.pipeline_mode<synchronous>, transform_indices = @transform_3, window_bounds = array<i64: 128, 128>}, {pipeline_mode = #tpu.pipeline_mode<synchronous>, transform_indices = @transform_4, window_bounds = array<i64: 1, 128>}, {transform_indices = @transform_5, window_bounds = array<i64: 1, 1, 128>}]} {
    %c0 = arith.constant 0 : index
    %c0_0 = arith.constant 0 : index
    %c0_1 = arith.constant 0 : index
    %0 = vector.load %arg1[%c0, %c0_0, %c0_1] : memref<1x16x256xbf16, #tpu.memory_space<vmem>>, vector<1x16x256xbf16>
    %1 = vector.shape_cast %0 : vector<1x16x256xbf16> to vector<16x256xbf16>
    %2 = arith.extf %1 : vector<16x256xbf16> to vector<16x256xf32>
    %cst = arith.constant dense<0.000000e+00> : vector<256xf32>
    %3 = vector.multi_reduction <add>, %2, %cst [0] : vector<16x256xf32> to vector<256xf32>
    %4 = vector.shape_cast %3 : vector<256xf32> to vector<1x256xf32>
    %cst_2 = arith.constant 1.600000e+01 : f32
    %5 = vector.broadcast %cst_2 : f32 to vector<1x256xf32>
    %6 = arith.divf %4, %5 : vector<1x256xf32>
    %7 = arith.truncf %6 : vector<1x256xf32> to vector<1x256xbf16>
    %c0_3 = arith.constant 0 : index
    %c0_4 = arith.constant 0 : index
    %8 = vector.load %arg2[%c0_3, %c0_4] : memref<256x128xbf16, #tpu.memory_space<vmem>>, vector<256x128xbf16>
    %cst_5 = arith.constant dense<0.000000e+00> : vector<1x128xf32>
    %9 = tpu.matmul %7, %8, %cst_5 {dimension_numbers = #tpu.dot_dimension_numbers<[1], [0], [0], [1], [0, 0, 1, 1], [], []>} : vector<1x256xbf16>, vector<256x128xbf16>, vector<1x128xf32> -> vector<1x128xf32>
    %c0_6 = arith.constant 0 : index
    %c0_7 = arith.constant 0 : index
    %10 = vector.load %arg3[%c0_6, %c0_7] : memref<1x128xf32, #tpu.memory_space<vmem>>, vector<1x128xf32>
    %11 = arith.addf %9, %10 : vector<1x128xf32>
    %cst_8 = arith.constant 3.000000e+00 : f32
    %12 = vector.broadcast %cst_8 : f32 to vector<1x128xf32>
    %13 = arith.addf %11, %12 : vector<1x128xf32>
    %cst_9 = arith.constant 0.000000e+00 : f32
    %cst_10 = arith.constant 6.000000e+00 : f32
    %14 = vector.broadcast %cst_9 : f32 to vector<1x128xf32>
    %15 = arith.maximumf %14, %13 : vector<1x128xf32>
    %16 = vector.broadcast %cst_10 : f32 to vector<1x128xf32>
    %17 = arith.minimumf %16, %15 : vector<1x128xf32>
    %cst_11 = arith.constant 0.166666672 : f32
    %18 = vector.broadcast %cst_11 : f32 to vector<1x128xf32>
    %19 = arith.mulf %17, %18 : vector<1x128xf32>
    %20 = arith.mulf %11, %19 : vector<1x128xf32>
    %21 = arith.truncf %20 : vector<1x128xf32> to vector<1x128xbf16>
    %c0_12 = arith.constant 0 : index
    %c0_13 = arith.constant 0 : index
    %22 = vector.load %arg4[%c0_12, %c0_13] : memref<128x128xbf16, #tpu.memory_space<vmem>>, vector<128x128xbf16>
    %cst_14 = arith.constant dense<0.000000e+00> : vector<1x128xf32>
    %23 = tpu.matmul %21, %22, %cst_14 {dimension_numbers = #tpu.dot_dimension_numbers<[1], [0], [0], [1], [0, 0, 1, 1], [], []>} : vector<1x128xbf16>, vector<128x128xbf16>, vector<1x128xf32> -> vector<1x128xf32>
    %c0_15 = arith.constant 0 : index
    %c0_16 = arith.constant 0 : index
    %24 = vector.load %arg5[%c0_15, %c0_16] : memref<1x128xf32, #tpu.memory_space<vmem>>, vector<1x128xf32>
    %25 = arith.addf %23, %24 : vector<1x128xf32>
    %c0_17 = arith.constant 0 : index
    %c0_18 = arith.constant 0 : index
    %c0_19 = arith.constant 0 : index
    %26 = vector.load %arg6[%c0_17, %c0_18, %c0_19] : memref<1x1x128xf32, #tpu.memory_space<vmem>>, vector<1x1x128xf32>
    %27 = vector.shape_cast %26 : vector<1x1x128xf32> to vector<1x128xf32>
    %28 = vector.shape_cast %25 : vector<1x128xf32> to vector<1x1x128xf32>
    tpu.vector_store %arg6[%c0_17, %c0_18, %c0_19], %28 {strides = array<i32>} : memref<1x1x128xf32, #tpu.memory_space<vmem>>, vector<1x1x128xf32>,
    return
  }
  func.func @transform_0(%arg0: i32) -> (i32, i32, i32) {
    %c0_i32 = arith.constant 0 : i32
    %c0_i32_0 = arith.constant 0 : i32
    %c0_i32_1 = arith.constant 0 : i32
    return %arg0, %c0_i32, %c0_i32_0 : i32, i32, i32
  }
  func.func @transform_1(%arg0: i32) -> (i32, i32) {
    %c0_i32 = arith.constant 0 : i32
    %c0_i32_0 = arith.constant 0 : i32
    %c0_i32_1 = arith.constant 0 : i32
    return %c0_i32, %c0_i32_0 : i32, i32
  }
  func.func @transform_2(%arg0: i32) -> (i32, i32) {
    %c0_i32 = arith.constant 0 : i32
    %c0_i32_0 = arith.constant 0 : i32
    %c0_i32_1 = arith.constant 0 : i32
    return %c0_i32, %c0_i32_0 : i32, i32
  }
  func.func @transform_3(%arg0: i32) -> (i32, i32) {
    %c0_i32 = arith.constant 0 : i32
    %c0_i32_0 = arith.constant 0 : i32
    %c0_i32_1 = arith.constant 0 : i32
    return %c0_i32, %c0_i32_0 : i32, i32
  }
  func.func @transform_4(%arg0: i32) -> (i32, i32) {
    %c0_i32 = arith.constant 0 : i32
    %c0_i32_0 = arith.constant 0 : i32
    %c0_i32_1 = arith.constant 0 : i32
    return %c0_i32, %c0_i32_0 : i32, i32
  }
  func.func @transform_5(%arg0: i32) -> (i32, i32, i32) {
    %c0_i32 = arith.constant 0 : i32
    %c0_i32_0 = arith.constant 0 : i32
    %c0_i32_1 = arith.constant 0 : i32
    return %arg0, %c0_i32, %c0_i32_0 : i32, i32, i32
  }
}

</mosaic_0001>

<bundles_post_ra>
// kernel: _lambda_.13
= control target key start
LH: loop header
LB: loop body
LE: loop exit
PB: predicated region body
PF: predicated region fallthrough
CT: control target
= control target key end

     0   :  { %s1089_s15 = smov 0   ;;  %s1292_s0 = inlined_call_operand.vmem [shape: bf16[512,27], index: 0, kind: input, shape index: {}]   ;;  %s1293_s1 = inlined_call_operand.vmem [shape: bf16[27,128], index: 1, kind: input, shape index: {}]   ;;  %s1294_s2 = inlined_call_operand.vmem [shape: f32[1,128], index: 2, kind: input, shape index: {}]   ;;  %s1295_s3 = inlined_call_operand.vmem [shape: f32[1,128], index: 3, kind: input, shape index: {}]   ;;  %s1296_s4 = inlined_call_operand.vmem [shape: bf16[512,128], index: 4, kind: output, shape index: {}]  }
   0x1 LB: > { %s826_s16 = sadd.s32 4294967295, %s1061_s15   ;;  %p830_p0 = scmp.ge.s32.totalorder %s1061_s15, 1  ;;  %s1061_s15 = sphi %s1089_s15, %s14_s15  }
   0x2   : > { %p163_p1 = scmp.lt.s32.totalorder %s1061_s15, 3 }
   0x4   : > { %p164_p2 = pnand %p830_p0, %p163_p1 }
   0x5   : > { %s831_s21 = sshll.u32 (!%p164_p2), %s826_s16, 5 }
   0x6   : > { %167 = sbr.rel (%p164_p2) target bundleno = 231 (0xe7), region = 36  ;;  %p190_p3 = scmp.lt.s32.totalorder (!%p164_p2), %s831_s21, 63 }
   0xb   : > { %v905_v0 = vld [vmem:[%s1293_s1 + $0x8] sm:$0xf]  ;;  %v942_v1 = vld [vmem:[%s1293_s1 + $0x8] sm:$0x30]  ;;  %vm378_vm0 = vcmask 1044480   ;;  %vm379_vm1 = vcmask 1045504  }
   0xc   : > { %v906_v2 = vor.u32 %v942_v1, %v905_v0  ;;  %v1063_v3 = vmov 65535   ;;  %s1298_s21 = smov (!%p190_p3, %s831_s21), 63  ;;  %v941_v7 = vld [vmem:[%s1293_s1] sm:$0xff]  ;;  %vm329_vm2 = vcmask 220160  }
   0xd   : > { %v380_v4 = vsel %vm378_vm0, 4294967295, %v1063_v3  ;;  %s832_s24 = sshll.u32 %s1298_s21, 2  ;;  %v1151_v24 = vld [vmem:[%s1294_s2] ss:$0 sm:$0xff] }
   0xe   : > { %v381_v5 = vsel %vm379_vm1, %v380_v4, 0  ;;  %s1114_s27 = scalar_lea.vmem %s1292_s0, %s832_s24  ;;  %v1156_v25 = vld [vmem:[%s1295_s3] ss:$0 sm:$0xff]  ;;  %s1192_s8 = scalar_lea.vmem %s1296_s4, %s832_s24 }
   0xf   : > { %v383_v6 = vand.u32 %v906_v2, %v381_v5  ;;  %v925_v8 = vld [vmem:[%s1114_s27] sm:$0xff]  ;;  %v926_v12 = vld [vmem:[%s1114_s27 + $0x8] sm:$0xff]  ;;  %v927_v16 = vld [vmem:[%s1114_s27 + $0x10] sm:$0xff] }
  0x10   : > { %v929_v9 = vld [vmem:[%s1114_s27 + $0x20] sm:$0xff]  ;;  %v930_v13 = vld [vmem:[%s1114_s27 + $0x28] sm:$0xff]  ;;  %v931_v17 = vld [vmem:[%s1114_s27 + $0x30] sm:$0xff] }
  0x11   : > { %391 = vmatpush.bf16.msra.mxu0 %v383_v6  ;;  %1038 = vmatpush.bf16.msra.mxu1 %v383_v6  ;;  %v933_v10 = vld [vmem:[%s1114_s27 + $0x40] sm:$0xff]  ;;  %v934_v14 = vld [vmem:[%s1114_s27 + $0x48] sm:$0xff]  ;;  %v935_v18 = vld [vmem:[%s1114_s27 + $0x50] sm:$0xff] }
  0x12   : > { %1039 = vmatpush.bf16.msra.mxu2 %v383_v6  ;;  %1040 = vmatpush.bf16.msra.mxu3 %v383_v6  ;;  %v937_v11 = vld [vmem:[%s1114_s27 + $0x60] sm:$0xff]  ;;  %v938_v15 = vld [vmem:[%s1114_s27 + $0x68] sm:$0xff]  ;;  %v939_v19 = vld [vmem:[%s1114_s27 + $0x70] sm:$0xff] }
  0x13   : > { %v928_v20 = vld [vmem:[%s1114_s27 + $0x18] sm:$0xff] }
  0x14   : > { %v932_v21 = vld [vmem:[%s1114_s27 + $0x38] sm:$0xff] }
  0x15   : > { %392 = vmatpush.bf16.msra.mxu0 %v941_v7  ;;  %1041 = vmatpush.bf16.msra.mxu1 %v941_v7  ;;  %v936_v22 = vld [vmem:[%s1114_s27 + $0x58] sm:$0xff] }
  0x16   : > { %1042 = vmatpush.bf16.msra.mxu2 %v941_v7  ;;  %1043 = vmatpush.bf16.msra.mxu3 %v941_v7  ;;  %v940_v23 = vld [vmem:[%s1114_s27 + $0x78] sm:$0xff] }
  0x18   : > { %907 = vmatmul.msk.bf16.vlgmr.msra.gmra.mxu0 %vm329_vm2, %v925_v8  ;;  %911 = vmatmul.msk.bf16.vlgmr.msra.gmra.mxu1 %vm329_vm2, %v929_v9 }
  0x19   : > { %915 = vmatmul.msk.bf16.vlgmr.msra.gmra.mxu2 %vm329_vm2, %v933_v10  ;;  %919 = vmatmul.msk.bf16.vlgmr.msra.gmra.mxu3 %vm329_vm2, %v937_v11 }
  0x28   : > { %908 = vmatmul.msk.bf16.gmra.mxu0 %vm329_vm2, %v926_v12  ;;  %912 = vmatmul.msk.bf16.gmra.mxu1 %vm329_vm2, %v930_v13 }
  0x29   : > { %916 = vmatmul.msk.bf16.gmra.mxu2 %vm329_vm2, %v934_v14  ;;  %920 = vmatmul.msk.bf16.gmra.mxu3 %vm329_vm2, %v938_v15 }
  0x38   : > { %909 = vmatmul.msk.bf16.gmra.mxu0 %vm329_vm2, %v927_v16  ;;  %913 = vmatmul.msk.bf16.gmra.mxu1 %vm329_vm2, %v931_v17 }
  0x39   : > { %917 = vmatmul.msk.bf16.gmra.mxu2 %vm329_vm2, %v935_v18  ;;  %921 = vmatmul.msk.bf16.gmra.mxu3 %vm329_vm2, %v939_v19 }
  0x48   : > { %910 = vmatmul.msk.bf16.gmra.mxu0 %vm329_vm2, %v928_v20  ;;  %914 = vmatmul.msk.bf16.gmra.mxu1 %vm329_vm2, %v932_v21 }
  0x49   : > { %918 = vmatmul.msk.bf16.gmra.mxu2 %vm329_vm2, %v936_v22  ;;  %922 = vmatmul.msk.bf16.gmra.mxu3 %vm329_vm2, %v940_v23 }
  0x95   : > { %v394_v26 = vpop.f32.mrf.mxu0  ;;  %v414_v27 = vpop.f32.mrf.mxu1 }
  0x96   : > { %v478_v28 = vmul.f32 %v1151_v24, %v394_v26  ;;  %v486_v29 = vmul.f32 %v1151_v24, %v414_v27 }
  0x98   : > { %v514_v30 = vadd.f32 %v1156_v25, %v478_v28  ;;  %v522_v31 = vadd.f32 %v1156_v25, %v486_v29 }
  0x9a   : > { %v546_v32 = vadd.f32 3.0, %v514_v30  ;;  %v554_v33 = vadd.f32 3.0, %v522_v31 }
  0x9c   : > { %v578_v34 = vmax.f32 %v546_v32, 0.0  ;;  %v434_v35 = vpop.f32.mrf.mxu2  ;;  %v454_v36 = vpop.f32.mrf.mxu3  ;;  %v586_v37 = vmax.f32 %v554_v33, 0.0 }
  0x9d   : > { %v494_v38 = vmul.f32 %v1151_v24, %v434_v35  ;;  %v502_v39 = vmul.f32 %v1151_v24, %v454_v36  ;;  %v396_v40 = vpop.f32.mrf.mxu0  ;;  %v416_v41 = vpop.f32.mrf.mxu1 }
  0x9e   : > { %v479_v42 = vmul.f32 %v1151_v24, %v396_v40  ;;  %v487_v43 = vmul.f32 %v1151_v24, %v416_v41  ;;  %v610_v44 = vmin.f32 %v578_v34, 6.0  ;;  %v618_v49 = vmin.f32 %v586_v37, 6.0 }
  0x9f   : > { %v530_v45 = vadd.f32 %v1156_v25, %v494_v38  ;;  %v1168_v46 = vadd.f32 %v1156_v25, %v502_v39 }
  0xa0   : > { %v515_v47 = vadd.f32 %v1156_v25, %v479_v42  ;;  %v523_v48 = vadd.f32 %v1156_v25, %v487_v43  ;;  %v642_v54 = vmul.f32 0.16666667, %v610_v44  ;;  %v650_v61 = vmul.f32 0.16666667, %v618_v49 }
  0xa1   : > { %v562_v50 = vadd.f32 3.0, %v530_v45  ;;  %v570_v51 = vadd.f32 3.0, %v1168_v46 }
  0xa2   : > { %v547_v52 = vadd.f32 3.0, %v515_v47  ;;  %v555_v53 = vadd.f32 3.0, %v523_v48  ;;  %v674_v7 = vmul.f32 %v642_v54, %v514_v30  ;;  %v682_v15 = vmul.f32 %v650_v61, %v522_v31 }
  0xa3   : > { %v594_v55 = vmax.f32 %v562_v50, 0.0  ;;  %v602_v56 = vmax.f32 %v570_v51, 0.0 }
  0xa4   : > { %v579_v57 = vmax.f32 %v547_v52, 0.0  ;;  %v587_v58 = vmax.f32 %v555_v53, 0.0  ;;  %v436_v59 = vpop.f32.mrf.mxu2  ;;  %v456_v60 = vpop.f32.mrf.mxu3 }
  0xa5   : > { %v626_v62 = vmin.f32 %v594_v55, 6.0  ;;  %v495_v63 = vmul.f32 %v1151_v24, %v436_v59  ;;  %v503_v0 = vmul.f32 %v1151_v24, %v456_v60  ;;  %v399_v1 = vpop.f32.mrf.mxu0  ;;  %v419_v2 = vpop.f32.mrf.mxu1  ;;  %v634_v8 = vmin.f32 %v602_v56, 6.0 }
  0xa6   : > { %v611_v3 = vmin.f32 %v579_v57, 6.0  ;;  %v619_v4 = vmin.f32 %v587_v58, 6.0  ;;  %v480_v5 = vmul.f32 %v1151_v24, %v399_v1  ;;  %v488_v6 = vmul.f32 %v1151_v24, %v419_v2 }
  0xa7   : > { %v531_v9 = vadd.f32 %v1156_v25, %v495_v63  ;;  %v539_v10 = vadd.f32 %v1156_v25, %v503_v0  ;;  %v658_v16 = vmul.f32 0.16666667, %v626_v62  ;;  %v666_v23 = vmul.f32 0.16666667, %v634_v8 }
  0xa8   : > { %v643_v11 = vmul.f32 0.16666667, %v611_v3  ;;  %v651_v12 = vmul.f32 0.16666667, %v619_v4  ;;  %v1180_v13 = vadd.f32 %v1156_v25, %v480_v5  ;;  %v1183_v14 = vadd.f32 %v1156_v25, %v488_v6 }
  0xa9   : > { %v563_v17 = vadd.f32 3.0, %v531_v9  ;;  %v571_v18 = vadd.f32 3.0, %v539_v10  ;;  %v690_v40 = vmul.f32 %v658_v16, %v530_v45  ;;  %v698_v50 = vmul.f32 %v666_v23, %v1168_v46 }
  0xaa   : > { %v675_v19 = vmul.f32 %v643_v11, %v515_v47  ;;  %v683_v20 = vmul.f32 %v651_v12, %v523_v48  ;;  %v548_v21 = vadd.f32 3.0, %v1180_v13  ;;  %v556_v22 = vadd.f32 3.0, %v1183_v14 }
  0xab   : > { %v595_v26 = vmax.f32 %v563_v17, 0.0  ;;  %v603_v27 = vmax.f32 %v571_v18, 0.0 }
  0xac   : > { %v946_v28 = vpack.c.bf16 %v675_v19, %v674_v7  ;;  %v966_v29 = vpack.c.bf16 %v683_v20, %v682_v15  ;;  %v580_v30 = vmax.f32 %v548_v21, 0.0  ;;  %v588_v31 = vmax.f32 %v556_v22, 0.0  ;;  %v439_v32 = vpop.f32.mrf.mxu2  ;;  %v459_v33 = vpop.f32.mrf.mxu3 }
  0xad   : > { %v627_v34 = vmin.f32 %v595_v26, 6.0  ;;  %v635_v35 = vmin.f32 %v603_v27, 6.0  ;;  %v496_v36 = vmul.f32 %v1151_v24, %v439_v32  ;;  %v504_v37 = vmul.f32 %v1151_v24, %v459_v33  ;;  %v401_v38 = vpop.f32.mrf.mxu0  ;;  %v421_v39 = vpop.f32.mrf.mxu1 }
  0xae   : > { %947 = vst [vmem:[%s1192_s8] sm:$0xff] %v946_v28   ;;  %v612_v41 = vmin.f32 %v580_v30, 6.0  ;;  %v481_v42 = vmul.f32 %v1151_v24, %v401_v38  ;;  %v489_v43 = vmul.f32 %v1151_v24, %v421_v39  ;;  %v620_v51 = vmin.f32 %v588_v31, 6.0 }
  0xaf   : > { %1026 = vst [vmem:[%s1192_s8 + $0x20] sm:$0xff] %v966_v29   ;;  %v659_v44 = vmul.f32 0.16666667, %v627_v34  ;;  %v667_v47 = vmul.f32 0.16666667, %v635_v35  ;;  %v1201_v48 = vadd.f32 %v1156_v25, %v496_v36  ;;  %v1204_v49 = vadd.f32 %v1156_v25, %v504_v37 }
  0xb0   : > { %v517_v45 = vadd.f32 %v1156_v25, %v481_v42  ;;  %v525_v52 = vadd.f32 %v1156_v25, %v489_v43  ;;  %v644_v57 = vmul.f32 0.16666667, %v612_v41  ;;  %v652_v3 = vmul.f32 0.16666667, %v620_v51 }
  0xb1   : > { %v691_v53 = vmul.f32 %v659_v44, %v531_v9  ;;  %v699_v54 = vmul.f32 %v667_v47, %v539_v10  ;;  %v564_v55 = vadd.f32 3.0, %v1201_v48  ;;  %v572_v56 = vadd.f32 3.0, %v1204_v49 }
  0xb2   : > { %v549_v58 = vadd.f32 3.0, %v517_v45  ;;  %v557_v59 = vadd.f32 3.0, %v525_v52  ;;  %v676_v15 = vmul.f32 %v644_v57, %v1180_v13  ;;  %v684_v23 = vmul.f32 %v652_v3, %v1183_v14 }
  0xb3   : > { %v986_v60 = vpack.c.bf16 %v691_v53, %v690_v40  ;;  %v1006_v61 = vpack.c.bf16 %v699_v54, %v698_v50  ;;  %v596_v62 = vmax.f32 %v564_v55, 0.0  ;;  %v604_v46 = vmax.f32 %v572_v56, 0.0 }
  0xb4   : > { %v581_v63 = vmax.f32 %v549_v58, 0.0  ;;  %v589_v0 = vmax.f32 %v557_v59, 0.0  ;;  %v441_v1 = vpop.f32.mrf.mxu2  ;;  %v461_v2 = vpop.f32.mrf.mxu3 }
  0xb5   : > { %1030 = vst [vmem:[%s1192_s8 + $0x40] sm:$0xff] %v986_v60   ;;  %v628_v4 = vmin.f32 %v596_v62, 6.0  ;;  %v497_v5 = vmul.f32 %v1151_v24, %v441_v1  ;;  %v505_v6 = vmul.f32 %v1151_v24, %v461_v2  ;;  %v404_v7 = vpop.f32.mrf.mxu0  ;;  %v424_v8 = vpop.f32.mrf.mxu1  ;;  %v636_v16 = vmin.f32 %v604_v46, 6.0 }
  0xb6   : > { %1034 = vst [vmem:[%s1192_s8 + $0x60] sm:$0xff] %v1006_v61   ;;  %v613_v9 = vmin.f32 %v581_v63, 6.0  ;;  %v621_v10 = vmin.f32 %v589_v0, 6.0  ;;  %v482_v11 = vmul.f32 %v1151_v24, %v404_v7  ;;  %v490_v12 = vmul.f32 %v1151_v24, %v424_v8 }
  0xb7   : > { %v533_v17 = vadd.f32 %v1156_v25, %v497_v5  ;;  %v541_v18 = vadd.f32 %v1156_v25, %v505_v6  ;;  %v660_v26 = vmul.f32 0.16666667, %v628_v4  ;;  %v668_v32 = vmul.f32 0.16666667, %v636_v16 }
  0xb8   : > { %v645_v19 = vmul.f32 0.16666667, %v613_v9  ;;  %v653_v20 = vmul.f32 0.16666667, %v621_v10  ;;  %v1221_v21 = vadd.f32 %v1156_v25, %v482_v11  ;;  %v1224_v22 = vadd.f32 %v1156_v25, %v490_v12 }
  0xb9   : > { %v565_v27 = vadd.f32 3.0, %v533_v17  ;;  %v573_v28 = vadd.f32 3.0, %v541_v18  ;;  %v692_v50 = vmul.f32 %v660_v26, %v1201_v48  ;;  %v700_v57 = vmul.f32 %v668_v32, %v1204_v49 }
  0xba   : > { %v677_v29 = vmul.f32 %v645_v19, %v517_v45  ;;  %v685_v13 = vmul.f32 %v653_v20, %v525_v52  ;;  %v550_v30 = vadd.f32 3.0, %v1221_v21  ;;  %v558_v31 = vadd.f32 3.0, %v1224_v22 }
  0xbb   : > { %v597_v33 = vmax.f32 %v565_v27, 0.0  ;;  %v605_v34 = vmax.f32 %v573_v28, 0.0 }
  0xbc   : > { %v951_v35 = vpack.c.bf16 %v677_v29, %v676_v15  ;;  %v971_v36 = vpack.c.bf16 %v685_v13, %v684_v23  ;;  %v582_v37 = vmax.f32 %v550_v30, 0.0  ;;  %v590_v38 = vmax.f32 %v558_v31, 0.0  ;;  %v444_v39 = vpop.f32.mrf.mxu2  ;;  %v464_v14 = vpop.f32.mrf.mxu3 }
  0xbd   : > { %v629_v40 = vmin.f32 %v597_v33, 6.0  ;;  %v637_v41 = vmin.f32 %v605_v34, 6.0  ;;  %v498_v42 = vmul.f32 %v1151_v24, %v444_v39  ;;  %v506_v43 = vmul.f32 %v1151_v24, %v464_v14  ;;  %v406_v44 = vpop.f32.mrf.mxu0  ;;  %v426_v47 = vpop.f32.mrf.mxu1 }
  0xbe   : > { %1023 = vst [vmem:[%s1192_s8 + $0x8] sm:$0xff] %v951_v35   ;;  %v614_v51 = vmin.f32 %v582_v37, 6.0  ;;  %v483_v45 = vmul.f32 %v1151_v24, %v406_v44  ;;  %v491_v52 = vmul.f32 %v1151_v24, %v426_v47  ;;  %v622_v58 = vmin.f32 %v590_v38, 6.0 }
  0xbf   : > { %1027 = vst [vmem:[%s1192_s8 + $0x28] sm:$0xff] %v971_v36   ;;  %v661_v53 = vmul.f32 0.16666667, %v629_v40  ;;  %v669_v54 = vmul.f32 0.16666667, %v637_v41  ;;  %v1237_v55 = vadd.f32 %v1156_v25, %v498_v42  ;;  %v1240_v56 = vadd.f32 %v1156_v25, %v506_v43 }
  0xc0   : > { %v519_v48 = vadd.f32 %v1156_v25, %v483_v45  ;;  %v527_v59 = vadd.f32 %v1156_v25, %v491_v52  ;;  %v646_v63 = vmul.f32 0.16666667, %v614_v51  ;;  %v654_v9 = vmul.f32 0.16666667, %v622_v58 }
  0xc1   : > { %v693_v60 = vmul.f32 %v661_v53, %v533_v17  ;;  %v701_v61 = vmul.f32 %v669_v54, %v541_v18  ;;  %v566_v62 = vadd.f32 3.0, %v1237_v55  ;;  %v574_v46 = vadd.f32 3.0, %v1240_v56 }
  0xc2   : > { %v551_v0 = vadd.f32 3.0, %v519_v48  ;;  %v559_v1 = vadd.f32 3.0, %v527_v59  ;;  %v678_v23 = vmul.f32 %v646_v63, %v1221_v21  ;;  %v686_v32 = vmul.f32 %v654_v9, %v1224_v22 }
  0xc3   : > { %v991_v2 = vpack.c.bf16 %v693_v60, %v692_v50  ;;  %v1011_v3 = vpack.c.bf16 %v701_v61, %v700_v57  ;;  %v598_v4 = vmax.f32 %v566_v62, 0.0  ;;  %v606_v49 = vmax.f32 %v574_v46, 0.0 }
  0xc4   : > { %v583_v5 = vmax.f32 %v551_v0, 0.0  ;;  %v591_v6 = vmax.f32 %v559_v1, 0.0  ;;  %v446_v7 = vpop.f32.mrf.mxu2  ;;  %v466_v8 = vpop.f32.mrf.mxu3 }
  0xc5   : > { %1031 = vst [vmem:[%s1192_s8 + $0x48] sm:$0xff] %v991_v2   ;;  %v630_v10 = vmin.f32 %v598_v4, 6.0  ;;  %v499_v11 = vmul.f32 %v1151_v24, %v446_v7  ;;  %v507_v12 = vmul.f32 %v1151_v24, %v466_v8  ;;  %v409_v15 = vpop.f32.mrf.mxu0  ;;  %v429_v16 = vpop.f32.mrf.mxu1  ;;  %v638_v26 = vmin.f32 %v606_v49, 6.0 }
  0xc6   : > { %1035 = vst [vmem:[%s1192_s8 + $0x68] sm:$0xff] %v1011_v3   ;;  %v615_v17 = vmin.f32 %v583_v5, 6.0  ;;  %v623_v18 = vmin.f32 %v591_v6, 6.0  ;;  %v484_v19 = vmul.f32 %v1151_v24, %v409_v15  ;;  %v492_v20 = vmul.f32 %v1151_v24, %v429_v16 }
  0xc7   : > { %v535_v27 = vadd.f32 %v1156_v25, %v499_v11  ;;  %v543_v28 = vadd.f32 %v1156_v25, %v507_v12  ;;  %v662_v33 = vmul.f32 0.16666667, %v630_v10  ;;  %v670_v40 = vmul.f32 0.16666667, %v638_v26 }
  0xc8   : > { %v647_v29 = vmul.f32 0.16666667, %v615_v17  ;;  %v655_v13 = vmul.f32 0.16666667, %v623_v18  ;;  %v1257_v30 = vadd.f32 %v1156_v25, %v484_v19  ;;  %v1260_v31 = vadd.f32 %v1156_v25, %v492_v20 }
  0xc9   : > { %v567_v34 = vadd.f32 3.0, %v535_v27  ;;  %v575_v35 = vadd.f32 3.0, %v543_v28  ;;  %v694_v54 = vmul.f32 %v662_v33, %v1237_v55  ;;  %v702_v46 = vmul.f32 %v670_v40, %v1240_v56 }
  0xca   : > { %v679_v36 = vmul.f32 %v647_v29, %v519_v48  ;;  %v687_v21 = vmul.f32 %v655_v13, %v527_v59  ;;  %v552_v37 = vadd.f32 3.0, %v1257_v30  ;;  %v560_v38 = vadd.f32 3.0, %v1260_v31 }
  0xcb   : > { %v599_v39 = vmax.f32 %v567_v34, 0.0  ;;  %v607_v14 = vmax.f32 %v575_v35, 0.0 }
  0xcc   : > { %v956_v41 = vpack.c.bf16 %v679_v36, %v678_v23  ;;  %v976_v42 = vpack.c.bf16 %v687_v21, %v686_v32  ;;  %v584_v43 = vmax.f32 %v552_v37, 0.0  ;;  %v449_v44 = vpop.f32.mrf.mxu2  ;;  %v469_v47 = vpop.f32.mrf.mxu3  ;;  %v592_v57 = vmax.f32 %v560_v38, 0.0 }
  0xcd   : > { %v631_v22 = vmin.f32 %v599_v39, 6.0  ;;  %v639_v50 = vmin.f32 %v607_v14, 6.0  ;;  %v500_v51 = vmul.f32 %v1151_v24, %v449_v44  ;;  %v508_v45 = vmul.f32 %v1151_v24, %v469_v47  ;;  %v411_v52 = vpop.f32.mrf.mxu0  ;;  %v431_v53 = vpop.f32.mrf.mxu1 }
  0xce   : > { %1024 = vst [vmem:[%s1192_s8 + $0x10] sm:$0xff] %v956_v41   ;;  %v485_v58 = vmul.f32 %v1151_v24, %v411_v52  ;;  %v493_v48 = vmul.f32 %v1151_v24, %v431_v53  ;;  %v616_v63 = vmin.f32 %v584_v43, 6.0  ;;  %v624_v49 = vmin.f32 %v592_v57, 6.0 }
  0xcf   : > { %1028 = vst [vmem:[%s1192_s8 + $0x30] sm:$0xff] %v976_v42   ;;  %v663_v59 = vmul.f32 0.16666667, %v631_v22  ;;  %v671_v60 = vmul.f32 0.16666667, %v639_v50  ;;  %v536_v61 = vadd.f32 %v1156_v25, %v500_v51  ;;  %v544_v62 = vadd.f32 %v1156_v25, %v508_v45 }
  0xd0   : > { %v521_v0 = vadd.f32 %v1156_v25, %v485_v58  ;;  %v529_v55 = vadd.f32 %v1156_v25, %v493_v48  ;;  %v648_v9 = vmul.f32 0.16666667, %v616_v63  ;;  %v656_v19 = vmul.f32 0.16666667, %v624_v49 }
  0xd1   : > { %v695_v1 = vmul.f32 %v663_v59, %v535_v27  ;;  %v703_v2 = vmul.f32 %v671_v60, %v543_v28  ;;  %v568_v3 = vadd.f32 3.0, %v536_v61  ;;  %v576_v4 = vadd.f32 3.0, %v544_v62 }
  0xd2   : > { %v553_v5 = vadd.f32 3.0, %v521_v0  ;;  %v561_v6 = vadd.f32 3.0, %v529_v55  ;;  %v680_v35 = vmul.f32 %v648_v9, %v1257_v30 }
  0xd3   : > { %v996_v7 = vpack.c.bf16 %v695_v1, %v694_v54  ;;  %v1016_v8 = vpack.c.bf16 %v703_v2, %v702_v46  ;;  %v600_v15 = vmax.f32 %v568_v3, 0.0  ;;  %v608_v16 = vmax.f32 %v576_v4, 0.0 }
  0xd4   : > { %v585_v10 = vmax.f32 %v553_v5, 0.0  ;;  %v593_v11 = vmax.f32 %v561_v6, 0.0  ;;  %v451_v56 = vpop.f32.mrf.mxu2  ;;  %v471_v12 = vpop.f32.mrf.mxu3 }
  0xd5   : > { %1032 = vst [vmem:[%s1192_s8 + $0x50] sm:$0xff] %v996_v7   ;;  %v501_v17 = vmul.f32 %v1151_v24, %v451_v56  ;;  %v509_v18 = vmul.f32 %v1151_v24, %v471_v12  ;;  %v632_v13 = vmin.f32 %v600_v15, 6.0  ;;  %v640_v32 = vmin.f32 %v608_v16, 6.0 }
  0xd6   : > { %1036 = vst [vmem:[%s1192_s8 + $0x70] sm:$0xff] %v1016_v8   ;;  %v617_v20 = vmin.f32 %v585_v10, 6.0  ;;  %v625_v23 = vmin.f32 %v593_v11, 6.0  ;;  %v688_v24 = vmul.f32 %v656_v19, %v1260_v31 }
  0xd7   : > { %v537_v26 = vadd.f32 %v1156_v25, %v501_v17  ;;  %v545_v27 = vadd.f32 %v1156_v25, %v509_v18  ;;  %v664_v25 = vmul.f32 0.16666667, %v632_v13  ;;  %v672_v40 = vmul.f32 0.16666667, %v640_v32 }
  0xd8   : > { %v649_v28 = vmul.f32 0.16666667, %v617_v20  ;;  %v657_v29 = vmul.f32 0.16666667, %v625_v23 }
  0xd9   : > { %v569_v33 = vadd.f32 3.0, %v537_v26  ;;  %v577_v34 = vadd.f32 3.0, %v545_v27  ;;  %v696_v47 = vmul.f32 %v664_v25, %v536_v61  ;;  %v704_v30 = vmul.f32 %v672_v40, %v544_v62 }
  0xda   : > { %v681_v36 = vmul.f32 %v649_v28, %v521_v0  ;;  %v689_v21 = vmul.f32 %v657_v29, %v529_v55 }
  0xdb   : > { %v601_v37 = vmax.f32 %v569_v33, 0.0  ;;  %v609_v38 = vmax.f32 %v577_v34, 0.0 }
  0xdc   : > { %v961_v39 = vpack.c.bf16 %v681_v36, %v680_v35  ;;  %v981_v14 = vpack.c.bf16 %v689_v21, %v688_v24 }
  0xdd   : > { %v633_v41 = vmin.f32 %v601_v37, 6.0  ;;  %v641_v42 = vmin.f32 %v609_v38, 6.0 }
  0xde   : > { %1025 = vst [vmem:[%s1192_s8 + $0x18] sm:$0xff] %v961_v39  }
  0xdf   : > { %1029 = vst [vmem:[%s1192_s8 + $0x38] sm:$0xff] %v981_v14   ;;  %v665_v43 = vmul.f32 0.16666667, %v633_v41  ;;  %v673_v44 = vmul.f32 0.16666667, %v641_v42 }
  0xe1   : > { %v697_v22 = vmul.f32 %v665_v43, %v537_v26  ;;  %v705_v31 = vmul.f32 %v673_v44, %v545_v27 }
  0xe3   : > { %v1001_v50 = vpack.c.bf16 %v697_v22, %v696_v47  ;;  %v1021_v51 = vpack.c.bf16 %v705_v31, %v704_v30 }
  0xe5   : > { %1033 = vst [vmem:[%s1192_s8 + $0x58] sm:$0xff] %v1001_v50  }
  0xe6   : > { %1037 = vst [vmem:[%s1192_s8 + $0x78] sm:$0xff] %v1021_v51  }
  0xe7 PF: > { %s14_s15 = sadd.s32 1, %s1061_s15  }
  0xe8   : > { %p11_p4 = scmp.ge.s32.totalorder %s14_s15, 4  }
  0xea   :  { %13 = sbr.rel (!%p11_p4) target bundleno = 1 (0x1), region = 66 }

// kernel: _lambda_.14
= control target key start
LH: loop header
LB: loop body
LE: loop exit
PB: predicated region body
PF: predicated region fallthrough
CT: control target
= control target key end

     0   :  { %s1308_s15 = smov 0   ;;  %s1310_s16 = smov 0   ;;  %s1810_s0 = inlined_call_operand.vmem [shape: bf16[4,2,9,9,128], index: 0, kind: input, shape index: {}]   ;;  %s1811_s1 = inlined_call_operand.vmem [shape: bf16[9,1,128], index: 1, kind: input, shape index: {}]   ;;  %s1812_s2 = inlined_call_operand.vmem [shape: f32[1,128], index: 2, kind: input, shape index: {}]   ;;  %s1813_s3 = inlined_call_operand.vmem [shape: f32[1,128], index: 3, kind: input, shape index: {}]   ;;  %s1814_s4 = inlined_call_operand.vmem [shape: bf16[2,8,8,128], index: 4, kind: output, shape index: {}]  }
   0x1   :  { %s1312_s17 = smov 0  }
   0x2 LB: > { %s1132_s18 = sadd.s32 4294967295, %s1281_s17   ;;  %s1325_s19 = sadd.s32 1, %s1281_s17   ;;  %s1281_s17 = sphi %s1312_s17, %s1818_s17   ;;  %s1277_s16 = sphi %s1310_s16, %s1817_s16   ;;  %s1273_s15 = sphi %s1308_s15, %s1816_s15  }
   0x3   : > { %s18_s20 = ssub.s32 %s1281_s17, %s1325_s19  ;;  %s21_s21 = sadd.s32 1, %s1277_s16 }
   0x4   : > { %p19_p0 = scmp.eq.s32.totalorder %s18_s20, 0  ;;  %p28_p1 = scmp.ne.s32.totalorder %s1277_s16, %s1273_s15 }
   0x5   : > { %p29_p2 = scmp.eq.s32.totalorder %s1281_s17, 0  ;;  %p1135_p4 = scmp.ge.s32.totalorder %s1281_s17, 2 }
   0x6   : > { %s1334_s22 = scalar_select %p19_p0, %s1277_s16, %s21_s21  }
   0x7   : > { %p30_p3 = por %p29_p2, %p28_p1  ;;  %152 = sbr.rel (%p1135_p4) target bundleno = 53 (0x35), region = 28 }
   0xc   : > { %155 = sbr.rel (!%p30_p3) target bundleno = 53 (0x35), region = 32  ;;  %s157_s23 = sand.u32 (%p30_p3), 1, %s1277_s16  }
   0xd   : > { %s1231_s24 = smul.u32 (%p30_p3), 72, %s1281_s17 }
   0xe   : > { %s1230_s25 = smul.u32 (%p30_p3), 288, %s157_s23 }
   0xf   : > { %s1342_s28 = scalar_lea.vmem (%p30_p3), %s1810_s0, %s1231_s24 }
  0x10   : > { %v179_v0 = vld [vmem:[%s1342_s28] sm:$0xff] (%p30_p3)   ;;  %v183_v1 = vld [vmem:[%s1342_s28 + $0x8] sm:$0xff] (%p30_p3)   ;;  %v187_v2 = vld [vmem:[%s1342_s28 + $0x10] sm:$0xff] (%p30_p3)   ;;  %s1347_s29 = scalar_lea.vmem (%p30_p3), [#allocation2], %s1230_s25 }
  0x11   : > { %180 = vst [vmem:[%s1347_s29] sm:$0xff] %v179_v0   ;;  %v191_v3 = vld [vmem:[%s1342_s28 + $0x18] sm:$0xff]   ;;  %v195_v4 = vld [vmem:[%s1342_s28 + $0x20] sm:$0xff]   ;;  %v199_v5 = vld [vmem:[%s1342_s28 + $0x28] sm:$0xff]  }
  0x12   : > { %184 = vst [vmem:[%s1347_s29 + $0x8] sm:$0xff] %v183_v1   ;;  %v203_v6 = vld [vmem:[%s1342_s28 + $0x30] sm:$0xff]   ;;  %v207_v7 = vld [vmem:[%s1342_s28 + $0x38] sm:$0xff]   ;;  %v211_v8 = vld [vmem:[%s1342_s28 + $0x40] sm:$0xff]  }
  0x13   : > { %188 = vst [vmem:[%s1347_s29 + $0x10] sm:$0xff] %v187_v2   ;;  %v215_v9 = vld [vmem:[%s1342_s28 + $0x90] sm:$0xff]   ;;  %v219_v10 = vld [vmem:[%s1342_s28 + $0x98] sm:$0xff]   ;;  %v223_v11 = vld [vmem:[%s1342_s28 + $0xa0] sm:$0xff]  }
  0x14   : > { %192 = vst [vmem:[%s1347_s29 + $0x18] sm:$0xff] %v191_v3   ;;  %v227_v12 = vld [vmem:[%s1342_s28 + $0xa8] sm:$0xff]   ;;  %v231_v13 = vld [vmem:[%s1342_s28 + $0xb0] sm:$0xff]   ;;  %v235_v14 = vld [vmem:[%s1342_s28 + $0xb8] sm:$0xff]  }
  0x15   : > { %196 = vst [vmem:[%s1347_s29 + $0x20] sm:$0xff] %v195_v4   ;;  %v239_v15 = vld [vmem:[%s1342_s28 + $0xc0] sm:$0xff]   ;;  %v243_v16 = vld [vmem:[%s1342_s28 + $0xc8] sm:$0xff]   ;;  %v247_v17 = vld [vmem:[%s1342_s28 + $0xd0] sm:$0xff]  }
  0x16   : > { %200 = vst [vmem:[%s1347_s29 + $0x28] sm:$0xff] %v199_v5   ;;  %v251_v18 = vld [vmem:[%s1342_s28 + $0x120] sm:$0xff]   ;;  %v255_v19 = vld [vmem:[%s1342_s28 + $0x128] sm:$0xff]   ;;  %v259_v20 = vld [vmem:[%s1342_s28 + $0x130] sm:$0xff]  }
  0x17   : > { %204 = vst [vmem:[%s1347_s29 + $0x30] sm:$0xff] %v203_v6   ;;  %v263_v21 = vld [vmem:[%s1342_s28 + $0x138] sm:$0xff]   ;;  %v267_v22 = vld [vmem:[%s1342_s28 + $0x140] sm:$0xff]   ;;  %v271_v23 = vld [vmem:[%s1342_s28 + $0x148] sm:$0xff]  }
  0x18   : > { %208 = vst [vmem:[%s1347_s29 + $0x38] sm:$0xff] %v207_v7   ;;  %v275_v24 = vld [vmem:[%s1342_s28 + $0x150] sm:$0xff]   ;;  %v279_v25 = vld [vmem:[%s1342_s28 + $0x158] sm:$0xff]   ;;  %v283_v26 = vld [vmem:[%s1342_s28 + $0x160] sm:$0xff]  }
  0x19   : > { %212 = vst [vmem:[%s1347_s29 + $0x40] sm:$0xff] %v211_v8   ;;  %v287_v27 = vld [vmem:[%s1342_s28 + $0x1b0] sm:$0xff]   ;;  %v291_v28 = vld [vmem:[%s1342_s28 + $0x1b8] sm:$0xff]   ;;  %v295_v29 = vld [vmem:[%s1342_s28 + $0x1c0] sm:$0xff]  }
  0x1a   : > { %216 = vst [vmem:[%s1347_s29 + $0x48] sm:$0xff] %v215_v9   ;;  %v299_v30 = vld [vmem:[%s1342_s28 + $0x1c8] sm:$0xff]   ;;  %v303_v31 = vld [vmem:[%s1342_s28 + $0x1d0] sm:$0xff]   ;;  %v307_v32 = vld [vmem:[%s1342_s28 + $0x1d8] sm:$0xff]  }
  0x1b   : > { %220 = vst [vmem:[%s1347_s29 + $0x50] sm:$0xff] %v219_v10   ;;  %v311_v33 = vld [vmem:[%s1342_s28 + $0x1e0] sm:$0xff]   ;;  %v315_v34 = vld [vmem:[%s1342_s28 + $0x1e8] sm:$0xff]   ;;  %v319_v35 = vld [vmem:[%s1342_s28 + $0x1f0] sm:$0xff]  }
  0x1c   : > { %224 = vst [vmem:[%s1347_s29 + $0x58] sm:$0xff] %v223_v11  }
  0x1d   : > { %228 = vst [vmem:[%s1347_s29 + $0x60] sm:$0xff] %v227_v12  }
  0x1e   : > { %232 = vst [vmem:[%s1347_s29 + $0x68] sm:$0xff] %v231_v13  }
  0x1f   : > { %236 = vst [vmem:[%s1347_s29 + $0x70] sm:$0xff] %v235_v14  }
  0x20   : > { %240 = vst [vmem:[%s1347_s29 + $0x78] sm:$0xff] %v239_v15  }
  0x21   : > { %244 = vst [vmem:[%s1347_s29 + $0x80] sm:$0xff] %v243_v16  }
  0x22   : > { %248 = vst [vmem:[%s1347_s29 + $0x88] sm:$0xff] %v247_v17  }
  0x23   : > { %252 = vst [vmem:[%s1347_s29 + $0x90] sm:$0xff] %v251_v18  }
  0x24   : > { %256 = vst [vmem:[%s1347_s29 + $0x98] sm:$0xff] %v255_v19  }
  0x25   : > { %260 = vst [vmem:[%s1347_s29 + $0xa0] sm:$0xff] %v259_v20  }
  0x26   : > { %264 = vst [vmem:[%s1347_s29 + $0xa8] sm:$0xff] %v263_v21  }
  0x27   : > { %268 = vst [vmem:[%s1347_s29 + $0xb0] sm:$0xff] %v267_v22  }
  0x28   : > { %272 = vst [vmem:[%s1347_s29 + $0xb8] sm:$0xff] %v271_v23  }
  0x29   : > { %276 = vst [vmem:[%s1347_s29 + $0xc0] sm:$0xff] %v275_v24  }
  0x2a   : > { %280 = vst [vmem:[%s1347_s29 + $0xc8] sm:$0xff] %v279_v25  }
  0x2b   : > { %284 = vst [vmem:[%s1347_s29 + $0xd0] sm:$0xff] %v283_v26  }
  0x2c   : > { %288 = vst [vmem:[%s1347_s29 + $0xd8] sm:$0xff] %v287_v27  }
  0x2d   : > { %292 = vst [vmem:[%s1347_s29 + $0xe0] sm:$0xff] %v291_v28  }
  0x2e   : > { %296 = vst [vmem:[%s1347_s29 + $0xe8] sm:$0xff] %v295_v29  }
  0x2f   : > { %300 = vst [vmem:[%s1347_s29 + $0xf0] sm:$0xff] %v299_v30  }
  0x30   : > { %304 = vst [vmem:[%s1347_s29 + $0xf8] sm:$0xff] %v303_v31  }
  0x31   : > { %308 = vst [vmem:[%s1347_s29 + $0x100] sm:$0xff] %v307_v32  }
  0x32   : > { %312 = vst [vmem:[%s1347_s29 + $0x108] sm:$0xff] %v311_v33  }
  0x33   : > { %316 = vst [vmem:[%s1347_s29 + $0x110] sm:$0xff] %v315_v34  }
  0x34   : > { %320 = vst [vmem:[%s1347_s29 + $0x118] sm:$0xff] %v319_v35  }
  0x35 PF: > { %p1137_p5 = scmp.ge.s32.totalorder %s1281_s17, 1  ;;  %p489_p6 = scmp.lt.s32.totalorder %s1281_s17, 3 }
  0x37   : > { %p490_p7 = pnand %p1137_p5, %p489_p6 }
  0x38   : > { %s496_s30 = sand.u32 (!%p490_p7), 1, %s1273_s15   ;;  %p1772_p8 = scmp.lt.s32.totalorder (!%p490_p7), %s1132_s18, 1 }
  0x39   : > { %493 = sbr.rel (%p490_p7) target bundleno = 157 (0x9d), region = 73 }
  0x3a   : > { %s1232_s9 = smul.u32 (!%p490_p7), 288, %s496_s30 }
  0x3c   : > { %s1435_s14 = scalar_lea.vmem (!%p490_p7), [#allocation2], %s1232_s9 }
  0x3e   : > { %v542_v36 = vld [vmem:[%s1811_s1] sm:$0x1]  ;;  %v1148_v37 = vld [vmem:[%s1811_s1 + $0x1] sm:$0x1]  ;;  %v1149_v40 = vld [vmem:[%s1811_s1 + $0x2] sm:$0x1] }
  0x3f   : > { %v543_v38 = vunpack.c.l.bf16 %v542_v36  ;;  %v580_v39 = vunpack.c.l.bf16 %v1148_v37  ;;  %v1433_v41 = vld [vmem:[%s1811_s1 + $0x3] sm:$0x1]  ;;  %v1445_v45 = vld [vmem:[%s1811_s1 + $0x4] sm:$0x1]  ;;  %v1448_v46 = vld [vmem:[%s1435_s14 + $0x8] sm:$0xf]  ;;  %v616_v49 = vunpack.c.l.bf16 %v1149_v40 }
  0x40   : > { %v1438_v42 = vld [vmem:[%s1435_s14] sm:$0xf]  ;;  %v1451_v47 = vld [vmem:[%s1435_s14 + $0x10] sm:$0xf]  ;;  %v1454_v48 = vld [vmem:[%s1435_s14 + $0x18] sm:$0xf]  ;;  %v535_v57 = vunpack.c.l.bf16 %v1448_v46  ;;  %v710_v63 = vunpack.c.l.bf16 %v1433_v41  ;;  %v747_v4 = vunpack.c.l.bf16 %v1445_v45 }
  0x41   : > { %v544_v43 = vperm.slane %v543_v38, 0  ;;  %v1440_v44 = vperm.slane %v580_v39, 0  ;;  %v1457_v50 = vld [vmem:[%s1435_s14 + $0x20] sm:$0xf]  ;;  %v1460_v51 = vld [vmem:[%s1435_s14 + $0x28] sm:$0xf]  ;;  %v534_v54 = vunpack.c.l.bf16 %v1438_v42  ;;  %v536_v58 = vunpack.c.l.bf16 %v1451_v47 }
  0x42   : > { %v1463_v52 = vld [vmem:[%s1435_s14 + $0x30] sm:$0xf]  ;;  %v1466_v53 = vld [vmem:[%s1435_s14 + $0x38] sm:$0xf]  ;;  %v1140_v55 = vld [vmem:[%s1435_s14 + $0x48] sm:$0xf]  ;;  %v537_v59 = vunpack.c.l.bf16 %v1454_v48  ;;  %v538_v0 = vunpack.c.l.bf16 %v1457_v50  ;;  %v539_v1 = vunpack.c.l.bf16 %v1460_v51 }
  0x43   : > { %v1141_v56 = vld [vmem:[%s1435_s14 + $0x50] sm:$0xf]  ;;  %v1142_v60 = vld [vmem:[%s1435_s14 + $0x58] sm:$0xf]  ;;  %v1143_v61 = vld [vmem:[%s1435_s14 + $0x60] sm:$0xf]  ;;  %v540_v5 = vunpack.c.l.bf16 %v1463_v52  ;;  %v541_v6 = vunpack.c.l.bf16 %v1466_v53  ;;  %v570_v9 = vunpack.c.l.bf16 %v1140_v55  ;;  %v545_v11 = vmul.f32 %v544_v43, %v534_v54 }
  0x44   : > { %v1144_v62 = vld [vmem:[%s1435_s14 + $0x68] sm:$0xf]  ;;  %v1145_v2 = vld [vmem:[%s1435_s14 + $0x70] sm:$0xf]  ;;  %v1481_v3 = vperm.slane %v616_v49, 0  ;;  %v571_v10 = vunpack.c.l.bf16 %v1141_v56  ;;  %v572_v12 = vunpack.c.l.bf16 %v1142_v60  ;;  %v573_v13 = vunpack.c.l.bf16 %v1143_v61  ;;  %s1820_s18 = smov (!%p1772_p8, %s1132_s18), 1 }
  0x45   : > { %v1146_v7 = vld [vmem:[%s1435_s14 + $0x78] sm:$0xf]  ;;  %v1147_v8 = vld [vmem:[%s1435_s14 + $0x80] sm:$0xf]  ;;  %v574_v14 = vunpack.c.l.bf16 %v1144_v62  ;;  %v546_v15 = vmul.f32 %v544_v43, %v535_v57  ;;  %v1488_v16 = vmul.f32 %v544_v43, %v536_v58  ;;  %v1492_v17 = vmul.f32 %v544_v43, %v537_v59  ;;  %v598_v19 = vld [vmem:[%s1435_s14 + $0x4] sm:$0x1] }
  0x46   : > { %v575_v18 = vunpack.c.l.bf16 %v1145_v2  ;;  %v1495_v20 = vmul.f32 %v544_v43, %v538_v0  ;;  %v1497_v21 = vmul.f32 %v544_v43, %v539_v1  ;;  %v576_v22 = vunpack.c.l.bf16 %v1146_v7  ;;  %v599_v24 = vld [vmem:[%s1435_s14 + $0xc] sm:$0x1]  ;;  %v600_v25 = vld [vmem:[%s1435_s14 + $0x14] sm:$0x1]  ;;  %v601_v26 = vld [vmem:[%s1435_s14 + $0x1c] sm:$0x1] }
  0x47   : > { %v577_v23 = vunpack.c.l.bf16 %v1147_v8  ;;  %v1502_v27 = vmul.f32 %v544_v43, %v540_v5  ;;  %v1504_v28 = vmul.f32 %v544_v43, %v541_v6  ;;  %v582_v29 = vmul.f32 %v1440_v44, %v570_v9  ;;  %v602_v31 = vld [vmem:[%s1435_s14 + $0x24] sm:$0x1]  ;;  %v603_v32 = vld [vmem:[%s1435_s14 + $0x2c] sm:$0x1]  ;;  %v604_v36 = vld [vmem:[%s1435_s14 + $0x34] sm:$0x1] }
  0x48   : > { %v583_v30 = vmul.f32 %v1440_v44, %v571_v10  ;;  %v584_v33 = vmul.f32 %v1440_v44, %v572_v12  ;;  %v585_v34 = vmul.f32 %v1440_v44, %v573_v13  ;;  %v586_v35 = vmul.f32 %v1440_v44, %v574_v14  ;;  %v605_v37 = vld [vmem:[%s1435_s14 + $0x3c] sm:$0x1]  ;;  %s1206_s17 = sshll.u32 %s1820_s18, 5 }
  0x49   : > { %v606_v38 = vunpack.c.l.bf16 %v598_v19  ;;  %v587_v39 = vmul.f32 %v1440_v44, %v575_v18  ;;  %v607_v40 = vunpack.c.l.bf16 %v599_v24  ;;  %v608_v42 = vunpack.c.l.bf16 %v600_v25  ;;  %s525_s11 = scalar_lea.vmem %s1814_s4, %s1206_s17 }
  0x4a   : > { %v609_v43 = vunpack.c.l.bf16 %v601_v26  ;;  %vm650_vm0 = vcmask 1046528   ;;  %v588_v46 = vmul.f32 %v1440_v44, %v576_v22  ;;  %v589_v47 = vmul.f32 %v1440_v44, %v577_v23 }
  0x4b   : > { %v610_v49 = vunpack.c.l.bf16 %v602_v31  ;;  %v611_v50 = vunpack.c.l.bf16 %v603_v32  ;;  %v590_v51 = vadd.f32 %v582_v29, %v545_v11  ;;  %v1518_v52 = vadd.f32 %v583_v30, %v546_v15  ;;  %v1539_v29 = vld [vmem:[%s1435_s14 + $0x90] sm:$0xf] }
  0x4c   : > { %v612_v53 = vunpack.c.l.bf16 %v604_v36  ;;  %v613_v55 = vunpack.c.l.bf16 %v605_v37  ;;  %v618_v56 = vmul.f32 %v1481_v3, %v534_v54  ;;  %v619_v60 = vmul.f32 %v1481_v3, %v606_v38  ;;  %v1546_v37 = vld [vmem:[%s1435_s14 + $0x98] sm:$0xf] }
  0x4d   : > { %v620_v61 = vmul.f32 %v1481_v3, %v535_v57  ;;  %v621_v62 = vmul.f32 %v1481_v3, %v607_v40  ;;  %v622_v2 = vmul.f32 %v1481_v3, %v536_v58  ;;  %v623_v7 = vmul.f32 %v1481_v3, %v608_v42 }
  0x4e   : > { %v624_v44 = vmul.f32 %v1481_v3, %v537_v59  ;;  %v625_v8 = vmul.f32 %v1481_v3, %v609_v43  ;;  %v626_v9 = vmul.f32 %v1481_v3, %v538_v0  ;;  %v627_v54 = vmul.f32 %v1481_v3, %v610_v49  ;;  %v1553_v49 = vld [vmem:[%s1435_s14 + $0xa0] sm:$0xf] }
  0x4f   : > { %v628_v10 = vmul.f32 %v1481_v3, %v539_v1  ;;  %v629_v57 = vmul.f32 %v1481_v3, %v611_v50  ;;  %v630_v11 = vmul.f32 %v1481_v3, %v540_v5  ;;  %v631_v58 = vmul.f32 %v1481_v3, %v612_v53 }
  0x50   : > { %v632_v12 = vmul.f32 %v1481_v3, %v541_v6  ;;  %v633_v48 = vmul.f32 %v1481_v3, %v613_v55  ;;  %v651_v13 = vrot.slane %v618_v56, 1  ;;  %v652_v59 = vrot.slane %v619_v60, 1 }
  0x51   : > { %v654_v14 = vrot.slane %v620_v61, 1  ;;  %v655_v15 = vrot.slane %v621_v62, 1  ;;  %v657_v0 = vrot.slane %v622_v2, 1  ;;  %v658_v18 = vrot.slane %v623_v7, 1  ;;  %v1159_v7 = vld [vmem:[%s1435_s14 + $0xd8] sm:$0xf] }
  0x52   : > { %v660_v19 = vrot.slane %v624_v44, 1  ;;  %v661_v1 = vrot.slane %v625_v8, 1  ;;  %v663_v22 = vrot.slane %v626_v9, 1  ;;  %v664_v23 = vrot.slane %v627_v54, 1 }
  0x53   : > { %v666_v24 = vrot.slane %v628_v10, 1  ;;  %v667_v5 = vrot.slane %v629_v57, 1  ;;  %v669_v25 = vrot.slane %v630_v11, 1  ;;  %v670_v6 = vrot.slane %v631_v58, 1  ;;  %v1160_v11 = vld [vmem:[%s1435_s14 + $0xe0] sm:$0xf] }
  0x54   : > { %v672_v3 = vrot.slane %v632_v12, 1  ;;  %v673_v26 = vrot.slane %v633_v48, 1  ;;  %v592_v30 = vadd.f32 %v584_v33, %v1488_v16  ;;  %v593_v31 = vadd.f32 %v585_v34, %v1492_v17  ;;  %v1556_v16 = vld [vmem:[%s1435_s14 + $0xa8] sm:$0xf]  ;;  %v1559_v17 = vld [vmem:[%s1435_s14 + $0xb0] sm:$0xf] }
  0x55   : > { %v594_v32 = vadd.f32 %v586_v35, %v1495_v20  ;;  %v653_v36 = vsel %vm650_vm0, %v651_v13, %v652_v59  ;;  %v595_v38 = vadd.f32 %v587_v39, %v1497_v21  ;;  %v596_v40 = vadd.f32 %v588_v46, %v1502_v27  ;;  %v1565_v35 = vld [vmem:[%s1435_s14 + $0xb8] sm:$0xf]  ;;  %v1568_v21 = vld [vmem:[%s1435_s14 + $0xc0] sm:$0xf]  ;;  %v1571_v27 = vld [vmem:[%s1435_s14 + $0xc8] sm:$0xf] }
  0x56   : > { %v597_v42 = vadd.f32 %v589_v47, %v1504_v28  ;;  %v656_v43 = vsel %vm650_vm0, %v654_v14, %v655_v15  ;;  %v659_v20 = vsel %vm650_vm0, %v657_v0, %v658_v18  ;;  %v662_v33 = vsel %vm650_vm0, %v660_v19, %v661_v1  ;;  %v1161_v58 = vld [vmem:[%s1435_s14 + $0xe8] sm:$0xf]  ;;  %v1162_v12 = vld [vmem:[%s1435_s14 + $0xf0] sm:$0xf]  ;;  %v1163_v59 = vld [vmem:[%s1435_s14 + $0xf8] sm:$0xf] }
  0x57   : > { %v665_v34 = vsel %vm650_vm0, %v663_v22, %v664_v23  ;;  %v700_v28 = vunpack.c.l.bf16 %v1539_v29  ;;  %v668_v39 = vsel %vm650_vm0, %v666_v24, %v667_v5  ;;  %v671_v46 = vsel %vm650_vm0, %v669_v25, %v670_v6  ;;  %v1164_v14 = vld [vmem:[%s1435_s14 + $0x100] sm:$0xf]  ;;  %v1165_v15 = vld [vmem:[%s1435_s14 + $0x108] sm:$0xf]  ;;  %v1166_v23 = vld [vmem:[%s1435_s14 + $0x110] sm:$0xf] }
  0x58   : > { %v674_v47 = vsel %vm650_vm0, %v672_v3, %v673_v26  ;;  %v683_v50 = vadd.f32 %v653_v36, %v590_v51  ;;  %v701_v53 = vunpack.c.l.bf16 %v1546_v37  ;;  %v702_v55 = vunpack.c.l.bf16 %v1553_v49 }
  0x59   : > { %v703_v56 = vunpack.c.l.bf16 %v1556_v16  ;;  %v711_v60 = vperm.slane %v710_v63, 0  ;;  %v704_v61 = vunpack.c.l.bf16 %v1559_v17  ;;  %v705_v62 = vunpack.c.l.bf16 %v1565_v35 }
  0x5a   : > { %v706_v2 = vunpack.c.l.bf16 %v1568_v21  ;;  %v707_v51 = vunpack.c.l.bf16 %v1571_v27  ;;  %v684_v44 = vadd.f32 %v656_v43, %v1518_v52  ;;  %v685_v8 = vadd.f32 %v659_v20, %v592_v30  ;;  %v1169_v43 = vld [vmem:[%s1435_s14 + $0x9c] sm:$0x1] }
  0x5b   : > { %v686_v9 = vadd.f32 %v662_v33, %v593_v31  ;;  %v712_v41 = vmul.f32 %v711_v60, %v700_v28  ;;  %v687_v63 = vadd.f32 %v665_v34, %v594_v32  ;;  %v688_v54 = vadd.f32 %v668_v39, %v595_v38 }
  0x5c   : > { %v689_v10 = vadd.f32 %v671_v46, %v596_v40  ;;  %v690_v57 = vadd.f32 %v674_v47, %v597_v42  ;;  %v713_v48 = vmul.f32 %v711_v60, %v701_v53  ;;  %v714_v52 = vmul.f32 %v711_v60, %v702_v55  ;;  %v1168_v42 = vld [vmem:[%s1435_s14 + $0x94] sm:$0x1]  ;;  %v1170_v46 = vld [vmem:[%s1435_s14 + $0xa4] sm:$0x1]  ;;  %v1171_v47 = vld [vmem:[%s1435_s14 + $0xac] sm:$0x1] }
  0x5d   : > { %v715_v13 = vmul.f32 %v711_v60, %v703_v56  ;;  %v737_v0 = vunpack.c.l.bf16 %v1159_v7  ;;  %v716_v18 = vmul.f32 %v711_v60, %v704_v61  ;;  %v717_v19 = vmul.f32 %v711_v60, %v705_v62 }
  0x5e   : > { %v718_v1 = vmul.f32 %v711_v60, %v706_v2  ;;  %v719_v22 = vmul.f32 %v711_v60, %v707_v51  ;;  %v720_v24 = vadd.f32 %v712_v41, %v683_v50  ;;  %v738_v5 = vunpack.c.l.bf16 %v1160_v11  ;;  %v1172_v50 = vld [vmem:[%s1435_s14 + $0xb4] sm:$0x1] }
  0x5f   : > { %v739_v25 = vunpack.c.l.bf16 %v1161_v58  ;;  %v740_v6 = vunpack.c.l.bf16 %v1162_v12  ;;  %v741_v3 = vunpack.c.l.bf16 %v1163_v59  ;;  %v742_v26 = vunpack.c.l.bf16 %v1164_v14 }
  0x60   : > { %v743_v30 = vunpack.c.l.bf16 %v1165_v15  ;;  %v748_v31 = vperm.slane %v747_v4, 0  ;;  %v721_v32 = vadd.f32 %v713_v48, %v684_v44  ;;  %v722_v36 = vadd.f32 %v714_v52, %v685_v8  ;;  %v1173_v44 = vld [vmem:[%s1435_s14 + $0xbc] sm:$0x1]  ;;  %v1174_v8 = vld [vmem:[%s1435_s14 + $0xc4] sm:$0x1] }
  0x61   : > { %v723_v38 = vadd.f32 %v715_v13, %v686_v9  ;;  %v744_v40 = vunpack.c.l.bf16 %v1166_v23  ;;  %v724_v20 = vadd.f32 %v716_v18, %v687_v63  ;;  %v725_v33 = vadd.f32 %v717_v19, %v688_v54  ;;  %v1176_v9 = vld [vmem:[%s1811_s1 + $0x5] sm:$0x1]  ;;  %v1175_v48 = vld [vmem:[%s1435_s14 + $0xcc] sm:$0x1]  ;;  %v1625_v15 = vld [vmem:[%s1435_s14 + $0x8] sm:$0xf] }
  0x62   : > { %v726_v34 = vadd.f32 %v718_v1, %v689_v10  ;;  %v727_v39 = vadd.f32 %v719_v22, %v690_v57  ;;  %v749_v60 = vmul.f32 %v748_v31, %v737_v0  ;;  %v750_v7 = vmul.f32 %v748_v31, %v738_v5  ;;  %v1628_v0 = vld [vmem:[%s1435_s14 + $0x10] sm:$0xf]  ;;  %v1639_v23 = vld [vmem:[%s1435_s14 + $0x18] sm:$0xf]  ;;  %v1642_v5 = vld [vmem:[%s1435_s14 + $0x20] sm:$0xf] }
  0x63   : > { %v751_v45 = vmul.f32 %v748_v31, %v739_v25  ;;  %v752_v4 = vmul.f32 %v748_v31, %v740_v6  ;;  %v753_v41 = vmul.f32 %v748_v31, %v741_v3  ;;  %v754_v63 = vmul.f32 %v748_v31, %v742_v26 }
  0x64   : > { %v755_v54 = vmul.f32 %v748_v31, %v743_v30  ;;  %v773_v10 = vunpack.c.l.bf16 %v1168_v42  ;;  %v756_v57 = vmul.f32 %v748_v31, %v744_v40  ;;  %v774_v11 = vunpack.c.l.bf16 %v1169_v43  ;;  %v1651_v30 = vld [vmem:[%s1435_s14 + $0x28] sm:$0xf] }
  0x65   : > { %v775_v58 = vunpack.c.l.bf16 %v1170_v46  ;;  %v776_v12 = vunpack.c.l.bf16 %v1171_v47  ;;  %v777_v52 = vunpack.c.l.bf16 %v1172_v50  ;;  %v778_v13 = vunpack.c.l.bf16 %v1173_v44 }
  0x66   : > { %v779_v59 = vunpack.c.l.bf16 %v1174_v8  ;;  %v783_v14 = vunpack.c.l.bf16 %v1176_v9  ;;  %v1630_v18 = vadd.f32 %v749_v60, %v720_v24  ;;  %v1632_v19 = vadd.f32 %v750_v7, %v721_v32  ;;  %v1654_v24 = vld [vmem:[%s1435_s14 + $0x30] sm:$0xf] }
  0x67   : > { %v1634_v1 = vadd.f32 %v751_v45, %v722_v36  ;;  %v1636_v22 = vadd.f32 %v752_v4, %v723_v38  ;;  %v1644_v25 = vadd.f32 %v753_v41, %v724_v20  ;;  %v1646_v6 = vadd.f32 %v754_v63, %v725_v33  ;;  %v1185_v45 = vld [vmem:[%s1811_s1 + $0x6] sm:$0x1] }
  0x68   : > { %v1648_v3 = vadd.f32 %v755_v54, %v726_v34  ;;  %v784_v26 = vperm.slane %v783_v14, 0  ;;  %v1656_v31 = vadd.f32 %v756_v57, %v727_v39  ;;  %v780_v32 = vunpack.c.l.bf16 %v1175_v48  ;;  %v1699_v48 = vld [vmem:[%s1435_s14 + $0x60] sm:$0xf] }
  0x69   : > { %v866_v36 = vunpack.c.l.bf16 %v1625_v15  ;;  %v867_v38 = vunpack.c.l.bf16 %v1628_v0  ;;  %v868_v33 = vunpack.c.l.bf16 %v1639_v23  ;;  %v869_v34 = vunpack.c.l.bf16 %v1642_v5 }
  0x6a   : > { %v785_v40 = vmul.f32 %v784_v26, %v700_v28  ;;  %v786_v42 = vmul.f32 %v784_v26, %v773_v10  ;;  %v787_v43 = vmul.f32 %v784_v26, %v701_v53  ;;  %v788_v20 = vmul.f32 %v784_v26, %v774_v11  ;;  %v1687_v10 = vld [vmem:[%s1435_s14 + $0x40] sm:$0xf] }
  0x6b   : > { %v870_v39 = vunpack.c.l.bf16 %v1651_v30  ;;  %v871_v46 = vunpack.c.l.bf16 %v1654_v24  ;;  %v789_v47 = vmul.f32 %v784_v26, %v702_v55  ;;  %v790_v50 = vmul.f32 %v784_v26, %v775_v58 }
  0x6c   : > { %v791_v29 = vmul.f32 %v784_v26, %v703_v56  ;;  %v792_v28 = vmul.f32 %v784_v26, %v776_v12  ;;  %v793_v37 = vmul.f32 %v784_v26, %v704_v61  ;;  %v794_v53 = vmul.f32 %v784_v26, %v777_v52  ;;  %v1680_v56 = vld [vmem:[%s1435_s14 + $0x38] sm:$0xf] }
  0x6d   : > { %v795_v60 = vmul.f32 %v784_v26, %v705_v62  ;;  %v796_v7 = vmul.f32 %v784_v26, %v778_v13  ;;  %v817_v49 = vrot.slane %v785_v40, 1  ;;  %v818_v55 = vrot.slane %v786_v42, 1  ;;  %v1696_v12 = vld [vmem:[%s1435_s14 + $0x58] sm:$0xf] }
  0x6e   : > { %v820_v4 = vrot.slane %v787_v43, 1  ;;  %v821_v16 = vrot.slane %v788_v20, 1  ;;  %v797_v17 = vmul.f32 %v784_v26, %v706_v2  ;;  %v798_v61 = vmul.f32 %v784_v26, %v779_v59  ;;  %v1691_v2 = vld [vmem:[%s1435_s14 + $0x50] sm:$0xf] }
  0x6f   : > { %v799_v35 = vmul.f32 %v784_v26, %v707_v51  ;;  %v800_v62 = vmul.f32 %v784_v26, %v780_v32  ;;  %v823_v44 = vrot.slane %v789_v47, 1  ;;  %v824_v8 = vrot.slane %v790_v50, 1  ;;  %v1189_v26 = vld [vmem:[%s1435_s14 + $0x68] sm:$0xf] }
  0x70   : > { %v826_v9 = vrot.slane %v791_v29, 1  ;;  %v827_v41 = vrot.slane %v792_v28, 1  ;;  %v829_v63 = vrot.slane %v793_v37, 1  ;;  %v830_v54 = vrot.slane %v794_v53, 1 }
  0x71   : > { %v872_v57 = vunpack.c.l.bf16 %v1680_v56  ;;  %v876_v21 = vunpack.c.l.bf16 %v1185_v45  ;;  %v819_v27 = vsel %vm650_vm0, %v817_v49, %v818_v55  ;;  %v822_v51 = vsel %vm650_vm0, %v820_v4, %v821_v16  ;;  %v1190_v4 = vld [vmem:[%s1435_s14 + $0x70] sm:$0xf] }
  0x72   : > { %v832_v11 = vrot.slane %v795_v60, 1  ;;  %v833_v58 = vrot.slane %v796_v7, 1  ;;  %v835_v52 = vrot.slane %v797_v17, 1  ;;  %v836_v13 = vrot.slane %v798_v61, 1  ;;  %v1191_v61 = vld [vmem:[%s1435_s14 + $0x78] sm:$0xf] }
  0x73   : > { %v838_v59 = vrot.slane %v799_v35, 1  ;;  %v839_v14 = vrot.slane %v800_v62, 1  ;;  %v825_v32 = vsel %vm650_vm0, %v823_v44, %v824_v8  ;;  %v828_v40 = vsel %vm650_vm0, %v826_v9, %v827_v41  ;;  %v1192_v35 = vld [vmem:[%s1435_s14 + $0x80] sm:$0xf]  ;;  %v1193_v8 = vld [vmem:[%s1435_s14 + $0x88] sm:$0xf] }
  0x74   : > { %v873_v42 = vunpack.c.l.bf16 %v1687_v10  ;;  %v903_v43 = vunpack.c.l.bf16 %v1691_v2  ;;  %v831_v20 = vsel %vm650_vm0, %v829_v63, %v830_v54  ;;  %v877_v47 = vperm.slane %v876_v21, 0 }
  0x75   : > { %v904_v50 = vunpack.c.l.bf16 %v1696_v12  ;;  %v905_v29 = vunpack.c.l.bf16 %v1699_v48  ;;  %v834_v28 = vsel %vm650_vm0, %v832_v11, %v833_v58  ;;  %v849_v37 = vadd.f32 %v819_v27, %v1630_v18 }
  0x76   : > { %v850_v53 = vadd.f32 %v822_v51, %v1632_v19  ;;  %v906_v60 = vunpack.c.l.bf16 %v1189_v26  ;;  %v837_v7 = vsel %vm650_vm0, %v835_v52, %v836_v13  ;;  %v840_v45 = vsel %vm650_vm0, %v838_v59, %v839_v14  ;;  %v1195_v51 = vld [vmem:[%s1435_s14 + $0xc] sm:$0x1]  ;;  %v1196_v14 = vld [vmem:[%s1435_s14 + $0x14] sm:$0x1] }
  0x77   : > { %v851_v49 = vadd.f32 %v825_v32, %v1634_v1  ;;  %v852_v55 = vadd.f32 %v828_v40, %v1636_v22  ;;  %v853_v16 = vadd.f32 %v831_v20, %v1644_v25  ;;  %v878_v17 = vmul.f32 %v877_v47, %v866_v36  ;;  %v1194_v1 = vld [vmem:[%s1811_s1 + $0x7] sm:$0x1]  ;;  %v1197_v40 = vld [vmem:[%s1435_s14 + $0x1c] sm:$0x1]  ;;  %v1198_v20 = vld [vmem:[%s1435_s14 + $0x24] sm:$0x1] }
  0x78   : > { %v879_v18 = vmul.f32 %v877_v47, %v867_v38  ;;  %v880_v19 = vmul.f32 %v877_v47, %v868_v33  ;;  %v854_v22 = vadd.f32 %v834_v28, %v1646_v6  ;;  %v881_v25 = vmul.f32 %v877_v47, %v869_v34 }
  0x79   : > { %v882_v62 = vmul.f32 %v877_v47, %v870_v39  ;;  %v883_v44 = vmul.f32 %v877_v47, %v871_v46  ;;  %v855_v9 = vadd.f32 %v837_v7, %v1648_v3  ;;  %v856_v41 = vadd.f32 %v840_v45, %v1656_v31  ;;  %v1203_v3 = vld [vmem:[%s1811_s1 + $0x8] sm:$0x1] }
  0x7a   : > { %v884_v63 = vmul.f32 %v877_v47, %v872_v57  ;;  %v885_v6 = vmul.f32 %v877_v47, %v873_v42  ;;  %v907_v54 = vunpack.c.l.bf16 %v1190_v4  ;;  %v908_v21 = vunpack.c.l.bf16 %v1191_v61  ;;  %v1199_v47 = vld [vmem:[%s1435_s14 + $0x2c] sm:$0x1]  ;;  %v1200_v4 = vld [vmem:[%s1435_s14 + $0x34] sm:$0x1] }
  0x7b   : > { %v909_v2 = vunpack.c.l.bf16 %v1192_v35  ;;  %v913_v27 = vunpack.c.l.bf16 %v1194_v1  ;;  %v886_v31 = vadd.f32 %v878_v17, %v849_v37  ;;  %v887_v11 = vadd.f32 %v879_v18, %v850_v53  ;;  %v1202_v17 = vld [vmem:[%s1435_s14 + $0x44] sm:$0x1] }
  0x7c   : > { %v888_v58 = vadd.f32 %v880_v19, %v851_v49  ;;  %v910_v12 = vunpack.c.l.bf16 %v1193_v8  ;;  %v889_v48 = vadd.f32 %v881_v25, %v852_v55  ;;  %v890_v52 = vadd.f32 %v882_v62, %v853_v16  ;;  %v1201_v55 = vld [vmem:[%s1435_s14 + $0x3c] sm:$0x1] }
  0x7d   : > { %v891_v13 = vadd.f32 %v883_v44, %v854_v22  ;;  %v914_v59 = vperm.slane %v913_v27, 0  ;;  %v892_v26 = vadd.f32 %v884_v63, %v855_v9  ;;  %v893_v32 = vadd.f32 %v885_v6, %v856_v41 }
  0x7e   : > { %v939_v28 = vunpack.c.l.bf16 %v1195_v51  ;;  %v949_v7 = vunpack.c.l.bf16 %v1203_v3  ;;  %v940_v35 = vunpack.c.l.bf16 %v1196_v14  ;;  %v941_v1 = vunpack.c.l.bf16 %v1197_v40  ;;  %v1257_v40 = vld [vmem:[%s1812_s2] ss:$0 sm:$0xff] }
  0x7f   : > { %v915_v45 = vmul.f32 %v914_v59, %v903_v43  ;;  %v916_v37 = vmul.f32 %v914_v59, %v904_v50  ;;  %v917_v53 = vmul.f32 %v914_v59, %v905_v29  ;;  %v918_v49 = vmul.f32 %v914_v59, %v906_v60 }
  0x80   : > { %v919_v16 = vmul.f32 %v914_v59, %v907_v54  ;;  %v920_v18 = vmul.f32 %v914_v59, %v908_v21  ;;  %v921_v19 = vmul.f32 %v914_v59, %v909_v2  ;;  %v922_v61 = vmul.f32 %v914_v59, %v910_v12 }
  0x81   : > { %v942_v22 = vunpack.c.l.bf16 %v1198_v20  ;;  %v943_v25 = vunpack.c.l.bf16 %v1199_v47  ;;  %v923_v62 = vadd.f32 %v915_v45, %v886_v31  ;;  %v944_v44 = vunpack.c.l.bf16 %v1200_v4  ;;  %v1258_v4 = vld [vmem:[%s1813_s3] ss:$0 sm:$0xff] }
  0x82   : > { %v945_v8 = vunpack.c.l.bf16 %v1201_v55  ;;  %v946_v9 = vunpack.c.l.bf16 %v1202_v17  ;;  %v924_v41 = vadd.f32 %v916_v37, %v887_v11  ;;  %v925_v43 = vadd.f32 %v917_v53, %v888_v58 }
  0x83   : > { %v926_v50 = vadd.f32 %v918_v49, %v889_v48  ;;  %v950_v29 = vperm.slane %v949_v7, 0  ;;  %v927_v60 = vadd.f32 %v919_v16, %v890_v52  ;;  %v928_v63 = vadd.f32 %v920_v18, %v891_v13 }
  0x84   : > { %v929_v6 = vadd.f32 %v921_v19, %v892_v26  ;;  %v930_v27 = vadd.f32 %v922_v61, %v893_v32 }
  0x85   : > { %v951_v54 = vmul.f32 %v950_v29, %v866_v36  ;;  %v952_v21 = vmul.f32 %v950_v29, %v939_v28  ;;  %v953_v2 = vmul.f32 %v950_v29, %v867_v38  ;;  %v954_v51 = vmul.f32 %v950_v29, %v940_v35 }
  0x86   : > { %v955_v3 = vmul.f32 %v950_v29, %v868_v33  ;;  %v956_v31 = vmul.f32 %v950_v29, %v941_v1  ;;  %v957_v11 = vmul.f32 %v950_v29, %v869_v34  ;;  %v958_v58 = vmul.f32 %v950_v29, %v942_v22 }
  0x87   : > { %v959_v12 = vmul.f32 %v950_v29, %v870_v39  ;;  %v960_v48 = vmul.f32 %v950_v29, %v943_v25  ;;  %v961_v15 = vmul.f32 %v950_v29, %v871_v46  ;;  %v962_v36 = vmul.f32 %v950_v29, %v944_v44 }
  0x88   : > { %v963_v0 = vmul.f32 %v950_v29, %v872_v57  ;;  %v964_v38 = vmul.f32 %v950_v29, %v945_v8  ;;  %v965_v23 = vmul.f32 %v950_v29, %v873_v42  ;;  %v966_v33 = vmul.f32 %v950_v29, %v946_v9 }
  0x89   : > { %v983_v5 = vrot.slane %v951_v54, 1  ;;  %v984_v34 = vrot.slane %v952_v21, 1  ;;  %v986_v52 = vrot.slane %v953_v2, 1  ;;  %v987_v13 = vrot.slane %v954_v51, 1 }
  0x8a   : > { %v989_v30 = vrot.slane %v955_v3, 1  ;;  %v990_v39 = vrot.slane %v956_v31, 1  ;;  %v992_v59 = vrot.slane %v957_v11, 1  ;;  %v993_v14 = vrot.slane %v958_v58, 1 }
  0x8b   : > { %v985_v24 = vsel %vm650_vm0, %v983_v5, %v984_v34  ;;  %v988_v46 = vsel %vm650_vm0, %v986_v52, %v987_v13  ;;  %v995_v56 = vrot.slane %v959_v12, 1  ;;  %v996_v10 = vrot.slane %v960_v48, 1 }
  0x8c   : > { %v991_v57 = vsel %vm650_vm0, %v989_v30, %v990_v39  ;;  %v994_v42 = vsel %vm650_vm0, %v992_v59, %v993_v14  ;;  %v998_v26 = vrot.slane %v961_v15, 1  ;;  %v999_v32 = vrot.slane %v962_v36, 1 }
  0x8d   : > { %v997_v20 = vsel %vm650_vm0, %v995_v56, %v996_v10  ;;  %v1001_v47 = vrot.slane %v963_v0, 1  ;;  %v1002_v28 = vrot.slane %v964_v38, 1  ;;  %v1004_v7 = vrot.slane %v965_v23, 1 }
  0x8e   : > { %v1000_v45 = vsel %vm650_vm0, %v998_v26, %v999_v32  ;;  %v1005_v37 = vrot.slane %v966_v33, 1  ;;  %v1015_v53 = vadd.f32 %v985_v24, %v923_v62  ;;  %v1016_v49 = vadd.f32 %v988_v46, %v924_v41 }
  0x8f   : > { %v1003_v55 = vsel %vm650_vm0, %v1001_v47, %v1002_v28  ;;  %v1017_v17 = vadd.f32 %v991_v57, %v925_v43  ;;  %v1018_v16 = vadd.f32 %v994_v42, %v926_v50  ;;  %v1019_v18 = vadd.f32 %v997_v20, %v927_v60 }
  0x90   : > { %v1006_v19 = vsel %vm650_vm0, %v1004_v7, %v1005_v37  ;;  %v1020_v61 = vadd.f32 %v1000_v45, %v928_v63  ;;  %v1021_v35 = vadd.f32 %v1003_v55, %v929_v6  ;;  %v1027_v1 = vmul.f32 %v1257_v40, %v1015_v53 }
  0x91   : > { %v1022_v22 = vadd.f32 %v1006_v19, %v930_v27  ;;  %v1028_v25 = vmul.f32 %v1257_v40, %v1016_v49  ;;  %v1029_v62 = vmul.f32 %v1257_v40, %v1017_v17  ;;  %v1030_v44 = vmul.f32 %v1257_v40, %v1018_v16 }
  0x92   : > { %v1031_v8 = vmul.f32 %v1257_v40, %v1019_v18  ;;  %v1032_v9 = vmul.f32 %v1257_v40, %v1020_v61  ;;  %v1033_v41 = vmul.f32 %v1257_v40, %v1021_v35  ;;  %v1039_v29 = vadd.f32 %v1258_v4, %v1027_v1 }
  0x93   : > { %v1034_v54 = vmul.f32 %v1257_v40, %v1022_v22  ;;  %v1040_v21 = vadd.f32 %v1258_v4, %v1028_v25  ;;  %v1041_v2 = vadd.f32 %v1258_v4, %v1029_v62  ;;  %v1042_v43 = vadd.f32 %v1258_v4, %v1030_v44 }
  0x94   : > { %v1043_v50 = vadd.f32 %v1258_v4, %v1031_v8  ;;  %v1044_v60 = vadd.f32 %v1258_v4, %v1032_v9  ;;  %v1045_v51 = vadd.f32 %v1258_v4, %v1033_v41  ;;  %v1047_v3 = vmax.f32 %v1039_v29, 0.0 }
  0x95   : > { %v1046_v63 = vadd.f32 %v1258_v4, %v1034_v54  ;;  %v1048_v6 = vmax.f32 %v1040_v21, 0.0  ;;  %v1049_v31 = vmax.f32 %v1041_v2, 0.0  ;;  %v1050_v27 = vmax.f32 %v1042_v43, 0.0 }
  0x96   : > { %v1051_v11 = vmax.f32 %v1043_v50, 0.0  ;;  %v1052_v58 = vmax.f32 %v1044_v60, 0.0  ;;  %v1053_v12 = vmax.f32 %v1045_v51, 0.0 }
  0x97   : > { %v1054_v48 = vmax.f32 %v1046_v63, 0.0  ;;  %v1210_v15 = vpack.c.bf16 %v1048_v6, %v1047_v3  ;;  %v1215_v36 = vpack.c.bf16 %v1050_v27, %v1049_v31 }
  0x98   : > { %v1220_v0 = vpack.c.bf16 %v1052_v58, %v1051_v11 }
  0x99   : > { %1211 = vst [vmem:[%s525_s11] sm:$0xff] %v1210_v15   ;;  %v1225_v38 = vpack.c.bf16 %v1054_v48, %v1053_v12 }
  0x9a   : > { %1227 = vst [vmem:[%s525_s11 + $0x8] sm:$0xff] %v1215_v36  }
  0x9b   : > { %1228 = vst [vmem:[%s525_s11 + $0x10] sm:$0xff] %v1220_v0  }
  0x9c   : > { %1229 = vst [vmem:[%s525_s11 + $0x18] sm:$0xff] %v1225_v38  }
  0x9d PF: > { %p11_p9 = scmp.ge.s32.totalorder %s1325_s19, 4   ;;  %s1816_s15 = smov %s1277_s16 }
  0x9e   : > { %s1817_s16 = smov %s1334_s22  ;;  %s1818_s17 = smov %s1325_s19 }
  0x9f   :  { %13 = sbr.rel (!%p11_p9) target bundleno = 2 (0x2), region = 125 }

// kernel: _lambda_.16
= control target key start
LH: loop header
LB: loop body
LE: loop exit
PB: predicated region body
PF: predicated region fallthrough
CT: control target
= control target key end

     0   :  { %s526_s1 = inlined_call_operand.vmem [shape: bf16[128,128], index: 1, kind: input, shape index: {}]   ;;  %s527_s2 = inlined_call_operand.vmem [shape: f32[1,128], index: 2, kind: input, shape index: {}]   ;;  %s528_s3 = inlined_call_operand.vmem [shape: f32[1,128], index: 3, kind: input, shape index: {}]   ;;  %s529_s0 = inlined_call_operand.vmem [shape: bf16[128,128], index: 0, kind: input, shape index: {}]   ;;  %s530_s4 = inlined_call_operand.vmem [shape: bf16[128,128], index: 4, kind: output, shape index: {}]  }
   0x1   :  { %v349_v0 = vld [vmem:[%s526_s1 + $0x38] sm:$0xff]  ;;  %v348_v1 = vld [vmem:[%s526_s1 + $0x30] sm:$0xff]  ;;  %v347_v2 = vld [vmem:[%s526_s1 + $0x28] sm:$0xff] }
   0x2   :  { %145 = vmatpush.bf16.msra.mxu0 %v349_v0  ;;  %397 = vmatpush.bf16.msra.mxu1 %v349_v0  ;;  %v346_v3 = vld [vmem:[%s526_s1 + $0x20] sm:$0xff]  ;;  %v345_v4 = vld [vmem:[%s526_s1 + $0x18] sm:$0xff]  ;;  %v344_v5 = vld [vmem:[%s526_s1 + $0x10] sm:$0xff] }
   0x3   :  { %398 = vmatpush.bf16.msra.mxu2 %v349_v0  ;;  %399 = vmatpush.bf16.msra.mxu3 %v349_v0  ;;  %v343_v6 = vld [vmem:[%s526_s1 + $0x8] sm:$0xff]  ;;  %v342_v7 = vld [vmem:[%s526_s1] sm:$0xff]  ;;  %v336_v9 = vld [vmem:[%s529_s0 + $0x10] sm:$0xff] }
   0x4   :  { %v334_v8 = vld [vmem:[%s529_s0] sm:$0xff]  ;;  %v340_v11 = vld [vmem:[%s529_s0 + $0x30] sm:$0xff]  ;;  %v335_v12 = vld [vmem:[%s529_s0 + $0x8] sm:$0xff] }
   0x5   :  { %v338_v10 = vld [vmem:[%s529_s0 + $0x20] sm:$0xff]  ;;  %v337_v13 = vld [vmem:[%s529_s0 + $0x18] sm:$0xff]  ;;  %v339_v14 = vld [vmem:[%s529_s0 + $0x28] sm:$0xff] }
   0x6   :  { %146 = vmatpush.bf16.msra.mxu0 %v348_v1  ;;  %400 = vmatpush.bf16.msra.mxu1 %v348_v1  ;;  %v341_v15 = vld [vmem:[%s529_s0 + $0x38] sm:$0xff]  ;;  %v421_v18 = vld [vmem:[%s527_s2] ss:$0 sm:$0xff] }
   0x7   :  { %401 = vmatpush.bf16.msra.mxu2 %v348_v1  ;;  %402 = vmatpush.bf16.msra.mxu3 %v348_v1  ;;  %v422_v20 = vld [vmem:[%s528_s3] ss:$0 sm:$0xff] }
   0xa   :  { %147 = vmatpush.bf16.msra.mxu0 %v347_v2  ;;  %403 = vmatpush.bf16.msra.mxu1 %v347_v2 }
   0xb   :  { %404 = vmatpush.bf16.msra.mxu2 %v347_v2  ;;  %405 = vmatpush.bf16.msra.mxu3 %v347_v2 }
   0xe   :  { %148 = vmatpush.bf16.msra.mxu0 %v346_v3  ;;  %406 = vmatpush.bf16.msra.mxu1 %v346_v3 }
   0xf   :  { %407 = vmatpush.bf16.msra.mxu2 %v346_v3  ;;  %408 = vmatpush.bf16.msra.mxu3 %v346_v3 }
  0x12   :  { %149 = vmatpush.bf16.msra.mxu0 %v345_v4  ;;  %409 = vmatpush.bf16.msra.mxu1 %v345_v4 }
  0x13   :  { %410 = vmatpush.bf16.msra.mxu2 %v345_v4  ;;  %411 = vmatpush.bf16.msra.mxu3 %v345_v4 }
  0x16   :  { %150 = vmatpush.bf16.msra.mxu0 %v344_v5  ;;  %412 = vmatpush.bf16.msra.mxu1 %v344_v5 }
  0x17   :  { %413 = vmatpush.bf16.msra.mxu2 %v344_v5  ;;  %414 = vmatpush.bf16.msra.mxu3 %v344_v5 }
  0x1a   :  { %151 = vmatpush.bf16.msra.mxu0 %v343_v6  ;;  %415 = vmatpush.bf16.msra.mxu1 %v343_v6 }
  0x1b   :  { %416 = vmatpush.bf16.msra.mxu2 %v343_v6  ;;  %417 = vmatpush.bf16.msra.mxu3 %v343_v6 }
  0x1e   :  { %152 = vmatpush.bf16.msra.mxu0 %v342_v7  ;;  %418 = vmatpush.bf16.msra.mxu1 %v342_v7 }
  0x1f   :  { %419 = vmatpush.bf16.msra.mxu2 %v342_v7  ;;  %420 = vmatpush.bf16.msra.mxu3 %v342_v7 }
  0x21   :  { %153 = vmatmul.bf16.vlgmr.msra.gmra.mxu0 %v334_v8  ;;  %163 = vmatmul.bf16.vlgmr.msra.gmra.mxu1 %v336_v9 }
  0x22   :  { %173 = vmatmul.bf16.vlgmr.msra.gmra.mxu2 %v338_v10  ;;  %183 = vmatmul.bf16.vlgmr.msra.gmra.mxu3 %v340_v11 }
  0x31   :  { %158 = vmatmul.bf16.gmra.mxu0 %v335_v12  ;;  %168 = vmatmul.bf16.gmra.mxu1 %v337_v13 }
  0x32   :  { %178 = vmatmul.bf16.gmra.mxu2 %v339_v14  ;;  %188 = vmatmul.bf16.gmra.mxu3 %v341_v15 }
  0x9e   :  { %v154_v16 = vpop.f32.mrf.mxu0  ;;  %v164_v17 = vpop.f32.mrf.mxu1 }
  0x9f   :  { %v198_v19 = vmul.f32 %v421_v18, %v154_v16  ;;  %v202_v21 = vmul.f32 %v421_v18, %v164_v17 }
  0xa1   :  { %v218_v28 = vadd.f32 %v422_v20, %v198_v19  ;;  %v222_v29 = vadd.f32 %v422_v20, %v202_v21 }
  0xa5   :  { %v174_v22 = vpop.f32.mrf.mxu2  ;;  %v184_v23 = vpop.f32.mrf.mxu3 }
  0xa6   :  { %v156_v24 = vpop.f32.mrf.mxu0  ;;  %v166_v25 = vpop.f32.mrf.mxu1  ;;  %v206_v34 = vmul.f32 %v421_v18, %v174_v22  ;;  %v210_v35 = vmul.f32 %v421_v18, %v184_v23 }
  0xa7   :  { %v199_v26 = vmul.f32 %v421_v18, %v156_v24  ;;  %v203_v27 = vmul.f32 %v421_v18, %v166_v25 }
  0xa8   :  { %v226_v42 = vadd.f32 %v422_v20, %v206_v34  ;;  %v230_v43 = vadd.f32 %v422_v20, %v210_v35 }
  0xa9   :  { %v219_v30 = vadd.f32 %v422_v20, %v199_v26  ;;  %v223_v31 = vadd.f32 %v422_v20, %v203_v27 }
  0xab   :  { %v353_v32 = vpack.c.bf16 %v219_v30, %v218_v28  ;;  %v363_v33 = vpack.c.bf16 %v223_v31, %v222_v29 }
  0xad   :  { %354 = vst [vmem:[%s530_s4] sm:$0xff] %v353_v32   ;;  %v176_v36 = vpop.f32.mrf.mxu2  ;;  %v186_v37 = vpop.f32.mrf.mxu3 }
  0xae   :  { %391 = vst [vmem:[%s530_s4 + $0x10] sm:$0xff] %v363_v33   ;;  %v207_v38 = vmul.f32 %v421_v18, %v176_v36  ;;  %v211_v39 = vmul.f32 %v421_v18, %v186_v37  ;;  %v159_v40 = vpop.f32.mrf.mxu0  ;;  %v169_v41 = vpop.f32.mrf.mxu1 }
  0xaf   :  { %v200_v48 = vmul.f32 %v421_v18, %v159_v40  ;;  %v204_v49 = vmul.f32 %v421_v18, %v169_v41 }
  0xb0   :  { %v227_v44 = vadd.f32 %v422_v20, %v207_v38  ;;  %v231_v45 = vadd.f32 %v422_v20, %v211_v39 }
  0xb1   :  { %v220_v56 = vadd.f32 %v422_v20, %v200_v48  ;;  %v224_v57 = vadd.f32 %v422_v20, %v204_v49 }
  0xb2   :  { %v373_v46 = vpack.c.bf16 %v227_v44, %v226_v42  ;;  %v383_v47 = vpack.c.bf16 %v231_v45, %v230_v43 }
  0xb4   :  { %393 = vst [vmem:[%s530_s4 + $0x20] sm:$0xff] %v373_v46  }
  0xb5   :  { %395 = vst [vmem:[%s530_s4 + $0x30] sm:$0xff] %v383_v47   ;;  %v179_v50 = vpop.f32.mrf.mxu2  ;;  %v189_v51 = vpop.f32.mrf.mxu3 }
  0xb6   :  { %v161_v52 = vpop.f32.mrf.mxu0  ;;  %v171_v53 = vpop.f32.mrf.mxu1  ;;  %v208_v62 = vmul.f32 %v421_v18, %v179_v50  ;;  %v212_v63 = vmul.f32 %v421_v18, %v189_v51 }
  0xb7   :  { %v201_v54 = vmul.f32 %v421_v18, %v161_v52  ;;  %v205_v55 = vmul.f32 %v421_v18, %v171_v53 }
  0xb8   :  { %v228_v4 = vadd.f32 %v422_v20, %v208_v62  ;;  %v232_v5 = vadd.f32 %v422_v20, %v212_v63 }
  0xb9   :  { %v221_v58 = vadd.f32 %v422_v20, %v201_v54  ;;  %v225_v59 = vadd.f32 %v422_v20, %v205_v55 }
  0xbb   :  { %v358_v60 = vpack.c.bf16 %v221_v58, %v220_v56  ;;  %v368_v61 = vpack.c.bf16 %v225_v59, %v224_v57 }
  0xbd   :  { %390 = vst [vmem:[%s530_s4 + $0x8] sm:$0xff] %v358_v60   ;;  %v181_v0 = vpop.f32.mrf.mxu2  ;;  %v191_v1 = vpop.f32.mrf.mxu3 }
  0xbe   :  { %392 = vst [vmem:[%s530_s4 + $0x18] sm:$0xff] %v368_v61   ;;  %v209_v2 = vmul.f32 %v421_v18, %v181_v0  ;;  %v213_v3 = vmul.f32 %v421_v18, %v191_v1 }
  0xc0   :  { %v229_v6 = vadd.f32 %v422_v20, %v209_v2  ;;  %v233_v7 = vadd.f32 %v422_v20, %v213_v3 }
  0xc2   :  { %v378_v8 = vpack.c.bf16 %v229_v6, %v228_v4  ;;  %v388_v9 = vpack.c.bf16 %v233_v7, %v232_v5 }
  0xc4   :  { %394 = vst [vmem:[%s530_s4 + $0x28] sm:$0xff] %v378_v8  }
  0xc5   :  { %396 = vst [vmem:[%s530_s4 + $0x38] sm:$0xff] %v388_v9  }

// kernel: _lambda_.15
= control target key start
LH: loop header
LB: loop body
LE: loop exit
PB: predicated region body
PF: predicated region fallthrough
CT: control target
= control target key end

     0   :  { %s690_s18 = smov 0   ;;  %s808_s0 = inlined_call_operand.vmem [shape: bf16[2,64,128], index: 0, kind: input, shape index: {}]   ;;  %s809_s1 = inlined_call_operand.vmem [shape: bf16[128,128], index: 1, kind: input, shape index: {}]   ;;  %s810_s2 = inlined_call_operand.vmem [shape: f32[1,128], index: 2, kind: input, shape index: {}, may-alias: {2,4}]   ;;  %s811_s3 = inlined_call_operand.vmem [shape: bf16[128,128], index: 3, kind: input, shape index: {}]   ;;  %s812_s4 = inlined_call_operand.vmem [shape: f32[1,128], index: 4, kind: input, shape index: {}, may-alias: {2,4}]   ;;  %s813_s5 = inlined_call_operand.vmem [shape: bf16[2,64,128], index: 5, kind: output, shape index: {}]  }
   0x1 LB: > { %s505_s19 = sadd.s32 4294967295, %s657_s18   ;;  %p509_p0 = scmp.ge.s32.totalorder %s657_s18, 1  ;;  %s657_s18 = sphi %s690_s18, %s15_s18  }
   0x2   : > { %p187_p1 = scmp.lt.s32.totalorder %s657_s18, 3 }
   0x4   : > { %p188_p2 = pnand %p509_p0, %p187_p1 }
   0x5   : > { %p215_p3 = scmp.lt.s32.totalorder (!%p188_p2), %s505_s19, 1 }
   0x6   : > { %191 = sbr.rel (%p188_p2) target bundleno = 325 (0x145), region = 40 }
   0xb   : > { %v589_v0 = vld [vmem:[%s809_s1 + $0x38] sm:$0xff]  ;;  %v588_v1 = vld [vmem:[%s809_s1 + $0x30] sm:$0xff]  ;;  %s815_s19 = smov (!%p215_p3, %s505_s19), 1  ;;  %v587_v2 = vld [vmem:[%s809_s1 + $0x28] sm:$0xff]  ;;  %v659_v8 = vmov 64.0  }
   0xc   : > { %328 = vmatpush.bf16.msra.mxu0 %v589_v0  ;;  %s580_s24 = sshll.u32 %s815_s19, 5  ;;  %649 = vrcp.f32 %v659_v8  ;;  %v597_v9 = vld [vmem:[%s811_s3 + $0x38] sm:$0xff]  ;;  %v596_v13 = vld [vmem:[%s811_s3 + $0x30] sm:$0xff]  ;;  %v586_v14 = vld [vmem:[%s809_s1 + $0x20] sm:$0xff] }
   0xd   : > { %s219_s27 = scalar_lea.vmem %s808_s0, %s580_s24  ;;  %408 = vmatpush.bf16.msra.mxu1 %v597_v9  ;;  %v595_v21 = vld [vmem:[%s811_s3 + $0x28] sm:$0xff]  ;;  %v585_v22 = vld [vmem:[%s809_s1 + $0x18] sm:$0xff]  ;;  %v594_v28 = vld [vmem:[%s811_s3 + $0x20] sm:$0xff]  ;;  %s224_s15 = scalar_lea.vmem %s813_s5, %s580_s24 }
   0xe   : > { %v715_v3 = vld [vmem:[%s219_s27] sm:$0xff]   ;;  %v717_v4 = vld [vmem:[%s219_s27 + $0x8] sm:$0xff]   ;;  %v725_v10 = vld [vmem:[%s219_s27 + $0x10] sm:$0xff]  }
   0xf   : > { %v600_v5 = vunpack.c.l.bf16 %v715_v3  ;;  %v601_v6 = vunpack.c.h.bf16 %v715_v3  ;;  %v604_v7 = vunpack.c.l.bf16 %v717_v4  ;;  %v605_v11 = vunpack.c.h.bf16 %v717_v4  ;;  %v741_v17 = vld [vmem:[%s219_s27 + $0x18] sm:$0xff]   ;;  %v584_v29 = vld [vmem:[%s809_s1 + $0x10] sm:$0xff]  ;;  %v583_v34 = vld [vmem:[%s809_s1 + $0x8] sm:$0xff] }
  0x10   : > { %329 = vmatpush.bf16.msra.mxu0 %v588_v1  ;;  %v608_v15 = vunpack.c.l.bf16 %v725_v10  ;;  %v609_v19 = vunpack.c.h.bf16 %v725_v10  ;;  %v612_v23 = vunpack.c.l.bf16 %v741_v17  ;;  %v613_v26 = vunpack.c.h.bf16 %v741_v17  ;;  %v593_v33 = vld [vmem:[%s811_s3 + $0x18] sm:$0xff]  ;;  %v592_v38 = vld [vmem:[%s811_s3 + $0x10] sm:$0xff]  ;;  %v582_v39 = vld [vmem:[%s809_s1] sm:$0xff] }
  0x11   : > { %v241_v12 = vadd.f32 %v601_v6, %v600_v5  ;;  %409 = vmatpush.bf16.msra.mxu1 %v596_v13  ;;  %v591_v48 = vld [vmem:[%s811_s3 + $0x8] sm:$0xff]  ;;  %v590_v49 = vld [vmem:[%s811_s3] sm:$0xff] }
  0x12   : > { %v650_v18 = vpop.eup %649  ;;  %v279_v50 = vld [vmem:[%s810_s2] sm:$0x1] }
  0x13   : > { %v242_v16 = vadd.f32 %v604_v7, %v241_v12  ;;  %v255_v25 = vmul.f32 64.0, %v650_v18  ;;  %vm259_vm0 = vweird.f32 %v650_v18  ;;  %v359_v56 = vld [vmem:[%s812_s4] sm:$0x1] }
  0x14   : > { %330 = vmatpush.bf16.msra.mxu0 %v587_v2 }
  0x15   : > { %v243_v20 = vadd.f32 %v605_v11, %v242_v16  ;;  %410 = vmatpush.bf16.msra.mxu1 %v595_v21  ;;  %v256_v31 = vsub.f32 1.0, %v255_v25 }
  0x17   : > { %v244_v24 = vadd.f32 %v608_v15, %v243_v20  ;;  %v257_v36 = vmul.f32 %v650_v18, %v256_v31 }
  0x18   : > { %331 = vmatpush.bf16.msra.mxu0 %v586_v14 }
  0x19   : > { %v245_v27 = vadd.f32 %v609_v19, %v244_v24  ;;  %411 = vmatpush.bf16.msra.mxu1 %v594_v28  ;;  %v258_v41 = vadd.f32 %v650_v18, %v257_v36 }
  0x1b   : > { %v246_v30 = vadd.f32 %v612_v23, %v245_v27  ;;  %v260_v44 = vsel %vm259_vm0, %v650_v18, %v258_v41 }
  0x1c   : > { %332 = vmatpush.bf16.msra.mxu0 %v585_v22 }
  0x1d   : > { %v247_v32 = vadd.f32 %v613_v26, %v246_v30  ;;  %412 = vmatpush.bf16.msra.mxu1 %v593_v33 }
  0x1f   : > { %v248_v35 = vrot.slane %v247_v32, 4 }
  0x20   : > { %333 = vmatpush.bf16.msra.mxu0 %v584_v29 }
  0x21   : > { %v249_v37 = vadd.f32 %v248_v35, %v247_v32  ;;  %413 = vmatpush.bf16.msra.mxu1 %v592_v38 }
  0x23   : > { %v250_v40 = vrot.slane %v249_v37, 2 }
  0x24   : > { %334 = vmatpush.bf16.msra.mxu0 %v583_v34 }
  0x25   : > { %v251_v42 = vadd.f32 %v250_v40, %v249_v37  ;;  %414 = vmatpush.bf16.msra.mxu1 %v591_v48 }
  0x27   : > { %v252_v43 = vrot.slane %v251_v42, 1 }
  0x28   : > { %335 = vmatpush.bf16.msra.mxu0 %v582_v39 }
  0x29   : > { %v253_v45 = vadd.f32 %v252_v43, %v251_v42  ;;  %415 = vmatpush.bf16.msra.mxu1 %v590_v49 }
  0x2b   : > { %v261_v46 = vmul.f32 %v260_v44, %v253_v45 }
  0x2d   : > { %v262_v47 = vpack.c.bf16 %v261_v46, %v261_v46 }
  0x2f   : > { %336 = vmatmul.bf16.vlgmr.msra.gmra.mxu0 %v262_v47 }
  0xac   : > { %v337_v51 = vpop.f32.mrf.mxu0 }
  0xad   : > { %v338_v52 = vadd.f32 %v337_v51, %v279_v50 }
  0xaf   : > { %v341_v53 = vmax.f32 %v338_v52, 0.0 }
  0xb1   : > { %v342_v54 = vpack.c.bf16 %v341_v53, %v341_v53 }
  0xb3   : > { %416 = vmatmul.bf16.vlgmr.msra.gmra.mxu1 %v342_v54 }
  0xb4   : > { %v339_v55 = vpop.f32.mrf.mxu0 }
 0x130   : > { %v417_v57 = vpop.f32.mrf.mxu1 }
 0x131   : > { %v418_v58 = vadd.f32 %v417_v57, %v359_v56 }
 0x133   : > { %v421_v59 = vadd.f32 3.0, %v418_v58 }
 0x135   : > { %v422_v60 = vmax.f32 %v421_v59, 0.0 }
 0x137   : > { %v423_v61 = vmin.f32 %v422_v60, 6.0 }
 0x138   : > { %v419_v62 = vpop.f32.mrf.mxu1 }
 0x139   : > { %v424_v63 = vmul.f32 0.16666667, %v423_v61 }
 0x13b   : > { %v425_v0 = vperm.slane %v424_v63, 0 }
 0x13d   : > { %v426_v1 = vmul.f32 %v600_v5, %v425_v0  ;;  %v427_v2 = vmul.f32 %v601_v6, %v425_v0  ;;  %v428_v8 = vmul.f32 %v604_v7, %v425_v0  ;;  %v429_v9 = vmul.f32 %v605_v11, %v425_v0 }
 0x13e   : > { %v430_v12 = vmul.f32 %v608_v15, %v425_v0  ;;  %v431_v5 = vmul.f32 %v609_v19, %v425_v0  ;;  %v432_v13 = vmul.f32 %v612_v23, %v425_v0  ;;  %v433_v3 = vmul.f32 %v613_v26, %v425_v0 }
 0x13f   : > { %v617_v6 = vpack.c.bf16 %v427_v2, %v426_v1  ;;  %v622_v14 = vpack.c.bf16 %v429_v9, %v428_v8 }
 0x140   : > { %v627_v16 = vpack.c.bf16 %v431_v5, %v430_v12  ;;  %v632_v7 = vpack.c.bf16 %v433_v3, %v432_v13 }
 0x141   : > { %618 = vst [vmem:[%s224_s15] sm:$0xff] %v617_v6  }
 0x142   : > { %637 = vst [vmem:[%s224_s15 + $0x8] sm:$0xff] %v622_v14  }
 0x143   : > { %638 = vst [vmem:[%s224_s15 + $0x10] sm:$0xff] %v627_v16  }
 0x144   : > { %639 = vst [vmem:[%s224_s15 + $0x18] sm:$0xff] %v632_v7  }
 0x145 PF: > { %s15_s18 = sadd.s32 1, %s657_s18  }
 0x146   : > { %p12_p4 = scmp.ge.s32.totalorder %s15_s18, 4  }
 0x148   :  { %14 = sbr.rel (!%p12_p4) target bundleno = 1 (0x1), region = 70 }

// kernel: _lambda_.17
= control target key start
LH: loop header
LB: loop body
LE: loop exit
PB: predicated region body
PF: predicated region fallthrough
CT: control target
= control target key end

     0   :  { %s578_s1 = inlined_call_operand.vmem [shape: bf16[128,128], index: 1, kind: input, shape index: {}]   ;;  %s579_s2 = inlined_call_operand.vmem [shape: f32[1,128], index: 2, kind: input, shape index: {}]   ;;  %s580_s3 = inlined_call_operand.vmem [shape: f32[1,128], index: 3, kind: input, shape index: {}]   ;;  %s581_s0 = inlined_call_operand.vmem [shape: bf16[128,128], index: 0, kind: input, shape index: {}]   ;;  %s582_s4 = inlined_call_operand.vmem [shape: bf16[128,128], index: 4, kind: output, shape index: {}]  }
   0x1   :  { %v365_v0 = vld [vmem:[%s578_s1 + $0x38] sm:$0xff]  ;;  %v364_v1 = vld [vmem:[%s578_s1 + $0x30] sm:$0xff]  ;;  %v363_v2 = vld [vmem:[%s578_s1 + $0x28] sm:$0xff] }
   0x2   :  { %145 = vmatpush.bf16.msra.mxu0 %v365_v0  ;;  %413 = vmatpush.bf16.msra.mxu1 %v365_v0  ;;  %v362_v3 = vld [vmem:[%s578_s1 + $0x20] sm:$0xff]  ;;  %v361_v4 = vld [vmem:[%s578_s1 + $0x18] sm:$0xff]  ;;  %v360_v5 = vld [vmem:[%s578_s1 + $0x10] sm:$0xff] }
   0x3   :  { %414 = vmatpush.bf16.msra.mxu2 %v365_v0  ;;  %415 = vmatpush.bf16.msra.mxu3 %v365_v0  ;;  %v359_v6 = vld [vmem:[%s578_s1 + $0x8] sm:$0xff]  ;;  %v358_v7 = vld [vmem:[%s578_s1] sm:$0xff]  ;;  %v352_v9 = vld [vmem:[%s581_s0 + $0x10] sm:$0xff] }
   0x4   :  { %v350_v8 = vld [vmem:[%s581_s0] sm:$0xff]  ;;  %v356_v11 = vld [vmem:[%s581_s0 + $0x30] sm:$0xff]  ;;  %v351_v12 = vld [vmem:[%s581_s0 + $0x8] sm:$0xff] }
   0x5   :  { %v354_v10 = vld [vmem:[%s581_s0 + $0x20] sm:$0xff]  ;;  %v353_v13 = vld [vmem:[%s581_s0 + $0x18] sm:$0xff]  ;;  %v355_v14 = vld [vmem:[%s581_s0 + $0x28] sm:$0xff] }
   0x6   :  { %146 = vmatpush.bf16.msra.mxu0 %v364_v1  ;;  %416 = vmatpush.bf16.msra.mxu1 %v364_v1  ;;  %v357_v15 = vld [vmem:[%s581_s0 + $0x38] sm:$0xff]  ;;  %v515_v18 = vld [vmem:[%s579_s2] ss:$0 sm:$0xff] }
   0x7   :  { %417 = vmatpush.bf16.msra.mxu2 %v364_v1  ;;  %418 = vmatpush.bf16.msra.mxu3 %v364_v1  ;;  %v521_v20 = vld [vmem:[%s580_s3] ss:$0 sm:$0xff] }
   0xa   :  { %147 = vmatpush.bf16.msra.mxu0 %v363_v2  ;;  %419 = vmatpush.bf16.msra.mxu1 %v363_v2 }
   0xb   :  { %420 = vmatpush.bf16.msra.mxu2 %v363_v2  ;;  %421 = vmatpush.bf16.msra.mxu3 %v363_v2 }
   0xe   :  { %148 = vmatpush.bf16.msra.mxu0 %v362_v3  ;;  %422 = vmatpush.bf16.msra.mxu1 %v362_v3 }
   0xf   :  { %423 = vmatpush.bf16.msra.mxu2 %v362_v3  ;;  %424 = vmatpush.bf16.msra.mxu3 %v362_v3 }
  0x12   :  { %149 = vmatpush.bf16.msra.mxu0 %v361_v4  ;;  %425 = vmatpush.bf16.msra.mxu1 %v361_v4 }
  0x13   :  { %426 = vmatpush.bf16.msra.mxu2 %v361_v4  ;;  %427 = vmatpush.bf16.msra.mxu3 %v361_v4 }
  0x16   :  { %150 = vmatpush.bf16.msra.mxu0 %v360_v5  ;;  %428 = vmatpush.bf16.msra.mxu1 %v360_v5 }
  0x17   :  { %429 = vmatpush.bf16.msra.mxu2 %v360_v5  ;;  %430 = vmatpush.bf16.msra.mxu3 %v360_v5 }
  0x1a   :  { %151 = vmatpush.bf16.msra.mxu0 %v359_v6  ;;  %431 = vmatpush.bf16.msra.mxu1 %v359_v6 }
  0x1b   :  { %432 = vmatpush.bf16.msra.mxu2 %v359_v6  ;;  %433 = vmatpush.bf16.msra.mxu3 %v359_v6 }
  0x1e   :  { %152 = vmatpush.bf16.msra.mxu0 %v358_v7  ;;  %434 = vmatpush.bf16.msra.mxu1 %v358_v7 }
  0x1f   :  { %435 = vmatpush.bf16.msra.mxu2 %v358_v7  ;;  %436 = vmatpush.bf16.msra.mxu3 %v358_v7 }
  0x21   :  { %153 = vmatmul.bf16.vlgmr.msra.gmra.mxu0 %v350_v8  ;;  %163 = vmatmul.bf16.vlgmr.msra.gmra.mxu1 %v352_v9 }
  0x22   :  { %173 = vmatmul.bf16.vlgmr.msra.gmra.mxu2 %v354_v10  ;;  %183 = vmatmul.bf16.vlgmr.msra.gmra.mxu3 %v356_v11 }
  0x31   :  { %158 = vmatmul.bf16.gmra.mxu0 %v351_v12  ;;  %168 = vmatmul.bf16.gmra.mxu1 %v353_v13 }
  0x32   :  { %178 = vmatmul.bf16.gmra.mxu2 %v355_v14  ;;  %188 = vmatmul.bf16.gmra.mxu3 %v357_v15 }
  0x9e   :  { %v154_v16 = vpop.f32.mrf.mxu0  ;;  %v164_v17 = vpop.f32.mrf.mxu1 }
  0x9f   :  { %v198_v19 = vmul.f32 %v515_v18, %v154_v16  ;;  %v202_v21 = vmul.f32 %v515_v18, %v164_v17 }
  0xa1   :  { %v218_v26 = vadd.f32 %v521_v20, %v198_v19  ;;  %v222_v27 = vadd.f32 %v521_v20, %v202_v21 }
  0xa3   :  { %v234_v34 = vmax.f32 %v218_v26, 0.0  ;;  %v238_v35 = vmax.f32 %v222_v27, 0.0 }
  0xa5   :  { %v174_v22 = vpop.f32.mrf.mxu2  ;;  %v184_v23 = vpop.f32.mrf.mxu3 }
  0xa6   :  { %v156_v24 = vpop.f32.mrf.mxu0  ;;  %v166_v25 = vpop.f32.mrf.mxu1  ;;  %v206_v32 = vmul.f32 %v515_v18, %v174_v22  ;;  %v210_v33 = vmul.f32 %v515_v18, %v184_v23 }
  0xa7   :  { %v199_v28 = vmul.f32 %v515_v18, %v156_v24  ;;  %v203_v29 = vmul.f32 %v515_v18, %v166_v25 }
  0xa8   :  { %v226_v42 = vadd.f32 %v521_v20, %v206_v32  ;;  %v230_v43 = vadd.f32 %v521_v20, %v210_v33 }
  0xa9   :  { %v219_v30 = vadd.f32 %v521_v20, %v199_v28  ;;  %v223_v31 = vadd.f32 %v521_v20, %v203_v29 }
  0xaa   :  { %v242_v50 = vmax.f32 %v226_v42, 0.0  ;;  %v246_v51 = vmax.f32 %v230_v43, 0.0 }
  0xab   :  { %v235_v36 = vmax.f32 %v219_v30, 0.0  ;;  %v239_v37 = vmax.f32 %v223_v31, 0.0 }
  0xad   :  { %v369_v38 = vpack.c.bf16 %v235_v36, %v234_v34  ;;  %v379_v39 = vpack.c.bf16 %v239_v37, %v238_v35  ;;  %v176_v40 = vpop.f32.mrf.mxu2  ;;  %v186_v41 = vpop.f32.mrf.mxu3 }
  0xae   :  { %v207_v44 = vmul.f32 %v515_v18, %v176_v40  ;;  %v211_v45 = vmul.f32 %v515_v18, %v186_v41  ;;  %v159_v46 = vpop.f32.mrf.mxu0  ;;  %v169_v47 = vpop.f32.mrf.mxu1 }
  0xaf   :  { %370 = vst [vmem:[%s582_s4] sm:$0xff] %v369_v38   ;;  %v200_v54 = vmul.f32 %v515_v18, %v159_v46  ;;  %v204_v55 = vmul.f32 %v515_v18, %v169_v47 }
  0xb0   :  { %407 = vst [vmem:[%s582_s4 + $0x10] sm:$0xff] %v379_v39   ;;  %v227_v48 = vadd.f32 %v521_v20, %v207_v44  ;;  %v231_v49 = vadd.f32 %v521_v20, %v211_v45 }
  0xb1   :  { %v220_v62 = vadd.f32 %v521_v20, %v200_v54  ;;  %v224_v63 = vadd.f32 %v521_v20, %v204_v55 }
  0xb2   :  { %v243_v52 = vmax.f32 %v227_v48, 0.0  ;;  %v247_v53 = vmax.f32 %v231_v49, 0.0 }
  0xb3   :  { %v236_v6 = vmax.f32 %v220_v62, 0.0  ;;  %v240_v7 = vmax.f32 %v224_v63, 0.0 }
  0xb4   :  { %v389_v56 = vpack.c.bf16 %v243_v52, %v242_v50  ;;  %v399_v57 = vpack.c.bf16 %v247_v53, %v246_v51 }
  0xb5   :  { %v179_v58 = vpop.f32.mrf.mxu2  ;;  %v189_v59 = vpop.f32.mrf.mxu3 }
  0xb6   :  { %409 = vst [vmem:[%s582_s4 + $0x20] sm:$0xff] %v389_v56   ;;  %v161_v60 = vpop.f32.mrf.mxu0  ;;  %v171_v61 = vpop.f32.mrf.mxu1  ;;  %v208_v4 = vmul.f32 %v515_v18, %v179_v58  ;;  %v212_v5 = vmul.f32 %v515_v18, %v189_v59 }
  0xb7   :  { %411 = vst [vmem:[%s582_s4 + $0x30] sm:$0xff] %v399_v57   ;;  %v201_v0 = vmul.f32 %v515_v18, %v161_v60  ;;  %v205_v1 = vmul.f32 %v515_v18, %v171_v61 }
  0xb8   :  { %v228_v14 = vadd.f32 %v521_v20, %v208_v4  ;;  %v232_v15 = vadd.f32 %v521_v20, %v212_v5 }
  0xb9   :  { %v221_v2 = vadd.f32 %v521_v20, %v201_v0  ;;  %v225_v3 = vadd.f32 %v521_v20, %v205_v1 }
  0xba   :  { %v244_v22 = vmax.f32 %v228_v14, 0.0  ;;  %v248_v23 = vmax.f32 %v232_v15, 0.0 }
  0xbb   :  { %v237_v8 = vmax.f32 %v221_v2, 0.0  ;;  %v241_v9 = vmax.f32 %v225_v3, 0.0 }
  0xbd   :  { %v374_v10 = vpack.c.bf16 %v237_v8, %v236_v6  ;;  %v384_v11 = vpack.c.bf16 %v241_v9, %v240_v7  ;;  %v181_v12 = vpop.f32.mrf.mxu2  ;;  %v191_v13 = vpop.f32.mrf.mxu3 }
  0xbe   :  { %v209_v16 = vmul.f32 %v515_v18, %v181_v12  ;;  %v213_v17 = vmul.f32 %v515_v18, %v191_v13 }
  0xbf   :  { %406 = vst [vmem:[%s582_s4 + $0x8] sm:$0xff] %v374_v10  }
  0xc0   :  { %408 = vst [vmem:[%s582_s4 + $0x18] sm:$0xff] %v384_v11   ;;  %v229_v19 = vadd.f32 %v521_v20, %v209_v16  ;;  %v233_v21 = vadd.f32 %v521_v20, %v213_v17 }
  0xc2   :  { %v245_v24 = vmax.f32 %v229_v19, 0.0  ;;  %v249_v25 = vmax.f32 %v233_v21, 0.0 }
  0xc4   :  { %v394_v26 = vpack.c.bf16 %v245_v24, %v244_v22  ;;  %v404_v27 = vpack.c.bf16 %v249_v25, %v248_v23 }
  0xc6   :  { %410 = vst [vmem:[%s582_s4 + $0x28] sm:$0xff] %v394_v26  }
  0xc7   :  { %412 = vst [vmem:[%s582_s4 + $0x38] sm:$0xff] %v404_v27  }

// kernel: _lambda_.19
= control target key start
LH: loop header
LB: loop body
LE: loop exit
PB: predicated region body
PF: predicated region fallthrough
CT: control target
= control target key end

     0   :  { %s282_s1 = inlined_call_operand.vmem [shape: bf16[128,128], index: 1, kind: input, shape index: {}]   ;;  %s283_s2 = inlined_call_operand.vmem [shape: f32[1,128], index: 2, kind: input, shape index: {}]   ;;  %s284_s3 = inlined_call_operand.vmem [shape: f32[1,128], index: 3, kind: input, shape index: {}]   ;;  %s285_s0 = inlined_call_operand.vmem [shape: bf16[32,128], index: 0, kind: input, shape index: {}]   ;;  %s286_s4 = inlined_call_operand.vmem [shape: bf16[32,128], index: 4, kind: output, shape index: {}]  }
   0x1   :  { %v193_v0 = vld [vmem:[%s282_s1 + $0x38] sm:$0xff]  ;;  %v192_v1 = vld [vmem:[%s282_s1 + $0x30] sm:$0xff]  ;;  %v191_v2 = vld [vmem:[%s282_s1 + $0x28] sm:$0xff] }
   0x2   :  { %97 = vmatpush.bf16.msra.mxu0 %v193_v0  ;;  %205 = vmatpush.bf16.msra.mxu1 %v193_v0  ;;  %v190_v3 = vld [vmem:[%s282_s1 + $0x20] sm:$0xff]  ;;  %v189_v4 = vld [vmem:[%s282_s1 + $0x18] sm:$0xff]  ;;  %v188_v5 = vld [vmem:[%s282_s1 + $0x10] sm:$0xff] }
   0x3   :  { %v187_v6 = vld [vmem:[%s282_s1 + $0x8] sm:$0xff]  ;;  %v186_v7 = vld [vmem:[%s282_s1] sm:$0xff] }
   0x4   :  { %v184_v8 = vld [vmem:[%s285_s0] sm:$0xff]  ;;  %v185_v9 = vld [vmem:[%s285_s0 + $0x8] sm:$0xff] }
   0x5   :  { %v213_v12 = vld [vmem:[%s283_s2] ss:$0 sm:$0xff] }
   0x6   :  { %98 = vmatpush.bf16.msra.mxu0 %v192_v1  ;;  %206 = vmatpush.bf16.msra.mxu1 %v192_v1  ;;  %v214_v14 = vld [vmem:[%s284_s3] ss:$0 sm:$0xff] }
   0xa   :  { %99 = vmatpush.bf16.msra.mxu0 %v191_v2  ;;  %207 = vmatpush.bf16.msra.mxu1 %v191_v2 }
   0xe   :  { %100 = vmatpush.bf16.msra.mxu0 %v190_v3  ;;  %208 = vmatpush.bf16.msra.mxu1 %v190_v3 }
  0x12   :  { %101 = vmatpush.bf16.msra.mxu0 %v189_v4  ;;  %209 = vmatpush.bf16.msra.mxu1 %v189_v4 }
  0x16   :  { %102 = vmatpush.bf16.msra.mxu0 %v188_v5  ;;  %210 = vmatpush.bf16.msra.mxu1 %v188_v5 }
  0x1a   :  { %103 = vmatpush.bf16.msra.mxu0 %v187_v6  ;;  %211 = vmatpush.bf16.msra.mxu1 %v187_v6 }
  0x1e   :  { %104 = vmatpush.bf16.msra.mxu0 %v186_v7  ;;  %212 = vmatpush.bf16.msra.mxu1 %v186_v7 }
  0x21   :  { %105 = vmatmul.bf16.vlgmr.msra.gmra.mxu0 %v184_v8  ;;  %110 = vmatmul.bf16.vlgmr.msra.gmra.mxu1 %v185_v9 }
  0x9e   :  { %v106_v10 = vpop.f32.mrf.mxu0  ;;  %v111_v11 = vpop.f32.mrf.mxu1 }
  0x9f   :  { %v120_v13 = vmul.f32 %v213_v12, %v106_v10  ;;  %v122_v15 = vmul.f32 %v213_v12, %v111_v11 }
  0xa1   :  { %v128_v20 = vadd.f32 %v214_v14, %v120_v13  ;;  %v130_v21 = vadd.f32 %v214_v14, %v122_v15 }
  0xa6   :  { %v108_v16 = vpop.f32.mrf.mxu0  ;;  %v113_v17 = vpop.f32.mrf.mxu1 }
  0xa7   :  { %v121_v18 = vmul.f32 %v213_v12, %v108_v16  ;;  %v123_v19 = vmul.f32 %v213_v12, %v113_v17 }
  0xa9   :  { %v129_v22 = vadd.f32 %v214_v14, %v121_v18  ;;  %v131_v23 = vadd.f32 %v214_v14, %v123_v19 }
  0xab   :  { %v197_v24 = vpack.c.bf16 %v129_v22, %v128_v20  ;;  %v202_v25 = vpack.c.bf16 %v131_v23, %v130_v21 }
  0xad   :  { %198 = vst [vmem:[%s286_s4] sm:$0xff] %v197_v24  }
  0xae   :  { %204 = vst [vmem:[%s286_s4 + $0x8] sm:$0xff] %v202_v25  }

// kernel: _lambda_.18
= control target key start
LH: loop header
LB: loop body
LE: loop exit
PB: predicated region body
PF: predicated region fallthrough
CT: control target
= control target key end

     0   :  { %s752_s15 = smov 0   ;;  %s754_s16 = smov 0   ;;  %s958_s0 = inlined_call_operand.vmem [shape: bf16[4,2,5,5,128], index: 0, kind: input, shape index: {}]   ;;  %s959_s1 = inlined_call_operand.vmem [shape: bf16[9,1,128], index: 1, kind: input, shape index: {}]   ;;  %s960_s2 = inlined_call_operand.vmem [shape: f32[1,128], index: 2, kind: input, shape index: {}]   ;;  %s961_s3 = inlined_call_operand.vmem [shape: f32[1,128], index: 3, kind: input, shape index: {}]   ;;  %s962_s4 = inlined_call_operand.vmem [shape: bf16[2,4,4,128], index: 4, kind: output, shape index: {}]  }
   0x1   :  { %s756_s17 = smov 0  }
   0x2 LB: > { %s627_s18 = sadd.s32 4294967295, %s725_s17   ;;  %s769_s19 = sadd.s32 1, %s725_s17   ;;  %s725_s17 = sphi %s756_s17, %s966_s17   ;;  %s721_s16 = sphi %s754_s16, %s965_s16   ;;  %s717_s15 = sphi %s752_s15, %s964_s15  }
   0x3   : > { %s18_s20 = ssub.s32 %s725_s17, %s769_s19  ;;  %s21_s21 = sadd.s32 1, %s721_s16 }
   0x4   : > { %p19_p0 = scmp.eq.s32.totalorder %s18_s20, 0  ;;  %p28_p1 = scmp.ne.s32.totalorder %s721_s16, %s717_s15 }
   0x5   : > { %p29_p2 = scmp.eq.s32.totalorder %s725_s17, 0  ;;  %p630_p4 = scmp.ge.s32.totalorder %s725_s17, 2 }
   0x6   : > { %s778_s22 = scalar_select %p19_p0, %s721_s16, %s21_s21  }
   0x7   : > { %p30_p3 = por %p29_p2, %p28_p1  ;;  %152 = sbr.rel (%p630_p4) target bundleno = 29 (0x1d), region = 28 }
   0xc   : > { %155 = sbr.rel (!%p30_p3) target bundleno = 29 (0x1d), region = 32  ;;  %s157_s23 = sand.u32 (%p30_p3), 1, %s721_s16  }
   0xd   : > { %s675_s24 = smul.u32 (%p30_p3), 20, %s725_s17 }
   0xe   : > { %s674_s25 = smul.u32 (%p30_p3), 80, %s157_s23 }
   0xf   : > { %s162_s28 = scalar_lea.vmem (%p30_p3), %s958_s0, %s675_s24 }
  0x10   : > { %v179_v0 = vld [vmem:[%s162_s28] sm:$0xff] (%p30_p3)   ;;  %v183_v1 = vld [vmem:[%s162_s28 + $0x8] sm:$0xff] (%p30_p3)   ;;  %v187_v2 = vld [vmem:[%s162_s28 + $0x10] sm:$0xf] (%p30_p3)  ;;  %s159_s29 = scalar_lea.vmem (%p30_p3), [#allocation2], %s674_s25 }
  0x11   : > { %180 = vst [vmem:[%s159_s29] sm:$0xff] %v179_v0   ;;  %v189_v3 = vld [vmem:[%s162_s28 + $0x28] sm:$0xff]   ;;  %v193_v4 = vld [vmem:[%s162_s28 + $0x30] sm:$0xff]   ;;  %v197_v5 = vld [vmem:[%s162_s28 + $0x38] sm:$0xf] }
  0x12   : > { %184 = vst [vmem:[%s159_s29 + $0x8] sm:$0xff] %v183_v1   ;;  %v199_v6 = vld [vmem:[%s162_s28 + $0x50] sm:$0xff]   ;;  %v203_v7 = vld [vmem:[%s162_s28 + $0x58] sm:$0xff]   ;;  %v207_v8 = vld [vmem:[%s162_s28 + $0x60] sm:$0xf] }
  0x13   : > { %188 = vst [vmem:[%s159_s29 + $0x10] sm:$0xf] %v187_v2  ;;  %v209_v9 = vld [vmem:[%s162_s28 + $0x78] sm:$0xff]   ;;  %v213_v10 = vld [vmem:[%s162_s28 + $0x80] sm:$0xff]   ;;  %v217_v11 = vld [vmem:[%s162_s28 + $0x88] sm:$0xf] }
  0x14   : > { %190 = vst [vmem:[%s159_s29 + $0x14] sm:$0xff] %v189_v3  }
  0x15   : > { %194 = vst [vmem:[%s159_s29 + $0x1c] sm:$0xff] %v193_v4  }
  0x16   : > { %198 = vst [vmem:[%s159_s29 + $0x24] sm:$0xf] %v197_v5 }
  0x17   : > { %200 = vst [vmem:[%s159_s29 + $0x28] sm:$0xff] %v199_v6  }
  0x18   : > { %204 = vst [vmem:[%s159_s29 + $0x30] sm:$0xff] %v203_v7  }
  0x19   : > { %208 = vst [vmem:[%s159_s29 + $0x38] sm:$0xf] %v207_v8 }
  0x1a   : > { %210 = vst [vmem:[%s159_s29 + $0x3c] sm:$0xff] %v209_v9  }
  0x1b   : > { %214 = vst [vmem:[%s159_s29 + $0x44] sm:$0xff] %v213_v10  }
  0x1c   : > { %218 = vst [vmem:[%s159_s29 + $0x4c] sm:$0xf] %v217_v11 }
  0x1d PF: > { %p632_p5 = scmp.ge.s32.totalorder %s725_s17, 1  ;;  %p281_p6 = scmp.lt.s32.totalorder %s725_s17, 3 }
  0x1f   : > { %p282_p7 = pnand %p632_p5, %p281_p6 }
  0x20   : > { %s288_s30 = sand.u32 (!%p282_p7), 1, %s717_s15   ;;  %p878_p8 = scmp.lt.s32.totalorder (!%p282_p7), %s627_s18, 1 }
  0x21   : > { %285 = sbr.rel (%p282_p7) target bundleno = 93 (0x5d), region = 73 }
  0x22   : > { %s676_s9 = smul.u32 (!%p282_p7), 80, %s288_s30 }
  0x24   : > { %s814_s25 = scalar_lea.vmem (!%p282_p7), [#allocation2], %s676_s9 }
  0x26   : > { %v326_v12 = vld [vmem:[%s959_s1] sm:$0x1]  ;;  %v639_v13 = vld [vmem:[%s959_s1 + $0x1] sm:$0x1]  ;;  %v640_v16 = vld [vmem:[%s959_s1 + $0x2] sm:$0x1] }
  0x27   : > { %v327_v14 = vunpack.c.l.bf16 %v326_v12  ;;  %v348_v15 = vunpack.c.l.bf16 %v639_v13  ;;  %v645_v17 = vld [vmem:[%s959_s1 + $0x3] sm:$0x1]  ;;  %v368_v18 = vunpack.c.l.bf16 %v640_v16  ;;  %v650_v20 = vld [vmem:[%s959_s1 + $0x4] sm:$0x1]  ;;  %v655_v21 = vld [vmem:[%s959_s1 + $0x5] sm:$0x1] }
  0x28   : > { %v401_v19 = vunpack.c.l.bf16 %v645_v17  ;;  %v422_v24 = vunpack.c.l.bf16 %v650_v20  ;;  %v442_v25 = vunpack.c.l.bf16 %v655_v21  ;;  %v660_v26 = vld [vmem:[%s959_s1 + $0x6] sm:$0x1]  ;;  %v318_v27 = vld [vmem:[%s814_s25] sm:$0x3]  ;;  %v635_v28 = vld [vmem:[%s814_s25 + $0x14] sm:$0x3] }
  0x29   : > { %v807_v22 = vperm.slane %v327_v14, 0  ;;  %v809_v23 = vperm.slane %v348_v15, 0  ;;  %v818_v29 = vperm.slane %v368_v18, 0  ;;  %v475_v30 = vunpack.c.l.bf16 %v660_v26  ;;  %v358_v33 = vld [vmem:[%s814_s25] sm:$0x7]  ;;  %s968_s18 = smov (!%p878_p8, %s627_s18), 1 }
  0x2a   : > { %v322_v31 = vunpack.c.l.bf16 %v318_v27  ;;  %v342_v32 = vunpack.c.l.bf16 %v635_v28  ;;  %v641_v34 = vld [vmem:[%s814_s25 + $0x28] sm:$0x3]  ;;  %v822_v35 = vperm.slane %v401_v19, 0  ;;  %v824_v36 = vperm.slane %v422_v24, 0  ;;  %v646_v39 = vld [vmem:[%s814_s25 + $0x3c] sm:$0x3] }
  0x2b   : > { %v362_v37 = vunpack.c.l.bf16 %v358_v33  ;;  %v395_v38 = vunpack.c.l.bf16 %v641_v34  ;;  %v651_v40 = vld [vmem:[%s814_s25 + $0x28] sm:$0x7]  ;;  %v828_v41 = vperm.slane %v442_v25, 0  ;;  %v830_v42 = vperm.slane %v475_v30, 0  ;;  %v656_v47 = vld [vmem:[%s814_s25 + $0x4] sm:$0x3] }
  0x2c   : > { %v329_v43 = vmul.f32 %v807_v22, %v322_v31  ;;  %v350_v44 = vmul.f32 %v809_v23, %v342_v32  ;;  %v416_v45 = vunpack.c.l.bf16 %v646_v39  ;;  %v436_v46 = vunpack.c.l.bf16 %v651_v40  ;;  %v661_v48 = vld [vmem:[%s814_s25 + $0x18] sm:$0x3]  ;;  %v665_v49 = vld [vmem:[%s959_s1 + $0x7] sm:$0x1]  ;;  %v666_v53 = vld [vmem:[%s814_s25 + $0x4] sm:$0x7] }
  0x2d   : > { %v370_v50 = vmul.f32 %v818_v29, %v362_v37  ;;  %v403_v51 = vmul.f32 %v822_v35, %v395_v38  ;;  %v469_v52 = vunpack.c.l.bf16 %v656_v47  ;;  %v670_v54 = vld [vmem:[%s959_s1 + $0x8] sm:$0x1]  ;;  %v490_v57 = vunpack.c.l.bf16 %v661_v48  ;;  %v319_v63 = vld [vmem:[%s814_s25 + $0x4] sm:$0x3]  ;;  %v642_v6 = vld [vmem:[%s814_s25 + $0x2c] sm:$0x3] }
  0x2e   : > { %v354_v55 = vadd.f32 %v350_v44, %v329_v43  ;;  %v444_v56 = vmul.f32 %v828_v41, %v436_v46  ;;  %v496_v58 = vunpack.c.l.bf16 %v665_v49  ;;  %v424_v60 = vmul.f32 %v824_v36, %v416_v45  ;;  %v636_v0 = vld [vmem:[%s814_s25 + $0x18] sm:$0x3]  ;;  %v359_v5 = vld [vmem:[%s814_s25 + $0x4] sm:$0x7]  ;;  %v647_v11 = vld [vmem:[%s814_s25 + $0x40] sm:$0x3] }
  0x2f   : > { %v378_v59 = vrot.slane %v370_v50, 1  ;;  %v510_v61 = vunpack.c.l.bf16 %v666_v53  ;;  %v516_v62 = vunpack.c.l.bf16 %v670_v54  ;;  %v477_v1 = vmul.f32 %v830_v42, %v469_v52  ;;  %v652_v12 = vld [vmem:[%s814_s25 + $0x2c] sm:$0x7]  ;;  %v657_v17 = vld [vmem:[%s814_s25 + $0x8] sm:$0x3]  ;;  %s673_s17 = sshll.u32 %s968_s18, 3 }
  0x30   : > { %v850_v2 = vperm.slane %v496_v58, 0  ;;  %v323_v3 = vunpack.c.l.bf16 %v319_v63  ;;  %v343_v4 = vunpack.c.l.bf16 %v636_v0  ;;  %v363_v9 = vunpack.c.l.bf16 %v359_v5  ;;  %v662_v24 = vld [vmem:[%s814_s25 + $0x1c] sm:$0x3]  ;;  %v667_v25 = vld [vmem:[%s814_s25 + $0x8] sm:$0x7]  ;;  %s929_s10 = scalar_lea.vmem %s962_s4, %s673_s17 }
  0x31   : > { %v386_v7 = vadd.f32 %v378_v59, %v354_v55  ;;  %v854_v8 = vperm.slane %v516_v62, 0  ;;  %v396_v10 = vunpack.c.l.bf16 %v642_v6  ;;  %v452_v13 = vrot.slane %v444_v56, 1  ;;  %v320_v26 = vld [vmem:[%s814_s25 + $0x8] sm:$0x3]  ;;  %v637_v32 = vld [vmem:[%s814_s25 + $0x1c] sm:$0x3] }
  0x32   : > { %v330_v14 = vmul.f32 %v807_v22, %v323_v3  ;;  %v351_v15 = vmul.f32 %v809_v23, %v343_v4  ;;  %v417_v16 = vunpack.c.l.bf16 %v647_v11  ;;  %v498_v19 = vmul.f32 %v850_v2, %v490_v57  ;;  %v360_v39 = vld [vmem:[%s814_s25 + $0x8] sm:$0x7]  ;;  %v643_v46 = vld [vmem:[%s814_s25 + $0x30] sm:$0x3]  ;;  %v663_v4 = vld [vmem:[%s814_s25 + $0x20] sm:$0x3] }
  0x33   : > { %v407_v18 = vadd.f32 %v403_v51, %v386_v7  ;;  %v518_v20 = vmul.f32 %v854_v8, %v510_v61  ;;  %v371_v21 = vmul.f32 %v818_v29, %v363_v9  ;;  %v404_v28 = vmul.f32 %v822_v35, %v396_v10  ;;  %v648_v51 = vld [vmem:[%s814_s25 + $0x44] sm:$0x3]  ;;  %v653_v52 = vld [vmem:[%s814_s25 + $0x30] sm:$0x7]  ;;  %v658_v61 = vld [vmem:[%s814_s25 + $0xc] sm:$0x3] }
  0x34   : > { %v355_v27 = vadd.f32 %v351_v15, %v330_v14  ;;  %v437_v30 = vunpack.c.l.bf16 %v652_v12  ;;  %v470_v31 = vunpack.c.l.bf16 %v657_v17  ;;  %v425_v38 = vmul.f32 %v824_v36, %v417_v16  ;;  %v668_v5 = vld [vmem:[%s814_s25 + $0xc] sm:$0x7]  ;;  %v907_v17 = vld [vmem:[%s961_s3] ss:$0 sm:$0xff] }
  0x35   : > { %v428_v33 = vadd.f32 %v424_v60, %v407_v18  ;;  %v526_v34 = vrot.slane %v518_v20, 1  ;;  %v379_v37 = vrot.slane %v371_v21, 1  ;;  %v491_v43 = vunpack.c.l.bf16 %v662_v24  ;;  %v321_v11 = vld [vmem:[%s814_s25 + $0xc] sm:$0x3]  ;;  %v638_v21 = vld [vmem:[%s814_s25 + $0x20] sm:$0x3] }
  0x36   : > { %v445_v40 = vmul.f32 %v828_v41, %v437_v30  ;;  %v511_v44 = vunpack.c.l.bf16 %v667_v25  ;;  %v324_v45 = vunpack.c.l.bf16 %v320_v26  ;;  %v478_v49 = vmul.f32 %v830_v42, %v470_v31  ;;  %v361_v24 = vld [vmem:[%s814_s25 + $0xc] sm:$0x7]  ;;  %v644_v30 = vld [vmem:[%s814_s25 + $0x34] sm:$0x3] }
  0x37   : > { %v460_v47 = vadd.f32 %v452_v13, %v428_v33  ;;  %v387_v48 = vadd.f32 %v379_v37, %v355_v27  ;;  %v344_v50 = vunpack.c.l.bf16 %v637_v32  ;;  %v364_v56 = vunpack.c.l.bf16 %v360_v39  ;;  %v649_v37 = vld [vmem:[%s814_s25 + $0x48] sm:$0x3] }
  0x38   : > { %v453_v53 = vrot.slane %v445_v40, 1  ;;  %v519_v54 = vmul.f32 %v854_v8, %v511_v44  ;;  %v331_v55 = vmul.f32 %v807_v22, %v324_v45  ;;  %v397_v60 = vunpack.c.l.bf16 %v643_v46  ;;  %v654_v44 = vld [vmem:[%s814_s25 + $0x34] sm:$0x7] }
  0x39   : > { %v481_v57 = vadd.f32 %v477_v1, %v460_v47  ;;  %v408_v58 = vadd.f32 %v404_v28, %v387_v48  ;;  %v352_v59 = vmul.f32 %v809_v23, %v344_v50  ;;  %v499_v62 = vmul.f32 %v850_v2, %v491_v43  ;;  %v893_v1 = vld [vmem:[%s960_s2] ss:$0 sm:$0xff] }
  0x3a   : > { %v372_v63 = vmul.f32 %v818_v29, %v364_v56  ;;  %v418_v0 = vunpack.c.l.bf16 %v648_v51  ;;  %v438_v3 = vunpack.c.l.bf16 %v653_v52  ;;  %v527_v9 = vrot.slane %v519_v54, 1  ;;  %v659_v56 = vld [vmem:[%s814_s25 + $0x10] sm:$0x3] }
  0x3b   : > { %v502_v6 = vadd.f32 %v498_v19, %v481_v57  ;;  %v429_v7 = vadd.f32 %v425_v38, %v408_v58  ;;  %v356_v10 = vadd.f32 %v352_v59, %v331_v55  ;;  %v405_v13 = vmul.f32 %v822_v35, %v397_v60  ;;  %v669_v57 = vld [vmem:[%s814_s25 + $0x10] sm:$0x7] }
  0x3c   : > { %v380_v12 = vrot.slane %v372_v63, 1  ;;  %v446_v14 = vmul.f32 %v828_v41, %v438_v3  ;;  %v471_v15 = vunpack.c.l.bf16 %v658_v61  ;;  %v492_v19 = vunpack.c.l.bf16 %v663_v4 }
  0x3d   : > { %v534_v16 = vadd.f32 %v526_v34, %v502_v6  ;;  %v461_v18 = vadd.f32 %v453_v53, %v429_v7  ;;  %v512_v20 = vunpack.c.l.bf16 %v668_v5  ;;  %v426_v26 = vmul.f32 %v824_v36, %v418_v0  ;;  %v664_v0 = vld [vmem:[%s814_s25 + $0x24] sm:$0x3] }
  0x3e   : > { %v388_v25 = vadd.f32 %v380_v12, %v356_v10  ;;  %v454_v27 = vrot.slane %v446_v14, 1  ;;  %v325_v28 = vunpack.c.l.bf16 %v321_v11  ;;  %v479_v33 = vmul.f32 %v830_v42, %v471_v15 }
  0x3f   : > { %v542_v31 = vmul.f32 %v893_v1, %v534_v16  ;;  %v482_v32 = vadd.f32 %v478_v49, %v461_v18  ;;  %v520_v34 = vmul.f32 %v854_v8, %v512_v20  ;;  %v345_v40 = vunpack.c.l.bf16 %v638_v21 }
  0x40   : > { %v409_v38 = vadd.f32 %v405_v13, %v388_v25  ;;  %v332_v39 = vmul.f32 %v807_v22, %v325_v28  ;;  %v365_v43 = vunpack.c.l.bf16 %v361_v24  ;;  %v500_v47 = vmul.f32 %v850_v2, %v492_v19 }
  0x41   : > { %v550_v45 = vadd.f32 %v907_v17, %v542_v31  ;;  %v503_v46 = vadd.f32 %v499_v62, %v482_v32  ;;  %v398_v48 = vunpack.c.l.bf16 %v644_v30  ;;  %v353_v50 = vmul.f32 %v809_v23, %v345_v40 }
  0x42   : > { %v430_v49 = vadd.f32 %v426_v26, %v409_v38  ;;  %v373_v51 = vmul.f32 %v818_v29, %v365_v43  ;;  %v419_v52 = vunpack.c.l.bf16 %v649_v37  ;;  %v528_v54 = vrot.slane %v520_v34, 1 }
  0x43   : > { %v554_v22 = vmax.f32 %v550_v45, 0.0  ;;  %v535_v53 = vadd.f32 %v527_v9, %v503_v46  ;;  %v439_v55 = vunpack.c.l.bf16 %v654_v44  ;;  %v357_v59 = vadd.f32 %v353_v50, %v332_v39 }
  0x44   : > { %v462_v58 = vadd.f32 %v454_v27, %v430_v49  ;;  %v381_v60 = vrot.slane %v373_v51, 1  ;;  %v406_v23 = vmul.f32 %v822_v35, %v398_v48  ;;  %v427_v62 = vmul.f32 %v824_v36, %v419_v52 }
  0x45   : > { %v558_v29 = vpack.c.bf16 %v554_v22, %v554_v22  ;;  %v543_v61 = vmul.f32 %v893_v1, %v535_v53  ;;  %v447_v63 = vmul.f32 %v828_v41, %v439_v55  ;;  %v472_v5 = vunpack.c.l.bf16 %v659_v56 }
  0x46   : > { %v483_v3 = vadd.f32 %v479_v33, %v462_v58  ;;  %v389_v4 = vadd.f32 %v381_v60, %v357_v59  ;;  %v513_v6 = vunpack.c.l.bf16 %v669_v57  ;;  %v493_v35 = vunpack.c.l.bf16 %v664_v0 }
  0x47   : > { %562 = vst [vmem:[%s929_s10] sm:$0x3] %v558_v29  ;;  %v551_v7 = vadd.f32 %v907_v17, %v543_v61  ;;  %v455_v11 = vrot.slane %v447_v63, 1  ;;  %v480_v36 = vmul.f32 %v830_v42, %v472_v5 }
  0x48   : > { %v504_v9 = vadd.f32 %v500_v47, %v483_v3  ;;  %v410_v10 = vadd.f32 %v406_v23, %v389_v4  ;;  %v521_v41 = vmul.f32 %v854_v8, %v513_v6  ;;  %v501_v19 = vmul.f32 %v850_v2, %v493_v35 }
  0x49   : > { %v555_v12 = vmax.f32 %v551_v7, 0.0 }
  0x4a   : > { %v536_v13 = vadd.f32 %v528_v54, %v504_v9  ;;  %v431_v14 = vadd.f32 %v427_v62, %v410_v10  ;;  %v529_v24 = vrot.slane %v521_v41, 1 }
  0x4b   : > { %v559_v15 = vpack.c.bf16 %v555_v12, %v555_v12 }
  0x4c   : > { %v544_v16 = vmul.f32 %v893_v1, %v536_v13  ;;  %v463_v18 = vadd.f32 %v455_v11, %v431_v14 }
  0x4d   : > { %563 = vst [vmem:[%s929_s10 + $0x2] sm:$0x3] %v559_v15 }
  0x4e   : > { %v552_v20 = vadd.f32 %v907_v17, %v544_v16  ;;  %v484_v21 = vadd.f32 %v480_v36, %v463_v18 }
  0x50   : > { %v556_v25 = vmax.f32 %v552_v20, 0.0  ;;  %v505_v26 = vadd.f32 %v501_v19, %v484_v21 }
  0x52   : > { %v560_v27 = vpack.c.bf16 %v556_v25, %v556_v25  ;;  %v537_v28 = vadd.f32 %v529_v24, %v505_v26 }
  0x54   : > { %564 = vst [vmem:[%s929_s10 + $0x4] sm:$0x3] %v560_v27  ;;  %v545_v42 = vmul.f32 %v893_v1, %v537_v28 }
  0x56   : > { %v553_v8 = vadd.f32 %v907_v17, %v545_v42 }
  0x58   : > { %v557_v30 = vmax.f32 %v553_v8, 0.0 }
  0x5a   : > { %v561_v31 = vpack.c.bf16 %v557_v30, %v557_v30 }
  0x5c   : > { %565 = vst [vmem:[%s929_s10 + $0x6] sm:$0x3] %v561_v31 }
  0x5d PF: > { %p11_p9 = scmp.ge.s32.totalorder %s769_s19, 4   ;;  %s964_s15 = smov %s721_s16 }
  0x5e   : > { %s965_s16 = smov %s778_s22  ;;  %s966_s17 = smov %s769_s19 }
  0x5f   :  { %13 = sbr.rel (!%p11_p9) target bundleno = 2 (0x2), region = 125 }

// kernel: _lambda_.20
= control target key start
LH: loop header
LB: loop body
LE: loop exit
PB: predicated region body
PF: predicated region fallthrough
CT: control target
= control target key end

     0   :  { %s302_s1 = inlined_call_operand.vmem [shape: bf16[128,128], index: 1, kind: input, shape index: {}]   ;;  %s303_s2 = inlined_call_operand.vmem [shape: f32[1,128], index: 2, kind: input, shape index: {}]   ;;  %s304_s3 = inlined_call_operand.vmem [shape: f32[1,128], index: 3, kind: input, shape index: {}]   ;;  %s305_s0 = inlined_call_operand.vmem [shape: bf16[32,128], index: 0, kind: input, shape index: {}]   ;;  %s306_s4 = inlined_call_operand.vmem [shape: bf16[32,128], index: 4, kind: output, shape index: {}]  }
   0x1   :  { %v213_v0 = vld [vmem:[%s302_s1 + $0x38] sm:$0xff]  ;;  %v212_v1 = vld [vmem:[%s302_s1 + $0x30] sm:$0xff]  ;;  %v211_v2 = vld [vmem:[%s302_s1 + $0x28] sm:$0xff] }
   0x2   :  { %97 = vmatpush.bf16.msra.mxu0 %v213_v0  ;;  %225 = vmatpush.bf16.msra.mxu1 %v213_v0  ;;  %v210_v3 = vld [vmem:[%s302_s1 + $0x20] sm:$0xff]  ;;  %v209_v4 = vld [vmem:[%s302_s1 + $0x18] sm:$0xff]  ;;  %v208_v5 = vld [vmem:[%s302_s1 + $0x10] sm:$0xff] }
   0x3   :  { %v207_v6 = vld [vmem:[%s302_s1 + $0x8] sm:$0xff]  ;;  %v206_v7 = vld [vmem:[%s302_s1] sm:$0xff] }
   0x4   :  { %v204_v8 = vld [vmem:[%s305_s0] sm:$0xff]  ;;  %v205_v9 = vld [vmem:[%s305_s0 + $0x8] sm:$0xff] }
   0x5   :  { %v233_v10 = vld [vmem:[%s303_s2] ss:$0 sm:$0xff] }
   0x6   :  { %98 = vmatpush.bf16.msra.mxu0 %v212_v1  ;;  %226 = vmatpush.bf16.msra.mxu1 %v212_v1  ;;  %v234_v11 = vld [vmem:[%s304_s3] ss:$0 sm:$0xff] }
   0xa   :  { %99 = vmatpush.bf16.msra.mxu0 %v211_v2  ;;  %227 = vmatpush.bf16.msra.mxu1 %v211_v2 }
   0xe   :  { %100 = vmatpush.bf16.msra.mxu0 %v210_v3  ;;  %228 = vmatpush.bf16.msra.mxu1 %v210_v3 }
  0x12   :  { %101 = vmatpush.bf16.msra.mxu0 %v209_v4  ;;  %229 = vmatpush.bf16.msra.mxu1 %v209_v4 }
  0x16   :  { %102 = vmatpush.bf16.msra.mxu0 %v208_v5  ;;  %230 = vmatpush.bf16.msra.mxu1 %v208_v5 }
  0x1a   :  { %103 = vmatpush.bf16.msra.mxu0 %v207_v6  ;;  %231 = vmatpush.bf16.msra.mxu1 %v207_v6 }
  0x1e   :  { %104 = vmatpush.bf16.msra.mxu0 %v206_v7  ;;  %232 = vmatpush.bf16.msra.mxu1 %v206_v7 }
  0x21   :  { %105 = vmatmul.bf16.vlgmr.msra.gmra.mxu0 %v204_v8  ;;  %110 = vmatmul.bf16.vlgmr.msra.gmra.mxu1 %v205_v9 }
  0x9e   :  { %v106_v12 = vpop.f32.mrf.mxu0  ;;  %v111_v13 = vpop.f32.mrf.mxu1 }
  0x9f   :  { %v120_v14 = vmul.f32 %v233_v10, %v106_v12  ;;  %v122_v15 = vmul.f32 %v233_v10, %v111_v13 }
  0xa1   :  { %v128_v16 = vadd.f32 %v234_v11, %v120_v14  ;;  %v130_v17 = vadd.f32 %v234_v11, %v122_v15 }
  0xa3   :  { %v132_v18 = vadd.f32 3.0, %v128_v16  ;;  %v134_v19 = vadd.f32 3.0, %v130_v17 }
  0xa5   :  { %v136_v22 = vmax.f32 %v132_v18, 0.0  ;;  %v138_v23 = vmax.f32 %v134_v19, 0.0 }
  0xa6   :  { %v108_v20 = vpop.f32.mrf.mxu0  ;;  %v113_v21 = vpop.f32.mrf.mxu1 }
  0xa7   :  { %v121_v24 = vmul.f32 %v233_v10, %v108_v20  ;;  %v123_v25 = vmul.f32 %v233_v10, %v113_v21  ;;  %v140_v28 = vmin.f32 %v136_v22, 6.0  ;;  %v142_v29 = vmin.f32 %v138_v23, 6.0 }
  0xa9   :  { %v129_v26 = vadd.f32 %v234_v11, %v121_v24  ;;  %v131_v27 = vadd.f32 %v234_v11, %v123_v25  ;;  %v144_v34 = vmul.f32 0.16666667, %v140_v28  ;;  %v146_v35 = vmul.f32 0.16666667, %v142_v29 }
  0xab   :  { %v133_v30 = vadd.f32 3.0, %v129_v26  ;;  %v135_v31 = vadd.f32 3.0, %v131_v27  ;;  %v148_v40 = vmul.f32 %v144_v34, %v128_v16  ;;  %v150_v41 = vmul.f32 %v146_v35, %v130_v17 }
  0xad   :  { %v137_v32 = vmax.f32 %v133_v30, 0.0  ;;  %v139_v33 = vmax.f32 %v135_v31, 0.0 }
  0xaf   :  { %v141_v36 = vmin.f32 %v137_v32, 6.0  ;;  %v143_v37 = vmin.f32 %v139_v33, 6.0 }
  0xb1   :  { %v145_v38 = vmul.f32 0.16666667, %v141_v36  ;;  %v147_v39 = vmul.f32 0.16666667, %v143_v37 }
  0xb3   :  { %v149_v42 = vmul.f32 %v145_v38, %v129_v26  ;;  %v151_v43 = vmul.f32 %v147_v39, %v131_v27 }
  0xb5   :  { %v217_v44 = vpack.c.bf16 %v149_v42, %v148_v40  ;;  %v222_v45 = vpack.c.bf16 %v151_v43, %v150_v41 }
  0xb7   :  { %218 = vst [vmem:[%s306_s4] sm:$0xff] %v217_v44  }
  0xb8   :  { %224 = vst [vmem:[%s306_s4 + $0x8] sm:$0xff] %v222_v45  }

// kernel: _lambda_.22
= control target key start
LH: loop header
LB: loop body
LE: loop exit
PB: predicated region body
PF: predicated region fallthrough
CT: control target
= control target key end

     0   :  { %s621_s18 = smov 0   ;;  %s699_s0 = inlined_call_operand.vmem [shape: bf16[2,16,128], index: 0, kind: input, shape index: {}]   ;;  %s700_s1 = inlined_call_operand.vmem [shape: bf16[128,128], index: 1, kind: input, shape index: {}]   ;;  %s701_s2 = inlined_call_operand.vmem [shape: f32[1,128], index: 2, kind: input, shape index: {}, may-alias: {2,4}]   ;;  %s702_s3 = inlined_call_operand.vmem [shape: bf16[128,128], index: 3, kind: input, shape index: {}]   ;;  %s703_s4 = inlined_call_operand.vmem [shape: f32[1,128], index: 4, kind: input, shape index: {}, may-alias: {2,4}]   ;;  %s704_s5 = inlined_call_operand.vmem [shape: bf16[2,16,128], index: 5, kind: output, shape index: {}]  }
   0x1 LB: > { %s469_s19 = sadd.s32 4294967295, %s588_s18   ;;  %p473_p0 = scmp.ge.s32.totalorder %s588_s18, 1  ;;  %s588_s18 = sphi %s621_s18, %s15_s18  }
   0x2   : > { %p187_p1 = scmp.lt.s32.totalorder %s588_s18, 3 }
   0x4   : > { %p188_p2 = pnand %p473_p0, %p187_p1 }
   0x5   : > { %p215_p3 = scmp.lt.s32.totalorder (!%p188_p2), %s469_s19, 1 }
   0x6   : > { %191 = sbr.rel (%p188_p2) target bundleno = 318 (0x13e), region = 40 }
   0xb   : > { %v553_v0 = vld [vmem:[%s700_s1 + $0x38] sm:$0xff]  ;;  %v590_v1 = vmov 16.0   ;;  %v552_v2 = vld [vmem:[%s700_s1 + $0x30] sm:$0xff]  ;;  %s706_s19 = smov (!%p215_p3, %s469_s19), 1  ;;  %v551_v5 = vld [vmem:[%s700_s1 + $0x28] sm:$0xff] }
   0xc   : > { %580 = vrcp.f32 %v590_v1  ;;  %310 = vmatpush.bf16.msra.mxu0 %v553_v0  ;;  %v561_v3 = vld [vmem:[%s702_s3 + $0x38] sm:$0xff]  ;;  %s544_s26 = sshll.u32 %s706_s19, 3  ;;  %v560_v4 = vld [vmem:[%s702_s3 + $0x30] sm:$0xff]  ;;  %v559_v11 = vld [vmem:[%s702_s3 + $0x28] sm:$0xff] }
   0xd   : > { %390 = vmatpush.bf16.msra.mxu1 %v561_v3  ;;  %s219_s6 = scalar_lea.vmem %s699_s0, %s544_s26  ;;  %v550_v13 = vld [vmem:[%s700_s1 + $0x20] sm:$0xff]  ;;  %v549_v18 = vld [vmem:[%s700_s1 + $0x18] sm:$0xff]  ;;  %v548_v23 = vld [vmem:[%s700_s1 + $0x10] sm:$0xff]  ;;  %s224_s15 = scalar_lea.vmem %s704_s5, %s544_s26 }
   0xe   : > { %v563_v6 = vld [vmem:[%s219_s6] sm:$0xff]   ;;  %v557_v21 = vld [vmem:[%s702_s3 + $0x18] sm:$0xff]  ;;  %v556_v26 = vld [vmem:[%s702_s3 + $0x10] sm:$0xff] }
   0xf   : > { %v564_v8 = vunpack.c.l.bf16 %v563_v6  ;;  %v565_v9 = vunpack.c.h.bf16 %v563_v6  ;;  %v558_v16 = vld [vmem:[%s702_s3 + $0x20] sm:$0xff]  ;;  %v547_v28 = vld [vmem:[%s700_s1 + $0x8] sm:$0xff] }
  0x10   : > { %311 = vmatpush.bf16.msra.mxu0 %v552_v2  ;;  %v546_v31 = vld [vmem:[%s700_s1] sm:$0xff]  ;;  %v555_v33 = vld [vmem:[%s702_s3 + $0x8] sm:$0xff] }
  0x11   : > { %391 = vmatpush.bf16.msra.mxu1 %v560_v4  ;;  %v229_v12 = vadd.f32 %v565_v9, %v564_v8  ;;  %v554_v34 = vld [vmem:[%s702_s3] sm:$0xff] }
  0x12   : > { %v581_v7 = vpop.eup %580  ;;  %v261_v35 = vld [vmem:[%s701_s2] sm:$0x1] }
  0x13   : > { %v237_v10 = vmul.f32 16.0, %v581_v7  ;;  %v230_v15 = vrot.slane %v229_v12, 4  ;;  %vm241_vm0 = vweird.f32 %v581_v7  ;;  %v341_v41 = vld [vmem:[%s703_s4] sm:$0x1] }
  0x14   : > { %312 = vmatpush.bf16.msra.mxu0 %v551_v5 }
  0x15   : > { %v238_v14 = vsub.f32 1.0, %v237_v10  ;;  %392 = vmatpush.bf16.msra.mxu1 %v559_v11  ;;  %v231_v17 = vadd.f32 %v230_v15, %v229_v12 }
  0x17   : > { %v239_v19 = vmul.f32 %v581_v7, %v238_v14  ;;  %v232_v20 = vrot.slane %v231_v17, 2 }
  0x18   : > { %313 = vmatpush.bf16.msra.mxu0 %v550_v13 }
  0x19   : > { %393 = vmatpush.bf16.msra.mxu1 %v558_v16  ;;  %v233_v22 = vadd.f32 %v232_v20, %v231_v17  ;;  %v240_v24 = vadd.f32 %v581_v7, %v239_v19 }
  0x1b   : > { %v234_v25 = vrot.slane %v233_v22, 1  ;;  %v242_v29 = vsel %vm241_vm0, %v581_v7, %v240_v24 }
  0x1c   : > { %314 = vmatpush.bf16.msra.mxu0 %v549_v18 }
  0x1d   : > { %394 = vmatpush.bf16.msra.mxu1 %v557_v21  ;;  %v235_v27 = vadd.f32 %v234_v25, %v233_v22 }
  0x1f   : > { %v243_v30 = vmul.f32 %v242_v29, %v235_v27 }
  0x20   : > { %315 = vmatpush.bf16.msra.mxu0 %v548_v23 }
  0x21   : > { %395 = vmatpush.bf16.msra.mxu1 %v556_v26  ;;  %v244_v32 = vpack.c.bf16 %v243_v30, %v243_v30 }
  0x24   : > { %316 = vmatpush.bf16.msra.mxu0 %v547_v28 }
  0x25   : > { %396 = vmatpush.bf16.msra.mxu1 %v555_v33 }
  0x28   : > { %317 = vmatpush.bf16.msra.mxu0 %v546_v31 }
  0x29   : > { %397 = vmatpush.bf16.msra.mxu1 %v554_v34 }
  0x2b   : > { %318 = vmatmul.bf16.vlgmr.msra.gmra.mxu0 %v244_v32 }
  0xa8   : > { %v319_v36 = vpop.f32.mrf.mxu0 }
  0xa9   : > { %v320_v37 = vadd.f32 %v319_v36, %v261_v35 }
  0xab   : > { %v323_v38 = vmax.f32 %v320_v37, 0.0 }
  0xad   : > { %v324_v39 = vpack.c.bf16 %v323_v38, %v323_v38 }
  0xaf   : > { %398 = vmatmul.bf16.vlgmr.msra.gmra.mxu1 %v324_v39 }
  0xb0   : > { %v321_v40 = vpop.f32.mrf.mxu0 }
 0x12c   : > { %v399_v42 = vpop.f32.mrf.mxu1 }
 0x12d   : > { %v400_v43 = vadd.f32 %v399_v42, %v341_v41 }
 0x12f   : > { %v403_v44 = vadd.f32 3.0, %v400_v43 }
 0x131   : > { %v404_v45 = vmax.f32 %v403_v44, 0.0 }
 0x133   : > { %v405_v46 = vmin.f32 %v404_v45, 6.0 }
 0x134   : > { %v401_v47 = vpop.f32.mrf.mxu1 }
 0x135   : > { %v406_v48 = vmul.f32 0.16666667, %v405_v46 }
 0x137   : > { %v407_v49 = vperm.slane %v406_v48, 0 }
 0x139   : > { %v408_v50 = vmul.f32 %v564_v8, %v407_v49  ;;  %v409_v51 = vmul.f32 %v565_v9, %v407_v49 }
 0x13b   : > { %v569_v52 = vpack.c.bf16 %v409_v51, %v408_v50 }
 0x13d   : > { %570 = vst [vmem:[%s224_s15] sm:$0xff] %v569_v52  }
 0x13e PF: > { %s15_s18 = sadd.s32 1, %s588_s18  }
 0x13f   : > { %p12_p4 = scmp.ge.s32.totalorder %s15_s18, 4  }
 0x141   :  { %14 = sbr.rel (!%p12_p4) target bundleno = 1 (0x1), region = 70 }

// kernel: _lambda_.23
= control target key start
LH: loop header
LB: loop body
LE: loop exit
PB: predicated region body
PF: predicated region fallthrough
CT: control target
= control target key end

     0   :  { %s317_s1 = inlined_call_operand.vmem [shape: bf16[128,128], index: 1, kind: input, shape index: {}]   ;;  %s318_s2 = inlined_call_operand.vmem [shape: f32[1,128], index: 2, kind: input, shape index: {}]   ;;  %s319_s3 = inlined_call_operand.vmem [shape: f32[1,128], index: 3, kind: input, shape index: {}]   ;;  %s320_s0 = inlined_call_operand.vmem [shape: bf16[32,128], index: 0, kind: input, shape index: {}]   ;;  %s321_s4 = inlined_call_operand.vmem [shape: bf16[32,128], index: 4, kind: input, shape index: {}]   ;;  %s322_s5 = inlined_call_operand.vmem [shape: bf16[32,128], index: 5, kind: output, shape index: {}]  }
   0x1   :  { %v208_v0 = vld [vmem:[%s317_s1 + $0x38] sm:$0xff]  ;;  %v207_v1 = vld [vmem:[%s317_s1 + $0x30] sm:$0xff]  ;;  %v206_v2 = vld [vmem:[%s317_s1 + $0x28] sm:$0xff] }
   0x2   :  { %100 = vmatpush.bf16.msra.mxu0 %v208_v0  ;;  %229 = vmatpush.bf16.msra.mxu1 %v208_v0  ;;  %v205_v3 = vld [vmem:[%s317_s1 + $0x20] sm:$0xff]  ;;  %v204_v4 = vld [vmem:[%s317_s1 + $0x18] sm:$0xff]  ;;  %v203_v5 = vld [vmem:[%s317_s1 + $0x10] sm:$0xff] }
   0x3   :  { %v202_v6 = vld [vmem:[%s317_s1 + $0x8] sm:$0xff]  ;;  %v201_v7 = vld [vmem:[%s317_s1] sm:$0xff] }
   0x4   :  { %v199_v8 = vld [vmem:[%s320_s0] sm:$0xff]  ;;  %v200_v9 = vld [vmem:[%s320_s0 + $0x8] sm:$0xff] }
   0x5   :  { %v237_v12 = vld [vmem:[%s318_s2] ss:$0 sm:$0xff]  ;;  %v227_v17 = vld [vmem:[%s321_s4 + $0x8] sm:$0xff]  }
   0x6   :  { %101 = vmatpush.bf16.msra.mxu0 %v207_v1  ;;  %230 = vmatpush.bf16.msra.mxu1 %v207_v1  ;;  %v238_v14 = vld [vmem:[%s319_s3] ss:$0 sm:$0xff]  ;;  %v215_v19 = vunpack.c.l.bf16 %v227_v17  ;;  %v216_v23 = vunpack.c.h.bf16 %v227_v17 }
   0x7   :  { %v210_v15 = vld [vmem:[%s321_s4] sm:$0xff]  }
   0x8   :  { %v211_v18 = vunpack.c.l.bf16 %v210_v15  ;;  %v212_v21 = vunpack.c.h.bf16 %v210_v15 }
   0xa   :  { %102 = vmatpush.bf16.msra.mxu0 %v206_v2  ;;  %231 = vmatpush.bf16.msra.mxu1 %v206_v2 }
   0xe   :  { %103 = vmatpush.bf16.msra.mxu0 %v205_v3  ;;  %232 = vmatpush.bf16.msra.mxu1 %v205_v3 }
  0x12   :  { %104 = vmatpush.bf16.msra.mxu0 %v204_v4  ;;  %233 = vmatpush.bf16.msra.mxu1 %v204_v4 }
  0x16   :  { %105 = vmatpush.bf16.msra.mxu0 %v203_v5  ;;  %234 = vmatpush.bf16.msra.mxu1 %v203_v5 }
  0x1a   :  { %106 = vmatpush.bf16.msra.mxu0 %v202_v6  ;;  %235 = vmatpush.bf16.msra.mxu1 %v202_v6 }
  0x1e   :  { %107 = vmatpush.bf16.msra.mxu0 %v201_v7  ;;  %236 = vmatpush.bf16.msra.mxu1 %v201_v7 }
  0x21   :  { %108 = vmatmul.bf16.vlgmr.msra.gmra.mxu0 %v199_v8  ;;  %113 = vmatmul.bf16.vlgmr.msra.gmra.mxu1 %v200_v9 }
  0x9e   :  { %v109_v10 = vpop.f32.mrf.mxu0  ;;  %v114_v11 = vpop.f32.mrf.mxu1 }
  0x9f   :  { %v123_v13 = vmul.f32 %v237_v12, %v109_v10  ;;  %v125_v16 = vmul.f32 %v237_v12, %v114_v11 }
  0xa1   :  { %v131_v24 = vadd.f32 %v238_v14, %v123_v13  ;;  %v133_v25 = vadd.f32 %v238_v14, %v125_v16 }
  0xa3   :  { %v143_v30 = vadd.f32 %v211_v18, %v131_v24  ;;  %v145_v31 = vadd.f32 %v215_v19, %v133_v25 }
  0xa6   :  { %v111_v20 = vpop.f32.mrf.mxu0  ;;  %v116_v22 = vpop.f32.mrf.mxu1 }
  0xa7   :  { %v124_v26 = vmul.f32 %v237_v12, %v111_v20  ;;  %v126_v27 = vmul.f32 %v237_v12, %v116_v22 }
  0xa9   :  { %v132_v28 = vadd.f32 %v238_v14, %v124_v26  ;;  %v134_v29 = vadd.f32 %v238_v14, %v126_v27 }
  0xab   :  { %v144_v32 = vadd.f32 %v212_v21, %v132_v28  ;;  %v146_v33 = vadd.f32 %v216_v23, %v134_v29 }
  0xad   :  { %v220_v34 = vpack.c.bf16 %v144_v32, %v143_v30  ;;  %v225_v35 = vpack.c.bf16 %v146_v33, %v145_v31 }
  0xaf   :  { %221 = vst [vmem:[%s322_s5] sm:$0xff] %v220_v34  }
  0xb0   :  { %228 = vst [vmem:[%s322_s5 + $0x8] sm:$0xff] %v225_v35  }

// kernel: _lambda_.24
= control target key start
LH: loop header
LB: loop body
LE: loop exit
PB: predicated region body
PF: predicated region fallthrough
CT: control target
= control target key end

     0   :  { %s498_s1 = inlined_call_operand.vmem [shape: bf16[128,256], index: 1, kind: input, shape index: {}]   ;;  %s499_s0 = inlined_call_operand.vmem [shape: bf16[32,128], index: 0, kind: input, shape index: {}]   ;;  %s500_s2 = inlined_call_operand.vmem [shape: f32[1,256], index: 2, kind: input, shape index: {}]   ;;  %s501_s3 = inlined_call_operand.vmem [shape: f32[1,256], index: 3, kind: input, shape index: {}]   ;;  %s502_s4 = inlined_call_operand.vmem [shape: bf16[32,256], index: 4, kind: output, shape index: {}]  }
   0x1   :  { %v313_v0 = vld [vmem:[%s498_s1 + $0x70] sm:$0xf]  ;;  %v336_v1 = vld [vmem:[%s498_s1 + $0x74] sm:$0xf0]  ;;  %v335_v2 = vld [vmem:[%s498_s1 + $0x74] sm:$0xf] }
   0x2   :  { %v314_v3 = vor.u32 %v336_v1, %v313_v0  ;;  %v315_v4 = vld [vmem:[%s498_s1 + $0x78] sm:$0xf0]  ;;  %v305_v5 = vld [vmem:[%s498_s1 + $0x60] sm:$0xf]  ;;  %v334_v6 = vld [vmem:[%s498_s1 + $0x64] sm:$0xf0] }
   0x3   :  { %v318_v7 = vor.u32 %v335_v2, %v315_v4  ;;  %v333_v8 = vld [vmem:[%s498_s1 + $0x64] sm:$0xf]  ;;  %v307_v9 = vld [vmem:[%s498_s1 + $0x68] sm:$0xf0]  ;;  %v306_v10 = vor.u32 %v334_v6, %v305_v5  ;;  %v297_v12 = vld [vmem:[%s498_s1 + $0x50] sm:$0xf] }
   0x4   :  { %129 = vmatpush.bf16.msra.mxu0 %v314_v3  ;;  %337 = vmatpush.bf16.msra.mxu2 %v314_v3  ;;  %v310_v11 = vor.u32 %v333_v8, %v307_v9  ;;  %v332_v13 = vld [vmem:[%s498_s1 + $0x54] sm:$0xf0]  ;;  %v331_v14 = vld [vmem:[%s498_s1 + $0x54] sm:$0xf]  ;;  %v299_v15 = vld [vmem:[%s498_s1 + $0x58] sm:$0xf0] }
   0x5   :  { %148 = vmatpush.bf16.msra.mxu1 %v318_v7  ;;  %345 = vmatpush.bf16.msra.mxu3 %v318_v7  ;;  %v298_v16 = vor.u32 %v332_v13, %v297_v12  ;;  %v302_v17 = vor.u32 %v331_v14, %v299_v15  ;;  %v289_v18 = vld [vmem:[%s498_s1 + $0x40] sm:$0xf]  ;;  %v330_v19 = vld [vmem:[%s498_s1 + $0x44] sm:$0xf0]  ;;  %v329_v20 = vld [vmem:[%s498_s1 + $0x44] sm:$0xf] }
   0x6   :  { %v291_v21 = vld [vmem:[%s498_s1 + $0x48] sm:$0xf0]  ;;  %v290_v22 = vor.u32 %v330_v19, %v289_v18  ;;  %v281_v24 = vld [vmem:[%s498_s1 + $0x30] sm:$0xf]  ;;  %v328_v25 = vld [vmem:[%s498_s1 + $0x34] sm:$0xf0] }
   0x7   :  { %v294_v23 = vor.u32 %v329_v20, %v291_v21  ;;  %v327_v26 = vld [vmem:[%s498_s1 + $0x34] sm:$0xf]  ;;  %v283_v27 = vld [vmem:[%s498_s1 + $0x38] sm:$0xf0]  ;;  %v282_v28 = vor.u32 %v328_v25, %v281_v24  ;;  %v273_v30 = vld [vmem:[%s498_s1 + $0x20] sm:$0xf] }
   0x8   :  { %130 = vmatpush.bf16.msra.mxu0 %v306_v10  ;;  %338 = vmatpush.bf16.msra.mxu2 %v306_v10  ;;  %v286_v29 = vor.u32 %v327_v26, %v283_v27  ;;  %v326_v31 = vld [vmem:[%s498_s1 + $0x24] sm:$0xf0]  ;;  %v325_v32 = vld [vmem:[%s498_s1 + $0x24] sm:$0xf]  ;;  %v275_v33 = vld [vmem:[%s498_s1 + $0x28] sm:$0xf0] }
   0x9   :  { %149 = vmatpush.bf16.msra.mxu1 %v310_v11  ;;  %346 = vmatpush.bf16.msra.mxu3 %v310_v11  ;;  %v274_v34 = vor.u32 %v326_v31, %v273_v30  ;;  %v278_v35 = vor.u32 %v325_v32, %v275_v33  ;;  %v265_v36 = vld [vmem:[%s498_s1 + $0x10] sm:$0xf]  ;;  %v324_v37 = vld [vmem:[%s498_s1 + $0x14] sm:$0xf0]  ;;  %v323_v38 = vld [vmem:[%s498_s1 + $0x14] sm:$0xf] }
   0xa   :  { %v267_v39 = vld [vmem:[%s498_s1 + $0x18] sm:$0xf0]  ;;  %v266_v40 = vor.u32 %v324_v37, %v265_v36  ;;  %v257_v42 = vld [vmem:[%s498_s1] sm:$0xf]  ;;  %v322_v43 = vld [vmem:[%s498_s1 + $0x4] sm:$0xf0] }
   0xb   :  { %v270_v41 = vor.u32 %v323_v38, %v267_v39  ;;  %v321_v44 = vld [vmem:[%s498_s1 + $0x4] sm:$0xf]  ;;  %v259_v45 = vld [vmem:[%s498_s1 + $0x8] sm:$0xf0]  ;;  %v258_v46 = vor.u32 %v322_v43, %v257_v42  ;;  %v167_v50 = vld [vmem:[%s500_s2] sm:$0x3] }
   0xc   :  { %131 = vmatpush.bf16.msra.mxu0 %v298_v16  ;;  %339 = vmatpush.bf16.msra.mxu2 %v298_v16  ;;  %v262_v47 = vor.u32 %v321_v44, %v259_v45  ;;  %v319_v48 = vld [vmem:[%s499_s0] sm:$0xff]  ;;  %v320_v49 = vld [vmem:[%s499_s0 + $0x8] sm:$0xff]  ;;  %v169_v52 = vperm.slane %v167_v50, 0  ;;  %v170_v53 = vperm.slane %v167_v50, 1 }
   0xd   :  { %150 = vmatpush.bf16.msra.mxu1 %v302_v17  ;;  %347 = vmatpush.bf16.msra.mxu3 %v302_v17  ;;  %v181_v51 = vld [vmem:[%s501_s3] sm:$0x3] }
   0xe   :  { %v183_v54 = vperm.slane %v181_v51, 0  ;;  %v184_v56 = vperm.slane %v181_v51, 1 }
  0x10   :  { %132 = vmatpush.bf16.msra.mxu0 %v290_v22  ;;  %340 = vmatpush.bf16.msra.mxu2 %v290_v22 }
  0x11   :  { %151 = vmatpush.bf16.msra.mxu1 %v294_v23  ;;  %348 = vmatpush.bf16.msra.mxu3 %v294_v23 }
  0x14   :  { %133 = vmatpush.bf16.msra.mxu0 %v282_v28  ;;  %341 = vmatpush.bf16.msra.mxu2 %v282_v28 }
  0x15   :  { %152 = vmatpush.bf16.msra.mxu1 %v286_v29  ;;  %349 = vmatpush.bf16.msra.mxu3 %v286_v29 }
  0x18   :  { %134 = vmatpush.bf16.msra.mxu0 %v274_v34  ;;  %342 = vmatpush.bf16.msra.mxu2 %v274_v34 }
  0x19   :  { %153 = vmatpush.bf16.msra.mxu1 %v278_v35  ;;  %350 = vmatpush.bf16.msra.mxu3 %v278_v35 }
  0x1c   :  { %135 = vmatpush.bf16.msra.mxu0 %v266_v40  ;;  %343 = vmatpush.bf16.msra.mxu2 %v266_v40 }
  0x1d   :  { %154 = vmatpush.bf16.msra.mxu1 %v270_v41  ;;  %351 = vmatpush.bf16.msra.mxu3 %v270_v41 }
  0x20   :  { %136 = vmatpush.bf16.msra.mxu0 %v258_v46  ;;  %344 = vmatpush.bf16.msra.mxu2 %v258_v46 }
  0x21   :  { %155 = vmatpush.bf16.msra.mxu1 %v262_v47  ;;  %352 = vmatpush.bf16.msra.mxu3 %v262_v47 }
  0x23   :  { %137 = vmatmul.bf16.vlgmr.msra.gmra.mxu0 %v319_v48  ;;  %142 = vmatmul.bf16.vlgmr.msra.gmra.mxu2 %v320_v49 }
  0x24   :  { %156 = vmatmul.bf16.vlgmr.msra.gmra.mxu1 %v319_v48  ;;  %161 = vmatmul.bf16.vlgmr.msra.gmra.mxu3 %v320_v49 }
  0xa0   :  { %v138_v55 = vpop.f32.mrf.mxu0 }
  0xa1   :  { %v173_v57 = vmul.f32 %v169_v52, %v138_v55  ;;  %v157_v58 = vpop.f32.mrf.mxu1 }
  0xa2   :  { %v174_v59 = vmul.f32 %v170_v53, %v157_v58 }
  0xa3   :  { %v187_v60 = vadd.f32 %v183_v54, %v173_v57 }
  0xa4   :  { %v188_v61 = vadd.f32 %v184_v56, %v174_v59 }
  0xa5   :  { %v195_v62 = vadd.f32 3.0, %v187_v60 }
  0xa6   :  { %v196_v63 = vadd.f32 3.0, %v188_v61  ;;  %v143_v0 = vpop.f32.mrf.mxu2 }
  0xa7   :  { %v203_v1 = vmax.f32 %v195_v62, 0.0  ;;  %v177_v2 = vmul.f32 %v169_v52, %v143_v0  ;;  %v162_v3 = vpop.f32.mrf.mxu3 }
  0xa8   :  { %v204_v4 = vmax.f32 %v196_v63, 0.0  ;;  %v178_v5 = vmul.f32 %v170_v53, %v162_v3  ;;  %v140_v6 = vpop.f32.mrf.mxu0 }
  0xa9   :  { %v211_v7 = vmin.f32 %v203_v1, 6.0  ;;  %v191_v8 = vadd.f32 %v183_v54, %v177_v2  ;;  %v175_v9 = vmul.f32 %v169_v52, %v140_v6  ;;  %v159_v10 = vpop.f32.mrf.mxu1 }
  0xaa   :  { %v212_v11 = vmin.f32 %v204_v4, 6.0  ;;  %v192_v12 = vadd.f32 %v184_v56, %v178_v5  ;;  %v176_v13 = vmul.f32 %v170_v53, %v159_v10 }
  0xab   :  { %v219_v14 = vmul.f32 0.16666667, %v211_v7  ;;  %v199_v15 = vadd.f32 3.0, %v191_v8  ;;  %v189_v16 = vadd.f32 %v183_v54, %v175_v9 }
  0xac   :  { %v220_v17 = vmul.f32 0.16666667, %v212_v11  ;;  %v200_v18 = vadd.f32 3.0, %v192_v12  ;;  %v190_v19 = vadd.f32 %v184_v56, %v176_v13 }
  0xad   :  { %v227_v20 = vmul.f32 %v219_v14, %v187_v60  ;;  %v207_v21 = vmax.f32 %v199_v15, 0.0  ;;  %v197_v22 = vadd.f32 3.0, %v189_v16 }
  0xae   :  { %v228_v23 = vmul.f32 %v220_v17, %v188_v61  ;;  %v208_v24 = vmax.f32 %v200_v18, 0.0  ;;  %v198_v25 = vadd.f32 3.0, %v190_v19  ;;  %v145_v26 = vpop.f32.mrf.mxu2 }
  0xaf   :  { %v215_v27 = vmin.f32 %v207_v21, 6.0  ;;  %v205_v28 = vmax.f32 %v197_v22, 0.0  ;;  %v179_v29 = vmul.f32 %v169_v52, %v145_v26  ;;  %v164_v30 = vpop.f32.mrf.mxu3 }
  0xb0   :  { %v235_v31 = vpack.c.bf16 %v228_v23, %v227_v20  ;;  %v216_v32 = vmin.f32 %v208_v24, 6.0  ;;  %v206_v33 = vmax.f32 %v198_v25, 0.0  ;;  %v180_v34 = vmul.f32 %v170_v53, %v164_v30 }
  0xb1   :  { %v223_v35 = vmul.f32 0.16666667, %v215_v27  ;;  %v213_v36 = vmin.f32 %v205_v28, 6.0  ;;  %v193_v37 = vadd.f32 %v183_v54, %v179_v29 }
  0xb2   :  { %239 = vst [vmem:[%s502_s4] sm:$0xff] %v235_v31  ;;  %v224_v38 = vmul.f32 0.16666667, %v216_v32  ;;  %v214_v39 = vmin.f32 %v206_v33, 6.0  ;;  %v194_v40 = vadd.f32 %v184_v56, %v180_v34 }
  0xb3   :  { %v231_v41 = vmul.f32 %v223_v35, %v191_v8  ;;  %v221_v42 = vmul.f32 0.16666667, %v213_v36  ;;  %v201_v43 = vadd.f32 3.0, %v193_v37 }
  0xb4   :  { %v232_v44 = vmul.f32 %v224_v38, %v192_v12  ;;  %v222_v45 = vmul.f32 0.16666667, %v214_v39  ;;  %v202_v46 = vadd.f32 3.0, %v194_v40 }
  0xb5   :  { %v229_v47 = vmul.f32 %v221_v42, %v189_v16  ;;  %v209_v48 = vmax.f32 %v201_v43, 0.0 }
  0xb6   :  { %v237_v49 = vpack.c.bf16 %v232_v44, %v231_v41  ;;  %v230_v50 = vmul.f32 %v222_v45, %v190_v19  ;;  %v210_v51 = vmax.f32 %v202_v46, 0.0 }
  0xb7   :  { %v217_v52 = vmin.f32 %v209_v48, 6.0 }
  0xb8   :  { %241 = vst [vmem:[%s502_s4 + $0x10] sm:$0xff] %v237_v49  ;;  %v236_v53 = vpack.c.bf16 %v230_v50, %v229_v47  ;;  %v218_v54 = vmin.f32 %v210_v51, 6.0 }
  0xb9   :  { %v225_v55 = vmul.f32 0.16666667, %v217_v52 }
  0xba   :  { %240 = vst [vmem:[%s502_s4 + $0x8] sm:$0xff] %v236_v53  ;;  %v226_v56 = vmul.f32 0.16666667, %v218_v54 }
  0xbb   :  { %v233_v57 = vmul.f32 %v225_v55, %v193_v37 }
  0xbc   :  { %v234_v58 = vmul.f32 %v226_v56, %v194_v40 }
  0xbe   :  { %v238_v59 = vpack.c.bf16 %v234_v58, %v233_v57 }
  0xc0   :  { %242 = vst [vmem:[%s502_s4 + $0x18] sm:$0xff] %v238_v59 }

// kernel: _lambda_.21
= control target key start
LH: loop header
LB: loop body
LE: loop exit
PB: predicated region body
PF: predicated region fallthrough
CT: control target
= control target key end

     0   :  { %s1200_s15 = smov 0   ;;  %s1449_s0 = inlined_call_operand.vmem [shape: bf16[1,2,8,8,128], index: 0, kind: input, shape index: {}]   ;;  %s1450_s1 = inlined_call_operand.vmem [shape: bf16[25,1,128], index: 1, kind: input, shape index: {}]   ;;  %s1451_s2 = inlined_call_operand.vmem [shape: f32[1,128], index: 2, kind: input, shape index: {}]   ;;  %s1452_s3 = inlined_call_operand.vmem [shape: f32[1,128], index: 3, kind: input, shape index: {}]   ;;  %s1453_s4 = inlined_call_operand.vmem [shape: bf16[2,4,4,128], index: 4, kind: output, shape index: {}]  }
   0x1 LB: > { %s1040_s16 = sadd.s32 4294967295, %s1173_s15   ;;  %p1044_p0 = scmp.ge.s32.totalorder %s1173_s15, 1  ;;  %s1173_s15 = sphi %s1200_s15, %s14_s15  }
   0x2   : > { %p162_p1 = scmp.lt.s32.totalorder %s1173_s15, 3 }
   0x4   : > { %p163_p2 = pnand %p1044_p0, %p162_p1 }
   0x5   : > { %p188_p3 = scmp.lt.s32.totalorder (!%p163_p2), %s1040_s16, 1 }
   0x6   : > { %166 = sbr.rel (%p163_p2) target bundleno = 145 (0x91), region = 36 }
   0xb   : > { %v206_v0 = vld [vmem:[%s1450_s1] sm:$0x1]  ;;  %v1049_v1 = vld [vmem:[%s1450_s1 + $0x1] sm:$0x1]  ;;  %v1050_v4 = vld [vmem:[%s1450_s1 + $0x2] sm:$0x1] }
   0xc   : > { %v207_v2 = vunpack.c.l.bf16 %v206_v0  ;;  %v227_v3 = vunpack.c.l.bf16 %v1049_v1  ;;  %v1051_v5 = vld [vmem:[%s1450_s1 + $0x3] sm:$0x1]  ;;  %v1052_v6 = vld [vmem:[%s1450_s1 + $0x4] sm:$0x1]  ;;  %s1455_s16 = smov (!%p188_p3, %s1040_s16), 1  ;;  %v259_v7 = vunpack.c.l.bf16 %v1050_v4 }
   0xd   : > { %v291_v8 = vunpack.c.l.bf16 %v1051_v5  ;;  %v323_v9 = vunpack.c.l.bf16 %v1052_v6  ;;  %v1057_v10 = vld [vmem:[%s1450_s1 + $0x5] sm:$0x1]  ;;  %v1062_v11 = vld [vmem:[%s1450_s1 + $0x6] sm:$0x1]  ;;  %v1234_v16 = vld [vmem:[%s1450_s1 + $0x7] sm:$0x1] }
   0xe   : > { %v208_v12 = vperm.slane %v207_v2, 0  ;;  %v228_v13 = vperm.slane %v227_v3, 0  ;;  %v356_v14 = vunpack.c.l.bf16 %v1057_v10  ;;  %v376_v15 = vunpack.c.l.bf16 %v1062_v11  ;;  %s1155_s7 = sshll.u32 %s1455_s16, 5  ;;  %v1244_v20 = vld [vmem:[%s1450_s1 + $0x8] sm:$0x1]  ;;  %s1156_s27 = sshll.u32 %s1455_s16, 3 }
   0xf   : > { %v260_v17 = vperm.slane %v259_v7, 0  ;;  %v1237_v18 = vperm.slane %v291_v8, 0  ;;  %v1239_v19 = vperm.slane %v323_v9, 0  ;;  %s1249_s12 = scalar_lea.vmem %s1449_s0, %s1155_s7  ;;  %v1258_v23 = vld [vmem:[%s1450_s1 + $0x9] sm:$0x1]  ;;  %v408_v27 = vunpack.c.l.bf16 %v1234_v16  ;;  %s197_s30 = scalar_lea.vmem %s1453_s4, %s1156_s27 }
  0x10   : > { %v1251_v21 = vperm.slane %v356_v14, 0  ;;  %v1253_v22 = vperm.slane %v376_v15, 0  ;;  %v198_v24 = vld [vmem:[%s1249_s12] sm:$0x3]  ;;  %v199_v25 = vld [vmem:[%s1249_s12 + $0x4] sm:$0x3]  ;;  %v440_v34 = vunpack.c.l.bf16 %v1244_v20  ;;  %v472_v41 = vunpack.c.l.bf16 %v1258_v23 }
  0x11   : > { %v200_v26 = vld [vmem:[%s1249_s12 + $0x8] sm:$0x3]  ;;  %v201_v28 = vld [vmem:[%s1249_s12 + $0xc] sm:$0x3]  ;;  %v202_v29 = vunpack.c.l.bf16 %v198_v24  ;;  %v203_v30 = vunpack.c.l.bf16 %v199_v25  ;;  %v217_v32 = vld [vmem:[%s1249_s12] sm:$0x7] }
  0x12   : > { %v204_v31 = vunpack.c.l.bf16 %v200_v26  ;;  %v218_v33 = vld [vmem:[%s1249_s12 + $0x4] sm:$0x7]  ;;  %v205_v35 = vunpack.c.l.bf16 %v201_v28  ;;  %v219_v36 = vld [vmem:[%s1249_s12 + $0x8] sm:$0x7]  ;;  %v220_v37 = vld [vmem:[%s1249_s12 + $0xc] sm:$0x7]  ;;  %v221_v38 = vunpack.c.l.bf16 %v217_v32 }
  0x13   : > { %v222_v39 = vunpack.c.l.bf16 %v218_v33  ;;  %v249_v40 = vld [vmem:[%s1249_s12] sm:$0x6]  ;;  %v209_v42 = vmul.f32 %v208_v12, %v202_v29  ;;  %v210_v43 = vmul.f32 %v208_v12, %v203_v30  ;;  %v223_v45 = vunpack.c.l.bf16 %v219_v36  ;;  %v250_v46 = vld [vmem:[%s1249_s12 + $0x4] sm:$0x6]  ;;  %v251_v47 = vld [vmem:[%s1249_s12 + $0x8] sm:$0x6] }
  0x14   : > { %v211_v44 = vmul.f32 %v208_v12, %v204_v31  ;;  %v252_v48 = vld [vmem:[%s1249_s12 + $0xc] sm:$0x6]  ;;  %v212_v49 = vmul.f32 %v208_v12, %v205_v35  ;;  %v224_v50 = vunpack.c.l.bf16 %v220_v37  ;;  %v229_v51 = vmul.f32 %v228_v13, %v221_v38  ;;  %v281_v1 = vld [vmem:[%s1249_s12] sm:$0xe]  ;;  %v282_v2 = vld [vmem:[%s1249_s12 + $0x4] sm:$0xe] }
  0x15   : > { %v230_v52 = vmul.f32 %v228_v13, %v222_v39  ;;  %v231_v53 = vmul.f32 %v228_v13, %v223_v45  ;;  %v253_v54 = vunpack.c.l.bf16 %v249_v40  ;;  %v254_v55 = vunpack.c.l.bf16 %v250_v46  ;;  %v283_v7 = vld [vmem:[%s1249_s12 + $0x8] sm:$0xe]  ;;  %v284_v8 = vld [vmem:[%s1249_s12 + $0xc] sm:$0xe]  ;;  %v314_v26 = vld [vmem:[%s1249_s12 + $0x4] sm:$0xc] }
  0x16   : > { %v255_v56 = vunpack.c.l.bf16 %v251_v47  ;;  %v232_v57 = vmul.f32 %v228_v13, %v224_v50  ;;  %v237_v58 = vrot.slane %v229_v51, 1  ;;  %v256_v60 = vunpack.c.l.bf16 %v252_v48  ;;  %v313_v13 = vld [vmem:[%s1249_s12] sm:$0xc]  ;;  %v315_v28 = vld [vmem:[%s1249_s12 + $0x8] sm:$0xc] }
  0x17   : > { %v238_v59 = vrot.slane %v230_v52, 1  ;;  %v239_v61 = vrot.slane %v231_v53, 1  ;;  %v261_v62 = vmul.f32 %v260_v17, %v253_v54  ;;  %v262_v63 = vmul.f32 %v260_v17, %v254_v55  ;;  %v316_v33 = vld [vmem:[%s1249_s12 + $0xc] sm:$0xc]  ;;  %v1053_v51 = vld [vmem:[%s1249_s12 + $0x4] sm:$0x3] }
  0x18   : > { %v263_v0 = vmul.f32 %v260_v17, %v255_v56  ;;  %v240_v3 = vrot.slane %v232_v57, 1  ;;  %v245_v4 = vadd.f32 %v237_v58, %v209_v42  ;;  %v264_v6 = vmul.f32 %v260_v17, %v256_v60  ;;  %v1054_v52 = vld [vmem:[%s1249_s12 + $0x8] sm:$0x3]  ;;  %v1055_v56 = vld [vmem:[%s1249_s12 + $0xc] sm:$0x3] }
  0x19   : > { %v246_v5 = vadd.f32 %v238_v59, %v210_v43  ;;  %v247_v9 = vadd.f32 %v239_v61, %v211_v44  ;;  %v269_v10 = vrot.slane %v261_v62, 2  ;;  %v270_v11 = vrot.slane %v262_v63, 2  ;;  %v1056_v57 = vld [vmem:[%s1249_s12 + $0x10] sm:$0x3]  ;;  %v1058_v62 = vld [vmem:[%s1249_s12 + $0x4] sm:$0x7] }
  0x1a   : > { %v271_v12 = vrot.slane %v263_v0, 2  ;;  %v248_v14 = vadd.f32 %v240_v3, %v212_v49  ;;  %v272_v15 = vrot.slane %v264_v6, 2  ;;  %v285_v24 = vunpack.c.l.bf16 %v281_v1  ;;  %v1059_v3 = vld [vmem:[%s1249_s12 + $0x8] sm:$0x7]  ;;  %v1087_v23 = vld [vmem:[%s1450_s1 + $0xb] sm:$0x1] }
  0x1b   : > { %v286_v25 = vunpack.c.l.bf16 %v282_v2  ;;  %v277_v29 = vadd.f32 %v269_v10, %v245_v4  ;;  %v278_v30 = vadd.f32 %v270_v11, %v246_v5  ;;  %v287_v32 = vunpack.c.l.bf16 %v283_v7  ;;  %v1060_v4 = vld [vmem:[%s1249_s12 + $0xc] sm:$0x7] }
  0x1c   : > { %v279_v31 = vadd.f32 %v271_v12, %v247_v9  ;;  %v280_v17 = vadd.f32 %v272_v15, %v248_v14  ;;  %v288_v35 = vunpack.c.l.bf16 %v284_v8  ;;  %v293_v36 = vmul.f32 %v1237_v18, %v285_v24  ;;  %v1061_v8 = vld [vmem:[%s1249_s12 + $0x10] sm:$0x7] }
  0x1d   : > { %v294_v37 = vmul.f32 %v1237_v18, %v286_v25  ;;  %v295_v38 = vmul.f32 %v1237_v18, %v287_v32  ;;  %v317_v39 = vunpack.c.l.bf16 %v313_v13  ;;  %v318_v40 = vunpack.c.l.bf16 %v314_v26  ;;  %v1063_v25 = vld [vmem:[%s1249_s12 + $0x4] sm:$0x6]  ;;  %v1064_v26 = vld [vmem:[%s1249_s12 + $0x8] sm:$0x6]  ;;  %v1065_v32 = vld [vmem:[%s1249_s12 + $0xc] sm:$0x6] }
  0x1e   : > { %v319_v42 = vunpack.c.l.bf16 %v315_v28  ;;  %v296_v43 = vmul.f32 %v1237_v18, %v288_v35  ;;  %v301_v44 = vrot.slane %v293_v36, 3  ;;  %v320_v46 = vunpack.c.l.bf16 %v316_v33 }
  0x1f   : > { %v302_v45 = vrot.slane %v294_v37, 3  ;;  %v303_v47 = vrot.slane %v295_v38, 3  ;;  %v325_v48 = vmul.f32 %v1239_v19, %v317_v39  ;;  %v326_v49 = vmul.f32 %v1239_v19, %v318_v40  ;;  %v1066_v37 = vld [vmem:[%s1249_s12 + $0x10] sm:$0x6]  ;;  %v1068_v38 = vld [vmem:[%s1249_s12 + $0x4] sm:$0xe] }
  0x20   : > { %v327_v50 = vmul.f32 %v1239_v19, %v319_v42  ;;  %v304_v53 = vrot.slane %v296_v43, 3  ;;  %v309_v54 = vadd.f32 %v301_v44, %v277_v29  ;;  %v328_v18 = vmul.f32 %v1239_v19, %v320_v46  ;;  %v1069_v43 = vld [vmem:[%s1249_s12 + $0x8] sm:$0xe] }
  0x21   : > { %v310_v55 = vadd.f32 %v302_v45, %v278_v30  ;;  %v311_v58 = vadd.f32 %v303_v47, %v279_v31  ;;  %v333_v59 = vrot.slane %v325_v48, 4  ;;  %v334_v60 = vrot.slane %v326_v49, 4  ;;  %v1070_v48 = vld [vmem:[%s1249_s12 + $0xc] sm:$0xe] }
  0x22   : > { %v335_v61 = vrot.slane %v327_v50, 4  ;;  %v312_v63 = vadd.f32 %v304_v53, %v280_v17  ;;  %v336_v0 = vrot.slane %v328_v18, 4  ;;  %v350_v1 = vunpack.c.l.bf16 %v1053_v51 }
  0x23   : > { %v351_v2 = vunpack.c.l.bf16 %v1054_v52  ;;  %v341_v5 = vadd.f32 %v333_v59, %v309_v54  ;;  %v342_v6 = vadd.f32 %v334_v60, %v310_v55  ;;  %v352_v19 = vunpack.c.l.bf16 %v1055_v56  ;;  %v1071_v52 = vld [vmem:[%s1249_s12 + $0x10] sm:$0xe]  ;;  %v1073_v56 = vld [vmem:[%s1249_s12 + $0x4] sm:$0xc] }
  0x24   : > { %v343_v7 = vadd.f32 %v335_v61, %v311_v58  ;;  %v344_v9 = vadd.f32 %v336_v0, %v312_v63  ;;  %v353_v10 = vunpack.c.l.bf16 %v1056_v57  ;;  %v358_v11 = vmul.f32 %v1251_v21, %v350_v1 }
  0x25   : > { %v359_v12 = vmul.f32 %v1251_v21, %v351_v2  ;;  %v360_v13 = vmul.f32 %v1251_v21, %v352_v19  ;;  %v370_v14 = vunpack.c.l.bf16 %v1058_v62  ;;  %v371_v15 = vunpack.c.l.bf16 %v1059_v3  ;;  %v1074_v2 = vld [vmem:[%s1249_s12 + $0x8] sm:$0xc]  ;;  %v1075_v19 = vld [vmem:[%s1249_s12 + $0xc] sm:$0xc] }
  0x26   : > { %v372_v24 = vunpack.c.l.bf16 %v1060_v4  ;;  %v361_v28 = vmul.f32 %v1251_v21, %v353_v10  ;;  %v362_v29 = vadd.f32 %v358_v11, %v341_v5  ;;  %v373_v31 = vunpack.c.l.bf16 %v1061_v8  ;;  %v1076_v8 = vld [vmem:[%s1249_s12 + $0x10] sm:$0xc] }
  0x27   : > { %v363_v30 = vadd.f32 %v359_v12, %v342_v6  ;;  %v364_v33 = vadd.f32 %v360_v13, %v343_v7  ;;  %v378_v17 = vmul.f32 %v1253_v22, %v370_v14  ;;  %v379_v35 = vmul.f32 %v1253_v22, %v371_v15  ;;  %v1079_v12 = vld [vmem:[%s1249_s12 + $0xc] sm:$0x3] }
  0x28   : > { %v380_v36 = vmul.f32 %v1253_v22, %v372_v24  ;;  %v365_v39 = vadd.f32 %v361_v28, %v344_v9  ;;  %v381_v40 = vmul.f32 %v1253_v22, %v373_v31  ;;  %v402_v42 = vunpack.c.l.bf16 %v1063_v25  ;;  %v1080_v25 = vld [vmem:[%s1249_s12 + $0x10] sm:$0x3]  ;;  %v1081_v31 = vld [vmem:[%s1249_s12 + $0x14] sm:$0x3] }
  0x29   : > { %v403_v21 = vunpack.c.l.bf16 %v1064_v26  ;;  %v386_v44 = vrot.slane %v378_v17, 1  ;;  %v387_v45 = vrot.slane %v379_v35, 1  ;;  %v404_v47 = vunpack.c.l.bf16 %v1065_v32  ;;  %v1082_v32 = vld [vmem:[%s1450_s1 + $0xa] sm:$0x1] }
  0x2a   : > { %v388_v46 = vrot.slane %v380_v36, 1  ;;  %v389_v49 = vrot.slane %v381_v40, 1  ;;  %v405_v50 = vunpack.c.l.bf16 %v1066_v37  ;;  %v409_v51 = vperm.slane %v408_v27, 0  ;;  %v1083_v37 = vld [vmem:[%s1249_s12 + $0x8] sm:$0x7] }
  0x2b   : > { %v434_v53 = vunpack.c.l.bf16 %v1068_v38  ;;  %v394_v54 = vadd.f32 %v386_v44, %v362_v29  ;;  %v395_v55 = vadd.f32 %v387_v45, %v363_v30  ;;  %v435_v18 = vunpack.c.l.bf16 %v1069_v43  ;;  %v1084_v38 = vld [vmem:[%s1249_s12 + $0xc] sm:$0x7] }
  0x2c   : > { %v396_v22 = vadd.f32 %v388_v46, %v364_v33  ;;  %v397_v57 = vadd.f32 %v389_v49, %v365_v39  ;;  %v410_v58 = vmul.f32 %v409_v51, %v402_v42  ;;  %v411_v59 = vmul.f32 %v409_v51, %v403_v21 }
  0x2d   : > { %v412_v60 = vmul.f32 %v409_v51, %v404_v47  ;;  %v413_v61 = vmul.f32 %v409_v51, %v405_v50  ;;  %v436_v62 = vunpack.c.l.bf16 %v1070_v48  ;;  %v437_v63 = vunpack.c.l.bf16 %v1071_v52  ;;  %v1085_v47 = vld [vmem:[%s1249_s12 + $0x10] sm:$0x7]  ;;  %v1086_v48 = vld [vmem:[%s1249_s12 + $0x14] sm:$0x7] }
  0x2e   : > { %v441_v16 = vperm.slane %v440_v34, 0  ;;  %v418_v27 = vrot.slane %v410_v58, 2  ;;  %v419_v0 = vrot.slane %v411_v59, 2  ;;  %v466_v3 = vunpack.c.l.bf16 %v1073_v56  ;;  %v1078_v34 = vld [vmem:[%s1249_s12 + $0x8] sm:$0x3] }
  0x2f   : > { %v420_v1 = vrot.slane %v412_v60, 2  ;;  %v421_v4 = vrot.slane %v413_v61, 2  ;;  %v467_v28 = vunpack.c.l.bf16 %v1074_v2  ;;  %v468_v29 = vunpack.c.l.bf16 %v1075_v19  ;;  %v1089_v59 = vld [vmem:[%s1249_s12 + $0xc] sm:$0x6]  ;;  %v1090_v60 = vld [vmem:[%s1249_s12 + $0x10] sm:$0x6] }
  0x30   : > { %v442_v5 = vmul.f32 %v441_v16, %v434_v53  ;;  %v443_v6 = vmul.f32 %v441_v16, %v435_v18  ;;  %v444_v7 = vmul.f32 %v441_v16, %v436_v62  ;;  %v426_v9 = vadd.f32 %v418_v27, %v394_v54 }
  0x31   : > { %v427_v10 = vadd.f32 %v419_v0, %v395_v55  ;;  %v428_v11 = vadd.f32 %v420_v1, %v396_v22  ;;  %v445_v20 = vmul.f32 %v441_v16, %v437_v63  ;;  %v429_v13 = vadd.f32 %v421_v4, %v397_v57  ;;  %v1088_v22 = vld [vmem:[%s1249_s12 + $0x8] sm:$0x6]  ;;  %v1092_v4 = vld [vmem:[%s1450_s1 + $0xc] sm:$0x1] }
  0x32   : > { %v450_v14 = vrot.slane %v442_v5, 3  ;;  %v451_v15 = vrot.slane %v443_v6, 3  ;;  %v452_v24 = vrot.slane %v444_v7, 3  ;;  %v469_v30 = vunpack.c.l.bf16 %v1076_v8  ;;  %v1093_v8 = vld [vmem:[%s1249_s12 + $0x8] sm:$0xe] }
  0x33   : > { %v453_v26 = vrot.slane %v445_v20, 3  ;;  %v473_v36 = vperm.slane %v472_v41, 0  ;;  %v499_v40 = vunpack.c.l.bf16 %v1078_v34  ;;  %v500_v42 = vunpack.c.l.bf16 %v1079_v12 }
  0x34   : > { %v458_v33 = vadd.f32 %v450_v14, %v426_v9  ;;  %v459_v17 = vadd.f32 %v451_v15, %v427_v10  ;;  %v460_v35 = vadd.f32 %v452_v24, %v428_v11  ;;  %v501_v21 = vunpack.c.l.bf16 %v1080_v25  ;;  %v1094_v9 = vld [vmem:[%s1249_s12 + $0xc] sm:$0xe]  ;;  %v1095_v24 = vld [vmem:[%s1249_s12 + $0x10] sm:$0xe]  ;;  %v1096_v25 = vld [vmem:[%s1249_s12 + $0x14] sm:$0xe] }
  0x35   : > { %v461_v39 = vadd.f32 %v453_v26, %v429_v13  ;;  %v474_v43 = vmul.f32 %v473_v36, %v466_v3  ;;  %v475_v44 = vmul.f32 %v473_v36, %v467_v28  ;;  %v476_v45 = vmul.f32 %v473_v36, %v468_v29  ;;  %v1091_v3 = vld [vmem:[%s1249_s12 + $0x14] sm:$0x6]  ;;  %v1097_v26 = vld [vmem:[%s1450_s1 + $0xd] sm:$0x1] }
  0x36   : > { %v477_v46 = vmul.f32 %v473_v36, %v469_v30  ;;  %v502_v41 = vunpack.c.l.bf16 %v1081_v31  ;;  %v505_v49 = vunpack.c.l.bf16 %v1082_v32  ;;  %v519_v50 = vunpack.c.l.bf16 %v1083_v37  ;;  %v1354_v36 = vld [vmem:[%s1249_s12 + $0x8] sm:$0xc] }
  0x37   : > { %v520_v51 = vunpack.c.l.bf16 %v1084_v38  ;;  %v482_v52 = vrot.slane %v474_v43, 4  ;;  %v483_v53 = vrot.slane %v475_v44, 4  ;;  %v484_v54 = vrot.slane %v476_v45, 4 }
  0x38   : > { %v485_v55 = vrot.slane %v477_v46, 4  ;;  %v506_v18 = vperm.slane %v505_v49, 0  ;;  %v521_v56 = vunpack.c.l.bf16 %v1085_v47  ;;  %v522_v57 = vunpack.c.l.bf16 %v1086_v48 }
  0x39   : > { %v525_v58 = vunpack.c.l.bf16 %v1087_v23  ;;  %v490_v61 = vadd.f32 %v482_v52, %v458_v33  ;;  %v491_v62 = vadd.f32 %v483_v53, %v459_v17  ;;  %v492_v63 = vadd.f32 %v484_v54, %v460_v35 }
  0x3a   : > { %v493_v16 = vadd.f32 %v485_v55, %v461_v39  ;;  %v507_v27 = vmul.f32 %v506_v18, %v499_v40  ;;  %v508_v0 = vmul.f32 %v506_v18, %v500_v42  ;;  %v509_v1 = vmul.f32 %v506_v18, %v501_v21  ;;  %v1099_v42 = vld [vmem:[%s1249_s12 + $0xc] sm:$0xc]  ;;  %v1100_v21 = vld [vmem:[%s1249_s12 + $0x10] sm:$0xc] }
  0x3b   : > { %v510_v2 = vmul.f32 %v506_v18, %v502_v41  ;;  %v526_v5 = vperm.slane %v525_v58, 0  ;;  %v551_v6 = vunpack.c.l.bf16 %v1088_v22  ;;  %v552_v7 = vunpack.c.l.bf16 %v1089_v59  ;;  %v1101_v18 = vld [vmem:[%s1249_s12 + $0x14] sm:$0xc] }
  0x3c   : > { %v553_v19 = vunpack.c.l.bf16 %v1090_v60  ;;  %v511_v10 = vadd.f32 %v507_v27, %v490_v61  ;;  %v512_v11 = vadd.f32 %v508_v0, %v491_v62  ;;  %v513_v20 = vadd.f32 %v509_v1, %v492_v63  ;;  %v1102_v60 = vld [vmem:[%s1450_s1 + $0xe] sm:$0x1]  ;;  %v1103_v61 = vld [vmem:[%s1249_s12 + $0xc] sm:$0x3]  ;;  %v1104_v62 = vld [vmem:[%s1249_s12 + $0x10] sm:$0x3] }
  0x3d   : > { %v514_v34 = vadd.f32 %v510_v2, %v493_v16  ;;  %v527_v12 = vmul.f32 %v526_v5, %v519_v50  ;;  %v528_v13 = vmul.f32 %v526_v5, %v520_v51  ;;  %v529_v14 = vmul.f32 %v526_v5, %v521_v56  ;;  %v1105_v1 = vld [vmem:[%s1249_s12 + $0x14] sm:$0x3]  ;;  %v1106_v2 = vld [vmem:[%s1249_s12 + $0x18] sm:$0x3] }
  0x3e   : > { %v530_v15 = vmul.f32 %v526_v5, %v522_v57  ;;  %v554_v28 = vunpack.c.l.bf16 %v1091_v3  ;;  %v557_v29 = vunpack.c.l.bf16 %v1092_v4  ;;  %v583_v30 = vunpack.c.l.bf16 %v1093_v8  ;;  %v1107_v3 = vld [vmem:[%s1450_s1 + $0xf] sm:$0x1] }
  0x3f   : > { %v584_v31 = vunpack.c.l.bf16 %v1094_v9  ;;  %v535_v32 = vrot.slane %v527_v12, 1  ;;  %v536_v33 = vrot.slane %v528_v13, 1  ;;  %v537_v17 = vrot.slane %v529_v14, 1  ;;  %v1111_v12 = vld [vmem:[%s1249_s12 + $0x18] sm:$0x7] }
  0x40   : > { %v538_v35 = vrot.slane %v530_v15, 1  ;;  %v558_v37 = vperm.slane %v557_v29, 0  ;;  %v585_v38 = vunpack.c.l.bf16 %v1095_v24  ;;  %v586_v39 = vunpack.c.l.bf16 %v1096_v25  ;;  %v1112_v25 = vld [vmem:[%s1450_s1 + $0x10] sm:$0x1] }
  0x41   : > { %v589_v40 = vunpack.c.l.bf16 %v1097_v26  ;;  %v543_v43 = vadd.f32 %v535_v32, %v511_v10  ;;  %v544_v44 = vadd.f32 %v536_v33, %v512_v11  ;;  %v545_v45 = vadd.f32 %v537_v17, %v513_v20  ;;  %v1109_v20 = vld [vmem:[%s1249_s12 + $0x10] sm:$0x7] }
  0x42   : > { %v546_v46 = vadd.f32 %v538_v35, %v514_v34  ;;  %v559_v47 = vmul.f32 %v558_v37, %v551_v6  ;;  %v560_v48 = vmul.f32 %v558_v37, %v552_v7  ;;  %v561_v23 = vmul.f32 %v558_v37, %v553_v19  ;;  %v1108_v19 = vld [vmem:[%s1249_s12 + $0xc] sm:$0x7]  ;;  %v1110_v34 = vld [vmem:[%s1249_s12 + $0x14] sm:$0x7]  ;;  %v1114_v32 = vld [vmem:[%s1249_s12 + $0x10] sm:$0x6] }
  0x43   : > { %v562_v41 = vmul.f32 %v558_v37, %v554_v28  ;;  %v590_v49 = vperm.slane %v589_v40, 0  ;;  %v615_v50 = vunpack.c.l.bf16 %v1354_v36  ;;  %v616_v51 = vunpack.c.l.bf16 %v1099_v42 }
  0x44   : > { %v617_v52 = vunpack.c.l.bf16 %v1100_v21  ;;  %v567_v53 = vrot.slane %v559_v47, 2  ;;  %v568_v54 = vrot.slane %v560_v48, 2  ;;  %v569_v55 = vrot.slane %v561_v23, 2 }
  0x45   : > { %v570_v22 = vrot.slane %v562_v41, 2  ;;  %v591_v56 = vmul.f32 %v590_v49, %v583_v30  ;;  %v592_v57 = vmul.f32 %v590_v49, %v584_v31  ;;  %v593_v58 = vmul.f32 %v590_v49, %v585_v38  ;;  %v1113_v31 = vld [vmem:[%s1249_s12 + $0xc] sm:$0x6] }
  0x46   : > { %v594_v59 = vmul.f32 %v590_v49, %v586_v39  ;;  %v575_v63 = vadd.f32 %v567_v53, %v543_v43  ;;  %v576_v16 = vadd.f32 %v568_v54, %v544_v44  ;;  %v577_v27 = vadd.f32 %v569_v55, %v545_v45  ;;  %v1115_v43 = vld [vmem:[%s1249_s12 + $0x14] sm:$0x6]  ;;  %v1116_v49 = vld [vmem:[%s1249_s12 + $0x18] sm:$0x6] }
  0x47   : > { %v578_v0 = vadd.f32 %v570_v22, %v546_v46  ;;  %v599_v4 = vrot.slane %v591_v56, 3  ;;  %v600_v5 = vrot.slane %v592_v57, 3  ;;  %v601_v6 = vrot.slane %v593_v58, 3  ;;  %v1117_v46 = vld [vmem:[%s1450_s1 + $0x11] sm:$0x1] }
  0x48   : > { %v602_v7 = vrot.slane %v594_v59, 3  ;;  %v618_v8 = vunpack.c.l.bf16 %v1101_v18  ;;  %v621_v9 = vunpack.c.l.bf16 %v1102_v60  ;;  %v648_v10 = vunpack.c.l.bf16 %v1103_v61  ;;  %v1385_v56 = vld [vmem:[%s1249_s12 + $0xc] sm:$0xe]  ;;  %v1119_v61 = vld [vmem:[%s1249_s12 + $0x10] sm:$0xe] }
  0x49   : > { %v649_v11 = vunpack.c.l.bf16 %v1104_v62  ;;  %v607_v13 = vadd.f32 %v599_v4, %v575_v63  ;;  %v608_v14 = vadd.f32 %v600_v5, %v576_v16  ;;  %v609_v15 = vadd.f32 %v601_v6, %v577_v27  ;;  %v1120_v62 = vld [vmem:[%s1249_s12 + $0x14] sm:$0xe] }
  0x4a   : > { %v610_v24 = vadd.f32 %v602_v7, %v578_v0  ;;  %v622_v26 = vperm.slane %v621_v9, 0  ;;  %v650_v28 = vunpack.c.l.bf16 %v1105_v1  ;;  %v651_v29 = vunpack.c.l.bf16 %v1106_v2 }
  0x4b   : > { %v654_v30 = vunpack.c.l.bf16 %v1107_v3  ;;  %v668_v33 = vunpack.c.l.bf16 %v1108_v19  ;;  %v669_v17 = vunpack.c.l.bf16 %v1109_v20  ;;  %v670_v35 = vunpack.c.l.bf16 %v1110_v34  ;;  %v1121_v20 = vld [vmem:[%s1249_s12 + $0x18] sm:$0xe] }
  0x4c   : > { %v671_v36 = vunpack.c.l.bf16 %v1111_v12  ;;  %v623_v37 = vmul.f32 %v622_v26, %v615_v50  ;;  %v624_v38 = vmul.f32 %v622_v26, %v616_v51  ;;  %v625_v39 = vmul.f32 %v622_v26, %v617_v52 }
  0x4d   : > { %v626_v40 = vmul.f32 %v622_v26, %v618_v8  ;;  %v655_v42 = vperm.slane %v654_v30, 0  ;;  %v674_v21 = vunpack.c.l.bf16 %v1112_v25  ;;  %v700_v44 = vunpack.c.l.bf16 %v1113_v31  ;;  %v1124_v25 = vld [vmem:[%s1249_s12 + $0x10] sm:$0xc]  ;;  %v1125_v31 = vld [vmem:[%s1249_s12 + $0x14] sm:$0xc] }
  0x4e   : > { %v701_v45 = vunpack.c.l.bf16 %v1114_v32  ;;  %v631_v47 = vrot.slane %v623_v37, 4  ;;  %v632_v48 = vrot.slane %v624_v38, 4  ;;  %v633_v23 = vrot.slane %v625_v39, 4  ;;  %v1126_v32 = vld [vmem:[%s1249_s12 + $0x18] sm:$0xc] }
  0x4f   : > { %v634_v41 = vrot.slane %v626_v40, 4  ;;  %v656_v50 = vmul.f32 %v655_v42, %v648_v10  ;;  %v657_v51 = vmul.f32 %v655_v42, %v649_v11  ;;  %v658_v52 = vmul.f32 %v655_v42, %v650_v28  ;;  %v1128_v38 = vld [vmem:[%s1249_s12 + $0x10] sm:$0x3] }
  0x50   : > { %v659_v53 = vmul.f32 %v655_v42, %v651_v29  ;;  %v639_v54 = vadd.f32 %v631_v47, %v607_v13  ;;  %v640_v55 = vadd.f32 %v632_v48, %v608_v14  ;;  %v641_v22 = vadd.f32 %v633_v23, %v609_v15  ;;  %v1122_v15 = vld [vmem:[%s1450_s1 + $0x12] sm:$0x1] }
  0x51   : > { %v642_v18 = vadd.f32 %v634_v41, %v610_v24  ;;  %v675_v57 = vperm.slane %v674_v21, 0  ;;  %v702_v58 = vunpack.c.l.bf16 %v1115_v43  ;;  %v703_v59 = vunpack.c.l.bf16 %v1116_v49  ;;  %v1123_v24 = vld [vmem:[%s1249_s12 + $0xc] sm:$0xc]  ;;  %v1129_v43 = vld [vmem:[%s1249_s12 + $0x14] sm:$0x3] }
  0x52   : > { %v706_v60 = vunpack.c.l.bf16 %v1117_v46  ;;  %v660_v63 = vadd.f32 %v656_v50, %v639_v54  ;;  %v661_v16 = vadd.f32 %v657_v51, %v640_v55  ;;  %v662_v27 = vadd.f32 %v658_v52, %v641_v22  ;;  %v1132_v41 = vld [vmem:[%s1450_s1 + $0x14] sm:$0x1] }
  0x53   : > { %v663_v0 = vadd.f32 %v659_v53, %v642_v18  ;;  %v676_v1 = vmul.f32 %v675_v57, %v668_v33  ;;  %v677_v2 = vmul.f32 %v675_v57, %v669_v17  ;;  %v678_v3 = vmul.f32 %v675_v57, %v670_v35  ;;  %v1127_v33 = vld [vmem:[%s1450_s1 + $0x13] sm:$0x1]  ;;  %v1133_v53 = vld [vmem:[%s1249_s12 + $0x10] sm:$0x7]  ;;  %v1134_v54 = vld [vmem:[%s1249_s12 + $0x14] sm:$0x7] }
  0x54   : > { %v679_v4 = vmul.f32 %v675_v57, %v671_v36  ;;  %v707_v5 = vperm.slane %v706_v60, 0  ;;  %v732_v6 = vunpack.c.l.bf16 %v1385_v56  ;;  %v733_v7 = vunpack.c.l.bf16 %v1119_v61 }
  0x55   : > { %v734_v19 = vunpack.c.l.bf16 %v1120_v62  ;;  %v684_v8 = vrot.slane %v676_v1, 1  ;;  %v685_v9 = vrot.slane %v677_v2, 1  ;;  %v686_v10 = vrot.slane %v678_v3, 1 }
  0x56   : > { %v687_v11 = vrot.slane %v679_v4, 1  ;;  %v708_v34 = vmul.f32 %v707_v5, %v700_v44  ;;  %v709_v12 = vmul.f32 %v707_v5, %v701_v45  ;;  %v710_v13 = vmul.f32 %v707_v5, %v702_v58  ;;  %v1130_v44 = vld [vmem:[%s1249_s12 + $0x18] sm:$0x3]  ;;  %v1131_v45 = vld [vmem:[%s1249_s12 + $0x1c] sm:$0x3] }
  0x57   : > { %v711_v14 = vmul.f32 %v707_v5, %v703_v59  ;;  %v692_v26 = vadd.f32 %v684_v8, %v660_v63  ;;  %v693_v28 = vadd.f32 %v685_v9, %v661_v16  ;;  %v694_v29 = vadd.f32 %v686_v10, %v662_v27  ;;  %v1135_v9 = vld [vmem:[%s1249_s12 + $0x18] sm:$0x7] }
  0x58   : > { %v695_v30 = vadd.f32 %v687_v11, %v663_v0  ;;  %v716_v17 = vrot.slane %v708_v34, 2  ;;  %v717_v35 = vrot.slane %v709_v12, 2  ;;  %v718_v36 = vrot.slane %v710_v13, 2 }
  0x59   : > { %v719_v37 = vrot.slane %v711_v14, 2  ;;  %v735_v39 = vunpack.c.l.bf16 %v1121_v20  ;;  %v738_v40 = vunpack.c.l.bf16 %v1122_v15  ;;  %v764_v42 = vunpack.c.l.bf16 %v1123_v24  ;;  %v1138_v15 = vld [vmem:[%s1249_s12 + $0x10] sm:$0x6] }
  0x5a   : > { %v765_v21 = vunpack.c.l.bf16 %v1124_v25  ;;  %v724_v46 = vadd.f32 %v716_v17, %v692_v26  ;;  %v725_v47 = vadd.f32 %v717_v35, %v693_v28  ;;  %v726_v48 = vadd.f32 %v718_v36, %v694_v29  ;;  %v1139_v29 = vld [vmem:[%s1249_s12 + $0x14] sm:$0x6] }
  0x5b   : > { %v727_v23 = vadd.f32 %v719_v37, %v695_v30  ;;  %v739_v49 = vperm.slane %v738_v40, 0  ;;  %v766_v50 = vunpack.c.l.bf16 %v1125_v31  ;;  %v767_v51 = vunpack.c.l.bf16 %v1126_v32  ;;  %v1140_v30 = vld [vmem:[%s1249_s12 + $0x18] sm:$0x6]  ;;  %v1142_v40 = vld [vmem:[%s1450_s1 + $0x16] sm:$0x1] }
  0x5c   : > { %v770_v52 = vunpack.c.l.bf16 %v1127_v33  ;;  %v797_v55 = vunpack.c.l.bf16 %v1128_v38  ;;  %v798_v22 = vunpack.c.l.bf16 %v1129_v43  ;;  %v799_v18 = vunpack.c.l.bf16 %v1130_v44 }
  0x5d   : > { %v800_v56 = vunpack.c.l.bf16 %v1131_v45  ;;  %v740_v57 = vmul.f32 %v739_v49, %v732_v6  ;;  %v741_v58 = vmul.f32 %v739_v49, %v733_v7  ;;  %v742_v59 = vmul.f32 %v739_v49, %v734_v19  ;;  %v1136_v6 = vld [vmem:[%s1249_s12 + $0x1c] sm:$0x7]  ;;  %v1137_v7 = vld [vmem:[%s1450_s1 + $0x15] sm:$0x1]  ;;  %v1143_v45 = vld [vmem:[%s1249_s12 + $0x10] sm:$0xe] }
  0x5e   : > { %v743_v60 = vmul.f32 %v739_v49, %v735_v39  ;;  %v771_v61 = vperm.slane %v770_v52, 0  ;;  %v803_v62 = vunpack.c.l.bf16 %v1132_v41  ;;  %v817_v63 = vunpack.c.l.bf16 %v1133_v53  ;;  %v1141_v39 = vld [vmem:[%s1249_s12 + $0x1c] sm:$0x6]  ;;  %v1145_v53 = vld [vmem:[%s1249_s12 + $0x18] sm:$0xe] }
  0x5f   : > { %v818_v16 = vunpack.c.l.bf16 %v1134_v54  ;;  %v748_v27 = vrot.slane %v740_v57, 3  ;;  %v749_v0 = vrot.slane %v741_v58, 3  ;;  %v750_v1 = vrot.slane %v742_v59, 3  ;;  %v1146_v54 = vld [vmem:[%s1249_s12 + $0x1c] sm:$0xe] }
  0x60   : > { %v751_v2 = vrot.slane %v743_v60, 3  ;;  %v772_v3 = vmul.f32 %v771_v61, %v764_v42  ;;  %v773_v4 = vmul.f32 %v771_v61, %v765_v21  ;;  %v774_v5 = vmul.f32 %v771_v61, %v766_v50 }
  0x61   : > { %v775_v8 = vmul.f32 %v771_v61, %v767_v51  ;;  %v756_v19 = vadd.f32 %v748_v27, %v724_v46  ;;  %v757_v10 = vadd.f32 %v749_v0, %v725_v47  ;;  %v758_v11 = vadd.f32 %v750_v1, %v726_v48  ;;  %v1144_v46 = vld [vmem:[%s1249_s12 + $0x14] sm:$0xe]  ;;  %v1148_v0 = vld [vmem:[%s1249_s12 + $0x10] sm:$0xc] }
  0x62   : > { %v759_v20 = vadd.f32 %v751_v2, %v727_v23  ;;  %v780_v34 = vrot.slane %v772_v3, 4  ;;  %v781_v12 = vrot.slane %v773_v4, 4  ;;  %v782_v13 = vrot.slane %v774_v5, 4 }
  0x63   : > { %v783_v14 = vrot.slane %v775_v8, 4  ;;  %v804_v24 = vperm.slane %v803_v62, 0  ;;  %v819_v25 = vunpack.c.l.bf16 %v1135_v9  ;;  %v820_v26 = vunpack.c.l.bf16 %v1136_v6 }
  0x64   : > { %v823_v28 = vunpack.c.l.bf16 %v1137_v7  ;;  %v788_v31 = vadd.f32 %v780_v34, %v756_v19  ;;  %v789_v32 = vadd.f32 %v781_v12, %v757_v10  ;;  %v790_v33 = vadd.f32 %v782_v13, %v758_v11  ;;  %v1149_v12 = vld [vmem:[%s1249_s12 + $0x14] sm:$0xc] }
  0x65   : > { %v791_v17 = vadd.f32 %v783_v14, %v759_v20  ;;  %v805_v35 = vmul.f32 %v804_v24, %v797_v55  ;;  %v806_v36 = vmul.f32 %v804_v24, %v798_v22  ;;  %v807_v37 = vmul.f32 %v804_v24, %v799_v18  ;;  %v1147_v55 = vld [vmem:[%s1450_s1 + $0x17] sm:$0x1] }
  0x66   : > { %v808_v38 = vmul.f32 %v804_v24, %v800_v56  ;;  %v824_v42 = vperm.slane %v823_v28, 0  ;;  %v849_v21 = vunpack.c.l.bf16 %v1138_v15  ;;  %v850_v43 = vunpack.c.l.bf16 %v1139_v29  ;;  %v1152_v28 = vld [vmem:[%s1450_s1 + $0x18] sm:$0x1] }
  0x67   : > { %v851_v44 = vunpack.c.l.bf16 %v1140_v30  ;;  %v809_v47 = vadd.f32 %v805_v35, %v788_v31  ;;  %v810_v48 = vadd.f32 %v806_v36, %v789_v32  ;;  %v811_v23 = vadd.f32 %v807_v37, %v790_v33 }
  0x68   : > { %v812_v41 = vadd.f32 %v808_v38, %v791_v17  ;;  %v825_v49 = vmul.f32 %v824_v42, %v817_v63  ;;  %v826_v50 = vmul.f32 %v824_v42, %v818_v16  ;;  %v827_v51 = vmul.f32 %v824_v42, %v819_v25  ;;  %v1150_v25 = vld [vmem:[%s1249_s12 + $0x18] sm:$0xc] }
  0x69   : > { %v828_v52 = vmul.f32 %v824_v42, %v820_v26  ;;  %v852_v22 = vunpack.c.l.bf16 %v1141_v39  ;;  %v855_v18 = vunpack.c.l.bf16 %v1142_v40  ;;  %v881_v56 = vunpack.c.l.bf16 %v1143_v45  ;;  %v1151_v26 = vld [vmem:[%s1249_s12 + $0x1c] sm:$0xc] }
  0x6a   : > { %v882_v57 = vunpack.c.l.bf16 %v1144_v46  ;;  %v833_v58 = vrot.slane %v825_v49, 1  ;;  %v834_v59 = vrot.slane %v826_v50, 1  ;;  %v835_v60 = vrot.slane %v827_v51, 1 }
  0x6b   : > { %v836_v61 = vrot.slane %v828_v52, 1  ;;  %v856_v62 = vperm.slane %v855_v18, 0  ;;  %v883_v63 = vunpack.c.l.bf16 %v1145_v53  ;;  %v884_v16 = vunpack.c.l.bf16 %v1146_v54  ;;  %v1165_v52 = vld [vmem:[%s1451_s2] ss:$0 sm:$0xff] }
  0x6c   : > { %v887_v27 = vunpack.c.l.bf16 %v1147_v55  ;;  %v841_v1 = vadd.f32 %v833_v58, %v809_v47  ;;  %v842_v2 = vadd.f32 %v834_v59, %v810_v48  ;;  %v843_v3 = vadd.f32 %v835_v60, %v811_v23  ;;  %v1166_v18 = vld [vmem:[%s1452_s3] ss:$0 sm:$0xff] }
  0x6d   : > { %v844_v4 = vadd.f32 %v836_v61, %v812_v41  ;;  %v857_v5 = vmul.f32 %v856_v62, %v849_v21  ;;  %v858_v8 = vmul.f32 %v856_v62, %v850_v43  ;;  %v859_v9 = vmul.f32 %v856_v62, %v851_v44 }
  0x6e   : > { %v860_v6 = vmul.f32 %v856_v62, %v852_v22  ;;  %v888_v7 = vperm.slane %v887_v27, 0  ;;  %v913_v19 = vunpack.c.l.bf16 %v1148_v0  ;;  %v914_v37 = vunpack.c.l.bf16 %v1149_v12 }
  0x6f   : > { %v865_v10 = vrot.slane %v857_v5, 2  ;;  %v866_v11 = vrot.slane %v858_v8, 2  ;;  %v867_v20 = vrot.slane %v859_v9, 2  ;;  %v915_v38 = vunpack.c.l.bf16 %v1150_v25 }
  0x70   : > { %v868_v34 = vrot.slane %v860_v6, 2  ;;  %v889_v13 = vmul.f32 %v888_v7, %v881_v56  ;;  %v890_v14 = vmul.f32 %v888_v7, %v882_v57  ;;  %v891_v15 = vmul.f32 %v888_v7, %v883_v63 }
  0x71   : > { %v892_v24 = vmul.f32 %v888_v7, %v884_v16  ;;  %v873_v29 = vadd.f32 %v865_v10, %v841_v1  ;;  %v874_v30 = vadd.f32 %v866_v11, %v842_v2  ;;  %v875_v31 = vadd.f32 %v867_v20, %v843_v3 }
  0x72   : > { %v876_v32 = vadd.f32 %v868_v34, %v844_v4  ;;  %v897_v33 = vrot.slane %v889_v13, 3  ;;  %v898_v17 = vrot.slane %v890_v14, 3  ;;  %v899_v35 = vrot.slane %v891_v15, 3 }
  0x73   : > { %v900_v36 = vrot.slane %v892_v24, 3  ;;  %v916_v39 = vunpack.c.l.bf16 %v1151_v26  ;;  %v919_v40 = vunpack.c.l.bf16 %v1152_v28 }
  0x74   : > { %v905_v21 = vadd.f32 %v897_v33, %v873_v29  ;;  %v906_v43 = vadd.f32 %v898_v17, %v874_v30  ;;  %v907_v44 = vadd.f32 %v899_v35, %v875_v31 }
  0x75   : > { %v920_v42 = vperm.slane %v919_v40, 0  ;;  %v908_v45 = vadd.f32 %v900_v36, %v876_v32 }
  0x77   : > { %v921_v46 = vmul.f32 %v920_v42, %v913_v19  ;;  %v922_v47 = vmul.f32 %v920_v42, %v914_v37  ;;  %v923_v48 = vmul.f32 %v920_v42, %v915_v38  ;;  %v924_v23 = vmul.f32 %v920_v42, %v916_v39 }
  0x79   : > { %v929_v41 = vrot.slane %v921_v46, 4  ;;  %v930_v49 = vrot.slane %v922_v47, 4  ;;  %v931_v50 = vrot.slane %v923_v48, 4  ;;  %v932_v51 = vrot.slane %v924_v23, 4 }
  0x7b   : > { %v937_v53 = vadd.f32 %v929_v41, %v905_v21  ;;  %v938_v54 = vadd.f32 %v930_v49, %v906_v43  ;;  %v939_v55 = vadd.f32 %v931_v50, %v907_v44  ;;  %v940_v22 = vadd.f32 %v932_v51, %v908_v45 }
  0x7d   : > { %v945_v56 = vmul.f32 %v1165_v52, %v937_v53  ;;  %v946_v57 = vmul.f32 %v1165_v52, %v938_v54  ;;  %v947_v58 = vmul.f32 %v1165_v52, %v939_v55  ;;  %v948_v59 = vmul.f32 %v1165_v52, %v940_v22 }
  0x7f   : > { %v953_v60 = vadd.f32 %v1166_v18, %v945_v56  ;;  %v954_v61 = vadd.f32 %v1166_v18, %v946_v57  ;;  %v955_v62 = vadd.f32 %v1166_v18, %v947_v58  ;;  %v956_v63 = vadd.f32 %v1166_v18, %v948_v59 }
  0x81   : > { %v957_v16 = vadd.f32 3.0, %v953_v60  ;;  %v958_v27 = vadd.f32 3.0, %v954_v61  ;;  %v959_v0 = vadd.f32 3.0, %v955_v62  ;;  %v960_v1 = vadd.f32 3.0, %v956_v63 }
  0x83   : > { %v961_v2 = vmax.f32 %v957_v16, 0.0  ;;  %v962_v3 = vmax.f32 %v958_v27, 0.0  ;;  %v963_v4 = vmax.f32 %v959_v0, 0.0  ;;  %v964_v5 = vmax.f32 %v960_v1, 0.0 }
  0x85   : > { %v965_v8 = vmin.f32 %v961_v2, 6.0  ;;  %v966_v9 = vmin.f32 %v962_v3, 6.0  ;;  %v967_v6 = vmin.f32 %v963_v4, 6.0  ;;  %v968_v7 = vmin.f32 %v964_v5, 6.0 }
  0x87   : > { %v969_v19 = vmul.f32 0.16666667, %v965_v8  ;;  %v970_v10 = vmul.f32 0.16666667, %v966_v9  ;;  %v971_v11 = vmul.f32 0.16666667, %v967_v6 }
  0x88   : > { %v972_v20 = vmul.f32 0.16666667, %v968_v7 }
  0x89   : > { %v973_v34 = vmul.f32 %v969_v19, %v953_v60  ;;  %v974_v12 = vmul.f32 %v970_v10, %v954_v61  ;;  %v975_v13 = vmul.f32 %v971_v11, %v955_v62 }
  0x8a   : > { %v976_v14 = vmul.f32 %v972_v20, %v956_v63 }
  0x8b   : > { %v977_v15 = vpack.c.bf16 %v973_v34, %v973_v34  ;;  %v978_v24 = vpack.c.bf16 %v974_v12, %v974_v12  ;;  %v979_v25 = vpack.c.bf16 %v975_v13, %v975_v13 }
  0x8c   : > { %v980_v26 = vpack.c.bf16 %v976_v14, %v976_v14 }
  0x8d   : > { %981 = vst [vmem:[%s197_s30] sm:$0x3] %v977_v15 }
  0x8e   : > { %982 = vst [vmem:[%s197_s30 + $0x2] sm:$0x3] %v978_v24 }
  0x8f   : > { %983 = vst [vmem:[%s197_s30 + $0x4] sm:$0x3] %v979_v25 }
  0x90   : > { %984 = vst [vmem:[%s197_s30 + $0x6] sm:$0x3] %v980_v26 }
  0x91 PF: > { %s14_s15 = sadd.s32 1, %s1173_s15  }
  0x92   : > { %p11_p4 = scmp.ge.s32.totalorder %s14_s15, 4  }
  0x94   :  { %13 = sbr.rel (!%p11_p4) target bundleno = 1 (0x1), region = 94 }

// kernel: _lambda_.25
= control target key start
LH: loop header
LB: loop body
LE: loop exit
PB: predicated region body
PF: predicated region fallthrough
CT: control target
= control target key end

     0   :  { %10 = vsyncpa [#allocation3], 0  ;;  %s990_s0 = inlined_call_operand.vmem [shape: bf16[2,16,256], index: 0, kind: input, shape index: {}]   ;;  %s991_s1 = inlined_call_operand.vmem [shape: bf16[256,128], index: 1, kind: input, shape index: {}]   ;;  %s992_s2 = inlined_call_operand.vmem [shape: f32[1,128], index: 2, kind: input, shape index: {}]   ;;  %s993_s3 = inlined_call_operand.vmem [shape: bf16[128,128], index: 3, kind: input, shape index: {}]   ;;  %s994_s4 = inlined_call_operand.vmem [shape: f32[1,128], index: 4, kind: input, shape index: {}]   ;;  %s995_s5 = inlined_call_operand.hbm [shape: f32[2,1,128], index: 5, kind: output, shape index: {}]  }
   0x1   :  { %12 = vsyncpa [#allocation3 + $0x1], 0  ;;  %s827_s18 = smov 0   ;;  %s829_s19 = smov 0  }
   0x2   :  { %s831_s20 = smov 0   ;;  %s833_s21 = smov 0  }
   0x3 LB: > { %s848_s22 = sadd.s32 4294967295, %s794_s21   ;;  %s561_s23 = sadd.s32 4294967294, %s794_s21   ;;  %s794_s21 = sphi %s833_s21, %s1001_s21   ;;  %s790_s20 = sphi %s831_s20, %s1000_s20   ;;  %s786_s19 = sphi %s829_s19, %s999_s19   ;;  %s782_s18 = sphi %s827_s18, %s998_s18  }
   0x4   : > { %s852_s24 = sadd.s32 1, %s794_s21   ;;  %s135_s25 = sadd.s32 1, %s790_s20 }
   0x5   : > { %s132_s26 = ssub.s32 %s794_s21, %s852_s24  ;;  %p145_p0 = scmp.ne.s32.totalorder %s790_s20, %s786_s19 }
   0x6   : > { %p133_p1 = scmp.eq.s32.totalorder %s132_s26, 0  ;;  %p146_p2 = scmp.eq.s32.totalorder %s848_s22, 1 }
   0x7   : > { %p151_p3 = scmp.ne.s32.totalorder %s786_s19, %s782_s18  ;;  %p152_p4 = scmp.eq.s32.totalorder %s561_s23, 1 }
   0x8   : > { %s863_s27 = scalar_select %p133_p1, %s790_s20, %s135_s25  }
   0x9   : > { %p865_p5 = por %p146_p2, %p145_p0  ;;  %p869_p6 = por %p152_p4, %p151_p3 }
   0xa   : > { %p564_p7 = scmp.ge.s32.totalorder %s794_s21, 1  ;;  %p190_p8 = scmp.lt.s32.totalorder %s794_s21, 3 }
   0xc   : > { %p191_p9 = pnand %p564_p7, %p190_p8 }
   0xd   : > { %p217_p10 = scmp.lt.s32.totalorder (!%p191_p9), %s848_s22, 1  ;;  %s215_s12 = sand.u32 (!%p191_p9), 1, %s786_s19  }
   0xe   : > { %194 = sbr.rel (%p191_p9) target bundleno = 333 (0x14d), region = 40  ;;  %s502_s15 = scalar_lea.hbm (!%p191_p9), %s995_s5, %s848_s22 }
   0xf   : > { %s216_s23 = scalar_lea.vmem (!%p191_p9), [#allocation2], %s215_s12  ;;  %s506_s26 = sshll.u32 (!%p191_p9), %s502_s15, 4  ;;  %s507_s26 = int_to_ptr.hbm [resolvable:$true] %s506_s26 }
  0x10   : > { %s494_s30 = scalar_lea.sflag (!%p191_p9), [#allocation3], %s215_s12  ;;  %s746_s6 = sshra.s32 (!%p191_p9), %s507_s26, 4  ;;  %s747_s6 = int_to_ptr.hbm [resolvable:$true] %s746_s6 }
  0x11   : > { %s748_s7 = scalar_lea.hbm (!%p191_p9), %s747_s6, 1  ;;  %s752_s9 = scalar_lea.hbm (!%p191_p9), %s995_s5, 2 }
  0x12   : > { %p749_p11 = scmp.ne.s32.totalorder (!%p191_p9), %s747_s6, %s748_s7  ;;  %p753_p0 = scmp.lt.s32.totalorder (!%p191_p9), %s747_s6, %s995_s5 }
  0x13   : > { %v673_v0 = vld [vmem:[%s991_s1 + $0x38] sm:$0xff]  ;;  %v796_v2 = vmov 16.0   ;;  %v672_v3 = vld [vmem:[%s991_s1 + $0x30] sm:$0xff]  ;;  %s218_s13 = scalar_select %p217_p10, %s848_s22, 1  ;;  %v671_v5 = vld [vmem:[%s991_s1 + $0x28] sm:$0xff] }
  0x14   : > { %v681_v1 = vld [vmem:[%s991_s1 + $0x78] sm:$0xff]  ;;  %730 = vrcp.f32 %v796_v2  ;;  %382 = vmatpush.bf16.msra.mxu0 %v673_v0  ;;  %v680_v4 = vld [vmem:[%s991_s1 + $0x70] sm:$0xff]  ;;  %v679_v7 = vld [vmem:[%s991_s1 + $0x68] sm:$0xff]  ;;  %p750_p12 = pnand %p749_p11, %p865_p5  ;;  %p754_p1 = scmp.lt.s32.totalorder %s752_s9, %s748_s7 }
  0x15   : > { %395 = vmatpush.bf16.msra.mxu1 %v681_v1  ;;  %s665_s14 = sshll.u32 %s218_s13, 4  ;;  %v689_v6 = vld [vmem:[%s993_s3 + $0x38] sm:$0xff]  ;;  %v688_v15 = vld [vmem:[%s993_s3 + $0x30] sm:$0xff]  ;;  %v670_v19 = vld [vmem:[%s991_s1 + $0x20] sm:$0xff] }
  0x16   : > { %s221_s25 = scalar_lea.vmem %s990_s0, %s665_s14  ;;  %479 = vmatpush.bf16.msra.mxu2 %v689_v6  ;;  %v678_v20 = vld [vmem:[%s991_s1 + $0x60] sm:$0xff]  ;;  %v687_v24 = vld [vmem:[%s993_s3 + $0x28] sm:$0xff]  ;;  %v669_v27 = vld [vmem:[%s991_s1 + $0x18] sm:$0xff]  ;;  %p751_p13 = pneg %p750_p12 }
  0x17   : > { %v222_v8 = vld [vmem:[%s221_s25] sm:$0xff]  ;;  %v223_v9 = vld [vmem:[%s221_s25 + $0x8] sm:$0xff]  ;;  %v677_v28 = vld [vmem:[%s991_s1 + $0x58] sm:$0xff]  ;;  %s504_s25 = sshll.u32 %s216_s23, 4  ;;  %p755_p2 = por %p754_p1, %p753_p0  ;;  %s505_s25 = int_to_ptr.vmem [resolvable:$true] %s504_s25 }
  0x18   : > { %383 = vmatpush.bf16.msra.mxu0 %v672_v3  ;;  %v224_v11 = vunpack.c.l.bf16 %v222_v8  ;;  %v226_v12 = vunpack.c.l.bf16 %v223_v9  ;;  %v225_v13 = vunpack.c.h.bf16 %v222_v8  ;;  %v227_v14 = vunpack.c.h.bf16 %v223_v9  ;;  %v686_v32 = vld [vmem:[%s993_s3 + $0x20] sm:$0xff]  ;;  %v668_v35 = vld [vmem:[%s991_s1 + $0x10] sm:$0xff]  ;;  %v667_v42 = vld [vmem:[%s991_s1 + $0x8] sm:$0xff] }
  0x19   : > { %396 = vmatpush.bf16.msra.mxu1 %v680_v4  ;;  %v676_v36 = vld [vmem:[%s991_s1 + $0x50] sm:$0xff]  ;;  %v675_v43 = vld [vmem:[%s991_s1 + $0x48] sm:$0xff]  ;;  %v666_v47 = vld [vmem:[%s991_s1] sm:$0xff]  ;;  %p756_p3 = pnand %p755_p2, %p751_p13 }
  0x1a   : > { %v731_v10 = vpop.eup %730  ;;  %v228_v17 = vadd.f32 %v226_v12, %v224_v11  ;;  %v235_v18 = vadd.f32 %v227_v14, %v225_v13  ;;  %480 = vmatpush.bf16.msra.mxu2 %v688_v15  ;;  %v674_v48 = vld [vmem:[%s991_s1 + $0x40] sm:$0xff]  ;;  %v685_v51 = vld [vmem:[%s993_s3 + $0x18] sm:$0xff]  ;;  %v684_v52 = vld [vmem:[%s993_s3 + $0x10] sm:$0xff] }
  0x1b   : > { %v243_v16 = vmul.f32 16.0, %v731_v10  ;;  %vm247_vm0 = vweird.f32 %v731_v10  ;;  %v683_v53 = vld [vmem:[%s993_s3 + $0x8] sm:$0xff]  ;;  %v682_v54 = vld [vmem:[%s993_s3] sm:$0xff] }
  0x1c   : > { %384 = vmatpush.bf16.msra.mxu0 %v671_v5  ;;  %v229_v22 = vrot.slane %v228_v17, 4  ;;  %v236_v23 = vrot.slane %v235_v18, 4  ;;  %v285_v55 = vld [vmem:[%s992_s2] sm:$0x1] }
  0x1d   : > { %397 = vmatpush.bf16.msra.mxu1 %v679_v7  ;;  %v244_v21 = vsub.f32 1.0, %v243_v16  ;;  %v430_v4 = vld [vmem:[%s994_s4] sm:$0x1] }
  0x1e   : > { %v230_v25 = vadd.f32 %v229_v22, %v228_v17  ;;  %v237_v26 = vadd.f32 %v236_v23, %v235_v18  ;;  %481 = vmatpush.bf16.msra.mxu2 %v687_v24 }
  0x1f   : > { %v245_v29 = vmul.f32 %v731_v10, %v244_v21 }
  0x20   : > { %385 = vmatpush.bf16.msra.mxu0 %v670_v19  ;;  %v231_v30 = vrot.slane %v230_v25, 2  ;;  %v238_v31 = vrot.slane %v237_v26, 2 }
  0x21   : > { %398 = vmatpush.bf16.msra.mxu1 %v678_v20  ;;  %v246_v37 = vadd.f32 %v731_v10, %v245_v29 }
  0x22   : > { %v232_v33 = vadd.f32 %v231_v30, %v230_v25  ;;  %v239_v34 = vadd.f32 %v238_v31, %v237_v26  ;;  %482 = vmatpush.bf16.msra.mxu2 %v686_v32 }
  0x23   : > { %v248_v44 = vsel %vm247_vm0, %v731_v10, %v246_v37 }
  0x24   : > { %386 = vmatpush.bf16.msra.mxu0 %v669_v27  ;;  %v233_v38 = vrot.slane %v232_v33, 1  ;;  %v240_v39 = vrot.slane %v239_v34, 1 }
  0x25   : > { %399 = vmatpush.bf16.msra.mxu1 %v677_v28 }
  0x26   : > { %v234_v40 = vadd.f32 %v233_v38, %v232_v33  ;;  %v241_v41 = vadd.f32 %v240_v39, %v239_v34  ;;  %483 = vmatpush.bf16.msra.mxu2 %v685_v51 }
  0x28   : > { %387 = vmatpush.bf16.msra.mxu0 %v668_v35  ;;  %v249_v45 = vmul.f32 %v248_v44, %v234_v40  ;;  %v250_v46 = vmul.f32 %v248_v44, %v241_v41 }
  0x29   : > { %400 = vmatpush.bf16.msra.mxu1 %v676_v36 }
  0x2a   : > { %v251_v49 = vpack.c.bf16 %v249_v45, %v249_v45  ;;  %v252_v50 = vpack.c.bf16 %v250_v46, %v250_v46  ;;  %484 = vmatpush.bf16.msra.mxu2 %v684_v52 }
  0x2c   : > { %388 = vmatpush.bf16.msra.mxu0 %v667_v42 }
  0x2d   : > { %401 = vmatpush.bf16.msra.mxu1 %v675_v43 }
  0x2e   : > { %485 = vmatpush.bf16.msra.mxu2 %v683_v53 }
  0x30   : > { %389 = vmatpush.bf16.msra.mxu0 %v666_v47 }
  0x31   : > { %402 = vmatpush.bf16.msra.mxu1 %v674_v48 }
  0x32   : > { %486 = vmatpush.bf16.msra.mxu2 %v682_v54 }
  0x33   : > { %390 = vmatmul.bf16.vlgmr.msra.gmra.mxu0 %v251_v49 }
  0x34   : > { %403 = vmatmul.bf16.vlgmr.msra.gmra.mxu1 %v252_v50 }
  0xb0   : > { %v391_v56 = vpop.f32.mrf.mxu0 }
  0xb1   : > { %v404_v57 = vpop.f32.mrf.mxu1  ;;  %v392_v58 = vadd.f32 %v391_v56, %v285_v55 }
  0xb3   : > { %v405_v59 = vadd.f32 %v404_v57, %v392_v58 }
  0xb5   : > { %v408_v60 = vadd.f32 3.0, %v405_v59 }
  0xb7   : > { %v409_v61 = vmax.f32 %v408_v60, 0.0 }
  0xb8   : > { %v393_v62 = vpop.f32.mrf.mxu0 }
  0xb9   : > { %v406_v63 = vpop.f32.mrf.mxu1  ;;  %v410_v0 = vmin.f32 %v409_v61, 6.0 }
  0xbb   : > { %v411_v1 = vmul.f32 0.16666667, %v410_v0 }
  0xbd   : > { %v412_v2 = vmul.f32 %v411_v1, %v405_v59 }
  0xbf   : > { %v413_v3 = vpack.c.bf16 %v412_v2, %v412_v2 }
  0xc1   : > { %487 = vmatmul.bf16.vlgmr.msra.gmra.mxu2 %v413_v3 }
 0x144   : > { %v488_v5 = vpop.f32.mrf.mxu2 }
 0x145   : > { %v489_v6 = vadd.f32 %v488_v5, %v430_v4 }
 0x147   : > { %492 = vst [vmem:[%s216_s23] sm:$0x1] %v489_v6 }
 0x148   : > { %759 = shalt.err (!%p756_p3)
}
 0x149   : > { %690 = dma.vmem_to_hbm [thread:$0]  (%p865_p5), %s505_s25, 16, %s507_s26, %s494_s30  }
 0x14c   : > { %v490_v7 = vpop.f32.mrf.mxu2 }
 0x14d PF: > { %p696_p4 = scmp.ge.s32.totalorder %s794_s21, 2  ;;  %s518_s12 = sand.u32 1, %s782_s18  }
 0x14e   : > { %s519_s13 = scalar_lea.sflag [#allocation3], %s518_s12 }
 0x14f   : > { %p693_p7 = pnand %p696_p4, %p869_p6 }
 0x151   : > { %p694_p8 = pneg %p693_p7 }
 0x153   : > { %777 = dma.done.wait (%p694_p8), %s519_s13, 16  }
 0x154   : > { %779 = vsyncadd (%p694_p8), %s519_s13, 4294967280  ;;  %p15_p9 = scmp.ge.s32.totalorder %s852_s24, 4   ;;  %s998_s18 = smov %s786_s19 }
 0x155   : > { %s999_s19 = smov %s790_s20  ;;  %s1000_s20 = smov %s863_s27 }
 0x156   : > { %s1001_s21 = smov %s852_s24  ;;  %17 = sbr.rel (!%p15_p9) target bundleno = 3 (0x3), region = 75 }
 0x15b   :  { %524 = vsyncpa [#allocation3], 1 }
 0x15c   :  { %526 = vsyncpa [#allocation3 + $0x1], 1 }

</bundles_post_ra>
